<compile_context>
chip_gen: v6e
topology: v6e:2x2x1
jax: 0.10.0
libtpu: 0.0.40
codegen_flags: <defaults>
</compile_context>

<pallas_src>
import functools

import jax
import jax.numpy as jnp
from jax import lax
from jax.experimental import pallas as pl
from jax.experimental.pallas import tpu as pltpu


# ----------------------------------------------------------------------------
# Pallas kernel: full Sequential of 4 BasicBlocks (8 fused conv+BN layers)
# ----------------------------------------------------------------------------
def _group_conv_level_kernel(H, W, x_ref, w_ref, scale_ref, bias_ref, out_ref,
                             xflat_ref, patch_ref, a_ref, b_ref):
    """All BasicBlocks of one level for a block of NB batch elements.

    x_ref     : (NB, C, P)    f32   input, P = H*(W+2), junk cols already 0
    w_ref     : (L, C, 9*C)   bf16  weights, columns ordered (kh, kw, c_in)
    scale_ref : (L, C, 1)     f32   folded-BN scale per conv layer
    bias_ref  : (L, C, 1)     f32   folded-BN bias per conv layer
    out_ref   : (NB, C, P)    f32
    xflat_ref : VMEM (C, (H+2)*(W+2)+2) f32  flattened zero-padded image
    patch_ref : VMEM (9*C, NB*P)        bf16 implicit-im2col patch matrix
    a_ref     : VMEM (C, NB*P)          f32  block input / residual
    b_ref     : VMEM (C, NB*P)          f32  mid-block activation
    """
    NB, C, P = x_ref.shape
    Wp = W + 2
    L = w_ref.shape[0]
    num_blocks = L // 2
    head = Wp + 1                     # interior-write window [head, tail)
    tail = head + P
    LEN = xflat_ref.shape[1]

    # One-time halo init: only the two chunks outside the interior-write
    # window are ever read as zero padding and never rewritten afterwards.
    xflat_ref[:, :head] = jnp.zeros((C, head), jnp.float32)
    xflat_ref[:, tail:] = jnp.zeros((C, LEN - tail), jnp.float32)

    # 0/1 lane mask zeroing the 2 junk columns (x in {W, W+1}) of every image
    # row in the extended layout; keeps the halo columns of the padded scratch
    # at zero when activations are written back between convs.
    col = lax.broadcasted_iota(jnp.int32, (1, NB * P), 1)
    junk_mask = ((col % Wp) < W).astype(jnp.float32)

    # Load the level input (wrapper already zero-padded the junk columns).
    for n in range(NB):
        a_ref[:, n * P:(n + 1) * P] = x_ref[n]

    def conv3x3_bn_relu(src_ref, layer, res_ref):
        # One 3x3 conv + folded BN (+ residual) + ReLU over all NB images as a
        # single MXU matmul (C, 9C) @ (9C, NB*P), bf16 in, f32 accumulate.
        for n in range(NB):
            # Interior write: one lane-offset store; halo stays zero because
            # the junk columns of src are zero.
            xflat_ref[:, head:tail] = src_ref[:, n * P:(n + 1) * P]
            # Implicit im2col: each tap is a contiguous lane slice of the
            # flattened padded image -> full-lane row-block stores into the
            # bf16 patch matrix (no reshape, no relayout).
            for k in range(9):
                s = (k // 3) * Wp + (k % 3)
                patch_ref[k * C:(k + 1) * C, n * P:(n + 1) * P] = (
                    xflat_ref[:, s:s + P].astype(jnp.bfloat16))
        acc = jnp.dot(w_ref[layer], patch_ref[...],
                      preferred_element_type=jnp.float32)       # (C, NB*P) f32
        acc = acc * scale_ref[layer] + bias_ref[layer]          # folded BN
        if res_ref is not None:
            acc = acc + res_ref[...]
        return jnp.maximum(acc, 0.0) * junk_mask

    for blk in range(num_blocks):
        # y   = relu(bn1(conv1(x)))      (x lives in a_ref and is the residual)
        b_ref[...] = conv3x3_bn_relu(a_ref, 2 * blk, None)
        # out = relu(bn2(conv2(y)) + x)
        y = conv3x3_bn_relu(b_ref, 2 * blk + 1, a_ref)
        if blk + 1 < num_blocks:
            a_ref[...] = y
        else:
            for n in range(NB):
                out_ref[n] = y[:, n * P:(n + 1) * P].astype(out_ref.dtype)


def _estimate_vmem_bytes(NB, C, P, L, LEN):
    """Rough (padded) sum of all VMEM buffers used by one grid step."""
    r8 = lambda v: -(-v // 8) * 8
    r128 = lambda v: -(-v // 128) * 128
    blk = lambda outer, sub, lane, isz: outer * r8(sub) * r128(lane) * isz
    est = 0
    est += 2 * 2 * blk(NB, C, P, 4)          # x + out blocks (double-buffered)
    est += 2 * blk(L, C, 9 * C, 2)           # weights
    est += 2 * 2 * blk(L, C, 1, 4)           # scale + bias
    est += blk(1, C, LEN, 4)                 # zero-padded image scratch
    est += blk(1, 9 * C, NB * P, 2)          # patch matrix scratch (bf16)
    est += 2 * blk(1, C, NB * P, 4)          # a/b activation scratch
    return est


@functools.partial(jax.jit, static_argnames=("batch_block",))
def group_conv_level(x_nchw, w_stack, scale_stack, bias_stack, *,
                     batch_block=None):
    """All 4 BasicBlocks (8 conv+BN layers) of one level in one pallas_call.

    Input/output are NCHW.  batch_block=None folds the whole batch into the
    matmul lane dimension (best on single-TC v5e/v6e); on v7x with N >= 2 pass
    batch_block=N//2 so the parallel grid axis spans both TensorCores.
    """
    N, C, H, W = x_nchw.shape
    Wp, P = W + 2, H * (W + 2)
    LEN = (H + 2) * Wp + 2
    L = w_stack.shape[0]
    NB = N if batch_block is None else batch_block
    assert N % NB == 0

    # Extended-row layout: zero-pad W by 2 and flatten (H, W+2) -> H*(W+2).
    # Layout-local (no transpose); the 2 zero columns per row become the halo.
    x_ext = jnp.pad(x_nchw, ((0, 0), (0, 0), (0, 0), (0, 2))).reshape(N, C, P)

    vmem_limit = int(min(max(2 * _estimate_vmem_bytes(NB, C, P, L, LEN),
                             4 << 20), 32 << 20))

    out_ext = pl.pallas_call(
        functools.partial(_group_conv_level_kernel, H, W),
        out_shape=jax.ShapeDtypeStruct((N, C, P), x_nchw.dtype),
        grid=(N // NB,),
        in_specs=[
            pl.BlockSpec((NB, C, P), lambda g: (g, 0, 0)),
            pl.BlockSpec((L, C, 9 * C), lambda g: (0, 0, 0)),
            pl.BlockSpec((L, C, 1), lambda g: (0, 0, 0)),
            pl.BlockSpec((L, C, 1), lambda g: (0, 0, 0)),
        ],
        out_specs=pl.BlockSpec((NB, C, P), lambda g: (g, 0, 0)),
        scratch_shapes=[
            pltpu.VMEM((C, LEN), jnp.float32),           # zero-padded image
            pltpu.VMEM((9 * C, NB * P), jnp.bfloat16),   # im2col patch matrix
            pltpu.VMEM((C, NB * P), jnp.float32),        # block input/residual
            pltpu.VMEM((C, NB * P), jnp.float32),        # mid-block activation
        ],
        compiler_params=pltpu.CompilerParams(
            dimension_semantics=("parallel",),
            vmem_limit_bytes=vmem_limit),
    )(x_ext, w_stack, scale_stack, bias_stack)

    # Drop the 2 junk columns per image row: (N, C, H*(W+2)) -> (N, C, H, W).
    return out_ext.reshape(N, C, H, Wp)[:, :, :, :W]


# ----------------------------------------------------------------------------
# Parameters (deterministic) and module-level forward
# ----------------------------------------------------------------------------
def _fold_bn(gamma, beta, mean, var, eps=1e-5):
    scale = gamma / jnp.sqrt(var + eps)
    bias = beta - mean * scale
    return scale, bias


def init_params(key, C, level, num_blocks=4):
    """Per level: im2col weights (C_out, 9*C_in) bf16 + folded-BN scale/bias.

    NOTE: to load a real PyTorch BasicBlock checkpoint, permute each conv's
    (C_out, C_in, 3, 3) weight to (C_out, kh, kw, C_in) and reshape to
    (C_out, 9*C_in) -- the kernel's patch rows are ordered (kh, kw, c_in).
    """
    params = []
    for i in range(level + 1):
        ch = (2 ** i) * C
        ws, ss, bs = [], [], []
        for layer in range(2 * num_blocks):
            k = jax.random.fold_in(jax.random.fold_in(key, i), layer)
            k1, k2 = jax.random.split(k)
            std = 1.0 / jnp.sqrt(9.0 * ch)
            # (tap = kh*3 + kw, c_in, c_out), matching the patch row order.
            w = jax.random.normal(k1, (9, ch, ch), jnp.float32) * std
            gamma = 1.0 + 0.1 * jax.random.normal(k2, (ch,), jnp.float32)
            sign = 1.0 if layer % 2 == 0 else -1.0
            beta = sign * 0.01 * jnp.arange(ch, dtype=jnp.float32)
            mean = sign * 0.05 * jnp.ones((ch,), jnp.float32)
            var = (1.0 if layer % 2 == 0 else 1.5) * jnp.ones((ch,), jnp.float32)
            s, b = _fold_bn(gamma, beta, mean, var)
            ws.append(jnp.transpose(w, (2, 0, 1)).reshape(ch, 9 * ch))
            ss.append(s[:, None])
            bs.append(b[:, None])
        params.append({
            "w": jnp.stack(ws).astype(jnp.bfloat16),   # (8, ch, 9*ch)
            "scale": jnp.stack(ss),                    # (8, ch, 1)
            "bias": jnp.stack(bs),                     # (8, ch, 1)
        })
    return params


def group_conv_unit_forward(x_list_nchw, params, level, batch_block=None):
    """Forward of groupConvUnit.  Inputs/outputs are NCHW (torch convention)."""
    out = []
    for i in range(level + 1):
        p = params[i]
        out.append(group_conv_level(x_list_nchw[i], p["w"], p["scale"],
                                    p["bias"], batch_block=batch_block))
    return out


# ----------------------------------------------------------------------------
# Pure-JAX reference (numerics-matched: bf16 conv operands, f32 accumulate)
# ----------------------------------------------------------------------------
def _reference_level(x, w_stack, scale_stack, bias_stack):
    C = w_stack.shape[1]

    def conv_bn(t, l):
        w = w_stack[l].reshape(C, 3, 3, C).transpose(0, 3, 1, 2)   # OIHW bf16
        y = lax.conv_general_dilated(
            t.astype(jnp.bfloat16), w, (1, 1), "SAME",
            dimension_numbers=("NCHW", "OIHW", "NCHW"),
            preferred_element_type=jnp.float32)
        return (y * scale_stack[l].reshape(1, C, 1, 1)
                + bias_stack[l].reshape(1, C, 1, 1))

    h = x
    for blk in range(w_stack.shape[0] // 2):
        res = h
        h = jnp.maximum(conv_bn(h, 2 * blk), 0.0)
        h = jnp.maximum(conv_bn(h, 2 * blk + 1) + res, 0.0)
    return h


if __name__ == "__main__":
    C = 4
    LEVEL = 1
    key = jax.random.PRNGKey(0)
    kx0, kx1, kp = jax.random.split(key, 3)

    # HRNet-style multi-resolution inputs (NCHW): level i has 2**i * C channels.
    x0 = jax.random.normal(kx0, (2, C, 16, 16), jnp.float32)
    x1 = jax.random.normal(kx1, (2, 2 * C, 8, 8), jnp.float32)
    x_list = [x0, x1]

    params = init_params(kp, C, LEVEL)

    out = group_conv_unit_forward(x_list, params, LEVEL)
    out = [jax.block_until_ready(o) for o in out]

    assert out[0].shape == (2, C, 16, 16) and out[0].dtype == jnp.float32
    assert out[1].shape == (2, 2 * C, 8, 8) and out[1].dtype == jnp.float32
    assert all(bool(jnp.all(jnp.isfinite(o))) for o in out)

    # Correctness vs numerics-matched pure-JAX reference (bf16 conv operands).
    for i in range(LEVEL + 1):
        ref = _reference_level(x_list[i], params[i]["w"], params[i]["scale"],
                               params[i]["bias"])
        err = float(jnp.max(jnp.abs(out[i] - ref)))
        assert err < 1e-2, f"level {i}: max abs err {err}"

    print("KERNEL_OK")
</pallas_src>

<mosaic_0001>
module attributes {stable_mosaic.version = 11 : i64} {
  func.func @_group_conv_level_kernel(%arg0: i32, %arg1: memref<2x4x288xf32, #tpu.memory_space<vmem>>, %arg2: memref<8x4x36xbf16, #tpu.memory_space<vmem>>, %arg3: memref<8x4x1xf32, #tpu.memory_space<vmem>>, %arg4: memref<8x4x1xf32, #tpu.memory_space<vmem>>, %arg5: memref<2x4x288xf32, #tpu.memory_space<vmem>>, %arg6: memref<4x326xf32, #tpu.memory_space<vmem>>, %arg7: memref<36x576xbf16, #tpu.memory_space<vmem>>, %arg8: memref<4x576xf32, #tpu.memory_space<vmem>>, %arg9: memref<4x576xf32, #tpu.memory_space<vmem>>) attributes {dimension_semantics = [#tpu.dimension_semantics<parallel>], iteration_bounds = array<i64: 1>, scalar_prefetch = 0 : i64, scratch_operands = 4 : i64, tpu.core_type = #tpu.core_type<tc>, window_params = [{transform_indices = @transform_0, window_bounds = array<i64: 2, 4, 288>}, {pipeline_mode = #tpu.pipeline_mode<synchronous>, transform_indices = @transform_1, window_bounds = array<i64: 8, 4, 36>}, {pipeline_mode = #tpu.pipeline_mode<synchronous>, transform_indices = @transform_2, window_bounds = array<i64: 8, 4, 1>}, {pipeline_mode = #tpu.pipeline_mode<synchronous>, transform_indices = @transform_3, window_bounds = array<i64: 8, 4, 1>}, {transform_indices = @transform_4, window_bounds = array<i64: 2, 4, 288>}]} {
    %cst = arith.constant 0.000000e+00 : f32
    %0 = vector.broadcast %cst : f32 to vector<4x19xf32>
    %c0 = arith.constant 0 : index
    %c0_0 = arith.constant 0 : index
    %1 = vector.load %arg6[%c0, %c0_0] : memref<4x326xf32, #tpu.memory_space<vmem>>, vector<4x19xf32>
    tpu.vector_store %arg6[%c0, %c0_0], %0 {strides = array<i32>} : memref<4x326xf32, #tpu.memory_space<vmem>>, vector<4x19xf32>,
    %cst_1 = arith.constant 0.000000e+00 : f32
    %2 = vector.broadcast %cst_1 : f32 to vector<4x19xf32>
    %c0_2 = arith.constant 0 : index
    %c307 = arith.constant 307 : index
    %3 = vector.load %arg6[%c0_2, %c307] : memref<4x326xf32, #tpu.memory_space<vmem>>, vector<4x19xf32>
    tpu.vector_store %arg6[%c0_2, %c307], %2 {strides = array<i32>} : memref<4x326xf32, #tpu.memory_space<vmem>>, vector<4x19xf32>,
    %4 = tpu.iota {dimensions = array<i32: 1>} : vector<1x576xi32>
    %c18_i32 = arith.constant 18 : i32
    %c0_i32 = arith.constant 0 : i32
    %5 = arith.cmpi eq, %c18_i32, %c0_i32 : i32
    %c1_i32 = arith.constant 1 : i32
    %6 = arith.select %5, %c1_i32, %c18_i32 : i32
    %7 = vector.broadcast %6 : i32 to vector<1x576xi32>
    %8 = arith.remsi %4, %7 : vector<1x576xi32>
    %c0_i32_3 = arith.constant 0 : i32
    %9 = vector.broadcast %c0_i32_3 : i32 to vector<1x576xi32>
    %10 = arith.cmpi ne, %8, %9 : vector<1x576xi32>
    %c0_i32_4 = arith.constant 0 : i32
    %11 = vector.broadcast %c0_i32_4 : i32 to vector<1x576xi32>
    %12 = arith.cmpi slt, %8, %11 : vector<1x576xi32>
    %c0_i32_5 = arith.constant 0 : i32
    %13 = arith.cmpi slt, %6, %c0_i32_5 : i32
    %14 = vector.broadcast %13 : i1 to vector<1x576xi1>
    %15 = vector.broadcast %14 : vector<1x576xi1> to vector<1x576xi1>
    %16 = arith.xori %12, %15 : vector<1x576xi1>
    %17 = arith.andi %16, %10 : vector<1x576xi1>
    %18 = vector.broadcast %6 : i32 to vector<1x576xi32>
    %19 = arith.addi %8, %18 : vector<1x576xi32>
    %20 = arith.select %17, %19, %8 : vector<1x576xi1>, vector<1x576xi32>
    %c16_i32 = arith.constant 16 : i32
    %21 = vector.broadcast %c16_i32 : i32 to vector<1x576xi32>
    %22 = arith.cmpi slt, %20, %21 : vector<1x576xi32>
    %23 = arith.extui %22 : vector<1x576xi1> to vector<1x576xi32>
    %24 = arith.sitofp %23 : vector<1x576xi32> to vector<1x576xf32>
    %c0_6 = arith.constant 0 : index
    %c0_7 = arith.constant 0 : index
    %c0_8 = arith.constant 0 : index
    %25 = vector.load %arg1[%c0_6, %c0_7, %c0_8] : memref<2x4x288xf32, #tpu.memory_space<vmem>>, vector<1x4x288xf32>
    %26 = vector.shape_cast %25 : vector<1x4x288xf32> to vector<4x288xf32>
    %c0_9 = arith.constant 0 : index
    %c0_10 = arith.constant 0 : index
    %27 = vector.load %arg8[%c0_9, %c0_10] : memref<4x576xf32, #tpu.memory_space<vmem>>, vector<4x288xf32>
    tpu.vector_store %arg8[%c0_9, %c0_10], %26 {strides = array<i32>} : memref<4x576xf32, #tpu.memory_space<vmem>>, vector<4x288xf32>,
    %c1 = arith.constant 1 : index
    %c0_11 = arith.constant 0 : index
    %c0_12 = arith.constant 0 : index
    %28 = vector.load %arg1[%c1, %c0_11, %c0_12] : memref<2x4x288xf32, #tpu.memory_space<vmem>>, vector<1x4x288xf32>
    %29 = vector.shape_cast %28 : vector<1x4x288xf32> to vector<4x288xf32>
    %c0_13 = arith.constant 0 : index
    %c288 = arith.constant 288 : index
    %30 = vector.load %arg8[%c0_13, %c288] : memref<4x576xf32, #tpu.memory_space<vmem>>, vector<4x288xf32>
    tpu.vector_store %arg8[%c0_13, %c288], %29 {strides = array<i32>} : memref<4x576xf32, #tpu.memory_space<vmem>>, vector<4x288xf32>,
    %c0_14 = arith.constant 0 : index
    %c0_15 = arith.constant 0 : index
    %31 = vector.load %arg8[%c0_14, %c0_15] : memref<4x576xf32, #tpu.memory_space<vmem>>, vector<4x288xf32>
    %c0_16 = arith.constant 0 : index
    %c19 = arith.constant 19 : index
    %32 = vector.load %arg6[%c0_16, %c19] : memref<4x326xf32, #tpu.memory_space<vmem>>, vector<4x288xf32>
    tpu.vector_store %arg6[%c0_16, %c19], %31 {strides = array<i32>} : memref<4x326xf32, #tpu.memory_space<vmem>>, vector<4x288xf32>,
    %c0_17 = arith.constant 0 : index
    %c0_18 = arith.constant 0 : index
    %33 = vector.load %arg6[%c0_17, %c0_18] : memref<4x326xf32, #tpu.memory_space<vmem>>, vector<4x288xf32>
    %34 = arith.truncf %33 : vector<4x288xf32> to vector<4x288xbf16>
    %c0_19 = arith.constant 0 : index
    %c0_20 = arith.constant 0 : index
    %35 = vector.load %arg7[%c0_19, %c0_20] : memref<36x576xbf16, #tpu.memory_space<vmem>>, vector<4x288xbf16>
    tpu.vector_store %arg7[%c0_19, %c0_20], %34 {strides = array<i32>} : memref<36x576xbf16, #tpu.memory_space<vmem>>, vector<4x288xbf16>,
    %c0_21 = arith.constant 0 : index
    %c1_22 = arith.constant 1 : index
    %36 = vector.load %arg6[%c0_21, %c1_22] : memref<4x326xf32, #tpu.memory_space<vmem>>, vector<4x288xf32>
    %37 = arith.truncf %36 : vector<4x288xf32> to vector<4x288xbf16>
    %c4 = arith.constant 4 : index
    %c0_23 = arith.constant 0 : index
    %38 = vector.load %arg7[%c4, %c0_23] : memref<36x576xbf16, #tpu.memory_space<vmem>>, vector<4x288xbf16>
    tpu.vector_store %arg7[%c4, %c0_23], %37 {strides = array<i32>} : memref<36x576xbf16, #tpu.memory_space<vmem>>, vector<4x288xbf16>,
    %c0_24 = arith.constant 0 : index
    %c2 = arith.constant 2 : index
    %39 = vector.load %arg6[%c0_24, %c2] : memref<4x326xf32, #tpu.memory_space<vmem>>, vector<4x288xf32>
    %40 = arith.truncf %39 : vector<4x288xf32> to vector<4x288xbf16>
    %c8 = arith.constant 8 : index
    %c0_25 = arith.constant 0 : index
    %41 = vector.load %arg7[%c8, %c0_25] : memref<36x576xbf16, #tpu.memory_space<vmem>>, vector<4x288xbf16>
    tpu.vector_store %arg7[%c8, %c0_25], %40 {strides = array<i32>} : memref<36x576xbf16, #tpu.memory_space<vmem>>, vector<4x288xbf16>,
    %c0_26 = arith.constant 0 : index
    %c18 = arith.constant 18 : index
    %42 = vector.load %arg6[%c0_26, %c18] : memref<4x326xf32, #tpu.memory_space<vmem>>, vector<4x288xf32>
    %43 = arith.truncf %42 : vector<4x288xf32> to vector<4x288xbf16>
    %c12 = arith.constant 12 : index
    %c0_27 = arith.constant 0 : index
    %44 = vector.load %arg7[%c12, %c0_27] : memref<36x576xbf16, #tpu.memory_space<vmem>>, vector<4x288xbf16>
    tpu.vector_store %arg7[%c12, %c0_27], %43 {strides = array<i32>} : memref<36x576xbf16, #tpu.memory_space<vmem>>, vector<4x288xbf16>,
    %c0_28 = arith.constant 0 : index
    %c19_29 = arith.constant 19 : index
    %45 = vector.load %arg6[%c0_28, %c19_29] : memref<4x326xf32, #tpu.memory_space<vmem>>, vector<4x288xf32>
    %46 = arith.truncf %45 : vector<4x288xf32> to vector<4x288xbf16>
    %c16 = arith.constant 16 : index
    %c0_30 = arith.constant 0 : index
    %47 = vector.load %arg7[%c16, %c0_30] : memref<36x576xbf16, #tpu.memory_space<vmem>>, vector<4x288xbf16>
    tpu.vector_store %arg7[%c16, %c0_30], %46 {strides = array<i32>} : memref<36x576xbf16, #tpu.memory_space<vmem>>, vector<4x288xbf16>,
    %c0_31 = arith.constant 0 : index
    %c20 = arith.constant 20 : index
    %48 = vector.load %arg6[%c0_31, %c20] : memref<4x326xf32, #tpu.memory_space<vmem>>, vector<4x288xf32>
    %49 = arith.truncf %48 : vector<4x288xf32> to vector<4x288xbf16>
    %c20_32 = arith.constant 20 : index
    %c0_33 = arith.constant 0 : index
    %50 = vector.load %arg7[%c20_32, %c0_33] : memref<36x576xbf16, #tpu.memory_space<vmem>>, vector<4x288xbf16>
    tpu.vector_store %arg7[%c20_32, %c0_33], %49 {strides = array<i32>} : memref<36x576xbf16, #tpu.memory_space<vmem>>, vector<4x288xbf16>,
    %c0_34 = arith.constant 0 : index
    %c36 = arith.constant 36 : index
    %51 = vector.load %arg6[%c0_34, %c36] : memref<4x326xf32, #tpu.memory_space<vmem>>, vector<4x288xf32>
    %52 = arith.truncf %51 : vector<4x288xf32> to vector<4x288xbf16>
    %c24 = arith.constant 24 : index
    %c0_35 = arith.constant 0 : index
    %53 = vector.load %arg7[%c24, %c0_35] : memref<36x576xbf16, #tpu.memory_space<vmem>>, vector<4x288xbf16>
    tpu.vector_store %arg7[%c24, %c0_35], %52 {strides = array<i32>} : memref<36x576xbf16, #tpu.memory_space<vmem>>, vector<4x288xbf16>,
    %c0_36 = arith.constant 0 : index
    %c37 = arith.constant 37 : index
    %54 = vector.load %arg6[%c0_36, %c37] : memref<4x326xf32, #tpu.memory_space<vmem>>, vector<4x288xf32>
    %55 = arith.truncf %54 : vector<4x288xf32> to vector<4x288xbf16>
    %c28 = arith.constant 28 : index
    %c0_37 = arith.constant 0 : index
    %56 = vector.load %arg7[%c28, %c0_37] : memref<36x576xbf16, #tpu.memory_space<vmem>>, vector<4x288xbf16>
    tpu.vector_store %arg7[%c28, %c0_37], %55 {strides = array<i32>} : memref<36x576xbf16, #tpu.memory_space<vmem>>, vector<4x288xbf16>,
    %c0_38 = arith.constant 0 : index
    %c38 = arith.constant 38 : index
    %57 = vector.load %arg6[%c0_38, %c38] : memref<4x326xf32, #tpu.memory_space<vmem>>, vector<4x288xf32>
    %58 = arith.truncf %57 : vector<4x288xf32> to vector<4x288xbf16>
    %c32 = arith.constant 32 : index
    %c0_39 = arith.constant 0 : index
    %59 = vector.load %arg7[%c32, %c0_39] : memref<36x576xbf16, #tpu.memory_space<vmem>>, vector<4x288xbf16>
    tpu.vector_store %arg7[%c32, %c0_39], %58 {strides = array<i32>} : memref<36x576xbf16, #tpu.memory_space<vmem>>, vector<4x288xbf16>,
    %c0_40 = arith.constant 0 : index
    %c288_41 = arith.constant 288 : index
    %60 = vector.load %arg8[%c0_40, %c288_41] : memref<4x576xf32, #tpu.memory_space<vmem>>, vector<4x288xf32>
    %c0_42 = arith.constant 0 : index
    %c19_43 = arith.constant 19 : index
    %61 = vector.load %arg6[%c0_42, %c19_43] : memref<4x326xf32, #tpu.memory_space<vmem>>, vector<4x288xf32>
    tpu.vector_store %arg6[%c0_42, %c19_43], %60 {strides = array<i32>} : memref<4x326xf32, #tpu.memory_space<vmem>>, vector<4x288xf32>,
    %c0_44 = arith.constant 0 : index
    %c0_45 = arith.constant 0 : index
    %62 = vector.load %arg6[%c0_44, %c0_45] : memref<4x326xf32, #tpu.memory_space<vmem>>, vector<4x288xf32>
    %63 = arith.truncf %62 : vector<4x288xf32> to vector<4x288xbf16>
    %c0_46 = arith.constant 0 : index
    %c288_47 = arith.constant 288 : index
    %64 = vector.load %arg7[%c0_46, %c288_47] : memref<36x576xbf16, #tpu.memory_space<vmem>>, vector<4x288xbf16>
    tpu.vector_store %arg7[%c0_46, %c288_47], %63 {strides = array<i32>} : memref<36x576xbf16, #tpu.memory_space<vmem>>, vector<4x288xbf16>,
    %c0_48 = arith.constant 0 : index
    %c1_49 = arith.constant 1 : index
    %65 = vector.load %arg6[%c0_48, %c1_49] : memref<4x326xf32, #tpu.memory_space<vmem>>, vector<4x288xf32>
    %66 = arith.truncf %65 : vector<4x288xf32> to vector<4x288xbf16>
    %c4_50 = arith.constant 4 : index
    %c288_51 = arith.constant 288 : index
    %67 = vector.load %arg7[%c4_50, %c288_51] : memref<36x576xbf16, #tpu.memory_space<vmem>>, vector<4x288xbf16>
    tpu.vector_store %arg7[%c4_50, %c288_51], %66 {strides = array<i32>} : memref<36x576xbf16, #tpu.memory_space<vmem>>, vector<4x288xbf16>,
    %c0_52 = arith.constant 0 : index
    %c2_53 = arith.constant 2 : index
    %68 = vector.load %arg6[%c0_52, %c2_53] : memref<4x326xf32, #tpu.memory_space<vmem>>, vector<4x288xf32>
    %69 = arith.truncf %68 : vector<4x288xf32> to vector<4x288xbf16>
    %c8_54 = arith.constant 8 : index
    %c288_55 = arith.constant 288 : index
    %70 = vector.load %arg7[%c8_54, %c288_55] : memref<36x576xbf16, #tpu.memory_space<vmem>>, vector<4x288xbf16>
    tpu.vector_store %arg7[%c8_54, %c288_55], %69 {strides = array<i32>} : memref<36x576xbf16, #tpu.memory_space<vmem>>, vector<4x288xbf16>,
    %c0_56 = arith.constant 0 : index
    %c18_57 = arith.constant 18 : index
    %71 = vector.load %arg6[%c0_56, %c18_57] : memref<4x326xf32, #tpu.memory_space<vmem>>, vector<4x288xf32>
    %72 = arith.truncf %71 : vector<4x288xf32> to vector<4x288xbf16>
    %c12_58 = arith.constant 12 : index
    %c288_59 = arith.constant 288 : index
    %73 = vector.load %arg7[%c12_58, %c288_59] : memref<36x576xbf16, #tpu.memory_space<vmem>>, vector<4x288xbf16>
    tpu.vector_store %arg7[%c12_58, %c288_59], %72 {strides = array<i32>} : memref<36x576xbf16, #tpu.memory_space<vmem>>, vector<4x288xbf16>,
    %c0_60 = arith.constant 0 : index
    %c19_61 = arith.constant 19 : index
    %74 = vector.load %arg6[%c0_60, %c19_61] : memref<4x326xf32, #tpu.memory_space<vmem>>, vector<4x288xf32>
    %75 = arith.truncf %74 : vector<4x288xf32> to vector<4x288xbf16>
    %c16_62 = arith.constant 16 : index
    %c288_63 = arith.constant 288 : index
    %76 = vector.load %arg7[%c16_62, %c288_63] : memref<36x576xbf16, #tpu.memory_space<vmem>>, vector<4x288xbf16>
    tpu.vector_store %arg7[%c16_62, %c288_63], %75 {strides = array<i32>} : memref<36x576xbf16, #tpu.memory_space<vmem>>, vector<4x288xbf16>,
    %c0_64 = arith.constant 0 : index
    %c20_65 = arith.constant 20 : index
    %77 = vector.load %arg6[%c0_64, %c20_65] : memref<4x326xf32, #tpu.memory_space<vmem>>, vector<4x288xf32>
    %78 = arith.truncf %77 : vector<4x288xf32> to vector<4x288xbf16>
    %c20_66 = arith.constant 20 : index
    %c288_67 = arith.constant 288 : index
    %79 = vector.load %arg7[%c20_66, %c288_67] : memref<36x576xbf16, #tpu.memory_space<vmem>>, vector<4x288xbf16>
    tpu.vector_store %arg7[%c20_66, %c288_67], %78 {strides = array<i32>} : memref<36x576xbf16, #tpu.memory_space<vmem>>, vector<4x288xbf16>,
    %c0_68 = arith.constant 0 : index
    %c36_69 = arith.constant 36 : index
    %80 = vector.load %arg6[%c0_68, %c36_69] : memref<4x326xf32, #tpu.memory_space<vmem>>, vector<4x288xf32>
    %81 = arith.truncf %80 : vector<4x288xf32> to vector<4x288xbf16>
    %c24_70 = arith.constant 24 : index
    %c288_71 = arith.constant 288 : index
    %82 = vector.load %arg7[%c24_70, %c288_71] : memref<36x576xbf16, #tpu.memory_space<vmem>>, vector<4x288xbf16>
    tpu.vector_store %arg7[%c24_70, %c288_71], %81 {strides = array<i32>} : memref<36x576xbf16, #tpu.memory_space<vmem>>, vector<4x288xbf16>,
    %c0_72 = arith.constant 0 : index
    %c37_73 = arith.constant 37 : index
    %83 = vector.load %arg6[%c0_72, %c37_73] : memref<4x326xf32, #tpu.memory_space<vmem>>, vector<4x288xf32>
    %84 = arith.truncf %83 : vector<4x288xf32> to vector<4x288xbf16>
    %c28_74 = arith.constant 28 : index
    %c288_75 = arith.constant 288 : index
    %85 = vector.load %arg7[%c28_74, %c288_75] : memref<36x576xbf16, #tpu.memory_space<vmem>>, vector<4x288xbf16>
    tpu.vector_store %arg7[%c28_74, %c288_75], %84 {strides = array<i32>} : memref<36x576xbf16, #tpu.memory_space<vmem>>, vector<4x288xbf16>,
    %c0_76 = arith.constant 0 : index
    %c38_77 = arith.constant 38 : index
    %86 = vector.load %arg6[%c0_76, %c38_77] : memref<4x326xf32, #tpu.memory_space<vmem>>, vector<4x288xf32>
    %87 = arith.truncf %86 : vector<4x288xf32> to vector<4x288xbf16>
    %c32_78 = arith.constant 32 : index
    %c288_79 = arith.constant 288 : index
    %88 = vector.load %arg7[%c32_78, %c288_79] : memref<36x576xbf16, #tpu.memory_space<vmem>>, vector<4x288xbf16>
    tpu.vector_store %arg7[%c32_78, %c288_79], %87 {strides = array<i32>} : memref<36x576xbf16, #tpu.memory_space<vmem>>, vector<4x288xbf16>,
    %c0_80 = arith.constant 0 : index
    %c0_81 = arith.constant 0 : index
    %c0_82 = arith.constant 0 : index
    %89 = vector.load %arg2[%c0_80, %c0_81, %c0_82] : memref<8x4x36xbf16, #tpu.memory_space<vmem>>, vector<1x4x36xbf16>
    %90 = vector.shape_cast %89 : vector<1x4x36xbf16> to vector<4x36xbf16>
    %c0_83 = arith.constant 0 : index
    %c0_84 = arith.constant 0 : index
    %91 = vector.load %arg7[%c0_83, %c0_84] : memref<36x576xbf16, #tpu.memory_space<vmem>>, vector<36x576xbf16>
    %cst_85 = arith.constant dense<0.000000e+00> : vector<4x576xf32>
    %92 = tpu.matmul %90, %91, %cst_85 {dimension_numbers = #tpu.dot_dimension_numbers<[1], [0], [0], [1], [0, 0, 1, 1], [], []>} : vector<4x36xbf16>, vector<36x576xbf16>, vector<4x576xf32> -> vector<4x576xf32>
    %c0_86 = arith.constant 0 : index
    %c0_87 = arith.constant 0 : index
    %c0_88 = arith.constant 0 : index
    %93 = vector.load %arg3[%c0_86, %c0_87, %c0_88] : memref<8x4x1xf32, #tpu.memory_space<vmem>>, vector<1x4x1xf32>
    %94 = vector.shape_cast %93 : vector<1x4x1xf32> to vector<4x1xf32>
    %95 = vector.broadcast %94 : vector<4x1xf32> to vector<4x576xf32>
    %96 = arith.mulf %92, %95 : vector<4x576xf32>
    %c0_89 = arith.constant 0 : index
    %c0_90 = arith.constant 0 : index
    %c0_91 = arith.constant 0 : index
    %97 = vector.load %arg4[%c0_89, %c0_90, %c0_91] : memref<8x4x1xf32, #tpu.memory_space<vmem>>, vector<1x4x1xf32>
    %98 = vector.shape_cast %97 : vector<1x4x1xf32> to vector<4x1xf32>
    %99 = vector.broadcast %98 : vector<4x1xf32> to vector<4x576xf32>
    %100 = arith.addf %96, %99 : vector<4x576xf32>
    %cst_92 = arith.constant 0.000000e+00 : f32
    %101 = vector.broadcast %cst_92 : f32 to vector<4x576xf32>
    %102 = arith.maximumf %100, %101 : vector<4x576xf32>
    %103 = vector.broadcast %24 : vector<1x576xf32> to vector<4x576xf32>
    %104 = arith.mulf %102, %103 : vector<4x576xf32>
    %c0_93 = arith.constant 0 : index
    %c0_94 = arith.constant 0 : index
    %105 = vector.load %arg9[%c0_93, %c0_94] : memref<4x576xf32, #tpu.memory_space<vmem>>, vector<4x576xf32>
    tpu.vector_store %arg9[%c0_93, %c0_94], %104 {strides = array<i32>} : memref<4x576xf32, #tpu.memory_space<vmem>>, vector<4x576xf32>,
    %c0_95 = arith.constant 0 : index
    %c0_96 = arith.constant 0 : index
    %106 = vector.load %arg9[%c0_95, %c0_96] : memref<4x576xf32, #tpu.memory_space<vmem>>, vector<4x288xf32>
    %c0_97 = arith.constant 0 : index
    %c19_98 = arith.constant 19 : index
    %107 = vector.load %arg6[%c0_97, %c19_98] : memref<4x326xf32, #tpu.memory_space<vmem>>, vector<4x288xf32>
    tpu.vector_store %arg6[%c0_97, %c19_98], %106 {strides = array<i32>} : memref<4x326xf32, #tpu.memory_space<vmem>>, vector<4x288xf32>,
    %c0_99 = arith.constant 0 : index
    %c0_100 = arith.constant 0 : index
    %108 = vector.load %arg6[%c0_99, %c0_100] : memref<4x326xf32, #tpu.memory_space<vmem>>, vector<4x288xf32>
    %109 = arith.truncf %108 : vector<4x288xf32> to vector<4x288xbf16>
    %c0_101 = arith.constant 0 : index
    %c0_102 = arith.constant 0 : index
    %110 = vector.load %arg7[%c0_101, %c0_102] : memref<36x576xbf16, #tpu.memory_space<vmem>>, vector<4x288xbf16>
    tpu.vector_store %arg7[%c0_101, %c0_102], %109 {strides = array<i32>} : memref<36x576xbf16, #tpu.memory_space<vmem>>, vector<4x288xbf16>,
    %c0_103 = arith.constant 0 : index
    %c1_104 = arith.constant 1 : index
    %111 = vector.load %arg6[%c0_103, %c1_104] : memref<4x326xf32, #tpu.memory_space<vmem>>, vector<4x288xf32>
    %112 = arith.truncf %111 : vector<4x288xf32> to vector<4x288xbf16>
    %c4_105 = arith.constant 4 : index
    %c0_106 = arith.constant 0 : index
    %113 = vector.load %arg7[%c4_105, %c0_106] : memref<36x576xbf16, #tpu.memory_space<vmem>>, vector<4x288xbf16>
    tpu.vector_store %arg7[%c4_105, %c0_106], %112 {strides = array<i32>} : memref<36x576xbf16, #tpu.memory_space<vmem>>, vector<4x288xbf16>,
    %c0_107 = arith.constant 0 : index
    %c2_108 = arith.constant 2 : index
    %114 = vector.load %arg6[%c0_107, %c2_108] : memref<4x326xf32, #tpu.memory_space<vmem>>, vector<4x288xf32>
    %115 = arith.truncf %114 : vector<4x288xf32> to vector<4x288xbf16>
    %c8_109 = arith.constant 8 : index
    %c0_110 = arith.constant 0 : index
    %116 = vector.load %arg7[%c8_109, %c0_110] : memref<36x576xbf16, #tpu.memory_space<vmem>>, vector<4x288xbf16>
    tpu.vector_store %arg7[%c8_109, %c0_110], %115 {strides = array<i32>} : memref<36x576xbf16, #tpu.memory_space<vmem>>, vector<4x288xbf16>,
    %c0_111 = arith.constant 0 : index
    %c18_112 = arith.constant 18 : index
    %117 = vector.load %arg6[%c0_111, %c18_112] : memref<4x326xf32, #tpu.memory_space<vmem>>, vector<4x288xf32>
    %118 = arith.truncf %117 : vector<4x288xf32> to vector<4x288xbf16>
    %c12_113 = arith.constant 12 : index
    %c0_114 = arith.constant 0 : index
    %119 = vector.load %arg7[%c12_113, %c0_114] : memref<36x576xbf16, #tpu.memory_space<vmem>>, vector<4x288xbf16>
    tpu.vector_store %arg7[%c12_113, %c0_114], %118 {strides = array<i32>} : memref<36x576xbf16, #tpu.memory_space<vmem>>, vector<4x288xbf16>,
    %c0_115 = arith.constant 0 : index
    %c19_116 = arith.constant 19 : index
    %120 = vector.load %arg6[%c0_115, %c19_116] : memref<4x326xf32, #tpu.memory_space<vmem>>, vector<4x288xf32>
    %121 = arith.truncf %120 : vector<4x288xf32> to vector<4x288xbf16>
    %c16_117 = arith.constant 16 : index
    %c0_118 = arith.constant 0 : index
    %122 = vector.load %arg7[%c16_117, %c0_118] : memref<36x576xbf16, #tpu.memory_space<vmem>>, vector<4x288xbf16>
    tpu.vector_store %arg7[%c16_117, %c0_118], %121 {strides = array<i32>} : memref<36x576xbf16, #tpu.memory_space<vmem>>, vector<4x288xbf16>,
    %c0_119 = arith.constant 0 : index
    %c20_120 = arith.constant 20 : index
    %123 = vector.load %arg6[%c0_119, %c20_120] : memref<4x326xf32, #tpu.memory_space<vmem>>, vector<4x288xf32>
    %124 = arith.truncf %123 : vector<4x288xf32> to vector<4x288xbf16>
    %c20_121 = arith.constant 20 : index
    %c0_122 = arith.constant 0 : index
    %125 = vector.load %arg7[%c20_121, %c0_122] : memref<36x576xbf16, #tpu.memory_space<vmem>>, vector<4x288xbf16>
    tpu.vector_store %arg7[%c20_121, %c0_122], %124 {strides = array<i32>} : memref<36x576xbf16, #tpu.memory_space<vmem>>, vector<4x288xbf16>,
    %c0_123 = arith.constant 0 : index
    %c36_124 = arith.constant 36 : index
    %126 = vector.load %arg6[%c0_123, %c36_124] : memref<4x326xf32, #tpu.memory_space<vmem>>, vector<4x288xf32>
    %127 = arith.truncf %126 : vector<4x288xf32> to vector<4x288xbf16>
    %c24_125 = arith.constant 24 : index
    %c0_126 = arith.constant 0 : index
    %128 = vector.load %arg7[%c24_125, %c0_126] : memref<36x576xbf16, #tpu.memory_space<vmem>>, vector<4x288xbf16>
    tpu.vector_store %arg7[%c24_125, %c0_126], %127 {strides = array<i32>} : memref<36x576xbf16, #tpu.memory_space<vmem>>, vector<4x288xbf16>,
    %c0_127 = arith.constant 0 : index
    %c37_128 = arith.constant 37 : index
    %129 = vector.load %arg6[%c0_127, %c37_128] : memref<4x326xf32, #tpu.memory_space<vmem>>, vector<4x288xf32>
    %130 = arith.truncf %129 : vector<4x288xf32> to vector<4x288xbf16>
    %c28_129 = arith.constant 28 : index
    %c0_130 = arith.constant 0 : index
    %131 = vector.load %arg7[%c28_129, %c0_130] : memref<36x576xbf16, #tpu.memory_space<vmem>>, vector<4x288xbf16>
    tpu.vector_store %arg7[%c28_129, %c0_130], %130 {strides = array<i32>} : memref<36x576xbf16, #tpu.memory_space<vmem>>, vector<4x288xbf16>,
    %c0_131 = arith.constant 0 : index
    %c38_132 = arith.constant 38 : index
    %132 = vector.load %arg6[%c0_131, %c38_132] : memref<4x326xf32, #tpu.memory_space<vmem>>, vector<4x288xf32>
    %133 = arith.truncf %132 : vector<4x288xf32> to vector<4x288xbf16>
    %c32_133 = arith.constant 32 : index
    %c0_134 = arith.constant 0 : index
    %134 = vector.load %arg7[%c32_133, %c0_134] : memref<36x576xbf16, #tpu.memory_space<vmem>>, vector<4x288xbf16>
    tpu.vector_store %arg7[%c32_133, %c0_134], %133 {strides = array<i32>} : memref<36x576xbf16, #tpu.memory_space<vmem>>, vector<4x288xbf16>,
    %c0_135 = arith.constant 0 : index
    %c288_136 = arith.constant 288 : index
    %135 = vector.load %arg9[%c0_135, %c288_136] : memref<4x576xf32, #tpu.memory_space<vmem>>, vector<4x288xf32>
    %c0_137 = arith.constant 0 : index
    %c19_138 = arith.constant 19 : index
    %136 = vector.load %arg6[%c0_137, %c19_138] : memref<4x326xf32, #tpu.memory_space<vmem>>, vector<4x288xf32>
    tpu.vector_store %arg6[%c0_137, %c19_138], %135 {strides = array<i32>} : memref<4x326xf32, #tpu.memory_space<vmem>>, vector<4x288xf32>,
    %c0_139 = arith.constant 0 : index
    %c0_140 = arith.constant 0 : index
    %137 = vector.load %arg6[%c0_139, %c0_140] : memref<4x326xf32, #tpu.memory_space<vmem>>, vector<4x288xf32>
    %138 = arith.truncf %137 : vector<4x288xf32> to vector<4x288xbf16>
    %c0_141 = arith.constant 0 : index
    %c288_142 = arith.constant 288 : index
    %139 = vector.load %arg7[%c0_141, %c288_142] : memref<36x576xbf16, #tpu.memory_space<vmem>>, vector<4x288xbf16>
    tpu.vector_store %arg7[%c0_141, %c288_142], %138 {strides = array<i32>} : memref<36x576xbf16, #tpu.memory_space<vmem>>, vector<4x288xbf16>,
    %c0_143 = arith.constant 0 : index
    %c1_144 = arith.constant 1 : index
    %140 = vector.load %arg6[%c0_143, %c1_144] : memref<4x326xf32, #tpu.memory_space<vmem>>, vector<4x288xf32>
    %141 = arith.truncf %140 : vector<4x288xf32> to vector<4x288xbf16>
    %c4_145 = arith.constant 4 : index
    %c288_146 = arith.constant 288 : index
    %142 = vector.load %arg7[%c4_145, %c288_146] : memref<36x576xbf16, #tpu.memory_space<vmem>>, vector<4x288xbf16>
    tpu.vector_store %arg7[%c4_145, %c288_146], %141 {strides = array<i32>} : memref<36x576xbf16, #tpu.memory_space<vmem>>, vector<4x288xbf16>,
    %c0_147 = arith.constant 0 : index
    %c2_148 = arith.constant 2 : index
    %143 = vector.load %arg6[%c0_147, %c2_148] : memref<4x326xf32, #tpu.memory_space<vmem>>, vector<4x288xf32>
    %144 = arith.truncf %143 : vector<4x288xf32> to vector<4x288xbf16>
    %c8_149 = arith.constant 8 : index
    %c288_150 = arith.constant 288 : index
    %145 = vector.load %arg7[%c8_149, %c288_150] : memref<36x576xbf16, #tpu.memory_space<vmem>>, vector<4x288xbf16>
    tpu.vector_store %arg7[%c8_149, %c288_150], %144 {strides = array<i32>} : memref<36x576xbf16, #tpu.memory_space<vmem>>, vector<4x288xbf16>,
    %c0_151 = arith.constant 0 : index
    %c18_152 = arith.constant 18 : index
    %146 = vector.load %arg6[%c0_151, %c18_152] : memref<4x326xf32, #tpu.memory_space<vmem>>, vector<4x288xf32>
    %147 = arith.truncf %146 : vector<4x288xf32> to vector<4x288xbf16>
    %c12_153 = arith.constant 12 : index
    %c288_154 = arith.constant 288 : index
    %148 = vector.load %arg7[%c12_153, %c288_154] : memref<36x576xbf16, #tpu.memory_space<vmem>>, vector<4x288xbf16>
    tpu.vector_store %arg7[%c12_153, %c288_154], %147 {strides = array<i32>} : memref<36x576xbf16, #tpu.memory_space<vmem>>, vector<4x288xbf16>,
    %c0_155 = arith.constant 0 : index
    %c19_156 = arith.constant 19 : index
    %149 = vector.load %arg6[%c0_155, %c19_156] : memref<4x326xf32, #tpu.memory_space<vmem>>, vector<4x288xf32>
    %150 = arith.truncf %149 : vector<4x288xf32> to vector<4x288xbf16>
    %c16_157 = arith.constant 16 : index
    %c288_158 = arith.constant 288 : index
    %151 = vector.load %arg7[%c16_157, %c288_158] : memref<36x576xbf16, #tpu.memory_space<vmem>>, vector<4x288xbf16>
    tpu.vector_store %arg7[%c16_157, %c288_158], %150 {strides = array<i32>} : memref<36x576xbf16, #tpu.memory_space<vmem>>, vector<4x288xbf16>,
    %c0_159 = arith.constant 0 : index
    %c20_160 = arith.constant 20 : index
    %152 = vector.load %arg6[%c0_159, %c20_160] : memref<4x326xf32, #tpu.memory_space<vmem>>, vector<4x288xf32>
    %153 = arith.truncf %152 : vector<4x288xf32> to vector<4x288xbf16>
    %c20_161 = arith.constant 20 : index
    %c288_162 = arith.constant 288 : index
    %154 = vector.load %arg7[%c20_161, %c288_162] : memref<36x576xbf16, #tpu.memory_space<vmem>>, vector<4x288xbf16>
    tpu.vector_store %arg7[%c20_161, %c288_162], %153 {strides = array<i32>} : memref<36x576xbf16, #tpu.memory_space<vmem>>, vector<4x288xbf16>,
    %c0_163 = arith.constant 0 : index
    %c36_164 = arith.constant 36 : index
    %155 = vector.load %arg6[%c0_163, %c36_164] : memref<4x326xf32, #tpu.memory_space<vmem>>, vector<4x288xf32>
    %156 = arith.truncf %155 : vector<4x288xf32> to vector<4x288xbf16>
    %c24_165 = arith.constant 24 : index
    %c288_166 = arith.constant 288 : index
    %157 = vector.load %arg7[%c24_165, %c288_166] : memref<36x576xbf16, #tpu.memory_space<vmem>>, vector<4x288xbf16>
    tpu.vector_store %arg7[%c24_165, %c288_166], %156 {strides = array<i32>} : memref<36x576xbf16, #tpu.memory_space<vmem>>, vector<4x288xbf16>,
    %c0_167 = arith.constant 0 : index
    %c37_168 = arith.constant 37 : index
    %158 = vector.load %arg6[%c0_167, %c37_168] : memref<4x326xf32, #tpu.memory_space<vmem>>, vector<4x288xf32>
    %159 = arith.truncf %158 : vector<4x288xf32> to vector<4x288xbf16>
    %c28_169 = arith.constant 28 : index
    %c288_170 = arith.constant 288 : index
    %160 = vector.load %arg7[%c28_169, %c288_170] : memref<36x576xbf16, #tpu.memory_space<vmem>>, vector<4x288xbf16>
    tpu.vector_store %arg7[%c28_169, %c288_170], %159 {strides = array<i32>} : memref<36x576xbf16, #tpu.memory_space<vmem>>, vector<4x288xbf16>,
    %c0_171 = arith.constant 0 : index
    %c38_172 = arith.constant 38 : index
    %161 = vector.load %arg6[%c0_171, %c38_172] : memref<4x326xf32, #tpu.memory_space<vmem>>, vector<4x288xf32>
    %162 = arith.truncf %161 : vector<4x288xf32> to vector<4x288xbf16>
    %c32_173 = arith.constant 32 : index
    %c288_174 = arith.constant 288 : index
    %163 = vector.load %arg7[%c32_173, %c288_174] : memref<36x576xbf16, #tpu.memory_space<vmem>>, vector<4x288xbf16>
    tpu.vector_store %arg7[%c32_173, %c288_174], %162 {strides = array<i32>} : memref<36x576xbf16, #tpu.memory_space<vmem>>, vector<4x288xbf16>,
    %c1_175 = arith.constant 1 : index
    %c0_176 = arith.constant 0 : index
    %c0_177 = arith.constant 0 : index
    %164 = vector.load %arg2[%c1_175, %c0_176, %c0_177] : memref<8x4x36xbf16, #tpu.memory_space<vmem>>, vector<1x4x36xbf16>
    %165 = vector.shape_cast %164 : vector<1x4x36xbf16> to vector<4x36xbf16>
    %c0_178 = arith.constant 0 : index
    %c0_179 = arith.constant 0 : index
    %166 = vector.load %arg7[%c0_178, %c0_179] : memref<36x576xbf16, #tpu.memory_space<vmem>>, vector<36x576xbf16>
    %cst_180 = arith.constant dense<0.000000e+00> : vector<4x576xf32>
    %167 = tpu.matmul %165, %166, %cst_180 {dimension_numbers = #tpu.dot_dimension_numbers<[1], [0], [0], [1], [0, 0, 1, 1], [], []>} : vector<4x36xbf16>, vector<36x576xbf16>, vector<4x576xf32> -> vector<4x576xf32>
    %c1_181 = arith.constant 1 : index
    %c0_182 = arith.constant 0 : index
    %c0_183 = arith.constant 0 : index
    %168 = vector.load %arg3[%c1_181, %c0_182, %c0_183] : memref<8x4x1xf32, #tpu.memory_space<vmem>>, vector<1x4x1xf32>
    %169 = vector.shape_cast %168 : vector<1x4x1xf32> to vector<4x1xf32>
    %170 = vector.broadcast %169 : vector<4x1xf32> to vector<4x576xf32>
    %171 = arith.mulf %167, %170 : vector<4x576xf32>
    %c1_184 = arith.constant 1 : index
    %c0_185 = arith.constant 0 : index
    %c0_186 = arith.constant 0 : index
    %172 = vector.load %arg4[%c1_184, %c0_185, %c0_186] : memref<8x4x1xf32, #tpu.memory_space<vmem>>, vector<1x4x1xf32>
    %173 = vector.shape_cast %172 : vector<1x4x1xf32> to vector<4x1xf32>
    %174 = vector.broadcast %173 : vector<4x1xf32> to vector<4x576xf32>
    %175 = arith.addf %171, %174 : vector<4x576xf32>
    %c0_187 = arith.constant 0 : index
    %c0_188 = arith.constant 0 : index
    %176 = vector.load %arg8[%c0_187, %c0_188] : memref<4x576xf32, #tpu.memory_space<vmem>>, vector<4x576xf32>
    %177 = arith.addf %175, %176 : vector<4x576xf32>
    %cst_189 = arith.constant 0.000000e+00 : f32
    %178 = vector.broadcast %cst_189 : f32 to vector<4x576xf32>
    %179 = arith.maximumf %177, %178 : vector<4x576xf32>
    %180 = vector.broadcast %24 : vector<1x576xf32> to vector<4x576xf32>
    %181 = arith.mulf %179, %180 : vector<4x576xf32>
    %c0_190 = arith.constant 0 : index
    %c0_191 = arith.constant 0 : index
    %182 = vector.load %arg8[%c0_190, %c0_191] : memref<4x576xf32, #tpu.memory_space<vmem>>, vector<4x576xf32>
    tpu.vector_store %arg8[%c0_190, %c0_191], %181 {strides = array<i32>} : memref<4x576xf32, #tpu.memory_space<vmem>>, vector<4x576xf32>,
    %c0_192 = arith.constant 0 : index
    %c0_193 = arith.constant 0 : index
    %183 = vector.load %arg8[%c0_192, %c0_193] : memref<4x576xf32, #tpu.memory_space<vmem>>, vector<4x288xf32>
    %c0_194 = arith.constant 0 : index
    %c19_195 = arith.constant 19 : index
    %184 = vector.load %arg6[%c0_194, %c19_195] : memref<4x326xf32, #tpu.memory_space<vmem>>, vector<4x288xf32>
    tpu.vector_store %arg6[%c0_194, %c19_195], %183 {strides = array<i32>} : memref<4x326xf32, #tpu.memory_space<vmem>>, vector<4x288xf32>,
    %c0_196 = arith.constant 0 : index
    %c0_197 = arith.constant 0 : index
    %185 = vector.load %arg6[%c0_196, %c0_197] : memref<4x326xf32, #tpu.memory_space<vmem>>, vector<4x288xf32>
    %186 = arith.truncf %185 : vector<4x288xf32> to vector<4x288xbf16>
    %c0_198 = arith.constant 0 : index
    %c0_199 = arith.constant 0 : index
    %187 = vector.load %arg7[%c0_198, %c0_199] : memref<36x576xbf16, #tpu.memory_space<vmem>>, vector<4x288xbf16>
    tpu.vector_store %arg7[%c0_198, %c0_199], %186 {strides = array<i32>} : memref<36x576xbf16, #tpu.memory_space<vmem>>, vector<4x288xbf16>,
    %c0_200 = arith.constant 0 : index
    %c1_201 = arith.constant 1 : index
    %188 = vector.load %arg6[%c0_200, %c1_201] : memref<4x326xf32, #tpu.memory_space<vmem>>, vector<4x288xf32>
    %189 = arith.truncf %188 : vector<4x288xf32> to vector<4x288xbf16>
    %c4_202 = arith.constant 4 : index
    %c0_203 = arith.constant 0 : index
    %190 = vector.load %arg7[%c4_202, %c0_203] : memref<36x576xbf16, #tpu.memory_space<vmem>>, vector<4x288xbf16>
    tpu.vector_store %arg7[%c4_202, %c0_203], %189 {strides = array<i32>} : memref<36x576xbf16, #tpu.memory_space<vmem>>, vector<4x288xbf16>,
    %c0_204 = arith.constant 0 : index
    %c2_205 = arith.constant 2 : index
    %191 = vector.load %arg6[%c0_204, %c2_205] : memref<4x326xf32, #tpu.memory_space<vmem>>, vector<4x288xf32>
    %192 = arith.truncf %191 : vector<4x288xf32> to vector<4x288xbf16>
    %c8_206 = arith.constant 8 : index
    %c0_207 = arith.constant 0 : index
    %193 = vector.load %arg7[%c8_206, %c0_207] : memref<36x576xbf16, #tpu.memory_space<vmem>>, vector<4x288xbf16>
    tpu.vector_store %arg7[%c8_206, %c0_207], %192 {strides = array<i32>} : memref<36x576xbf16, #tpu.memory_space<vmem>>, vector<4x288xbf16>,
    %c0_208 = arith.constant 0 : index
    %c18_209 = arith.constant 18 : index
    %194 = vector.load %arg6[%c0_208, %c18_209] : memref<4x326xf32, #tpu.memory_space<vmem>>, vector<4x288xf32>
    %195 = arith.truncf %194 : vector<4x288xf32> to vector<4x288xbf16>
    %c12_210 = arith.constant 12 : index
    %c0_211 = arith.constant 0 : index
    %196 = vector.load %arg7[%c12_210, %c0_211] : memref<36x576xbf16, #tpu.memory_space<vmem>>, vector<4x288xbf16>
    tpu.vector_store %arg7[%c12_210, %c0_211], %195 {strides = array<i32>} : memref<36x576xbf16, #tpu.memory_space<vmem>>, vector<4x288xbf16>,
    %c0_212 = arith.constant 0 : index
    %c19_213 = arith.constant 19 : index
    %197 = vector.load %arg6[%c0_212, %c19_213] : memref<4x326xf32, #tpu.memory_space<vmem>>, vector<4x288xf32>
    %198 = arith.truncf %197 : vector<4x288xf32> to vector<4x288xbf16>
    %c16_214 = arith.constant 16 : index
    %c0_215 = arith.constant 0 : index
    %199 = vector.load %arg7[%c16_214, %c0_215] : memref<36x576xbf16, #tpu.memory_space<vmem>>, vector<4x288xbf16>
    tpu.vector_store %arg7[%c16_214, %c0_215], %198 {strides = array<i32>} : memref<36x576xbf16, #tpu.memory_space<vmem>>, vector<4x288xbf16>,
    %c0_216 = arith.constant 0 : index
    %c20_217 = arith.constant 20 : index
    %200 = vector.load %arg6[%c0_216, %c20_217] : memref<4x326xf32, #tpu.memory_space<vmem>>, vector<4x288xf32>
    %201 = arith.truncf %200 : vector<4x288xf32> to vector<4x288xbf16>
    %c20_218 = arith.constant 20 : index
    %c0_219 = arith.constant 0 : index
    %202 = vector.load %arg7[%c20_218, %c0_219] : memref<36x576xbf16, #tpu.memory_space<vmem>>, vector<4x288xbf16>
    tpu.vector_store %arg7[%c20_218, %c0_219], %201 {strides = array<i32>} : memref<36x576xbf16, #tpu.memory_space<vmem>>, vector<4x288xbf16>,
    %c0_220 = arith.constant 0 : index
    %c36_221 = arith.constant 36 : index
    %203 = vector.load %arg6[%c0_220, %c36_221] : memref<4x326xf32, #tpu.memory_space<vmem>>, vector<4x288xf32>
    %204 = arith.truncf %203 : vector<4x288xf32> to vector<4x288xbf16>
    %c24_222 = arith.constant 24 : index
    %c0_223 = arith.constant 0 : index
    %205 = vector.load %arg7[%c24_222, %c0_223] : memref<36x576xbf16, #tpu.memory_space<vmem>>, vector<4x288xbf16>
    tpu.vector_store %arg7[%c24_222, %c0_223], %204 {strides = array<i32>} : memref<36x576xbf16, #tpu.memory_space<vmem>>, vector<4x288xbf16>,
    %c0_224 = arith.constant 0 : index
    %c37_225 = arith.constant 37 : index
    %206 = vector.load %arg6[%c0_224, %c37_225] : memref<4x326xf32, #tpu.memory_space<vmem>>, vector<4x288xf32>
    %207 = arith.truncf %206 : vector<4x288xf32> to vector<4x288xbf16>
    %c28_226 = arith.constant 28 : index
    %c0_227 = arith.constant 0 : index
    %208 = vector.load %arg7[%c28_226, %c0_227] : memref<36x576xbf16, #tpu.memory_space<vmem>>, vector<4x288xbf16>
    tpu.vector_store %arg7[%c28_226, %c0_227], %207 {strides = array<i32>} : memref<36x576xbf16, #tpu.memory_space<vmem>>, vector<4x288xbf16>,
    %c0_228 = arith.constant 0 : index
    %c38_229 = arith.constant 38 : index
    %209 = vector.load %arg6[%c0_228, %c38_229] : memref<4x326xf32, #tpu.memory_space<vmem>>, vector<4x288xf32>
    %210 = arith.truncf %209 : vector<4x288xf32> to vector<4x288xbf16>
    %c32_230 = arith.constant 32 : index
    %c0_231 = arith.constant 0 : index
    %211 = vector.load %arg7[%c32_230, %c0_231] : memref<36x576xbf16, #tpu.memory_space<vmem>>, vector<4x288xbf16>
    tpu.vector_store %arg7[%c32_230, %c0_231], %210 {strides = array<i32>} : memref<36x576xbf16, #tpu.memory_space<vmem>>, vector<4x288xbf16>,
    %c0_232 = arith.constant 0 : index
    %c288_233 = arith.constant 288 : index
    %212 = vector.load %arg8[%c0_232, %c288_233] : memref<4x576xf32, #tpu.memory_space<vmem>>, vector<4x288xf32>
    %c0_234 = arith.constant 0 : index
    %c19_235 = arith.constant 19 : index
    %213 = vector.load %arg6[%c0_234, %c19_235] : memref<4x326xf32, #tpu.memory_space<vmem>>, vector<4x288xf32>
    tpu.vector_store %arg6[%c0_234, %c19_235], %212 {strides = array<i32>} : memref<4x326xf32, #tpu.memory_space<vmem>>, vector<4x288xf32>,
    %c0_236 = arith.constant 0 : index
    %c0_237 = arith.constant 0 : index
    %214 = vector.load %arg6[%c0_236, %c0_237] : memref<4x326xf32, #tpu.memory_space<vmem>>, vector<4x288xf32>
    %215 = arith.truncf %214 : vector<4x288xf32> to vector<4x288xbf16>
    %c0_238 = arith.constant 0 : index
    %c288_239 = arith.constant 288 : index
    %216 = vector.load %arg7[%c0_238, %c288_239] : memref<36x576xbf16, #tpu.memory_space<vmem>>, vector<4x288xbf16>
    tpu.vector_store %arg7[%c0_238, %c288_239], %215 {strides = array<i32>} : memref<36x576xbf16, #tpu.memory_space<vmem>>, vector<4x288xbf16>,
    %c0_240 = arith.constant 0 : index
    %c1_241 = arith.constant 1 : index
    %217 = vector.load %arg6[%c0_240, %c1_241] : memref<4x326xf32, #tpu.memory_space<vmem>>, vector<4x288xf32>
    %218 = arith.truncf %217 : vector<4x288xf32> to vector<4x288xbf16>
    %c4_242 = arith.constant 4 : index
    %c288_243 = arith.constant 288 : index
    %219 = vector.load %arg7[%c4_242, %c288_243] : memref<36x576xbf16, #tpu.memory_space<vmem>>, vector<4x288xbf16>
    tpu.vector_store %arg7[%c4_242, %c288_243], %218 {strides = array<i32>} : memref<36x576xbf16, #tpu.memory_space<vmem>>, vector<4x288xbf16>,
    %c0_244 = arith.constant 0 : index
    %c2_245 = arith.constant 2 : index
    %220 = vector.load %arg6[%c0_244, %c2_245] : memref<4x326xf32, #tpu.memory_space<vmem>>, vector<4x288xf32>
    %221 = arith.truncf %220 : vector<4x288xf32> to vector<4x288xbf16>
    %c8_246 = arith.constant 8 : index
    %c288_247 = arith.constant 288 : index
    %222 = vector.load %arg7[%c8_246, %c288_247] : memref<36x576xbf16, #tpu.memory_space<vmem>>, vector<4x288xbf16>
    tpu.vector_store %arg7[%c8_246, %c288_247], %221 {strides = array<i32>} : memref<36x576xbf16, #tpu.memory_space<vmem>>, vector<4x288xbf16>,
    %c0_248 = arith.constant 0 : index
    %c18_249 = arith.constant 18 : index
    %223 = vector.load %arg6[%c0_248, %c18_249] : memref<4x326xf32, #tpu.memory_space<vmem>>, vector<4x288xf32>
    %224 = arith.truncf %223 : vector<4x288xf32> to vector<4x288xbf16>
    %c12_250 = arith.constant 12 : index
    %c288_251 = arith.constant 288 : index
    %225 = vector.load %arg7[%c12_250, %c288_251] : memref<36x576xbf16, #tpu.memory_space<vmem>>, vector<4x288xbf16>
    tpu.vector_store %arg7[%c12_250, %c288_251], %224 {strides = array<i32>} : memref<36x576xbf16, #tpu.memory_space<vmem>>, vector<4x288xbf16>,
    %c0_252 = arith.constant 0 : index
    %c19_253 = arith.constant 19 : index
    %226 = vector.load %arg6[%c0_252, %c19_253] : memref<4x326xf32, #tpu.memory_space<vmem>>, vector<4x288xf32>
    %227 = arith.truncf %226 : vector<4x288xf32> to vector<4x288xbf16>
    %c16_254 = arith.constant 16 : index
    %c288_255 = arith.constant 288 : index
    %228 = vector.load %arg7[%c16_254, %c288_255] : memref<36x576xbf16, #tpu.memory_space<vmem>>, vector<4x288xbf16>
    tpu.vector_store %arg7[%c16_254, %c288_255], %227 {strides = array<i32>} : memref<36x576xbf16, #tpu.memory_space<vmem>>, vector<4x288xbf16>,
    %c0_256 = arith.constant 0 : index
    %c20_257 = arith.constant 20 : index
    %229 = vector.load %arg6[%c0_256, %c20_257] : memref<4x326xf32, #tpu.memory_space<vmem>>, vector<4x288xf32>
    %230 = arith.truncf %229 : vector<4x288xf32> to vector<4x288xbf16>
    %c20_258 = arith.constant 20 : index
    %c288_259 = arith.constant 288 : index
    %231 = vector.load %arg7[%c20_258, %c288_259] : memref<36x576xbf16, #tpu.memory_space<vmem>>, vector<4x288xbf16>
    tpu.vector_store %arg7[%c20_258, %c288_259], %230 {strides = array<i32>} : memref<36x576xbf16, #tpu.memory_space<vmem>>, vector<4x288xbf16>,
    %c0_260 = arith.constant 0 : index
    %c36_261 = arith.constant 36 : index
    %232 = vector.load %arg6[%c0_260, %c36_261] : memref<4x326xf32, #tpu.memory_space<vmem>>, vector<4x288xf32>
    %233 = arith.truncf %232 : vector<4x288xf32> to vector<4x288xbf16>
    %c24_262 = arith.constant 24 : index
    %c288_263 = arith.constant 288 : index
    %234 = vector.load %arg7[%c24_262, %c288_263] : memref<36x576xbf16, #tpu.memory_space<vmem>>, vector<4x288xbf16>
    tpu.vector_store %arg7[%c24_262, %c288_263], %233 {strides = array<i32>} : memref<36x576xbf16, #tpu.memory_space<vmem>>, vector<4x288xbf16>,
    %c0_264 = arith.constant 0 : index
    %c37_265 = arith.constant 37 : index
    %235 = vector.load %arg6[%c0_264, %c37_265] : memref<4x326xf32, #tpu.memory_space<vmem>>, vector<4x288xf32>
    %236 = arith.truncf %235 : vector<4x288xf32> to vector<4x288xbf16>
    %c28_266 = arith.constant 28 : index
    %c288_267 = arith.constant 288 : index
    %237 = vector.load %arg7[%c28_266, %c288_267] : memref<36x576xbf16, #tpu.memory_space<vmem>>, vector<4x288xbf16>
    tpu.vector_store %arg7[%c28_266, %c288_267], %236 {strides = array<i32>} : memref<36x576xbf16, #tpu.memory_space<vmem>>, vector<4x288xbf16>,
    %c0_268 = arith.constant 0 : index
    %c38_269 = arith.constant 38 : index
    %238 = vector.load %arg6[%c0_268, %c38_269] : memref<4x326xf32, #tpu.memory_space<vmem>>, vector<4x288xf32>
    %239 = arith.truncf %238 : vector<4x288xf32> to vector<4x288xbf16>
    %c32_270 = arith.constant 32 : index
    %c288_271 = arith.constant 288 : index
    %240 = vector.load %arg7[%c32_270, %c288_271] : memref<36x576xbf16, #tpu.memory_space<vmem>>, vector<4x288xbf16>
    tpu.vector_store %arg7[%c32_270, %c288_271], %239 {strides = array<i32>} : memref<36x576xbf16, #tpu.memory_space<vmem>>, vector<4x288xbf16>,
    %c2_272 = arith.constant 2 : index
    %c0_273 = arith.constant 0 : index
    %c0_274 = arith.constant 0 : index
    %241 = vector.load %arg2[%c2_272, %c0_273, %c0_274] : memref<8x4x36xbf16, #tpu.memory_space<vmem>>, vector<1x4x36xbf16>
    %242 = vector.shape_cast %241 : vector<1x4x36xbf16> to vector<4x36xbf16>
    %c0_275 = arith.constant 0 : index
    %c0_276 = arith.constant 0 : index
    %243 = vector.load %arg7[%c0_275, %c0_276] : memref<36x576xbf16, #tpu.memory_space<vmem>>, vector<36x576xbf16>
    %cst_277 = arith.constant dense<0.000000e+00> : vector<4x576xf32>
    %244 = tpu.matmul %242, %243, %cst_277 {dimension_numbers = #tpu.dot_dimension_numbers<[1], [0], [0], [1], [0, 0, 1, 1], [], []>} : vector<4x36xbf16>, vector<36x576xbf16>, vector<4x576xf32> -> vector<4x576xf32>
    %c2_278 = arith.constant 2 : index
    %c0_279 = arith.constant 0 : index
    %c0_280 = arith.constant 0 : index
    %245 = vector.load %arg3[%c2_278, %c0_279, %c0_280] : memref<8x4x1xf32, #tpu.memory_space<vmem>>, vector<1x4x1xf32>
    %246 = vector.shape_cast %245 : vector<1x4x1xf32> to vector<4x1xf32>
    %247 = vector.broadcast %246 : vector<4x1xf32> to vector<4x576xf32>
    %248 = arith.mulf %244, %247 : vector<4x576xf32>
    %c2_281 = arith.constant 2 : index
    %c0_282 = arith.constant 0 : index
    %c0_283 = arith.constant 0 : index
    %249 = vector.load %arg4[%c2_281, %c0_282, %c0_283] : memref<8x4x1xf32, #tpu.memory_space<vmem>>, vector<1x4x1xf32>
    %250 = vector.shape_cast %249 : vector<1x4x1xf32> to vector<4x1xf32>
    %251 = vector.broadcast %250 : vector<4x1xf32> to vector<4x576xf32>
    %252 = arith.addf %248, %251 : vector<4x576xf32>
    %cst_284 = arith.constant 0.000000e+00 : f32
    %253 = vector.broadcast %cst_284 : f32 to vector<4x576xf32>
    %254 = arith.maximumf %252, %253 : vector<4x576xf32>
    %255 = vector.broadcast %24 : vector<1x576xf32> to vector<4x576xf32>
    %256 = arith.mulf %254, %255 : vector<4x576xf32>
    %c0_285 = arith.constant 0 : index
    %c0_286 = arith.constant 0 : index
    %257 = vector.load %arg9[%c0_285, %c0_286] : memref<4x576xf32, #tpu.memory_space<vmem>>, vector<4x576xf32>
    tpu.vector_store %arg9[%c0_285, %c0_286], %256 {strides = array<i32>} : memref<4x576xf32, #tpu.memory_space<vmem>>, vector<4x576xf32>,
    %c0_287 = arith.constant 0 : index
    %c0_288 = arith.constant 0 : index
    %258 = vector.load %arg9[%c0_287, %c0_288] : memref<4x576xf32, #tpu.memory_space<vmem>>, vector<4x288xf32>
    %c0_289 = arith.constant 0 : index
    %c19_290 = arith.constant 19 : index
    %259 = vector.load %arg6[%c0_289, %c19_290] : memref<4x326xf32, #tpu.memory_space<vmem>>, vector<4x288xf32>
    tpu.vector_store %arg6[%c0_289, %c19_290], %258 {strides = array<i32>} : memref<4x326xf32, #tpu.memory_space<vmem>>, vector<4x288xf32>,
    %c0_291 = arith.constant 0 : index
    %c0_292 = arith.constant 0 : index
    %260 = vector.load %arg6[%c0_291, %c0_292] : memref<4x326xf32, #tpu.memory_space<vmem>>, vector<4x288xf32>
    %261 = arith.truncf %260 : vector<4x288xf32> to vector<4x288xbf16>
    %c0_293 = arith.constant 0 : index
    %c0_294 = arith.constant 0 : index
    %262 = vector.load %arg7[%c0_293, %c0_294] : memref<36x576xbf16, #tpu.memory_space<vmem>>, vector<4x288xbf16>
    tpu.vector_store %arg7[%c0_293, %c0_294], %261 {strides = array<i32>} : memref<36x576xbf16, #tpu.memory_space<vmem>>, vector<4x288xbf16>,
    %c0_295 = arith.constant 0 : index
    %c1_296 = arith.constant 1 : index
    %263 = vector.load %arg6[%c0_295, %c1_296] : memref<4x326xf32, #tpu.memory_space<vmem>>, vector<4x288xf32>
    %264 = arith.truncf %263 : vector<4x288xf32> to vector<4x288xbf16>
    %c4_297 = arith.constant 4 : index
    %c0_298 = arith.constant 0 : index
    %265 = vector.load %arg7[%c4_297, %c0_298] : memref<36x576xbf16, #tpu.memory_space<vmem>>, vector<4x288xbf16>
    tpu.vector_store %arg7[%c4_297, %c0_298], %264 {strides = array<i32>} : memref<36x576xbf16, #tpu.memory_space<vmem>>, vector<4x288xbf16>,
    %c0_299 = arith.constant 0 : index
    %c2_300 = arith.constant 2 : index
    %266 = vector.load %arg6[%c0_299, %c2_300] : memref<4x326xf32, #tpu.memory_space<vmem>>, vector<4x288xf32>
    %267 = arith.truncf %266 : vector<4x288xf32> to vector<4x288xbf16>
    %c8_301 = arith.constant 8 : index
    %c0_302 = arith.constant 0 : index
    %268 = vector.load %arg7[%c8_301, %c0_302] : memref<36x576xbf16, #tpu.memory_space<vmem>>, vector<4x288xbf16>
    tpu.vector_store %arg7[%c8_301, %c0_302], %267 {strides = array<i32>} : memref<36x576xbf16, #tpu.memory_space<vmem>>, vector<4x288xbf16>,
    %c0_303 = arith.constant 0 : index
    %c18_304 = arith.constant 18 : index
    %269 = vector.load %arg6[%c0_303, %c18_304] : memref<4x326xf32, #tpu.memory_space<vmem>>, vector<4x288xf32>
    %270 = arith.truncf %269 : vector<4x288xf32> to vector<4x288xbf16>
    %c12_305 = arith.constant 12 : index
    %c0_306 = arith.constant 0 : index
    %271 = vector.load %arg7[%c12_305, %c0_306] : memref<36x576xbf16, #tpu.memory_space<vmem>>, vector<4x288xbf16>
    tpu.vector_store %arg7[%c12_305, %c0_306], %270 {strides = array<i32>} : memref<36x576xbf16, #tpu.memory_space<vmem>>, vector<4x288xbf16>,
    %c0_307 = arith.constant 0 : index
    %c19_308 = arith.constant 19 : index
    %272 = vector.load %arg6[%c0_307, %c19_308] : memref<4x326xf32, #tpu.memory_space<vmem>>, vector<4x288xf32>
    %273 = arith.truncf %272 : vector<4x288xf32> to vector<4x288xbf16>
    %c16_309 = arith.constant 16 : index
    %c0_310 = arith.constant 0 : index
    %274 = vector.load %arg7[%c16_309, %c0_310] : memref<36x576xbf16, #tpu.memory_space<vmem>>, vector<4x288xbf16>
    tpu.vector_store %arg7[%c16_309, %c0_310], %273 {strides = array<i32>} : memref<36x576xbf16, #tpu.memory_space<vmem>>, vector<4x288xbf16>,
    %c0_311 = arith.constant 0 : index
    %c20_312 = arith.constant 20 : index
    %275 = vector.load %arg6[%c0_311, %c20_312] : memref<4x326xf32, #tpu.memory_space<vmem>>, vector<4x288xf32>
    %276 = arith.truncf %275 : vector<4x288xf32> to vector<4x288xbf16>
    %c20_313 = arith.constant 20 : index
    %c0_314 = arith.constant 0 : index
    %277 = vector.load %arg7[%c20_313, %c0_314] : memref<36x576xbf16, #tpu.memory_space<vmem>>, vector<4x288xbf16>
    tpu.vector_store %arg7[%c20_313, %c0_314], %276 {strides = array<i32>} : memref<36x576xbf16, #tpu.memory_space<vmem>>, vector<4x288xbf16>,
    %c0_315 = arith.constant 0 : index
    %c36_316 = arith.constant 36 : index
    %278 = vector.load %arg6[%c0_315, %c36_316] : memref<4x326xf32, #tpu.memory_space<vmem>>, vector<4x288xf32>
    %279 = arith.truncf %278 : vector<4x288xf32> to vector<4x288xbf16>
    %c24_317 = arith.constant 24 : index
    %c0_318 = arith.constant 0 : index
    %280 = vector.load %arg7[%c24_317, %c0_318] : memref<36x576xbf16, #tpu.memory_space<vmem>>, vector<4x288xbf16>
    tpu.vector_store %arg7[%c24_317, %c0_318], %279 {strides = array<i32>} : memref<36x576xbf16, #tpu.memory_space<vmem>>, vector<4x288xbf16>,
    %c0_319 = arith.constant 0 : index
    %c37_320 = arith.constant 37 : index
    %281 = vector.load %arg6[%c0_319, %c37_320] : memref<4x326xf32, #tpu.memory_space<vmem>>, vector<4x288xf32>
    %282 = arith.truncf %281 : vector<4x288xf32> to vector<4x288xbf16>
    %c28_321 = arith.constant 28 : index
    %c0_322 = arith.constant 0 : index
    %283 = vector.load %arg7[%c28_321, %c0_322] : memref<36x576xbf16, #tpu.memory_space<vmem>>, vector<4x288xbf16>
    tpu.vector_store %arg7[%c28_321, %c0_322], %282 {strides = array<i32>} : memref<36x576xbf16, #tpu.memory_space<vmem>>, vector<4x288xbf16>,
    %c0_323 = arith.constant 0 : index
    %c38_324 = arith.constant 38 : index
    %284 = vector.load %arg6[%c0_323, %c38_324] : memref<4x326xf32, #tpu.memory_space<vmem>>, vector<4x288xf32>
    %285 = arith.truncf %284 : vector<4x288xf32> to vector<4x288xbf16>
    %c32_325 = arith.constant 32 : index
    %c0_326 = arith.constant 0 : index
    %286 = vector.load %arg7[%c32_325, %c0_326] : memref<36x576xbf16, #tpu.memory_space<vmem>>, vector<4x288xbf16>
    tpu.vector_store %arg7[%c32_325, %c0_326], %285 {strides = array<i32>} : memref<36x576xbf16, #tpu.memory_space<vmem>>, vector<4x288xbf16>,
    %c0_327 = arith.constant 0 : index
    %c288_328 = arith.constant 288 : index
    %287 = vector.load %arg9[%c0_327, %c288_328] : memref<4x576xf32, #tpu.memory_space<vmem>>, vector<4x288xf32>
    %c0_329 = arith.constant 0 : index
    %c19_330 = arith.constant 19 : index
    %288 = vector.load %arg6[%c0_329, %c19_330] : memref<4x326xf32, #tpu.memory_space<vmem>>, vector<4x288xf32>
    tpu.vector_store %arg6[%c0_329, %c19_330], %287 {strides = array<i32>} : memref<4x326xf32, #tpu.memory_space<vmem>>, vector<4x288xf32>,
    %c0_331 = arith.constant 0 : index
    %c0_332 = arith.constant 0 : index
    %289 = vector.load %arg6[%c0_331, %c0_332] : memref<4x326xf32, #tpu.memory_space<vmem>>, vector<4x288xf32>
    %290 = arith.truncf %289 : vector<4x288xf32> to vector<4x288xbf16>
    %c0_333 = arith.constant 0 : index
    %c288_334 = arith.constant 288 : index
    %291 = vector.load %arg7[%c0_333, %c288_334] : memref<36x576xbf16, #tpu.memory_space<vmem>>, vector<4x288xbf16>
    tpu.vector_store %arg7[%c0_333, %c288_334], %290 {strides = array<i32>} : memref<36x576xbf16, #tpu.memory_space<vmem>>, vector<4x288xbf16>,
    %c0_335 = arith.constant 0 : index
    %c1_336 = arith.constant 1 : index
    %292 = vector.load %arg6[%c0_335, %c1_336] : memref<4x326xf32, #tpu.memory_space<vmem>>, vector<4x288xf32>
    %293 = arith.truncf %292 : vector<4x288xf32> to vector<4x288xbf16>
    %c4_337 = arith.constant 4 : index
    %c288_338 = arith.constant 288 : index
    %294 = vector.load %arg7[%c4_337, %c288_338] : memref<36x576xbf16, #tpu.memory_space<vmem>>, vector<4x288xbf16>
    tpu.vector_store %arg7[%c4_337, %c288_338], %293 {strides = array<i32>} : memref<36x576xbf16, #tpu.memory_space<vmem>>, vector<4x288xbf16>,
    %c0_339 = arith.constant 0 : index
    %c2_340 = arith.constant 2 : index
    %295 = vector.load %arg6[%c0_339, %c2_340] : memref<4x326xf32, #tpu.memory_space<vmem>>, vector<4x288xf32>
    %296 = arith.truncf %295 : vector<4x288xf32> to vector<4x288xbf16>
    %c8_341 = arith.constant 8 : index
    %c288_342 = arith.constant 288 : index
    %297 = vector.load %arg7[%c8_341, %c288_342] : memref<36x576xbf16, #tpu.memory_space<vmem>>, vector<4x288xbf16>
    tpu.vector_store %arg7[%c8_341, %c288_342], %296 {strides = array<i32>} : memref<36x576xbf16, #tpu.memory_space<vmem>>, vector<4x288xbf16>,
    %c0_343 = arith.constant 0 : index
    %c18_344 = arith.constant 18 : index
    %298 = vector.load %arg6[%c0_343, %c18_344] : memref<4x326xf32, #tpu.memory_space<vmem>>, vector<4x288xf32>
    %299 = arith.truncf %298 : vector<4x288xf32> to vector<4x288xbf16>
    %c12_345 = arith.constant 12 : index
    %c288_346 = arith.constant 288 : index
    %300 = vector.load %arg7[%c12_345, %c288_346] : memref<36x576xbf16, #tpu.memory_space<vmem>>, vector<4x288xbf16>
    tpu.vector_store %arg7[%c12_345, %c288_346], %299 {strides = array<i32>} : memref<36x576xbf16, #tpu.memory_space<vmem>>, vector<4x288xbf16>,
    %c0_347 = arith.constant 0 : index
    %c19_348 = arith.constant 19 : index
    %301 = vector.load %arg6[%c0_347, %c19_348] : memref<4x326xf32, #tpu.memory_space<vmem>>, vector<4x288xf32>
    %302 = arith.truncf %301 : vector<4x288xf32> to vector<4x288xbf16>
    %c16_349 = arith.constant 16 : index
    %c288_350 = arith.constant 288 : index
    %303 = vector.load %arg7[%c16_349, %c288_350] : memref<36x576xbf16, #tpu.memory_space<vmem>>, vector<4x288xbf16>
    tpu.vector_store %arg7[%c16_349, %c288_350], %302 {strides = array<i32>} : memref<36x576xbf16, #tpu.memory_space<vmem>>, vector<4x288xbf16>,
    %c0_351 = arith.constant 0 : index
    %c20_352 = arith.constant 20 : index
    %304 = vector.load %arg6[%c0_351, %c20_352] : memref<4x326xf32, #tpu.memory_space<vmem>>, vector<4x288xf32>
    %305 = arith.truncf %304 : vector<4x288xf32> to vector<4x288xbf16>
    %c20_353 = arith.constant 20 : index
    %c288_354 = arith.constant 288 : index
    %306 = vector.load %arg7[%c20_353, %c288_354] : memref<36x576xbf16, #tpu.memory_space<vmem>>, vector<4x288xbf16>
    tpu.vector_store %arg7[%c20_353, %c288_354], %305 {strides = array<i32>} : memref<36x576xbf16, #tpu.memory_space<vmem>>, vector<4x288xbf16>,
    %c0_355 = arith.constant 0 : index
    %c36_356 = arith.constant 36 : index
    %307 = vector.load %arg6[%c0_355, %c36_356] : memref<4x326xf32, #tpu.memory_space<vmem>>, vector<4x288xf32>
    %308 = arith.truncf %307 : vector<4x288xf32> to vector<4x288xbf16>
    %c24_357 = arith.constant 24 : index
    %c288_358 = arith.constant 288 : index
    %309 = vector.load %arg7[%c24_357, %c288_358] : memref<36x576xbf16, #tpu.memory_space<vmem>>, vector<4x288xbf16>
    tpu.vector_store %arg7[%c24_357, %c288_358], %308 {strides = array<i32>} : memref<36x576xbf16, #tpu.memory_space<vmem>>, vector<4x288xbf16>,
    %c0_359 = arith.constant 0 : index
    %c37_360 = arith.constant 37 : index
    %310 = vector.load %arg6[%c0_359, %c37_360] : memref<4x326xf32, #tpu.memory_space<vmem>>, vector<4x288xf32>
    %311 = arith.truncf %310 : vector<4x288xf32> to vector<4x288xbf16>
    %c28_361 = arith.constant 28 : index
    %c288_362 = arith.constant 288 : index
    %312 = vector.load %arg7[%c28_361, %c288_362] : memref<36x576xbf16, #tpu.memory_space<vmem>>, vector<4x288xbf16>
    tpu.vector_store %arg7[%c28_361, %c288_362], %311 {strides = array<i32>} : memref<36x576xbf16, #tpu.memory_space<vmem>>, vector<4x288xbf16>,
    %c0_363 = arith.constant 0 : index
    %c38_364 = arith.constant 38 : index
    %313 = vector.load %arg6[%c0_363, %c38_364] : memref<4x326xf32, #tpu.memory_space<vmem>>, vector<4x288xf32>
    %314 = arith.truncf %313 : vector<4x288xf32> to vector<4x288xbf16>
    %c32_365 = arith.constant 32 : index
    %c288_366 = arith.constant 288 : index
    %315 = vector.load %arg7[%c32_365, %c288_366] : memref<36x576xbf16, #tpu.memory_space<vmem>>, vector<4x288xbf16>
    tpu.vector_store %arg7[%c32_365, %c288_366], %314 {strides = array<i32>} : memref<36x576xbf16, #tpu.memory_space<vmem>>, vector<4x288xbf16>,
    %c3 = arith.constant 3 : index
    %c0_367 = arith.constant 0 : index
    %c0_368 = arith.constant 0 : index
    %316 = vector.load %arg2[%c3, %c0_367, %c0_368] : memref<8x4x36xbf16, #tpu.memory_space<vmem>>, vector<1x4x36xbf16>
    %317 = vector.shape_cast %316 : vector<1x4x36xbf16> to vector<4x36xbf16>
    %c0_369 = arith.constant 0 : index
    %c0_370 = arith.constant 0 : index
    %318 = vector.load %arg7[%c0_369, %c0_370] : memref<36x576xbf16, #tpu.memory_space<vmem>>, vector<36x576xbf16>
    %cst_371 = arith.constant dense<0.000000e+00> : vector<4x576xf32>
    %319 = tpu.matmul %317, %318, %cst_371 {dimension_numbers = #tpu.dot_dimension_numbers<[1], [0], [0], [1], [0, 0, 1, 1], [], []>} : vector<4x36xbf16>, vector<36x576xbf16>, vector<4x576xf32> -> vector<4x576xf32>
    %c3_372 = arith.constant 3 : index
    %c0_373 = arith.constant 0 : index
    %c0_374 = arith.constant 0 : index
    %320 = vector.load %arg3[%c3_372, %c0_373, %c0_374] : memref<8x4x1xf32, #tpu.memory_space<vmem>>, vector<1x4x1xf32>
    %321 = vector.shape_cast %320 : vector<1x4x1xf32> to vector<4x1xf32>
    %322 = vector.broadcast %321 : vector<4x1xf32> to vector<4x576xf32>
    %323 = arith.mulf %319, %322 : vector<4x576xf32>
    %c3_375 = arith.constant 3 : index
    %c0_376 = arith.constant 0 : index
    %c0_377 = arith.constant 0 : index
    %324 = vector.load %arg4[%c3_375, %c0_376, %c0_377] : memref<8x4x1xf32, #tpu.memory_space<vmem>>, vector<1x4x1xf32>
    %325 = vector.shape_cast %324 : vector<1x4x1xf32> to vector<4x1xf32>
    %326 = vector.broadcast %325 : vector<4x1xf32> to vector<4x576xf32>
    %327 = arith.addf %323, %326 : vector<4x576xf32>
    %c0_378 = arith.constant 0 : index
    %c0_379 = arith.constant 0 : index
    %328 = vector.load %arg8[%c0_378, %c0_379] : memref<4x576xf32, #tpu.memory_space<vmem>>, vector<4x576xf32>
    %329 = arith.addf %327, %328 : vector<4x576xf32>
    %cst_380 = arith.constant 0.000000e+00 : f32
    %330 = vector.broadcast %cst_380 : f32 to vector<4x576xf32>
    %331 = arith.maximumf %329, %330 : vector<4x576xf32>
    %332 = vector.broadcast %24 : vector<1x576xf32> to vector<4x576xf32>
    %333 = arith.mulf %331, %332 : vector<4x576xf32>
    %c0_381 = arith.constant 0 : index
    %c0_382 = arith.constant 0 : index
    %334 = vector.load %arg8[%c0_381, %c0_382] : memref<4x576xf32, #tpu.memory_space<vmem>>, vector<4x576xf32>
    tpu.vector_store %arg8[%c0_381, %c0_382], %333 {strides = array<i32>} : memref<4x576xf32, #tpu.memory_space<vmem>>, vector<4x576xf32>,
    %c0_383 = arith.constant 0 : index
    %c0_384 = arith.constant 0 : index
    %335 = vector.load %arg8[%c0_383, %c0_384] : memref<4x576xf32, #tpu.memory_space<vmem>>, vector<4x288xf32>
    %c0_385 = arith.constant 0 : index
    %c19_386 = arith.constant 19 : index
    %336 = vector.load %arg6[%c0_385, %c19_386] : memref<4x326xf32, #tpu.memory_space<vmem>>, vector<4x288xf32>
    tpu.vector_store %arg6[%c0_385, %c19_386], %335 {strides = array<i32>} : memref<4x326xf32, #tpu.memory_space<vmem>>, vector<4x288xf32>,
    %c0_387 = arith.constant 0 : index
    %c0_388 = arith.constant 0 : index
    %337 = vector.load %arg6[%c0_387, %c0_388] : memref<4x326xf32, #tpu.memory_space<vmem>>, vector<4x288xf32>
    %338 = arith.truncf %337 : vector<4x288xf32> to vector<4x288xbf16>
    %c0_389 = arith.constant 0 : index
    %c0_390 = arith.constant 0 : index
    %339 = vector.load %arg7[%c0_389, %c0_390] : memref<36x576xbf16, #tpu.memory_space<vmem>>, vector<4x288xbf16>
    tpu.vector_store %arg7[%c0_389, %c0_390], %338 {strides = array<i32>} : memref<36x576xbf16, #tpu.memory_space<vmem>>, vector<4x288xbf16>,
    %c0_391 = arith.constant 0 : index
    %c1_392 = arith.constant 1 : index
    %340 = vector.load %arg6[%c0_391, %c1_392] : memref<4x326xf32, #tpu.memory_space<vmem>>, vector<4x288xf32>
    %341 = arith.truncf %340 : vector<4x288xf32> to vector<4x288xbf16>
    %c4_393 = arith.constant 4 : index
    %c0_394 = arith.constant 0 : index
    %342 = vector.load %arg7[%c4_393, %c0_394] : memref<36x576xbf16, #tpu.memory_space<vmem>>, vector<4x288xbf16>
    tpu.vector_store %arg7[%c4_393, %c0_394], %341 {strides = array<i32>} : memref<36x576xbf16, #tpu.memory_space<vmem>>, vector<4x288xbf16>,
    %c0_395 = arith.constant 0 : index
    %c2_396 = arith.constant 2 : index
    %343 = vector.load %arg6[%c0_395, %c2_396] : memref<4x326xf32, #tpu.memory_space<vmem>>, vector<4x288xf32>
    %344 = arith.truncf %343 : vector<4x288xf32> to vector<4x288xbf16>
    %c8_397 = arith.constant 8 : index
    %c0_398 = arith.constant 0 : index
    %345 = vector.load %arg7[%c8_397, %c0_398] : memref<36x576xbf16, #tpu.memory_space<vmem>>, vector<4x288xbf16>
    tpu.vector_store %arg7[%c8_397, %c0_398], %344 {strides = array<i32>} : memref<36x576xbf16, #tpu.memory_space<vmem>>, vector<4x288xbf16>,
    %c0_399 = arith.constant 0 : index
    %c18_400 = arith.constant 18 : index
    %346 = vector.load %arg6[%c0_399, %c18_400] : memref<4x326xf32, #tpu.memory_space<vmem>>, vector<4x288xf32>
    %347 = arith.truncf %346 : vector<4x288xf32> to vector<4x288xbf16>
    %c12_401 = arith.constant 12 : index
    %c0_402 = arith.constant 0 : index
    %348 = vector.load %arg7[%c12_401, %c0_402] : memref<36x576xbf16, #tpu.memory_space<vmem>>, vector<4x288xbf16>
    tpu.vector_store %arg7[%c12_401, %c0_402], %347 {strides = array<i32>} : memref<36x576xbf16, #tpu.memory_space<vmem>>, vector<4x288xbf16>,
    %c0_403 = arith.constant 0 : index
    %c19_404 = arith.constant 19 : index
    %349 = vector.load %arg6[%c0_403, %c19_404] : memref<4x326xf32, #tpu.memory_space<vmem>>, vector<4x288xf32>
    %350 = arith.truncf %349 : vector<4x288xf32> to vector<4x288xbf16>
    %c16_405 = arith.constant 16 : index
    %c0_406 = arith.constant 0 : index
    %351 = vector.load %arg7[%c16_405, %c0_406] : memref<36x576xbf16, #tpu.memory_space<vmem>>, vector<4x288xbf16>
    tpu.vector_store %arg7[%c16_405, %c0_406], %350 {strides = array<i32>} : memref<36x576xbf16, #tpu.memory_space<vmem>>, vector<4x288xbf16>,
    %c0_407 = arith.constant 0 : index
    %c20_408 = arith.constant 20 : index
    %352 = vector.load %arg6[%c0_407, %c20_408] : memref<4x326xf32, #tpu.memory_space<vmem>>, vector<4x288xf32>
    %353 = arith.truncf %352 : vector<4x288xf32> to vector<4x288xbf16>
    %c20_409 = arith.constant 20 : index
    %c0_410 = arith.constant 0 : index
    %354 = vector.load %arg7[%c20_409, %c0_410] : memref<36x576xbf16, #tpu.memory_space<vmem>>, vector<4x288xbf16>
    tpu.vector_store %arg7[%c20_409, %c0_410], %353 {strides = array<i32>} : memref<36x576xbf16, #tpu.memory_space<vmem>>, vector<4x288xbf16>,
    %c0_411 = arith.constant 0 : index
    %c36_412 = arith.constant 36 : index
    %355 = vector.load %arg6[%c0_411, %c36_412] : memref<4x326xf32, #tpu.memory_space<vmem>>, vector<4x288xf32>
    %356 = arith.truncf %355 : vector<4x288xf32> to vector<4x288xbf16>
    %c24_413 = arith.constant 24 : index
    %c0_414 = arith.constant 0 : index
    %357 = vector.load %arg7[%c24_413, %c0_414] : memref<36x576xbf16, #tpu.memory_space<vmem>>, vector<4x288xbf16>
    tpu.vector_store %arg7[%c24_413, %c0_414], %356 {strides = array<i32>} : memref<36x576xbf16, #tpu.memory_space<vmem>>, vector<4x288xbf16>,
    %c0_415 = arith.constant 0 : index
    %c37_416 = arith.constant 37 : index
    %358 = vector.load %arg6[%c0_415, %c37_416] : memref<4x326xf32, #tpu.memory_space<vmem>>, vector<4x288xf32>
    %359 = arith.truncf %358 : vector<4x288xf32> to vector<4x288xbf16>
    %c28_417 = arith.constant 28 : index
    %c0_418 = arith.constant 0 : index
    %360 = vector.load %arg7[%c28_417, %c0_418] : memref<36x576xbf16, #tpu.memory_space<vmem>>, vector<4x288xbf16>
    tpu.vector_store %arg7[%c28_417, %c0_418], %359 {strides = array<i32>} : memref<36x576xbf16, #tpu.memory_space<vmem>>, vector<4x288xbf16>,
    %c0_419 = arith.constant 0 : index
    %c38_420 = arith.constant 38 : index
    %361 = vector.load %arg6[%c0_419, %c38_420] : memref<4x326xf32, #tpu.memory_space<vmem>>, vector<4x288xf32>
    %362 = arith.truncf %361 : vector<4x288xf32> to vector<4x288xbf16>
    %c32_421 = arith.constant 32 : index
    %c0_422 = arith.constant 0 : index
    %363 = vector.load %arg7[%c32_421, %c0_422] : memref<36x576xbf16, #tpu.memory_space<vmem>>, vector<4x288xbf16>
    tpu.vector_store %arg7[%c32_421, %c0_422], %362 {strides = array<i32>} : memref<36x576xbf16, #tpu.memory_space<vmem>>, vector<4x288xbf16>,
    %c0_423 = arith.constant 0 : index
    %c288_424 = arith.constant 288 : index
    %364 = vector.load %arg8[%c0_423, %c288_424] : memref<4x576xf32, #tpu.memory_space<vmem>>, vector<4x288xf32>
    %c0_425 = arith.constant 0 : index
    %c19_426 = arith.constant 19 : index
    %365 = vector.load %arg6[%c0_425, %c19_426] : memref<4x326xf32, #tpu.memory_space<vmem>>, vector<4x288xf32>
    tpu.vector_store %arg6[%c0_425, %c19_426], %364 {strides = array<i32>} : memref<4x326xf32, #tpu.memory_space<vmem>>, vector<4x288xf32>,
    %c0_427 = arith.constant 0 : index
    %c0_428 = arith.constant 0 : index
    %366 = vector.load %arg6[%c0_427, %c0_428] : memref<4x326xf32, #tpu.memory_space<vmem>>, vector<4x288xf32>
    %367 = arith.truncf %366 : vector<4x288xf32> to vector<4x288xbf16>
    %c0_429 = arith.constant 0 : index
    %c288_430 = arith.constant 288 : index
    %368 = vector.load %arg7[%c0_429, %c288_430] : memref<36x576xbf16, #tpu.memory_space<vmem>>, vector<4x288xbf16>
    tpu.vector_store %arg7[%c0_429, %c288_430], %367 {strides = array<i32>} : memref<36x576xbf16, #tpu.memory_space<vmem>>, vector<4x288xbf16>,
    %c0_431 = arith.constant 0 : index
    %c1_432 = arith.constant 1 : index
    %369 = vector.load %arg6[%c0_431, %c1_432] : memref<4x326xf32, #tpu.memory_space<vmem>>, vector<4x288xf32>
    %370 = arith.truncf %369 : vector<4x288xf32> to vector<4x288xbf16>
    %c4_433 = arith.constant 4 : index
    %c288_434 = arith.constant 288 : index
    %371 = vector.load %arg7[%c4_433, %c288_434] : memref<36x576xbf16, #tpu.memory_space<vmem>>, vector<4x288xbf16>
    tpu.vector_store %arg7[%c4_433, %c288_434], %370 {strides = array<i32>} : memref<36x576xbf16, #tpu.memory_space<vmem>>, vector<4x288xbf16>,
    %c0_435 = arith.constant 0 : index
    %c2_436 = arith.constant 2 : index
    %372 = vector.load %arg6[%c0_435, %c2_436] : memref<4x326xf32, #tpu.memory_space<vmem>>, vector<4x288xf32>
    %373 = arith.truncf %372 : vector<4x288xf32> to vector<4x288xbf16>
    %c8_437 = arith.constant 8 : index
    %c288_438 = arith.constant 288 : index
    %374 = vector.load %arg7[%c8_437, %c288_438] : memref<36x576xbf16, #tpu.memory_space<vmem>>, vector<4x288xbf16>
    tpu.vector_store %arg7[%c8_437, %c288_438], %373 {strides = array<i32>} : memref<36x576xbf16, #tpu.memory_space<vmem>>, vector<4x288xbf16>,
    %c0_439 = arith.constant 0 : index
    %c18_440 = arith.constant 18 : index
    %375 = vector.load %arg6[%c0_439, %c18_440] : memref<4x326xf32, #tpu.memory_space<vmem>>, vector<4x288xf32>
    %376 = arith.truncf %375 : vector<4x288xf32> to vector<4x288xbf16>
    %c12_441 = arith.constant 12 : index
    %c288_442 = arith.constant 288 : index
    %377 = vector.load %arg7[%c12_441, %c288_442] : memref<36x576xbf16, #tpu.memory_space<vmem>>, vector<4x288xbf16>
    tpu.vector_store %arg7[%c12_441, %c288_442], %376 {strides = array<i32>} : memref<36x576xbf16, #tpu.memory_space<vmem>>, vector<4x288xbf16>,
    %c0_443 = arith.constant 0 : index
    %c19_444 = arith.constant 19 : index
    %378 = vector.load %arg6[%c0_443, %c19_444] : memref<4x326xf32, #tpu.memory_space<vmem>>, vector<4x288xf32>
    %379 = arith.truncf %378 : vector<4x288xf32> to vector<4x288xbf16>
    %c16_445 = arith.constant 16 : index
    %c288_446 = arith.constant 288 : index
    %380 = vector.load %arg7[%c16_445, %c288_446] : memref<36x576xbf16, #tpu.memory_space<vmem>>, vector<4x288xbf16>
    tpu.vector_store %arg7[%c16_445, %c288_446], %379 {strides = array<i32>} : memref<36x576xbf16, #tpu.memory_space<vmem>>, vector<4x288xbf16>,
    %c0_447 = arith.constant 0 : index
    %c20_448 = arith.constant 20 : index
    %381 = vector.load %arg6[%c0_447, %c20_448] : memref<4x326xf32, #tpu.memory_space<vmem>>, vector<4x288xf32>
    %382 = arith.truncf %381 : vector<4x288xf32> to vector<4x288xbf16>
    %c20_449 = arith.constant 20 : index
    %c288_450 = arith.constant 288 : index
    %383 = vector.load %arg7[%c20_449, %c288_450] : memref<36x576xbf16, #tpu.memory_space<vmem>>, vector<4x288xbf16>
    tpu.vector_store %arg7[%c20_449, %c288_450], %382 {strides = array<i32>} : memref<36x576xbf16, #tpu.memory_space<vmem>>, vector<4x288xbf16>,
    %c0_451 = arith.constant 0 : index
    %c36_452 = arith.constant 36 : index
    %384 = vector.load %arg6[%c0_451, %c36_452] : memref<4x326xf32, #tpu.memory_space<vmem>>, vector<4x288xf32>
    %385 = arith.truncf %384 : vector<4x288xf32> to vector<4x288xbf16>
    %c24_453 = arith.constant 24 : index
    %c288_454 = arith.constant 288 : index
    %386 = vector.load %arg7[%c24_453, %c288_454] : memref<36x576xbf16, #tpu.memory_space<vmem>>, vector<4x288xbf16>
    tpu.vector_store %arg7[%c24_453, %c288_454], %385 {strides = array<i32>} : memref<36x576xbf16, #tpu.memory_space<vmem>>, vector<4x288xbf16>,
    %c0_455 = arith.constant 0 : index
    %c37_456 = arith.constant 37 : index
    %387 = vector.load %arg6[%c0_455, %c37_456] : memref<4x326xf32, #tpu.memory_space<vmem>>, vector<4x288xf32>
    %388 = arith.truncf %387 : vector<4x288xf32> to vector<4x288xbf16>
    %c28_457 = arith.constant 28 : index
    %c288_458 = arith.constant 288 : index
    %389 = vector.load %arg7[%c28_457, %c288_458] : memref<36x576xbf16, #tpu.memory_space<vmem>>, vector<4x288xbf16>
    tpu.vector_store %arg7[%c28_457, %c288_458], %388 {strides = array<i32>} : memref<36x576xbf16, #tpu.memory_space<vmem>>, vector<4x288xbf16>,
    %c0_459 = arith.constant 0 : index
    %c38_460 = arith.constant 38 : index
    %390 = vector.load %arg6[%c0_459, %c38_460] : memref<4x326xf32, #tpu.memory_space<vmem>>, vector<4x288xf32>
    %391 = arith.truncf %390 : vector<4x288xf32> to vector<4x288xbf16>
    %c32_461 = arith.constant 32 : index
    %c288_462 = arith.constant 288 : index
    %392 = vector.load %arg7[%c32_461, %c288_462] : memref<36x576xbf16, #tpu.memory_space<vmem>>, vector<4x288xbf16>
    tpu.vector_store %arg7[%c32_461, %c288_462], %391 {strides = array<i32>} : memref<36x576xbf16, #tpu.memory_space<vmem>>, vector<4x288xbf16>,
    %c4_463 = arith.constant 4 : index
    %c0_464 = arith.constant 0 : index
    %c0_465 = arith.constant 0 : index
    %393 = vector.load %arg2[%c4_463, %c0_464, %c0_465] : memref<8x4x36xbf16, #tpu.memory_space<vmem>>, vector<1x4x36xbf16>
    %394 = vector.shape_cast %393 : vector<1x4x36xbf16> to vector<4x36xbf16>
    %c0_466 = arith.constant 0 : index
    %c0_467 = arith.constant 0 : index
    %395 = vector.load %arg7[%c0_466, %c0_467] : memref<36x576xbf16, #tpu.memory_space<vmem>>, vector<36x576xbf16>
    %cst_468 = arith.constant dense<0.000000e+00> : vector<4x576xf32>
    %396 = tpu.matmul %394, %395, %cst_468 {dimension_numbers = #tpu.dot_dimension_numbers<[1], [0], [0], [1], [0, 0, 1, 1], [], []>} : vector<4x36xbf16>, vector<36x576xbf16>, vector<4x576xf32> -> vector<4x576xf32>
    %c4_469 = arith.constant 4 : index
    %c0_470 = arith.constant 0 : index
    %c0_471 = arith.constant 0 : index
    %397 = vector.load %arg3[%c4_469, %c0_470, %c0_471] : memref<8x4x1xf32, #tpu.memory_space<vmem>>, vector<1x4x1xf32>
    %398 = vector.shape_cast %397 : vector<1x4x1xf32> to vector<4x1xf32>
    %399 = vector.broadcast %398 : vector<4x1xf32> to vector<4x576xf32>
    %400 = arith.mulf %396, %399 : vector<4x576xf32>
    %c4_472 = arith.constant 4 : index
    %c0_473 = arith.constant 0 : index
    %c0_474 = arith.constant 0 : index
    %401 = vector.load %arg4[%c4_472, %c0_473, %c0_474] : memref<8x4x1xf32, #tpu.memory_space<vmem>>, vector<1x4x1xf32>
    %402 = vector.shape_cast %401 : vector<1x4x1xf32> to vector<4x1xf32>
    %403 = vector.broadcast %402 : vector<4x1xf32> to vector<4x576xf32>
    %404 = arith.addf %400, %403 : vector<4x576xf32>
    %cst_475 = arith.constant 0.000000e+00 : f32
    %405 = vector.broadcast %cst_475 : f32 to vector<4x576xf32>
    %406 = arith.maximumf %404, %405 : vector<4x576xf32>
    %407 = vector.broadcast %24 : vector<1x576xf32> to vector<4x576xf32>
    %408 = arith.mulf %406, %407 : vector<4x576xf32>
    %c0_476 = arith.constant 0 : index
    %c0_477 = arith.constant 0 : index
    %409 = vector.load %arg9[%c0_476, %c0_477] : memref<4x576xf32, #tpu.memory_space<vmem>>, vector<4x576xf32>
    tpu.vector_store %arg9[%c0_476, %c0_477], %408 {strides = array<i32>} : memref<4x576xf32, #tpu.memory_space<vmem>>, vector<4x576xf32>,
    %c0_478 = arith.constant 0 : index
    %c0_479 = arith.constant 0 : index
    %410 = vector.load %arg9[%c0_478, %c0_479] : memref<4x576xf32, #tpu.memory_space<vmem>>, vector<4x288xf32>
    %c0_480 = arith.constant 0 : index
    %c19_481 = arith.constant 19 : index
    %411 = vector.load %arg6[%c0_480, %c19_481] : memref<4x326xf32, #tpu.memory_space<vmem>>, vector<4x288xf32>
    tpu.vector_store %arg6[%c0_480, %c19_481], %410 {strides = array<i32>} : memref<4x326xf32, #tpu.memory_space<vmem>>, vector<4x288xf32>,
    %c0_482 = arith.constant 0 : index
    %c0_483 = arith.constant 0 : index
    %412 = vector.load %arg6[%c0_482, %c0_483] : memref<4x326xf32, #tpu.memory_space<vmem>>, vector<4x288xf32>
    %413 = arith.truncf %412 : vector<4x288xf32> to vector<4x288xbf16>
    %c0_484 = arith.constant 0 : index
    %c0_485 = arith.constant 0 : index
    %414 = vector.load %arg7[%c0_484, %c0_485] : memref<36x576xbf16, #tpu.memory_space<vmem>>, vector<4x288xbf16>
    tpu.vector_store %arg7[%c0_484, %c0_485], %413 {strides = array<i32>} : memref<36x576xbf16, #tpu.memory_space<vmem>>, vector<4x288xbf16>,
    %c0_486 = arith.constant 0 : index
    %c1_487 = arith.constant 1 : index
    %415 = vector.load %arg6[%c0_486, %c1_487] : memref<4x326xf32, #tpu.memory_space<vmem>>, vector<4x288xf32>
    %416 = arith.truncf %415 : vector<4x288xf32> to vector<4x288xbf16>
    %c4_488 = arith.constant 4 : index
    %c0_489 = arith.constant 0 : index
    %417 = vector.load %arg7[%c4_488, %c0_489] : memref<36x576xbf16, #tpu.memory_space<vmem>>, vector<4x288xbf16>
    tpu.vector_store %arg7[%c4_488, %c0_489], %416 {strides = array<i32>} : memref<36x576xbf16, #tpu.memory_space<vmem>>, vector<4x288xbf16>,
    %c0_490 = arith.constant 0 : index
    %c2_491 = arith.constant 2 : index
    %418 = vector.load %arg6[%c0_490, %c2_491] : memref<4x326xf32, #tpu.memory_space<vmem>>, vector<4x288xf32>
    %419 = arith.truncf %418 : vector<4x288xf32> to vector<4x288xbf16>
    %c8_492 = arith.constant 8 : index
    %c0_493 = arith.constant 0 : index
    %420 = vector.load %arg7[%c8_492, %c0_493] : memref<36x576xbf16, #tpu.memory_space<vmem>>, vector<4x288xbf16>
    tpu.vector_store %arg7[%c8_492, %c0_493], %419 {strides = array<i32>} : memref<36x576xbf16, #tpu.memory_space<vmem>>, vector<4x288xbf16>,
    %c0_494 = arith.constant 0 : index
    %c18_495 = arith.constant 18 : index
    %421 = vector.load %arg6[%c0_494, %c18_495] : memref<4x326xf32, #tpu.memory_space<vmem>>, vector<4x288xf32>
    %422 = arith.truncf %421 : vector<4x288xf32> to vector<4x288xbf16>
    %c12_496 = arith.constant 12 : index
    %c0_497 = arith.constant 0 : index
    %423 = vector.load %arg7[%c12_496, %c0_497] : memref<36x576xbf16, #tpu.memory_space<vmem>>, vector<4x288xbf16>
    tpu.vector_store %arg7[%c12_496, %c0_497], %422 {strides = array<i32>} : memref<36x576xbf16, #tpu.memory_space<vmem>>, vector<4x288xbf16>,
    %c0_498 = arith.constant 0 : index
    %c19_499 = arith.constant 19 : index
    %424 = vector.load %arg6[%c0_498, %c19_499] : memref<4x326xf32, #tpu.memory_space<vmem>>, vector<4x288xf32>
    %425 = arith.truncf %424 : vector<4x288xf32> to vector<4x288xbf16>
    %c16_500 = arith.constant 16 : index
    %c0_501 = arith.constant 0 : index
    %426 = vector.load %arg7[%c16_500, %c0_501] : memref<36x576xbf16, #tpu.memory_space<vmem>>, vector<4x288xbf16>
    tpu.vector_store %arg7[%c16_500, %c0_501], %425 {strides = array<i32>} : memref<36x576xbf16, #tpu.memory_space<vmem>>, vector<4x288xbf16>,
    %c0_502 = arith.constant 0 : index
    %c20_503 = arith.constant 20 : index
    %427 = vector.load %arg6[%c0_502, %c20_503] : memref<4x326xf32, #tpu.memory_space<vmem>>, vector<4x288xf32>
    %428 = arith.truncf %427 : vector<4x288xf32> to vector<4x288xbf16>
    %c20_504 = arith.constant 20 : index
    %c0_505 = arith.constant 0 : index
    %429 = vector.load %arg7[%c20_504, %c0_505] : memref<36x576xbf16, #tpu.memory_space<vmem>>, vector<4x288xbf16>
    tpu.vector_store %arg7[%c20_504, %c0_505], %428 {strides = array<i32>} : memref<36x576xbf16, #tpu.memory_space<vmem>>, vector<4x288xbf16>,
    %c0_506 = arith.constant 0 : index
    %c36_507 = arith.constant 36 : index
    %430 = vector.load %arg6[%c0_506, %c36_507] : memref<4x326xf32, #tpu.memory_space<vmem>>, vector<4x288xf32>
    %431 = arith.truncf %430 : vector<4x288xf32> to vector<4x288xbf16>
    %c24_508 = arith.constant 24 : index
    %c0_509 = arith.constant 0 : index
    %432 = vector.load %arg7[%c24_508, %c0_509] : memref<36x576xbf16, #tpu.memory_space<vmem>>, vector<4x288xbf16>
    tpu.vector_store %arg7[%c24_508, %c0_509], %431 {strides = array<i32>} : memref<36x576xbf16, #tpu.memory_space<vmem>>, vector<4x288xbf16>,
    %c0_510 = arith.constant 0 : index
    %c37_511 = arith.constant 37 : index
    %433 = vector.load %arg6[%c0_510, %c37_511] : memref<4x326xf32, #tpu.memory_space<vmem>>, vector<4x288xf32>
    %434 = arith.truncf %433 : vector<4x288xf32> to vector<4x288xbf16>
    %c28_512 = arith.constant 28 : index
    %c0_513 = arith.constant 0 : index
    %435 = vector.load %arg7[%c28_512, %c0_513] : memref<36x576xbf16, #tpu.memory_space<vmem>>, vector<4x288xbf16>
    tpu.vector_store %arg7[%c28_512, %c0_513], %434 {strides = array<i32>} : memref<36x576xbf16, #tpu.memory_space<vmem>>, vector<4x288xbf16>,
    %c0_514 = arith.constant 0 : index
    %c38_515 = arith.constant 38 : index
    %436 = vector.load %arg6[%c0_514, %c38_515] : memref<4x326xf32, #tpu.memory_space<vmem>>, vector<4x288xf32>
    %437 = arith.truncf %436 : vector<4x288xf32> to vector<4x288xbf16>
    %c32_516 = arith.constant 32 : index
    %c0_517 = arith.constant 0 : index
    %438 = vector.load %arg7[%c32_516, %c0_517] : memref<36x576xbf16, #tpu.memory_space<vmem>>, vector<4x288xbf16>
    tpu.vector_store %arg7[%c32_516, %c0_517], %437 {strides = array<i32>} : memref<36x576xbf16, #tpu.memory_space<vmem>>, vector<4x288xbf16>,
    %c0_518 = arith.constant 0 : index
    %c288_519 = arith.constant 288 : index
    %439 = vector.load %arg9[%c0_518, %c288_519] : memref<4x576xf32, #tpu.memory_space<vmem>>, vector<4x288xf32>
    %c0_520 = arith.constant 0 : index
    %c19_521 = arith.constant 19 : index
    %440 = vector.load %arg6[%c0_520, %c19_521] : memref<4x326xf32, #tpu.memory_space<vmem>>, vector<4x288xf32>
    tpu.vector_store %arg6[%c0_520, %c19_521], %439 {strides = array<i32>} : memref<4x326xf32, #tpu.memory_space<vmem>>, vector<4x288xf32>,
    %c0_522 = arith.constant 0 : index
    %c0_523 = arith.constant 0 : index
    %441 = vector.load %arg6[%c0_522, %c0_523] : memref<4x326xf32, #tpu.memory_space<vmem>>, vector<4x288xf32>
    %442 = arith.truncf %441 : vector<4x288xf32> to vector<4x288xbf16>
    %c0_524 = arith.constant 0 : index
    %c288_525 = arith.constant 288 : index
    %443 = vector.load %arg7[%c0_524, %c288_525] : memref<36x576xbf16, #tpu.memory_space<vmem>>, vector<4x288xbf16>
    tpu.vector_store %arg7[%c0_524, %c288_525], %442 {strides = array<i32>} : memref<36x576xbf16, #tpu.memory_space<vmem>>, vector<4x288xbf16>,
    %c0_526 = arith.constant 0 : index
    %c1_527 = arith.constant 1 : index
    %444 = vector.load %arg6[%c0_526, %c1_527] : memref<4x326xf32, #tpu.memory_space<vmem>>, vector<4x288xf32>
    %445 = arith.truncf %444 : vector<4x288xf32> to vector<4x288xbf16>
    %c4_528 = arith.constant 4 : index
    %c288_529 = arith.constant 288 : index
    %446 = vector.load %arg7[%c4_528, %c288_529] : memref<36x576xbf16, #tpu.memory_space<vmem>>, vector<4x288xbf16>
    tpu.vector_store %arg7[%c4_528, %c288_529], %445 {strides = array<i32>} : memref<36x576xbf16, #tpu.memory_space<vmem>>, vector<4x288xbf16>,
    %c0_530 = arith.constant 0 : index
    %c2_531 = arith.constant 2 : index
    %447 = vector.load %arg6[%c0_530, %c2_531] : memref<4x326xf32, #tpu.memory_space<vmem>>, vector<4x288xf32>
    %448 = arith.truncf %447 : vector<4x288xf32> to vector<4x288xbf16>
    %c8_532 = arith.constant 8 : index
    %c288_533 = arith.constant 288 : index
    %449 = vector.load %arg7[%c8_532, %c288_533] : memref<36x576xbf16, #tpu.memory_space<vmem>>, vector<4x288xbf16>
    tpu.vector_store %arg7[%c8_532, %c288_533], %448 {strides = array<i32>} : memref<36x576xbf16, #tpu.memory_space<vmem>>, vector<4x288xbf16>,
    %c0_534 = arith.constant 0 : index
    %c18_535 = arith.constant 18 : index
    %450 = vector.load %arg6[%c0_534, %c18_535] : memref<4x326xf32, #tpu.memory_space<vmem>>, vector<4x288xf32>
    %451 = arith.truncf %450 : vector<4x288xf32> to vector<4x288xbf16>
    %c12_536 = arith.constant 12 : index
    %c288_537 = arith.constant 288 : index
    %452 = vector.load %arg7[%c12_536, %c288_537] : memref<36x576xbf16, #tpu.memory_space<vmem>>, vector<4x288xbf16>
    tpu.vector_store %arg7[%c12_536, %c288_537], %451 {strides = array<i32>} : memref<36x576xbf16, #tpu.memory_space<vmem>>, vector<4x288xbf16>,
    %c0_538 = arith.constant 0 : index
    %c19_539 = arith.constant 19 : index
    %453 = vector.load %arg6[%c0_538, %c19_539] : memref<4x326xf32, #tpu.memory_space<vmem>>, vector<4x288xf32>
    %454 = arith.truncf %453 : vector<4x288xf32> to vector<4x288xbf16>
    %c16_540 = arith.constant 16 : index
    %c288_541 = arith.constant 288 : index
    %455 = vector.load %arg7[%c16_540, %c288_541] : memref<36x576xbf16, #tpu.memory_space<vmem>>, vector<4x288xbf16>
    tpu.vector_store %arg7[%c16_540, %c288_541], %454 {strides = array<i32>} : memref<36x576xbf16, #tpu.memory_space<vmem>>, vector<4x288xbf16>,
    %c0_542 = arith.constant 0 : index
    %c20_543 = arith.constant 20 : index
    %456 = vector.load %arg6[%c0_542, %c20_543] : memref<4x326xf32, #tpu.memory_space<vmem>>, vector<4x288xf32>
    %457 = arith.truncf %456 : vector<4x288xf32> to vector<4x288xbf16>
    %c20_544 = arith.constant 20 : index
    %c288_545 = arith.constant 288 : index
    %458 = vector.load %arg7[%c20_544, %c288_545] : memref<36x576xbf16, #tpu.memory_space<vmem>>, vector<4x288xbf16>
    tpu.vector_store %arg7[%c20_544, %c288_545], %457 {strides = array<i32>} : memref<36x576xbf16, #tpu.memory_space<vmem>>, vector<4x288xbf16>,
    %c0_546 = arith.constant 0 : index
    %c36_547 = arith.constant 36 : index
    %459 = vector.load %arg6[%c0_546, %c36_547] : memref<4x326xf32, #tpu.memory_space<vmem>>, vector<4x288xf32>
    %460 = arith.truncf %459 : vector<4x288xf32> to vector<4x288xbf16>
    %c24_548 = arith.constant 24 : index
    %c288_549 = arith.constant 288 : index
    %461 = vector.load %arg7[%c24_548, %c288_549] : memref<36x576xbf16, #tpu.memory_space<vmem>>, vector<4x288xbf16>
    tpu.vector_store %arg7[%c24_548, %c288_549], %460 {strides = array<i32>} : memref<36x576xbf16, #tpu.memory_space<vmem>>, vector<4x288xbf16>,
    %c0_550 = arith.constant 0 : index
    %c37_551 = arith.constant 37 : index
    %462 = vector.load %arg6[%c0_550, %c37_551] : memref<4x326xf32, #tpu.memory_space<vmem>>, vector<4x288xf32>
    %463 = arith.truncf %462 : vector<4x288xf32> to vector<4x288xbf16>
    %c28_552 = arith.constant 28 : index
    %c288_553 = arith.constant 288 : index
    %464 = vector.load %arg7[%c28_552, %c288_553] : memref<36x576xbf16, #tpu.memory_space<vmem>>, vector<4x288xbf16>
    tpu.vector_store %arg7[%c28_552, %c288_553], %463 {strides = array<i32>} : memref<36x576xbf16, #tpu.memory_space<vmem>>, vector<4x288xbf16>,
    %c0_554 = arith.constant 0 : index
    %c38_555 = arith.constant 38 : index
    %465 = vector.load %arg6[%c0_554, %c38_555] : memref<4x326xf32, #tpu.memory_space<vmem>>, vector<4x288xf32>
    %466 = arith.truncf %465 : vector<4x288xf32> to vector<4x288xbf16>
    %c32_556 = arith.constant 32 : index
    %c288_557 = arith.constant 288 : index
    %467 = vector.load %arg7[%c32_556, %c288_557] : memref<36x576xbf16, #tpu.memory_space<vmem>>, vector<4x288xbf16>
    tpu.vector_store %arg7[%c32_556, %c288_557], %466 {strides = array<i32>} : memref<36x576xbf16, #tpu.memory_space<vmem>>, vector<4x288xbf16>,
    %c5 = arith.constant 5 : index
    %c0_558 = arith.constant 0 : index
    %c0_559 = arith.constant 0 : index
    %468 = vector.load %arg2[%c5, %c0_558, %c0_559] : memref<8x4x36xbf16, #tpu.memory_space<vmem>>, vector<1x4x36xbf16>
    %469 = vector.shape_cast %468 : vector<1x4x36xbf16> to vector<4x36xbf16>
    %c0_560 = arith.constant 0 : index
    %c0_561 = arith.constant 0 : index
    %470 = vector.load %arg7[%c0_560, %c0_561] : memref<36x576xbf16, #tpu.memory_space<vmem>>, vector<36x576xbf16>
    %cst_562 = arith.constant dense<0.000000e+00> : vector<4x576xf32>
    %471 = tpu.matmul %469, %470, %cst_562 {dimension_numbers = #tpu.dot_dimension_numbers<[1], [0], [0], [1], [0, 0, 1, 1], [], []>} : vector<4x36xbf16>, vector<36x576xbf16>, vector<4x576xf32> -> vector<4x576xf32>
    %c5_563 = arith.constant 5 : index
    %c0_564 = arith.constant 0 : index
    %c0_565 = arith.constant 0 : index
    %472 = vector.load %arg3[%c5_563, %c0_564, %c0_565] : memref<8x4x1xf32, #tpu.memory_space<vmem>>, vector<1x4x1xf32>
    %473 = vector.shape_cast %472 : vector<1x4x1xf32> to vector<4x1xf32>
    %474 = vector.broadcast %473 : vector<4x1xf32> to vector<4x576xf32>
    %475 = arith.mulf %471, %474 : vector<4x576xf32>
    %c5_566 = arith.constant 5 : index
    %c0_567 = arith.constant 0 : index
    %c0_568 = arith.constant 0 : index
    %476 = vector.load %arg4[%c5_566, %c0_567, %c0_568] : memref<8x4x1xf32, #tpu.memory_space<vmem>>, vector<1x4x1xf32>
    %477 = vector.shape_cast %476 : vector<1x4x1xf32> to vector<4x1xf32>
    %478 = vector.broadcast %477 : vector<4x1xf32> to vector<4x576xf32>
    %479 = arith.addf %475, %478 : vector<4x576xf32>
    %c0_569 = arith.constant 0 : index
    %c0_570 = arith.constant 0 : index
    %480 = vector.load %arg8[%c0_569, %c0_570] : memref<4x576xf32, #tpu.memory_space<vmem>>, vector<4x576xf32>
    %481 = arith.addf %479, %480 : vector<4x576xf32>
    %cst_571 = arith.constant 0.000000e+00 : f32
    %482 = vector.broadcast %cst_571 : f32 to vector<4x576xf32>
    %483 = arith.maximumf %481, %482 : vector<4x576xf32>
    %484 = vector.broadcast %24 : vector<1x576xf32> to vector<4x576xf32>
    %485 = arith.mulf %483, %484 : vector<4x576xf32>
    %c0_572 = arith.constant 0 : index
    %c0_573 = arith.constant 0 : index
    %486 = vector.load %arg8[%c0_572, %c0_573] : memref<4x576xf32, #tpu.memory_space<vmem>>, vector<4x576xf32>
    tpu.vector_store %arg8[%c0_572, %c0_573], %485 {strides = array<i32>} : memref<4x576xf32, #tpu.memory_space<vmem>>, vector<4x576xf32>,
    %c0_574 = arith.constant 0 : index
    %c0_575 = arith.constant 0 : index
    %487 = vector.load %arg8[%c0_574, %c0_575] : memref<4x576xf32, #tpu.memory_space<vmem>>, vector<4x288xf32>
    %c0_576 = arith.constant 0 : index
    %c19_577 = arith.constant 19 : index
    %488 = vector.load %arg6[%c0_576, %c19_577] : memref<4x326xf32, #tpu.memory_space<vmem>>, vector<4x288xf32>
    tpu.vector_store %arg6[%c0_576, %c19_577], %487 {strides = array<i32>} : memref<4x326xf32, #tpu.memory_space<vmem>>, vector<4x288xf32>,
    %c0_578 = arith.constant 0 : index
    %c0_579 = arith.constant 0 : index
    %489 = vector.load %arg6[%c0_578, %c0_579] : memref<4x326xf32, #tpu.memory_space<vmem>>, vector<4x288xf32>
    %490 = arith.truncf %489 : vector<4x288xf32> to vector<4x288xbf16>
    %c0_580 = arith.constant 0 : index
    %c0_581 = arith.constant 0 : index
    %491 = vector.load %arg7[%c0_580, %c0_581] : memref<36x576xbf16, #tpu.memory_space<vmem>>, vector<4x288xbf16>
    tpu.vector_store %arg7[%c0_580, %c0_581], %490 {strides = array<i32>} : memref<36x576xbf16, #tpu.memory_space<vmem>>, vector<4x288xbf16>,
    %c0_582 = arith.constant 0 : index
    %c1_583 = arith.constant 1 : index
    %492 = vector.load %arg6[%c0_582, %c1_583] : memref<4x326xf32, #tpu.memory_space<vmem>>, vector<4x288xf32>
    %493 = arith.truncf %492 : vector<4x288xf32> to vector<4x288xbf16>
    %c4_584 = arith.constant 4 : index
    %c0_585 = arith.constant 0 : index
    %494 = vector.load %arg7[%c4_584, %c0_585] : memref<36x576xbf16, #tpu.memory_space<vmem>>, vector<4x288xbf16>
    tpu.vector_store %arg7[%c4_584, %c0_585], %493 {strides = array<i32>} : memref<36x576xbf16, #tpu.memory_space<vmem>>, vector<4x288xbf16>,
    %c0_586 = arith.constant 0 : index
    %c2_587 = arith.constant 2 : index
    %495 = vector.load %arg6[%c0_586, %c2_587] : memref<4x326xf32, #tpu.memory_space<vmem>>, vector<4x288xf32>
    %496 = arith.truncf %495 : vector<4x288xf32> to vector<4x288xbf16>
    %c8_588 = arith.constant 8 : index
    %c0_589 = arith.constant 0 : index
    %497 = vector.load %arg7[%c8_588, %c0_589] : memref<36x576xbf16, #tpu.memory_space<vmem>>, vector<4x288xbf16>
    tpu.vector_store %arg7[%c8_588, %c0_589], %496 {strides = array<i32>} : memref<36x576xbf16, #tpu.memory_space<vmem>>, vector<4x288xbf16>,
    %c0_590 = arith.constant 0 : index
    %c18_591 = arith.constant 18 : index
    %498 = vector.load %arg6[%c0_590, %c18_591] : memref<4x326xf32, #tpu.memory_space<vmem>>, vector<4x288xf32>
    %499 = arith.truncf %498 : vector<4x288xf32> to vector<4x288xbf16>
    %c12_592 = arith.constant 12 : index
    %c0_593 = arith.constant 0 : index
    %500 = vector.load %arg7[%c12_592, %c0_593] : memref<36x576xbf16, #tpu.memory_space<vmem>>, vector<4x288xbf16>
    tpu.vector_store %arg7[%c12_592, %c0_593], %499 {strides = array<i32>} : memref<36x576xbf16, #tpu.memory_space<vmem>>, vector<4x288xbf16>,
    %c0_594 = arith.constant 0 : index
    %c19_595 = arith.constant 19 : index
    %501 = vector.load %arg6[%c0_594, %c19_595] : memref<4x326xf32, #tpu.memory_space<vmem>>, vector<4x288xf32>
    %502 = arith.truncf %501 : vector<4x288xf32> to vector<4x288xbf16>
    %c16_596 = arith.constant 16 : index
    %c0_597 = arith.constant 0 : index
    %503 = vector.load %arg7[%c16_596, %c0_597] : memref<36x576xbf16, #tpu.memory_space<vmem>>, vector<4x288xbf16>
    tpu.vector_store %arg7[%c16_596, %c0_597], %502 {strides = array<i32>} : memref<36x576xbf16, #tpu.memory_space<vmem>>, vector<4x288xbf16>,
    %c0_598 = arith.constant 0 : index
    %c20_599 = arith.constant 20 : index
    %504 = vector.load %arg6[%c0_598, %c20_599] : memref<4x326xf32, #tpu.memory_space<vmem>>, vector<4x288xf32>
    %505 = arith.truncf %504 : vector<4x288xf32> to vector<4x288xbf16>
    %c20_600 = arith.constant 20 : index
    %c0_601 = arith.constant 0 : index
    %506 = vector.load %arg7[%c20_600, %c0_601] : memref<36x576xbf16, #tpu.memory_space<vmem>>, vector<4x288xbf16>
    tpu.vector_store %arg7[%c20_600, %c0_601], %505 {strides = array<i32>} : memref<36x576xbf16, #tpu.memory_space<vmem>>, vector<4x288xbf16>,
    %c0_602 = arith.constant 0 : index
    %c36_603 = arith.constant 36 : index
    %507 = vector.load %arg6[%c0_602, %c36_603] : memref<4x326xf32, #tpu.memory_space<vmem>>, vector<4x288xf32>
    %508 = arith.truncf %507 : vector<4x288xf32> to vector<4x288xbf16>
    %c24_604 = arith.constant 24 : index
    %c0_605 = arith.constant 0 : index
    %509 = vector.load %arg7[%c24_604, %c0_605] : memref<36x576xbf16, #tpu.memory_space<vmem>>, vector<4x288xbf16>
    tpu.vector_store %arg7[%c24_604, %c0_605], %508 {strides = array<i32>} : memref<36x576xbf16, #tpu.memory_space<vmem>>, vector<4x288xbf16>,
    %c0_606 = arith.constant 0 : index
    %c37_607 = arith.constant 37 : index
    %510 = vector.load %arg6[%c0_606, %c37_607] : memref<4x326xf32, #tpu.memory_space<vmem>>, vector<4x288xf32>
    %511 = arith.truncf %510 : vector<4x288xf32> to vector<4x288xbf16>
    %c28_608 = arith.constant 28 : index
    %c0_609 = arith.constant 0 : index
    %512 = vector.load %arg7[%c28_608, %c0_609] : memref<36x576xbf16, #tpu.memory_space<vmem>>, vector<4x288xbf16>
    tpu.vector_store %arg7[%c28_608, %c0_609], %511 {strides = array<i32>} : memref<36x576xbf16, #tpu.memory_space<vmem>>, vector<4x288xbf16>,
    %c0_610 = arith.constant 0 : index
    %c38_611 = arith.constant 38 : index
    %513 = vector.load %arg6[%c0_610, %c38_611] : memref<4x326xf32, #tpu.memory_space<vmem>>, vector<4x288xf32>
    %514 = arith.truncf %513 : vector<4x288xf32> to vector<4x288xbf16>
    %c32_612 = arith.constant 32 : index
    %c0_613 = arith.constant 0 : index
    %515 = vector.load %arg7[%c32_612, %c0_613] : memref<36x576xbf16, #tpu.memory_space<vmem>>, vector<4x288xbf16>
    tpu.vector_store %arg7[%c32_612, %c0_613], %514 {strides = array<i32>} : memref<36x576xbf16, #tpu.memory_space<vmem>>, vector<4x288xbf16>,
    %c0_614 = arith.constant 0 : index
    %c288_615 = arith.constant 288 : index
    %516 = vector.load %arg8[%c0_614, %c288_615] : memref<4x576xf32, #tpu.memory_space<vmem>>, vector<4x288xf32>
    %c0_616 = arith.constant 0 : index
    %c19_617 = arith.constant 19 : index
    %517 = vector.load %arg6[%c0_616, %c19_617] : memref<4x326xf32, #tpu.memory_space<vmem>>, vector<4x288xf32>
    tpu.vector_store %arg6[%c0_616, %c19_617], %516 {strides = array<i32>} : memref<4x326xf32, #tpu.memory_space<vmem>>, vector<4x288xf32>,
    %c0_618 = arith.constant 0 : index
    %c0_619 = arith.constant 0 : index
    %518 = vector.load %arg6[%c0_618, %c0_619] : memref<4x326xf32, #tpu.memory_space<vmem>>, vector<4x288xf32>
    %519 = arith.truncf %518 : vector<4x288xf32> to vector<4x288xbf16>
    %c0_620 = arith.constant 0 : index
    %c288_621 = arith.constant 288 : index
    %520 = vector.load %arg7[%c0_620, %c288_621] : memref<36x576xbf16, #tpu.memory_space<vmem>>, vector<4x288xbf16>
    tpu.vector_store %arg7[%c0_620, %c288_621], %519 {strides = array<i32>} : memref<36x576xbf16, #tpu.memory_space<vmem>>, vector<4x288xbf16>,
    %c0_622 = arith.constant 0 : index
    %c1_623 = arith.constant 1 : index
    %521 = vector.load %arg6[%c0_622, %c1_623] : memref<4x326xf32, #tpu.memory_space<vmem>>, vector<4x288xf32>
    %522 = arith.truncf %521 : vector<4x288xf32> to vector<4x288xbf16>
    %c4_624 = arith.constant 4 : index
    %c288_625 = arith.constant 288 : index
    %523 = vector.load %arg7[%c4_624, %c288_625] : memref<36x576xbf16, #tpu.memory_space<vmem>>, vector<4x288xbf16>
    tpu.vector_store %arg7[%c4_624, %c288_625], %522 {strides = array<i32>} : memref<36x576xbf16, #tpu.memory_space<vmem>>, vector<4x288xbf16>,
    %c0_626 = arith.constant 0 : index
    %c2_627 = arith.constant 2 : index
    %524 = vector.load %arg6[%c0_626, %c2_627] : memref<4x326xf32, #tpu.memory_space<vmem>>, vector<4x288xf32>
    %525 = arith.truncf %524 : vector<4x288xf32> to vector<4x288xbf16>
    %c8_628 = arith.constant 8 : index
    %c288_629 = arith.constant 288 : index
    %526 = vector.load %arg7[%c8_628, %c288_629] : memref<36x576xbf16, #tpu.memory_space<vmem>>, vector<4x288xbf16>
    tpu.vector_store %arg7[%c8_628, %c288_629], %525 {strides = array<i32>} : memref<36x576xbf16, #tpu.memory_space<vmem>>, vector<4x288xbf16>,
    %c0_630 = arith.constant 0 : index
    %c18_631 = arith.constant 18 : index
    %527 = vector.load %arg6[%c0_630, %c18_631] : memref<4x326xf32, #tpu.memory_space<vmem>>, vector<4x288xf32>
    %528 = arith.truncf %527 : vector<4x288xf32> to vector<4x288xbf16>
    %c12_632 = arith.constant 12 : index
    %c288_633 = arith.constant 288 : index
    %529 = vector.load %arg7[%c12_632, %c288_633] : memref<36x576xbf16, #tpu.memory_space<vmem>>, vector<4x288xbf16>
    tpu.vector_store %arg7[%c12_632, %c288_633], %528 {strides = array<i32>} : memref<36x576xbf16, #tpu.memory_space<vmem>>, vector<4x288xbf16>,
    %c0_634 = arith.constant 0 : index
    %c19_635 = arith.constant 19 : index
    %530 = vector.load %arg6[%c0_634, %c19_635] : memref<4x326xf32, #tpu.memory_space<vmem>>, vector<4x288xf32>
    %531 = arith.truncf %530 : vector<4x288xf32> to vector<4x288xbf16>
    %c16_636 = arith.constant 16 : index
    %c288_637 = arith.constant 288 : index
    %532 = vector.load %arg7[%c16_636, %c288_637] : memref<36x576xbf16, #tpu.memory_space<vmem>>, vector<4x288xbf16>
    tpu.vector_store %arg7[%c16_636, %c288_637], %531 {strides = array<i32>} : memref<36x576xbf16, #tpu.memory_space<vmem>>, vector<4x288xbf16>,
    %c0_638 = arith.constant 0 : index
    %c20_639 = arith.constant 20 : index
    %533 = vector.load %arg6[%c0_638, %c20_639] : memref<4x326xf32, #tpu.memory_space<vmem>>, vector<4x288xf32>
    %534 = arith.truncf %533 : vector<4x288xf32> to vector<4x288xbf16>
    %c20_640 = arith.constant 20 : index
    %c288_641 = arith.constant 288 : index
    %535 = vector.load %arg7[%c20_640, %c288_641] : memref<36x576xbf16, #tpu.memory_space<vmem>>, vector<4x288xbf16>
    tpu.vector_store %arg7[%c20_640, %c288_641], %534 {strides = array<i32>} : memref<36x576xbf16, #tpu.memory_space<vmem>>, vector<4x288xbf16>,
    %c0_642 = arith.constant 0 : index
    %c36_643 = arith.constant 36 : index
    %536 = vector.load %arg6[%c0_642, %c36_643] : memref<4x326xf32, #tpu.memory_space<vmem>>, vector<4x288xf32>
    %537 = arith.truncf %536 : vector<4x288xf32> to vector<4x288xbf16>
    %c24_644 = arith.constant 24 : index
    %c288_645 = arith.constant 288 : index
    %538 = vector.load %arg7[%c24_644, %c288_645] : memref<36x576xbf16, #tpu.memory_space<vmem>>, vector<4x288xbf16>
    tpu.vector_store %arg7[%c24_644, %c288_645], %537 {strides = array<i32>} : memref<36x576xbf16, #tpu.memory_space<vmem>>, vector<4x288xbf16>,
    %c0_646 = arith.constant 0 : index
    %c37_647 = arith.constant 37 : index
    %539 = vector.load %arg6[%c0_646, %c37_647] : memref<4x326xf32, #tpu.memory_space<vmem>>, vector<4x288xf32>
    %540 = arith.truncf %539 : vector<4x288xf32> to vector<4x288xbf16>
    %c28_648 = arith.constant 28 : index
    %c288_649 = arith.constant 288 : index
    %541 = vector.load %arg7[%c28_648, %c288_649] : memref<36x576xbf16, #tpu.memory_space<vmem>>, vector<4x288xbf16>
    tpu.vector_store %arg7[%c28_648, %c288_649], %540 {strides = array<i32>} : memref<36x576xbf16, #tpu.memory_space<vmem>>, vector<4x288xbf16>,
    %c0_650 = arith.constant 0 : index
    %c38_651 = arith.constant 38 : index
    %542 = vector.load %arg6[%c0_650, %c38_651] : memref<4x326xf32, #tpu.memory_space<vmem>>, vector<4x288xf32>
    %543 = arith.truncf %542 : vector<4x288xf32> to vector<4x288xbf16>
    %c32_652 = arith.constant 32 : index
    %c288_653 = arith.constant 288 : index
    %544 = vector.load %arg7[%c32_652, %c288_653] : memref<36x576xbf16, #tpu.memory_space<vmem>>, vector<4x288xbf16>
    tpu.vector_store %arg7[%c32_652, %c288_653], %543 {strides = array<i32>} : memref<36x576xbf16, #tpu.memory_space<vmem>>, vector<4x288xbf16>,
    %c6 = arith.constant 6 : index
    %c0_654 = arith.constant 0 : index
    %c0_655 = arith.constant 0 : index
    %545 = vector.load %arg2[%c6, %c0_654, %c0_655] : memref<8x4x36xbf16, #tpu.memory_space<vmem>>, vector<1x4x36xbf16>
    %546 = vector.shape_cast %545 : vector<1x4x36xbf16> to vector<4x36xbf16>
    %c0_656 = arith.constant 0 : index
    %c0_657 = arith.constant 0 : index
    %547 = vector.load %arg7[%c0_656, %c0_657] : memref<36x576xbf16, #tpu.memory_space<vmem>>, vector<36x576xbf16>
    %cst_658 = arith.constant dense<0.000000e+00> : vector<4x576xf32>
    %548 = tpu.matmul %546, %547, %cst_658 {dimension_numbers = #tpu.dot_dimension_numbers<[1], [0], [0], [1], [0, 0, 1, 1], [], []>} : vector<4x36xbf16>, vector<36x576xbf16>, vector<4x576xf32> -> vector<4x576xf32>
    %c6_659 = arith.constant 6 : index
    %c0_660 = arith.constant 0 : index
    %c0_661 = arith.constant 0 : index
    %549 = vector.load %arg3[%c6_659, %c0_660, %c0_661] : memref<8x4x1xf32, #tpu.memory_space<vmem>>, vector<1x4x1xf32>
    %550 = vector.shape_cast %549 : vector<1x4x1xf32> to vector<4x1xf32>
    %551 = vector.broadcast %550 : vector<4x1xf32> to vector<4x576xf32>
    %552 = arith.mulf %548, %551 : vector<4x576xf32>
    %c6_662 = arith.constant 6 : index
    %c0_663 = arith.constant 0 : index
    %c0_664 = arith.constant 0 : index
    %553 = vector.load %arg4[%c6_662, %c0_663, %c0_664] : memref<8x4x1xf32, #tpu.memory_space<vmem>>, vector<1x4x1xf32>
    %554 = vector.shape_cast %553 : vector<1x4x1xf32> to vector<4x1xf32>
    %555 = vector.broadcast %554 : vector<4x1xf32> to vector<4x576xf32>
    %556 = arith.addf %552, %555 : vector<4x576xf32>
    %cst_665 = arith.constant 0.000000e+00 : f32
    %557 = vector.broadcast %cst_665 : f32 to vector<4x576xf32>
    %558 = arith.maximumf %556, %557 : vector<4x576xf32>
    %559 = vector.broadcast %24 : vector<1x576xf32> to vector<4x576xf32>
    %560 = arith.mulf %558, %559 : vector<4x576xf32>
    %c0_666 = arith.constant 0 : index
    %c0_667 = arith.constant 0 : index
    %561 = vector.load %arg9[%c0_666, %c0_667] : memref<4x576xf32, #tpu.memory_space<vmem>>, vector<4x576xf32>
    tpu.vector_store %arg9[%c0_666, %c0_667], %560 {strides = array<i32>} : memref<4x576xf32, #tpu.memory_space<vmem>>, vector<4x576xf32>,
    %c0_668 = arith.constant 0 : index
    %c0_669 = arith.constant 0 : index
    %562 = vector.load %arg9[%c0_668, %c0_669] : memref<4x576xf32, #tpu.memory_space<vmem>>, vector<4x288xf32>
    %c0_670 = arith.constant 0 : index
    %c19_671 = arith.constant 19 : index
    %563 = vector.load %arg6[%c0_670, %c19_671] : memref<4x326xf32, #tpu.memory_space<vmem>>, vector<4x288xf32>
    tpu.vector_store %arg6[%c0_670, %c19_671], %562 {strides = array<i32>} : memref<4x326xf32, #tpu.memory_space<vmem>>, vector<4x288xf32>,
    %c0_672 = arith.constant 0 : index
    %c0_673 = arith.constant 0 : index
    %564 = vector.load %arg6[%c0_672, %c0_673] : memref<4x326xf32, #tpu.memory_space<vmem>>, vector<4x288xf32>
    %565 = arith.truncf %564 : vector<4x288xf32> to vector<4x288xbf16>
    %c0_674 = arith.constant 0 : index
    %c0_675 = arith.constant 0 : index
    %566 = vector.load %arg7[%c0_674, %c0_675] : memref<36x576xbf16, #tpu.memory_space<vmem>>, vector<4x288xbf16>
    tpu.vector_store %arg7[%c0_674, %c0_675], %565 {strides = array<i32>} : memref<36x576xbf16, #tpu.memory_space<vmem>>, vector<4x288xbf16>,
    %c0_676 = arith.constant 0 : index
    %c1_677 = arith.constant 1 : index
    %567 = vector.load %arg6[%c0_676, %c1_677] : memref<4x326xf32, #tpu.memory_space<vmem>>, vector<4x288xf32>
    %568 = arith.truncf %567 : vector<4x288xf32> to vector<4x288xbf16>
    %c4_678 = arith.constant 4 : index
    %c0_679 = arith.constant 0 : index
    %569 = vector.load %arg7[%c4_678, %c0_679] : memref<36x576xbf16, #tpu.memory_space<vmem>>, vector<4x288xbf16>
    tpu.vector_store %arg7[%c4_678, %c0_679], %568 {strides = array<i32>} : memref<36x576xbf16, #tpu.memory_space<vmem>>, vector<4x288xbf16>,
    %c0_680 = arith.constant 0 : index
    %c2_681 = arith.constant 2 : index
    %570 = vector.load %arg6[%c0_680, %c2_681] : memref<4x326xf32, #tpu.memory_space<vmem>>, vector<4x288xf32>
    %571 = arith.truncf %570 : vector<4x288xf32> to vector<4x288xbf16>
    %c8_682 = arith.constant 8 : index
    %c0_683 = arith.constant 0 : index
    %572 = vector.load %arg7[%c8_682, %c0_683] : memref<36x576xbf16, #tpu.memory_space<vmem>>, vector<4x288xbf16>
    tpu.vector_store %arg7[%c8_682, %c0_683], %571 {strides = array<i32>} : memref<36x576xbf16, #tpu.memory_space<vmem>>, vector<4x288xbf16>,
    %c0_684 = arith.constant 0 : index
    %c18_685 = arith.constant 18 : index
    %573 = vector.load %arg6[%c0_684, %c18_685] : memref<4x326xf32, #tpu.memory_space<vmem>>, vector<4x288xf32>
    %574 = arith.truncf %573 : vector<4x288xf32> to vector<4x288xbf16>
    %c12_686 = arith.constant 12 : index
    %c0_687 = arith.constant 0 : index
    %575 = vector.load %arg7[%c12_686, %c0_687] : memref<36x576xbf16, #tpu.memory_space<vmem>>, vector<4x288xbf16>
    tpu.vector_store %arg7[%c12_686, %c0_687], %574 {strides = array<i32>} : memref<36x576xbf16, #tpu.memory_space<vmem>>, vector<4x288xbf16>,
    %c0_688 = arith.constant 0 : index
    %c19_689 = arith.constant 19 : index
    %576 = vector.load %arg6[%c0_688, %c19_689] : memref<4x326xf32, #tpu.memory_space<vmem>>, vector<4x288xf32>
    %577 = arith.truncf %576 : vector<4x288xf32> to vector<4x288xbf16>
    %c16_690 = arith.constant 16 : index
    %c0_691 = arith.constant 0 : index
    %578 = vector.load %arg7[%c16_690, %c0_691] : memref<36x576xbf16, #tpu.memory_space<vmem>>, vector<4x288xbf16>
    tpu.vector_store %arg7[%c16_690, %c0_691], %577 {strides = array<i32>} : memref<36x576xbf16, #tpu.memory_space<vmem>>, vector<4x288xbf16>,
    %c0_692 = arith.constant 0 : index
    %c20_693 = arith.constant 20 : index
    %579 = vector.load %arg6[%c0_692, %c20_693] : memref<4x326xf32, #tpu.memory_space<vmem>>, vector<4x288xf32>
    %580 = arith.truncf %579 : vector<4x288xf32> to vector<4x288xbf16>
    %c20_694 = arith.constant 20 : index
    %c0_695 = arith.constant 0 : index
    %581 = vector.load %arg7[%c20_694, %c0_695] : memref<36x576xbf16, #tpu.memory_space<vmem>>, vector<4x288xbf16>
    tpu.vector_store %arg7[%c20_694, %c0_695], %580 {strides = array<i32>} : memref<36x576xbf16, #tpu.memory_space<vmem>>, vector<4x288xbf16>,
    %c0_696 = arith.constant 0 : index
    %c36_697 = arith.constant 36 : index
    %582 = vector.load %arg6[%c0_696, %c36_697] : memref<4x326xf32, #tpu.memory_space<vmem>>, vector<4x288xf32>
    %583 = arith.truncf %582 : vector<4x288xf32> to vector<4x288xbf16>
    %c24_698 = arith.constant 24 : index
    %c0_699 = arith.constant 0 : index
    %584 = vector.load %arg7[%c24_698, %c0_699] : memref<36x576xbf16, #tpu.memory_space<vmem>>, vector<4x288xbf16>
    tpu.vector_store %arg7[%c24_698, %c0_699], %583 {strides = array<i32>} : memref<36x576xbf16, #tpu.memory_space<vmem>>, vector<4x288xbf16>,
    %c0_700 = arith.constant 0 : index
    %c37_701 = arith.constant 37 : index
    %585 = vector.load %arg6[%c0_700, %c37_701] : memref<4x326xf32, #tpu.memory_space<vmem>>, vector<4x288xf32>
    %586 = arith.truncf %585 : vector<4x288xf32> to vector<4x288xbf16>
    %c28_702 = arith.constant 28 : index
    %c0_703 = arith.constant 0 : index
    %587 = vector.load %arg7[%c28_702, %c0_703] : memref<36x576xbf16, #tpu.memory_space<vmem>>, vector<4x288xbf16>
    tpu.vector_store %arg7[%c28_702, %c0_703], %586 {strides = array<i32>} : memref<36x576xbf16, #tpu.memory_space<vmem>>, vector<4x288xbf16>,
    %c0_704 = arith.constant 0 : index
    %c38_705 = arith.constant 38 : index
    %588 = vector.load %arg6[%c0_704, %c38_705] : memref<4x326xf32, #tpu.memory_space<vmem>>, vector<4x288xf32>
    %589 = arith.truncf %588 : vector<4x288xf32> to vector<4x288xbf16>
    %c32_706 = arith.constant 32 : index
    %c0_707 = arith.constant 0 : index
    %590 = vector.load %arg7[%c32_706, %c0_707] : memref<36x576xbf16, #tpu.memory_space<vmem>>, vector<4x288xbf16>
    tpu.vector_store %arg7[%c32_706, %c0_707], %589 {strides = array<i32>} : memref<36x576xbf16, #tpu.memory_space<vmem>>, vector<4x288xbf16>,
    %c0_708 = arith.constant 0 : index
    %c288_709 = arith.constant 288 : index
    %591 = vector.load %arg9[%c0_708, %c288_709] : memref<4x576xf32, #tpu.memory_space<vmem>>, vector<4x288xf32>
    %c0_710 = arith.constant 0 : index
    %c19_711 = arith.constant 19 : index
    %592 = vector.load %arg6[%c0_710, %c19_711] : memref<4x326xf32, #tpu.memory_space<vmem>>, vector<4x288xf32>
    tpu.vector_store %arg6[%c0_710, %c19_711], %591 {strides = array<i32>} : memref<4x326xf32, #tpu.memory_space<vmem>>, vector<4x288xf32>,
    %c0_712 = arith.constant 0 : index
    %c0_713 = arith.constant 0 : index
    %593 = vector.load %arg6[%c0_712, %c0_713] : memref<4x326xf32, #tpu.memory_space<vmem>>, vector<4x288xf32>
    %594 = arith.truncf %593 : vector<4x288xf32> to vector<4x288xbf16>
    %c0_714 = arith.constant 0 : index
    %c288_715 = arith.constant 288 : index
    %595 = vector.load %arg7[%c0_714, %c288_715] : memref<36x576xbf16, #tpu.memory_space<vmem>>, vector<4x288xbf16>
    tpu.vector_store %arg7[%c0_714, %c288_715], %594 {strides = array<i32>} : memref<36x576xbf16, #tpu.memory_space<vmem>>, vector<4x288xbf16>,
    %c0_716 = arith.constant 0 : index
    %c1_717 = arith.constant 1 : index
    %596 = vector.load %arg6[%c0_716, %c1_717] : memref<4x326xf32, #tpu.memory_space<vmem>>, vector<4x288xf32>
    %597 = arith.truncf %596 : vector<4x288xf32> to vector<4x288xbf16>
    %c4_718 = arith.constant 4 : index
    %c288_719 = arith.constant 288 : index
    %598 = vector.load %arg7[%c4_718, %c288_719] : memref<36x576xbf16, #tpu.memory_space<vmem>>, vector<4x288xbf16>
    tpu.vector_store %arg7[%c4_718, %c288_719], %597 {strides = array<i32>} : memref<36x576xbf16, #tpu.memory_space<vmem>>, vector<4x288xbf16>,
    %c0_720 = arith.constant 0 : index
    %c2_721 = arith.constant 2 : index
    %599 = vector.load %arg6[%c0_720, %c2_721] : memref<4x326xf32, #tpu.memory_space<vmem>>, vector<4x288xf32>
    %600 = arith.truncf %599 : vector<4x288xf32> to vector<4x288xbf16>
    %c8_722 = arith.constant 8 : index
    %c288_723 = arith.constant 288 : index
    %601 = vector.load %arg7[%c8_722, %c288_723] : memref<36x576xbf16, #tpu.memory_space<vmem>>, vector<4x288xbf16>
    tpu.vector_store %arg7[%c8_722, %c288_723], %600 {strides = array<i32>} : memref<36x576xbf16, #tpu.memory_space<vmem>>, vector<4x288xbf16>,
    %c0_724 = arith.constant 0 : index
    %c18_725 = arith.constant 18 : index
    %602 = vector.load %arg6[%c0_724, %c18_725] : memref<4x326xf32, #tpu.memory_space<vmem>>, vector<4x288xf32>
    %603 = arith.truncf %602 : vector<4x288xf32> to vector<4x288xbf16>
    %c12_726 = arith.constant 12 : index
    %c288_727 = arith.constant 288 : index
    %604 = vector.load %arg7[%c12_726, %c288_727] : memref<36x576xbf16, #tpu.memory_space<vmem>>, vector<4x288xbf16>
    tpu.vector_store %arg7[%c12_726, %c288_727], %603 {strides = array<i32>} : memref<36x576xbf16, #tpu.memory_space<vmem>>, vector<4x288xbf16>,
    %c0_728 = arith.constant 0 : index
    %c19_729 = arith.constant 19 : index
    %605 = vector.load %arg6[%c0_728, %c19_729] : memref<4x326xf32, #tpu.memory_space<vmem>>, vector<4x288xf32>
    %606 = arith.truncf %605 : vector<4x288xf32> to vector<4x288xbf16>
    %c16_730 = arith.constant 16 : index
    %c288_731 = arith.constant 288 : index
    %607 = vector.load %arg7[%c16_730, %c288_731] : memref<36x576xbf16, #tpu.memory_space<vmem>>, vector<4x288xbf16>
    tpu.vector_store %arg7[%c16_730, %c288_731], %606 {strides = array<i32>} : memref<36x576xbf16, #tpu.memory_space<vmem>>, vector<4x288xbf16>,
    %c0_732 = arith.constant 0 : index
    %c20_733 = arith.constant 20 : index
    %608 = vector.load %arg6[%c0_732, %c20_733] : memref<4x326xf32, #tpu.memory_space<vmem>>, vector<4x288xf32>
    %609 = arith.truncf %608 : vector<4x288xf32> to vector<4x288xbf16>
    %c20_734 = arith.constant 20 : index
    %c288_735 = arith.constant 288 : index
    %610 = vector.load %arg7[%c20_734, %c288_735] : memref<36x576xbf16, #tpu.memory_space<vmem>>, vector<4x288xbf16>
    tpu.vector_store %arg7[%c20_734, %c288_735], %609 {strides = array<i32>} : memref<36x576xbf16, #tpu.memory_space<vmem>>, vector<4x288xbf16>,
    %c0_736 = arith.constant 0 : index
    %c36_737 = arith.constant 36 : index
    %611 = vector.load %arg6[%c0_736, %c36_737] : memref<4x326xf32, #tpu.memory_space<vmem>>, vector<4x288xf32>
    %612 = arith.truncf %611 : vector<4x288xf32> to vector<4x288xbf16>
    %c24_738 = arith.constant 24 : index
    %c288_739 = arith.constant 288 : index
    %613 = vector.load %arg7[%c24_738, %c288_739] : memref<36x576xbf16, #tpu.memory_space<vmem>>, vector<4x288xbf16>
    tpu.vector_store %arg7[%c24_738, %c288_739], %612 {strides = array<i32>} : memref<36x576xbf16, #tpu.memory_space<vmem>>, vector<4x288xbf16>,
    %c0_740 = arith.constant 0 : index
    %c37_741 = arith.constant 37 : index
    %614 = vector.load %arg6[%c0_740, %c37_741] : memref<4x326xf32, #tpu.memory_space<vmem>>, vector<4x288xf32>
    %615 = arith.truncf %614 : vector<4x288xf32> to vector<4x288xbf16>
    %c28_742 = arith.constant 28 : index
    %c288_743 = arith.constant 288 : index
    %616 = vector.load %arg7[%c28_742, %c288_743] : memref<36x576xbf16, #tpu.memory_space<vmem>>, vector<4x288xbf16>
    tpu.vector_store %arg7[%c28_742, %c288_743], %615 {strides = array<i32>} : memref<36x576xbf16, #tpu.memory_space<vmem>>, vector<4x288xbf16>,
    %c0_744 = arith.constant 0 : index
    %c38_745 = arith.constant 38 : index
    %617 = vector.load %arg6[%c0_744, %c38_745] : memref<4x326xf32, #tpu.memory_space<vmem>>, vector<4x288xf32>
    %618 = arith.truncf %617 : vector<4x288xf32> to vector<4x288xbf16>
    %c32_746 = arith.constant 32 : index
    %c288_747 = arith.constant 288 : index
    %619 = vector.load %arg7[%c32_746, %c288_747] : memref<36x576xbf16, #tpu.memory_space<vmem>>, vector<4x288xbf16>
    tpu.vector_store %arg7[%c32_746, %c288_747], %618 {strides = array<i32>} : memref<36x576xbf16, #tpu.memory_space<vmem>>, vector<4x288xbf16>,
    %c7 = arith.constant 7 : index
    %c0_748 = arith.constant 0 : index
    %c0_749 = arith.constant 0 : index
    %620 = vector.load %arg2[%c7, %c0_748, %c0_749] : memref<8x4x36xbf16, #tpu.memory_space<vmem>>, vector<1x4x36xbf16>
    %621 = vector.shape_cast %620 : vector<1x4x36xbf16> to vector<4x36xbf16>
    %c0_750 = arith.constant 0 : index
    %c0_751 = arith.constant 0 : index
    %622 = vector.load %arg7[%c0_750, %c0_751] : memref<36x576xbf16, #tpu.memory_space<vmem>>, vector<36x576xbf16>
    %cst_752 = arith.constant dense<0.000000e+00> : vector<4x576xf32>
    %623 = tpu.matmul %621, %622, %cst_752 {dimension_numbers = #tpu.dot_dimension_numbers<[1], [0], [0], [1], [0, 0, 1, 1], [], []>} : vector<4x36xbf16>, vector<36x576xbf16>, vector<4x576xf32> -> vector<4x576xf32>
    %c7_753 = arith.constant 7 : index
    %c0_754 = arith.constant 0 : index
    %c0_755 = arith.constant 0 : index
    %624 = vector.load %arg3[%c7_753, %c0_754, %c0_755] : memref<8x4x1xf32, #tpu.memory_space<vmem>>, vector<1x4x1xf32>
    %625 = vector.shape_cast %624 : vector<1x4x1xf32> to vector<4x1xf32>
    %626 = vector.broadcast %625 : vector<4x1xf32> to vector<4x576xf32>
    %627 = arith.mulf %623, %626 : vector<4x576xf32>
    %c7_756 = arith.constant 7 : index
    %c0_757 = arith.constant 0 : index
    %c0_758 = arith.constant 0 : index
    %628 = vector.load %arg4[%c7_756, %c0_757, %c0_758] : memref<8x4x1xf32, #tpu.memory_space<vmem>>, vector<1x4x1xf32>
    %629 = vector.shape_cast %628 : vector<1x4x1xf32> to vector<4x1xf32>
    %630 = vector.broadcast %629 : vector<4x1xf32> to vector<4x576xf32>
    %631 = arith.addf %627, %630 : vector<4x576xf32>
    %c0_759 = arith.constant 0 : index
    %c0_760 = arith.constant 0 : index
    %632 = vector.load %arg8[%c0_759, %c0_760] : memref<4x576xf32, #tpu.memory_space<vmem>>, vector<4x576xf32>
    %633 = arith.addf %631, %632 : vector<4x576xf32>
    %cst_761 = arith.constant 0.000000e+00 : f32
    %634 = vector.broadcast %cst_761 : f32 to vector<4x576xf32>
    %635 = arith.maximumf %633, %634 : vector<4x576xf32>
    %636 = vector.broadcast %24 : vector<1x576xf32> to vector<4x576xf32>
    %637 = arith.mulf %635, %636 : vector<4x576xf32>
    %638 = vector.extract_strided_slice %637 {offsets = [0, 0], sizes = [4, 288], strides = [1, 1]} : vector<4x576xf32> to vector<4x288xf32>
    %c0_762 = arith.constant 0 : index
    %c0_763 = arith.constant 0 : index
    %c0_764 = arith.constant 0 : index
    %639 = vector.load %arg5[%c0_762, %c0_763, %c0_764] : memref<2x4x288xf32, #tpu.memory_space<vmem>>, vector<1x4x288xf32>
    %640 = vector.shape_cast %639 : vector<1x4x288xf32> to vector<4x288xf32>
    %641 = vector.shape_cast %638 : vector<4x288xf32> to vector<1x4x288xf32>
    tpu.vector_store %arg5[%c0_762, %c0_763, %c0_764], %641 {strides = array<i32>} : memref<2x4x288xf32, #tpu.memory_space<vmem>>, vector<1x4x288xf32>,
    %642 = vector.extract_strided_slice %637 {offsets = [0, 288], sizes = [4, 288], strides = [1, 1]} : vector<4x576xf32> to vector<4x288xf32>
    %c1_765 = arith.constant 1 : index
    %c0_766 = arith.constant 0 : index
    %c0_767 = arith.constant 0 : index
    %643 = vector.load %arg5[%c1_765, %c0_766, %c0_767] : memref<2x4x288xf32, #tpu.memory_space<vmem>>, vector<1x4x288xf32>
    %644 = vector.shape_cast %643 : vector<1x4x288xf32> to vector<4x288xf32>
    %645 = vector.shape_cast %642 : vector<4x288xf32> to vector<1x4x288xf32>
    tpu.vector_store %arg5[%c1_765, %c0_766, %c0_767], %645 {strides = array<i32>} : memref<2x4x288xf32, #tpu.memory_space<vmem>>, vector<1x4x288xf32>,
    return
  }
  func.func @transform_0(%arg0: i32) -> (i32, i32, i32) {
    %c0_i32 = arith.constant 0 : i32
    %c0_i32_0 = arith.constant 0 : i32
    %c0_i32_1 = arith.constant 0 : i32
    return %arg0, %c0_i32, %c0_i32_0 : i32, i32, i32
  }
  func.func @transform_1(%arg0: i32) -> (i32, i32, i32) {
    %c0_i32 = arith.constant 0 : i32
    %c0_i32_0 = arith.constant 0 : i32
    %c0_i32_1 = arith.constant 0 : i32
    %c0_i32_2 = arith.constant 0 : i32
    return %c0_i32, %c0_i32_0, %c0_i32_1 : i32, i32, i32
  }
  func.func @transform_2(%arg0: i32) -> (i32, i32, i32) {
    %c0_i32 = arith.constant 0 : i32
    %c0_i32_0 = arith.constant 0 : i32
    %c0_i32_1 = arith.constant 0 : i32
    %c0_i32_2 = arith.constant 0 : i32
    return %c0_i32, %c0_i32_0, %c0_i32_1 : i32, i32, i32
  }
  func.func @transform_3(%arg0: i32) -> (i32, i32, i32) {
    %c0_i32 = arith.constant 0 : i32
    %c0_i32_0 = arith.constant 0 : i32
    %c0_i32_1 = arith.constant 0 : i32
    %c0_i32_2 = arith.constant 0 : i32
    return %c0_i32, %c0_i32_0, %c0_i32_1 : i32, i32, i32
  }
  func.func @transform_4(%arg0: i32) -> (i32, i32, i32) {
    %c0_i32 = arith.constant 0 : i32
    %c0_i32_0 = arith.constant 0 : i32
    %c0_i32_1 = arith.constant 0 : i32
    return %arg0, %c0_i32, %c0_i32_0 : i32, i32, i32
  }
}

</mosaic_0001>

<bundles_post_ra>
// kernel: group_conv_level.1
= control target key start
LH: loop header
LB: loop body
LE: loop exit
PB: predicated region body
PF: predicated region fallthrough
CT: control target
= control target key end

     0   :  { %vm9298_vm0 = vcmask 257024   ;;  %s7701_s21 = smov 32   ;;  %s7702_s22 = smov 19   ;;  %vm18_vm1 = vcmask 150528   ;;  %v7703_v4 = vmov 0.0   ;;  %vm143_vm2 = vcmask 1043712   ;;  %s9293_s0 = inlined_call_operand.vmem [shape: f32[2,4,288], index: 0, kind: input, shape index: {}]   ;;  %s9294_s2 = inlined_call_operand.vmem [shape: f32[8,4,1], index: 2, kind: input, shape index: {}]   ;;  %s9295_s3 = inlined_call_operand.vmem [shape: f32[8,4,1], index: 3, kind: input, shape index: {}]   ;;  %s9296_s1 = inlined_call_operand.vmem [shape: bf16[8,4,36], index: 1, kind: input, shape index: {}]   ;;  %s9297_s4 = inlined_call_operand.vmem [shape: f32[2,4,288], index: 4, kind: output, shape index: {}]  }
   0x1   :  { %v6692_v0 = vld [vmem:[%s9293_s0 + $0xc] sm:$0xff]  ;;  %v123_v1 = vld [vmem:[%s9293_s0] sm:$0xff]  ;;  %v124_v2 = vld [vmem:[%s9293_s0 + $0x8] sm:$0xf]  ;;  %19 = vst.msk [vmem:[#allocation2] sm:$0xf] %vm18_vm1, %v7703_v4 }
   0x2   :  { %133 = vrot.lane.b32.xlu0 %v6692_v0, %s7701_s21  ;;  %125 = vst [vmem:[#allocation4] sm:$0xff] %v123_v1  ;;  %153 = vrot.lane.b32.xlu1 %v123_v1, %s7702_s22  ;;  %127 = vst.msk [vmem:[#allocation4 + $0x8] sm:$0xf] %vm9298_vm0, %v124_v2  ;;  %v6693_v3 = vld [vmem:[%s9293_s0 + $0x14] sm:$0xf]  ;;  %vm144_vm3 = vcmask 1047556  }
   0x3   :  { %vm163_vm4 = vcmask 1043608   ;;  %vm20_vm5 = vcmask 568728   ;;  %vm9312_vm6 = vcmask 261120   ;;  %vm145_vm7 = vmor %vm144_vm3, %vm143_vm2  ;;  %vm158_vm8 = vcmask 154624   ;;  %s7704_s0 = smov 115   ;;  %s7705_s25 = smov 90  }
   0x4   :  { %21 = vst.msk [vmem:[#allocation2 + $0x8] sm:$0xf] %vm20_vm5, %v7703_v4  ;;  %vm7767_vm9 = vmor %vm144_vm3, %vm163_vm4  ;;  %vm147_vm10 = vcmask 519168   ;;  %s7706_s26 = smov 109   ;;  %s7707_s27 = smov 92   ;;  %vm166_vm11 = vcmask 412672  }
   0x5   :  { %s7708_s28 = smov 126   ;;  %s7709_s29 = smov 108   ;;  %vm9325_vm12 = vcmask 1043456   ;;  %vm9306_vm13 = vcmask 941056   ;;  %vm9305_vm14 = vcmask 254976   ;;  %v7719_v61 = vmov 0  }
   0x6   :  { %135 = vrot.lane.b32.xlu0 %v6693_v3, %s7701_s21  ;;  %s7710_s30 = smov 91   ;;  %s7711_s5 = smov 127   ;;  %853 = vmatprep.mubr.bf16.mxu0 %v7719_v61  ;;  %vm9301_vm15 = vcmask 736256   ;;  %vm9299_vm1 = vcmask 891904   ;;  %vm9300_vm2 = vcmask 752640   ;;  %vm9304_vm3 = vcmask 1031168  }
   0x7   :  { %s7712_s6 = smov 110   ;;  %s7713_s7 = smov 122   ;;  %894 = vmatprep.mubr.bf16.mxu1 %v7719_v61  ;;  %7598 = vset.pattern.permute.xlu0 %v7719_v61  ;;  %vm9324_vm4 = vcmask 1041408   ;;  %vm475_vm5 = vcmask 1041664   ;;  %vm9308_vm0 = vcmask 257026  }
   0x8   :  { %s7714_s8 = smov 124   ;;  %s7715_s9 = smov 13   ;;  %7599 = vset.pattern.permute.xlu1 %v7719_v61 }
   0x9   :  { %s7716_s10 = smov 123   ;;  %s7717_s11 = smov 30  }
   0xa   :  { %s7718_s12 = smov 12   ;;  %s7720_s13 = smov 31  }
   0xb   :  { %s7721_s14 = smov 14  }
  0x74   :  { %v134_v5 = vpop.permute.xlu0 %133  ;;  %v154_v6 = vpop.permute.xlu1 %153 }
  0x75   :  { %v137_v8 = vrot.slane %v134_v5, 4  ;;  %v157_v9 = vrot.slane %v154_v6, 4 }
  0x77   :  { %v139_v10 = vsel %vm9312_vm6, %v137_v8, %v134_v5  ;;  %v159_v11 = vsel %vm158_vm8, %v157_v9, %v154_v6 }
  0x78   :  { %146 = vst.msk [vmem:[#allocation4 + $0x8] sm:$0xff] %vm145_vm7, %v139_v10  ;;  %v136_v12 = vpop.permute.xlu0 %135  ;;  %vm476_vm7 = vcmask 1045508  }
  0x79   :  { %165 = vst.msk [vmem:[#allocation2] sm:$0xff] %vm7767_vm9, %v159_v11  ;;  %v140_v13 = vsel %vm9312_vm6, %v137_v8, %v136_v12 }
  0x7a   :  { %148 = vst.msk [vmem:[#allocation4 + $0x10] sm:$0xf] %vm147_vm10, %v140_v13 }
  0x7f   :  { %v431_v14 = vld [vmem:[#allocation4 + $0x8] sm:$0xff] }
  0x80   :  { %v150_v15 = vld [vmem:[#allocation4 + $0x8] sm:$0xf]  ;;  %v168_v16 = vld [vmem:[#allocation2] sm:$0xff]  ;;  %435 = vrot.lane.b32.xlu0 %v431_v14, %s7704_s0 }
  0x81   :  { %155 = vrot.lane.b32.xlu1 %v150_v15, %s7702_s22  ;;  %v171_v17 = vcombine.high %v168_v16, %v168_v16  ;;  %v432_v19 = vld [vmem:[#allocation4 + $0x10] sm:$0xf] }
  0x83   :  { %v7165_v18 = vpack.c.bf16 %v171_v17, %v168_v16  ;;  %v943_v16 = vld [vmem:[%s9294_s2] sm:$0xf] }
  0x84   :  { %v954_v17 = vld [vmem:[%s9295_s3] sm:$0xf] }
  0x85   :  { %437 = vrot.lane.b32.xlu1 %v432_v19, %s7704_s0  ;;  %186 = vst [vmem:[#allocation3] sm:$0x33] %v7165_v18  ;;  %418 = vrot.lane.b32.xlu0 %v7165_v18, %s7705_s25  ;;  %v327_v20 = vrot.slane %v7165_v18, 6 }
  0x89   :  { %298 = vrot.lane.b32.xlu0 %v7165_v18, %s7706_s26 }
  0x8d   :  { %358 = vrot.lane.b32.xlu0 %v7165_v18, %s7707_s27 }
  0x91   :  { %238 = vrot.lane.b32.xlu0 %v7165_v18, %s7708_s28 }
  0x95   :  { %329 = vrot.lane.b32.xlu0 %v327_v20, %s7709_s29 }
  0x99   :  { %389 = vrot.lane.b32.xlu0 %v327_v20, %s7710_s30 }
  0x9d   :  { %207 = vrot.lane.b32.xlu0 %v327_v20, %s7711_s5 }
  0xa1   :  { %269 = vrot.lane.b32.xlu0 %v327_v20, %s7712_s6 }
  0xf2   :  { %v436_v23 = vpop.permute.xlu0 %435 }
  0xf3   :  { %v156_v21 = vpop.permute.xlu1 %155  ;;  %v439_v25 = vrot.slane %v436_v23, 4 }
  0xf4   :  { %v160_v22 = vsel %vm158_vm8, %v157_v9, %v156_v21 }
  0xf5   :  { %167 = vst.msk [vmem:[#allocation2 + $0x8] sm:$0xf] %vm166_vm11, %v160_v22 }
  0xf7   :  { %v438_v24 = vpop.permute.xlu1 %437  ;;  %v419_v18 = vpop.permute.xlu0 %418 }
  0xf8   :  { %v440_v26 = vrot.slane %v438_v24, 4 }
  0xfa   :  { %v442_v27 = vsel %vm9325_vm12, %v439_v25, %v440_v26  ;;  %v422_v26 = vrot.slane %v419_v18, 4 }
  0xfb   :  { %v444_v28 = vsel %vm9306_vm13, %v436_v23, %v442_v27  ;;  %v299_v19 = vpop.permute.xlu0 %298  ;;  %vm9313_vm13 = vcmask 517120  }
  0xfc   :  { %v169_v29 = vld [vmem:[#allocation2 + $0x8] sm:$0xf]  ;;  %447 = vst.msk [vmem:[#allocation2] sm:$0xff] %vm7767_vm9, %v444_v28 }
  0xfd   :  { %v190_v30 = vld [vmem:[#allocation2 + $0x8] sm:$0xf]  ;;  %v7166_v35 = vpack.c.bf16 %v169_v29, %v169_v29 }
  0xfe   :  { %v223_v31 = vld [vmem:[#allocation2 + $0x8] sm:$0xf]  ;;  %v7168_v50 = vpack.c.bf16 %v190_v30, %v190_v30 }
  0xff   :  { %v252_v32 = vld [vmem:[#allocation2 + $0x8] sm:$0xf]  ;;  %188 = vst.msk [vmem:[#allocation3 + $0x8] sm:$0x3] %vm9305_vm14, %v7166_v35  ;;  %v7170_v45 = vpack.c.bf16 %v223_v31, %v223_v31  ;;  %v359_v20 = vpop.permute.xlu0 %358 }
 0x100   :  { %v283_v33 = vld [vmem:[#allocation2 + $0x8] sm:$0xf]  ;;  %v206_v52 = vrot.slane %v7168_v50, 6  ;;  %v7172_v53 = vpack.c.bf16 %v252_v32, %v252_v32  ;;  %v302_v32 = vrot.slane %v299_v19, 4 }
 0x101   :  { %v312_v34 = vld [vmem:[#allocation2 + $0x8] sm:$0xf]  ;;  %v7174_v40 = vpack.c.bf16 %v283_v33, %v283_v33 }
 0x102   :  { %v343_v36 = vld [vmem:[#allocation2 + $0x8] sm:$0xf]  ;;  %v7176_v46 = vpack.c.bf16 %v312_v34, %v312_v34  ;;  %v268_v54 = vrot.slane %v7172_v53, 6 }
 0x103   :  { %v372_v37 = vld [vmem:[#allocation2 + $0x8] sm:$0xf]  ;;  %v691_v41 = vld [vmem:[#allocation2] sm:$0xff]  ;;  %v7178_v44 = vpack.c.bf16 %v343_v36, %v343_v36  ;;  %v239_v21 = vpop.permute.xlu0 %238 }
 0x104   :  { %v403_v38 = vld [vmem:[#allocation2 + $0x8] sm:$0xf]  ;;  %v694_v42 = vcombine.high %v691_v41, %v691_v41  ;;  %v328_v47 = vrot.slane %v7176_v46, 6  ;;  %v7180_v48 = vpack.c.bf16 %v372_v37, %v372_v37 }
 0x105   :  { %448 = vst.msk [vmem:[#allocation2 + $0x8] sm:$0xf] %vm166_vm11, %v438_v24  ;;  %v7182_v39 = vpack.c.bf16 %v403_v38, %v403_v38  ;;  %v362_v38 = vrot.slane %v359_v20, 4 }
 0x106   :  { %v7199_v43 = vpack.c.bf16 %v694_v42, %v691_v41  ;;  %v388_v49 = vrot.slane %v7180_v48, 6  ;;  %v242_v42 = vrot.slane %v239_v21, 4 }
 0x107   :  { %420 = vrot.lane.b32.xlu1 %v7182_v39, %s7705_s25  ;;  %v330_v22 = vpop.permute.xlu0 %329 }
 0x108   :  { %707 = vrot.lane.b32.xlu0 %v7199_v43, %s7713_s7  ;;  %v676_v51 = vrot.slane %v7199_v43, 6 }
 0x10b   :  { %300 = vrot.lane.b32.xlu1 %v7174_v40, %s7706_s26  ;;  %v7832_v23 = vpop.permute.xlu0 %389 }
 0x10c   :  { %647 = vrot.lane.b32.xlu0 %v7199_v43, %s7714_s8  ;;  %v574_v55 = vld [vmem:[#allocation2 + $0x8] sm:$0xf] }
 0x10d   :  { %v7192_v56 = vpack.c.bf16 %v574_v55, %v574_v55  ;;  %v450_v57 = vld [vmem:[#allocation2 + $0x8] sm:$0xf] }
 0x10e   :  { %v7184_v58 = vpack.c.bf16 %v450_v57, %v450_v57  ;;  %v516_v59 = vld [vmem:[#allocation2 + $0x8] sm:$0xf] }
 0x10f   :  { %360 = vrot.lane.b32.xlu1 %v7178_v44, %s7707_s27  ;;  %v692_v60 = vld [vmem:[#allocation2 + $0x8] sm:$0xf]  ;;  %v7188_v62 = vpack.c.bf16 %v516_v59, %v516_v59  ;;  %v7834_v24 = vpop.permute.xlu0 %207 }
 0x110   :  { %589 = vrot.lane.b32.xlu0 %v7199_v43, %s7715_s9  ;;  %v7200_v63 = vpack.c.bf16 %v692_v60, %v692_v60  ;;  %v632_v0 = vld [vmem:[#allocation2 + $0x8] sm:$0xf] }
 0x111   :  { %v661_v1 = vld [vmem:[#allocation2 + $0x8] sm:$0xf]  ;;  %v7196_v2 = vpack.c.bf16 %v632_v0, %v632_v0 }
 0x112   :  { %v7198_v3 = vpack.c.bf16 %v661_v1, %v661_v1  ;;  %v602_v6 = vld [vmem:[#allocation2 + $0x8] sm:$0xf]  ;;  %v393_v1 = vrot.slane %v7832_v23, 4 }
 0x113   :  { %240 = vrot.lane.b32.xlu1 %v7170_v45, %s7708_s28  ;;  %v7194_v8 = vpack.c.bf16 %v602_v6, %v602_v6  ;;  %v482_v9 = vld [vmem:[#allocation2 + $0x8] sm:$0xf]  ;;  %v7837_v28 = vpop.permute.xlu0 %269 }
 0x114   :  { %465 = vrot.lane.b32.xlu0 %v7199_v43, %s7701_s21  ;;  %v677_v5 = vrot.slane %v7198_v3, 6  ;;  %v7186_v11 = vpack.c.bf16 %v482_v9, %v482_v9  ;;  %v544_v12 = vld [vmem:[#allocation2 + $0x8] sm:$0xf] }
 0x115   :  { %v618_v10 = vrot.slane %v7194_v8, 6  ;;  %v7190_v14 = vpack.c.bf16 %v544_v12, %v544_v12 }
 0x116   :  { %v498_v13 = vrot.slane %v7186_v11, 6 }
 0x117   :  { %331 = vrot.lane.b32.xlu1 %v328_v47, %s7709_s29  ;;  %v560_v15 = vrot.slane %v7190_v14, 6 }
 0x118   :  { %678 = vrot.lane.b32.xlu0 %v676_v51, %s7716_s10 }
 0x11b   :  { %391 = vrot.lane.b32.xlu1 %v388_v49, %s7710_s30 }
 0x11c   :  { %531 = vrot.lane.b32.xlu0 %v7199_v43, %s7717_s11 }
 0x11f   :  { %209 = vrot.lane.b32.xlu1 %v206_v52, %s7711_s5 }
 0x120   :  { %591 = vrot.lane.b32.xlu0 %v7192_v56, %s7715_s9  ;;  %v333_v56 = vrot.slane %v330_v22, 4 }
 0x123   :  { %271 = vrot.lane.b32.xlu1 %v268_v54, %s7712_s6 }
 0x124   :  { %467 = vrot.lane.b32.xlu0 %v7184_v58, %s7701_s21 }
 0x127   :  { %619 = vrot.lane.b32.xlu1 %v676_v51, %s7718_s12 }
 0x128   :  { %533 = vrot.lane.b32.xlu0 %v7188_v62, %s7717_s11 }
 0x12b   :  { %499 = vrot.lane.b32.xlu1 %v676_v51, %s7720_s13 }
 0x12c   :  { %946 = vperm.xlu0 %7598, %v943_v16  }
 0x12f   :  { %709 = vrot.lane.b32.xlu1 %v7200_v63, %s7713_s7 }
 0x133   :  { %649 = vrot.lane.b32.xlu1 %v7196_v2, %s7714_s8 }
 0x137   :  { %680 = vrot.lane.b32.xlu1 %v677_v5, %s7716_s10 }
 0x13b   :  { %561 = vrot.lane.b32.xlu1 %v676_v51, %s7721_s14 }
 0x13f   :  { %621 = vrot.lane.b32.xlu1 %v618_v10, %s7718_s12  ;;  %v211_v10 = vrot.slane %v7834_v24, 4 }
 0x143   :  { %501 = vrot.lane.b32.xlu1 %v498_v13, %s7720_s13 }
 0x147   :  { %563 = vrot.lane.b32.xlu1 %v560_v15, %s7721_s14 }
 0x14b   :  { %957 = vperm.xlu1 %7599, %v954_v17   ;;  %v273_v17 = vrot.slane %v7837_v28, 4 }
 0x179   :  { %v421_v25 = vpop.permute.xlu1 %420 }
 0x17a   :  { %v423_v27 = vrot.slane %v421_v25, 4  ;;  %430 = vst.msk [vmem:[#allocation3 + $0x58] sm:$0x3] %vm9305_vm14, %v421_v25  ;;  %v7843_v35 = vpop.permute.xlu0 %707 }
 0x17c   :  { %v424_v29 = vsel %vm9325_vm12, %v422_v26, %v423_v27 }
 0x17d   :  { %v426_v30 = vsel %vm9301_vm15, %v419_v18, %v424_v29  ;;  %v301_v31 = vpop.permute.xlu1 %300  ;;  %vm9302_vm15 = vcmask 883712  }
 0x17e   :  { %429 = vst [vmem:[#allocation3 + $0x50] sm:$0x33] %v426_v30  ;;  %v303_v33 = vrot.slane %v301_v31, 4  ;;  %310 = vst.msk [vmem:[#allocation3 + $0x30] sm:$0x3] %vm9305_vm14, %v301_v31  ;;  %v7848_v41 = vpop.permute.xlu0 %647 }
 0x180   :  { %v304_v34 = vsel %vm9325_vm12, %v302_v32, %v303_v33 }
 0x181   :  { %v306_v36 = vsel %vm9299_vm1, %v299_v19, %v304_v34  ;;  %v361_v37 = vpop.permute.xlu1 %360  ;;  %vm9323_vm1 = vcmask 105472  }
 0x182   :  { %309 = vst [vmem:[#allocation3 + $0x28] sm:$0x33] %v306_v36  ;;  %v363_v39 = vrot.slane %v361_v37, 4  ;;  %370 = vst.msk [vmem:[#allocation3 + $0x44] sm:$0x3] %vm9305_vm14, %v361_v37  ;;  %v590_v51 = vpop.permute.xlu0 %589 }
 0x183   :  { %v593_v55 = vrot.slane %v590_v51, 4 }
 0x184   :  { %v364_v40 = vsel %vm9325_vm12, %v362_v38, %v363_v39 }
 0x185   :  { %v366_v43 = vsel %vm9300_vm2, %v359_v20, %v364_v40  ;;  %v241_v44 = vpop.permute.xlu1 %240  ;;  %v733_v45 = vld [vmem:[#allocation3 + $0x50] sm:$0x33]  ;;  %vm7857_vm2 = vmor %vm476_vm7, %vm475_vm5  ;;  %v595_v58 = vsel %vm9323_vm1, %v593_v55, %v590_v51  ;;  %vm9303_vm5 = vcmask 744448   ;;  %vm9307_vm7 = vcmask 1039360  }
 0x186   :  { %369 = vst [vmem:[#allocation3 + $0x3c] sm:$0x33] %v366_v43  ;;  %v243_v46 = vrot.slane %v241_v44, 4  ;;  %250 = vst.msk [vmem:[#allocation3 + $0x1c] sm:$0x3] %vm9305_vm14, %v241_v44  ;;  %v6741_v47 = vcombine.high %v733_v45, %v733_v45  ;;  %v6740_v48 = vcombine.low %v733_v45, %v733_v45  ;;  %v466_v60 = vpop.permute.xlu0 %465  ;;  %vm510_vm14 = vcmask 1047558  }
 0x187   :  { %599 = vst.msk [vmem:[#allocation3 + $0x30] sm:$0x33] %vm7857_vm2, %v595_v58  ;;  %v469_v0 = vrot.slane %v466_v60, 4  ;;  %v711_v44 = vrot.slane %v7843_v35, 4  ;;  %v7926_v51 = vld [vmem:[%s9296_s1] sm:$0x3] }
 0x188   :  { %v244_v49 = vsel %vm9325_vm12, %v242_v42, %v243_v46  ;;  %6745 = vmatprep.subr.msk.bf16.mxu0 %vm9324_vm4, %v6741_v47  ;;  %v807_v50 = vsel %vm9324_vm4, %v6740_v48, 0 }
 0x189   :  { %v246_v52 = vsel %vm9304_vm3, %v239_v21, %v244_v49  ;;  %832 = vmatpush1.bf16.msra.mxu0 %v807_v50  ;;  %v332_v53 = vpop.permute.xlu1 %331  ;;  %v471_v3 = vsel %vm9312_vm6, %v469_v0, %v466_v60  ;;  %vm509_vm3 = vcmask 1043714  }
 0x18a   :  { %249 = vst [vmem:[#allocation3 + $0x14] sm:$0x33] %v246_v52  ;;  %v334_v57 = vrot.slane %v332_v53, 4  ;;  %341 = vst.msk [vmem:[#allocation3 + $0x30] sm:$0xc] %vm9308_vm0, %v332_v53  ;;  %v7873_v6 = vpop.permute.xlu0 %678  ;;  %v651_v52 = vrot.slane %v7848_v41, 4 }
 0x18b   :  { %478 = vst.msk [vmem:[#allocation3 + $0x8] sm:$0x33] %vm7857_vm2, %v471_v3  ;;  %v682_v58 = vrot.slane %v7873_v6, 4 }
 0x18c   :  { %v335_v59 = vsel %vm9325_vm12, %v333_v56, %v334_v57 }
 0x18d   :  { %v337_v62 = vsel %vm9302_vm15, %v330_v22, %v335_v59  ;;  %v392_v63 = vpop.permute.xlu1 %391  ;;  %vm9309_vm15 = vcmask 244736  }
 0x18e   :  { %340 = vst [vmem:[#allocation3 + $0x28] sm:$0xcc] %v337_v62  ;;  %v394_v2 = vrot.slane %v392_v63, 4  ;;  %401 = vst.msk [vmem:[#allocation3 + $0x44] sm:$0xc] %vm9308_vm0, %v392_v63  ;;  %v532_v13 = vpop.permute.xlu0 %531 }
 0x18f   :  { %v535_v16 = vrot.slane %v532_v13, 4 }
 0x190   :  { %v395_v5 = vsel %vm9325_vm12, %v393_v1, %v394_v2 }
 0x191   :  { %v397_v8 = vsel %vm9303_vm5, %v7832_v23, %v395_v5  ;;  %v210_v9 = vpop.permute.xlu1 %209  ;;  %vm9310_vm5 = vcmask 900096   ;;  %v537_v19 = vsel %vm9309_vm15, %v535_v16, %v532_v13 }
 0x192   :  { %400 = vst [vmem:[#allocation3 + $0x3c] sm:$0xcc] %v397_v8  ;;  %v212_v11 = vrot.slane %v210_v9, 4  ;;  %221 = vst.msk [vmem:[#allocation3 + $0x8] sm:$0xc] %vm9308_vm0, %v210_v9  ;;  %v592_v21 = vpop.permute.xlu0 %591 }
 0x193   :  { %541 = vst.msk [vmem:[#allocation3 + $0x1c] sm:$0x33] %vm7857_vm2, %v537_v19  ;;  %v596_v26 = vsel %vm9323_vm1, %v593_v55, %v592_v21 }
 0x194   :  { %v214_v12 = vsel %vm9325_vm12, %v211_v10, %v212_v11  ;;  %600 = vst.msk [vmem:[#allocation3 + $0x38] sm:$0x3] %vm9313_vm13, %v596_v26 }
 0x195   :  { %v216_v14 = vsel %vm9307_vm7, %v7834_v24, %v214_v12  ;;  %v272_v15 = vpop.permute.xlu1 %271  ;;  %v727_v22 = vld [vmem:[#allocation3 + $0x28] sm:$0xff]  ;;  %vm9322_vm7 = vcmask 97280  }
 0x196   :  { %219 = vst [vmem:[#allocation3] sm:$0xcc] %v216_v14  ;;  %v274_v18 = vrot.slane %v272_v15, 4  ;;  %281 = vst.msk [vmem:[#allocation3 + $0x1c] sm:$0xc] %vm9308_vm0, %v272_v15  ;;  %v468_v32 = vpop.permute.xlu0 %467 }
 0x197   :  { %vm7893_vm0 = vmor %vm510_vm14, %vm509_vm3  ;;  %vm9321_vm14 = vcmask 252928   ;;  %v472_v34 = vsel %vm9312_vm6, %v469_v0, %v468_v32  ;;  %vm9311_vm3 = vcmask 998400   ;;  %vm9318_vm6 = vmmov 0  }
 0x198   :  { %v275_v20 = vsel %vm9325_vm12, %v273_v17, %v274_v18  ;;  %480 = vst.msk [vmem:[#allocation3 + $0x10] sm:$0x3] %vm9313_vm13, %v472_v34 }
 0x199   :  { %v730_v23 = vld [vmem:[#allocation3 + $0x3c] sm:$0xff]  ;;  %v277_v24 = vsel %vm9310_vm5, %v7837_v28, %v275_v20  ;;  %v7890_v25 = vpop.permute.xlu1 %619  ;;  %vm9314_vm5 = vcmask 1014784  }
 0x19a   :  { %280 = vst [vmem:[#allocation3 + $0x14] sm:$0xcc] %v277_v24  ;;  %v623_v29 = vrot.slane %v7890_v25, 4  ;;  %v6736_v30 = vcombine.high %v727_v22, %v730_v23  ;;  %v6735_v31 = vcombine.low %v727_v22, %v730_v23  ;;  %v534_v38 = vpop.permute.xlu0 %533 }
 0x19b   :  { %v538_v43 = vsel %vm9309_vm15, %v535_v16, %v534_v38  ;;  %vm9320_vm15 = vcmask 293888  }
 0x19c   :  { %v625_v28 = vsel %vm9322_vm7, %v623_v29, %v7890_v25  ;;  %833 = vmatprep.subr.bf16.mxu0 %v6736_v30  ;;  %542 = vst.msk [vmem:[#allocation3 + $0x24] sm:$0x3] %vm9313_vm13, %v538_v43  ;;  %v22_v30 = vlaneseq }
 0x19d   :  { %629 = vst.msk [vmem:[#allocation3 + $0x30] sm:$0xcc] %vm7893_vm0, %v625_v28  ;;  %834 = vmatpush1.bf16.msra.mxu0 %v6735_v31  ;;  %v7905_v33 = vpop.permute.xlu1 %499  ;;  %v721_v39 = vld [vmem:[#allocation3] sm:$0xff] }
 0x19e   :  { %v503_v36 = vrot.slane %v7905_v33, 4  ;;  %v23_v31 = vand.u32 127, %v22_v30 }
 0x1a0   :  { %v505_v37 = vsel %vm9321_vm14, %v503_v36, %v7905_v33  ;;  %v24_v28 = vadd.s32 128, %v23_v31  ;;  %v7973_v32 = vmul.u32.u64.low 3817748708, %v23_v31  ;;  %v7974_v33 = vmul.u32.u64.high 3817748708, %v23_v31, %v7973_v32 }
 0x1a1   :  { %v724_v40 = vld [vmem:[#allocation3 + $0x14] sm:$0xff]  ;;  %512 = vst.msk [vmem:[#allocation3 + $0x8] sm:$0xcc] %vm7893_vm0, %v505_v37  ;;  %v710_v42 = vpop.permute.xlu1 %709 }
 0x1a2   :  { %v712_v45 = vrot.slane %v710_v42, 4  ;;  %719 = vst.msk [vmem:[#allocation3 + $0x60] sm:$0x3] %vm9313_vm13, %v710_v42  ;;  %v6731_v46 = vcombine.high %v721_v39, %v724_v40  ;;  %v6730_v47 = vcombine.low %v721_v39, %v724_v40  ;;  %v34_v37 = vshrl.u32 %v7974_v33, 4 }
 0x1a4   :  { %v713_v48 = vsel %vm9325_vm12, %v711_v44, %v712_v45  ;;  %835 = vmatprep.subr.bf16.mxu0 %v6731_v46  ;;  %v728_v10 = vld [vmem:[#allocation3 + $0x30] sm:$0xff]  ;;  %v35_v39 = vmul.u32 18, %v34_v37  ;;  %v25_v44 = vadd.s32 256, %v23_v31  ;;  %v26_v46 = vadd.s32 384, %v23_v31 }
 0x1a5   :  { %v715_v49 = vsel %vm9311_vm3, %v7843_v35, %v713_v48  ;;  %836 = vmatpush1.bf16.msra.mxu0 %v6730_v47  ;;  %v650_v50 = vpop.permute.xlu1 %649  ;;  %vm9317_vm3 = vcmask 519170  }
 0x1a6   :  { %718 = vst.msk [vmem:[#allocation3 + $0x58] sm:$0x33] %vm7857_vm2, %v715_v49  ;;  %v652_v53 = vrot.slane %v650_v50, 4  ;;  %7485 = vmatprep.subr.bf16.mxu0 %v7703_v4  ;;  %v36_v42 = vsub.s32 %v23_v31, %v35_v39  ;;  %v7981_v48 = vmul.u32.u64.low 3817748708, %v25_v44  ;;  %v7982_v49 = vmul.u32.u64.high 3817748708, %v25_v44, %v7981_v48 }
 0x1a7   :  { %659 = vst.msk [vmem:[#allocation3 + $0x4c] sm:$0x3] %vm9313_vm13, %v650_v50  ;;  %vm9316_vm13 = vcmask 1006592   ;;  %v7984_v50 = vpop.permute.xlu0 %946 }
 0x1a8   :  { %v653_v35 = vsel %vm9325_vm12, %v651_v52, %v652_v53  ;;  %6746 = vmatmul.mubr.msk.bf16.vlgmr.msra.gmra.mxu0 %vm9320_vm15, %v7926_v51  ;;  %v722_v16 = vld [vmem:[#allocation3 + $0x8] sm:$0xff]  ;;  %v98_v45 = vadd.s32 18, %v36_v42  ;;  %v7986_v52 = vmul.u32.u64.low 3817748708, %v26_v46  ;;  %v7987_v53 = vmul.u32.u64.high 3817748708, %v26_v46, %v7986_v52 }
 0x1a9   :  { %v655_v55 = vsel %vm9314_vm5, %v7848_v41, %v653_v35  ;;  %v681_v56 = vpop.permute.xlu1 %680  ;;  %v7604_v57 = vld [vmem:[#allocation3 + $0x60] ss:$0 sps:$4 sm:$0x33]   ;;  %7491 = vmatprep.mubr.msk.bf16.mxu0 %vm9318_vm6, %v7703_v4  ;;  %vm9315_vm5 = vcmask 113664  }
 0x1aa   :  { %658 = vst.msk [vmem:[#allocation3 + $0x44] sm:$0x33] %vm7857_vm2, %v655_v55  ;;  %v683_v59 = vrot.slane %v681_v56, 4  ;;  %v819_v60 = vsel %vm9324_vm4, %v7604_v57, 0  ;;  %v27_v57 = vadd.s32 512, %v23_v31 }
 0x1ab   :  { %690 = vst.msk [vmem:[#allocation3 + $0x4c] sm:$0xc] %vm9317_vm3, %v681_v56  ;;  %7486 = vmatpush3.bf16.msra.mxu0 %v819_v60 }
 0x1ac   :  { %v684_v62 = vsel %vm9325_vm12, %v682_v58, %v683_v59  ;;  %7487 = vmatprep.subr.bf16.mxu0 %v7703_v4 }
 0x1ad   :  { %v734_v41 = vld [vmem:[#allocation3 + $0x58] sm:$0x33]  ;;  %v686_v63 = vsel %vm9316_vm13, %v7873_v6, %v684_v62  ;;  %v562_v0 = vpop.permute.xlu1 %561  ;;  %vm88_vm13 = vcmp.lt.s32.totalorder %v36_v42, 0 }
 0x1ae   :  { %689 = vst.msk [vmem:[#allocation3 + $0x44] sm:$0xcc] %vm7893_vm0, %v686_v63  ;;  %v565_v1 = vrot.slane %v562_v0, 4  ;;  %v6743_v2 = vcombine.high %v734_v41, %v734_v41  ;;  %v6742_v3 = vcombine.low %v734_v41, %v734_v41 }
 0x1b0   :  { %v567_v5 = vsel %vm9315_vm5, %v565_v1, %v562_v0  ;;  %6747 = vmatprep.subr.msk.bf16.mxu1 %vm9324_vm4, %v6743_v2  ;;  %v813_v8 = vsel %vm9324_vm4, %v6742_v3, 0 }
 0x1b1   :  { %571 = vst.msk [vmem:[#allocation3 + $0x1c] sm:$0xcc] %vm7893_vm0, %v567_v5  ;;  %873 = vmatpush1.bf16.msra.mxu1 %v813_v8  ;;  %v622_v6 = vpop.permute.xlu1 %621  ;;  %v56_v5 = vshrl.u32 %v7982_v49, 4 }
 0x1b2   :  { %v626_v9 = vsel %vm9322_vm7, %v623_v29, %v622_v6  ;;  %v732_v20 = vld [vmem:[#allocation3 + $0x4c] sm:$0xf] }
 0x1b3   :  { %630 = vst.msk [vmem:[#allocation3 + $0x38] sm:$0xc] %vm9317_vm3, %v626_v9  ;;  %v67_v9 = vshrl.u32 %v7987_v53, 4 }
 0x1b5   :  { %v731_v11 = vld [vmem:[#allocation3 + $0x44] sm:$0xff]  ;;  %v502_v12 = vpop.permute.xlu1 %501 }
 0x1b6   :  { %v506_v13 = vsel %vm9321_vm14, %v503_v36, %v502_v12  ;;  %v6738_v14 = vcombine.high %v728_v10, %v731_v11  ;;  %v6737_v15 = vcombine.low %v728_v10, %v731_v11 }
 0x1b7   :  { %514 = vst.msk [vmem:[#allocation3 + $0x10] sm:$0xc] %vm9317_vm3, %v506_v13  ;;  %v7976_v34 = vmul.u32.u64.low 3817748708, %v24_v28  ;;  %v7977_v36 = vmul.u32.u64.high 3817748708, %v24_v28, %v7976_v34  ;;  %v57_v13 = vmul.u32 18, %v56_v5 }
 0x1b8   :  { %v725_v17 = vld [vmem:[#allocation3 + $0x1c] sm:$0xff]  ;;  %874 = vmatprep.subr.bf16.mxu1 %v6738_v14  ;;  %v68_v14 = vmul.u32 18, %v67_v9 }
 0x1b9   :  { %875 = vmatpush1.bf16.msra.mxu1 %v6737_v15  ;;  %v564_v18 = vpop.permute.xlu1 %563  ;;  %v6733_v19 = vcombine.high %v722_v16, %v725_v17  ;;  %v6732_v23 = vcombine.low %v722_v16, %v725_v17  ;;  %v45_v38 = vshrl.u32 %v7977_v36, 4  ;;  %v58_v17 = vsub.s32 %v25_v44, %v57_v13 }
 0x1ba   :  { %v729_v21 = vld [vmem:[#allocation3 + $0x38] sm:$0xf]  ;;  %v568_v22 = vsel %vm9315_vm5, %v565_v1, %v564_v18  ;;  %vm83_vm5 = vcmp.ne.s32.totalorder %v36_v42, 0  ;;  %v7997_v0 = vmul.u32.u64.low 3817748708, %v27_v57  ;;  %v7998_v1 = vmul.u32.u64.high 3817748708, %v27_v57, %v7997_v0 }
 0x1bb   :  { %572 = vst.msk [vmem:[#allocation3 + $0x24] sm:$0xc] %vm9317_vm3, %v568_v22  ;;  %876 = vmatprep.subr.bf16.mxu1 %v6733_v19  ;;  %v6739_v24 = vcombine.low %v729_v21, %v732_v20  ;;  %v46_v40 = vmul.u32 18, %v45_v38  ;;  %v69_v18 = vsub.s32 %v26_v46, %v68_v14  ;;  %v100_v20 = vadd.s32 18, %v58_v17 }
 0x1bc   :  { %v78_v16 = vshrl.u32 %v7998_v1, 4 }
 0x1bd   :  { %877 = vmatpush1.bf16.msra.mxu1 %v6732_v23  ;;  %7488 = vmatpush3.bf16.msra.mxu0 %v6739_v24  ;;  %v47_v43 = vsub.s32 %v24_v28, %v46_v40  ;;  %v101_v21 = vadd.s32 18, %v69_v18 }
 0x1be   :  { %7489 = vmatprep.subr.bf16.mxu0 %v7703_v4  ;;  %v723_v25 = vld [vmem:[#allocation3 + $0x10] sm:$0xf]  ;;  %v79_v19 = vmul.u32 18, %v78_v16 }
 0x1bf   :  { %vm84_vm3 = vcmp.ne.s32.totalorder %v47_v43, 0  ;;  %vm89_vm6 = vcmp.lt.s32.totalorder %v47_v43, 0  ;;  %v99_v47 = vadd.s32 18, %v47_v43 }
 0x1c0   :  { %6748 = vmatmul.mubr.msk.bf16.vlgmr.msra.gmra.mxu1 %vm9320_vm15, %v7926_v51  ;;  %vm94_vm14 = vmand %vm89_vm6, %vm84_vm3  ;;  %v80_v22 = vsub.s32 %v27_v57, %v79_v19 }
 0x1c1   :  { %1655 = vmatprep.mubr.bf16.mxu1 %v7719_v61  ;;  %v104_v55 = vsel %vm94_vm14, %v99_v47, %v47_v43 }
 0x1c2   :  { %v726_v26 = vld [vmem:[#allocation3 + $0x24] sm:$0xf]  ;;  %vm109_vm6 = vcmp.lt.s32.totalorder %v104_v55, 16  ;;  %vm92_vm1 = vcmp.lt.s32.totalorder %v80_v22, 0  ;;  %v102_v30 = vadd.s32 18, %v80_v22 }
 0x1c3   :  { %v6734_v29 = vcombine.low %v723_v25, %v726_v26  ;;  %v8003_v8 = vsel %vm109_vm6, 1.0, %v7703_v4  ;;  %vm87_vm6 = vcmp.ne.s32.totalorder %v80_v22, 0 }
 0x1c5   :  { %7490 = vmatpush3.bf16.msra.mxu0 %v6734_v29 }
 0x1c6   :  { %v7989_v56 = vpop.permute.xlu1 %957 }
 0x1c8   :  { %7492 = vmatmul.mubr.msk.bf16.vlgmr.msra.gmra.mxu0 %vm9320_vm15, %v7926_v51  ;;  %vm93_vm15 = vmand %vm88_vm13, %vm83_vm5  ;;  %vm85_vm13 = vcmp.ne.s32.totalorder %v58_v17, 0  ;;  %vm86_vm5 = vcmp.ne.s32.totalorder %v69_v18, 0 }
 0x1c9   :  { %1696 = vmatprep.mubr.bf16.mxu0 %v7719_v61  ;;  %v103_v51 = vsel %vm93_vm15, %v98_v45, %v36_v42  ;;  %vm90_vm15 = vcmp.lt.s32.totalorder %v58_v17, 0 }
 0x1ca   :  { %vm108_vm7 = vcmp.lt.s32.totalorder %v103_v51, 16  ;;  %vm95_vm14 = vmand %vm90_vm15, %vm85_vm13 }
 0x1cb   :  { %v7995_v41 = vsel %vm108_vm7, 1.0, %v7703_v4  ;;  %vm91_vm7 = vcmp.lt.s32.totalorder %v69_v18, 0  ;;  %v105_v23 = vsel %vm95_vm14, %v100_v20, %v58_v17  ;;  %vm97_vm13 = vmand %vm92_vm1, %vm87_vm6  ;;  %vm9333_vm1 = vcmask 941056  }
 0x1cc   :  { %vm96_vm3 = vmand %vm91_vm7, %vm86_vm5  ;;  %vm110_vm4 = vcmp.lt.s32.totalorder %v105_v23, 16  ;;  %v107_v39 = vsel %vm97_vm13, %v102_v30, %v80_v22  ;;  %vm9337_vm14 = vcmask 736256   ;;  %vm9340_vm13 = vcmask 891904  }
 0x1cd   :  { %v106_v25 = vsel %vm96_vm3, %v101_v21, %v69_v18  ;;  %v8015_v36 = vsel %vm110_vm4, 1.0, %v7703_v4  ;;  %vm112_vm15 = vcmp.lt.s32.totalorder %v107_v39, 16  ;;  %vm9334_vm4 = vcmask 254976  }
 0x1ce   :  { %vm111_vm12 = vcmp.lt.s32.totalorder %v106_v25, 16  ;;  %v8025_v49 = vsel %vm112_vm15, 1.0, %v7703_v4  ;;  %vm9335_vm5 = vmmov %vm9334_vm4 }
 0x1cf   :  { %v8018_v37 = vsel %vm111_vm12, 1.0, %v7703_v4  ;;  %vm9332_vm12 = vcmask 1043456   ;;  %vm9338_vm3 = vmmov %vm9334_vm4 }
 0x1d0   :  { %vm9336_vm7 = vmmov %vm9332_vm12 }
 0x1d1   :  { %vm9339_vm6 = vmmov %vm9336_vm7 }
 0x1d2   :  { %vm9341_vm15 = vmmov %vm9338_vm3 }
 0x268   :  { %v855_v35 = vpop.f32.mrf.mxu0 }
 0x269   :  { %v949_v58 = vmul.f32 %v7984_v50, %v855_v35 }
 0x26a   :  { %v857_v59 = vpop.f32.mrf.mxu0 }
 0x26b   :  { %v950_v60 = vmul.f32 %v7984_v50, %v857_v59  ;;  %v960_v62 = vadd.f32 %v7989_v56, %v949_v58 }
 0x26c   :  { %v859_v63 = vpop.f32.mrf.mxu0 }
 0x26d   :  { %v961_v2 = vadd.f32 %v7989_v56, %v950_v60  ;;  %v965_v3 = vmax.f32 %v960_v62, 0.0 }
 0x26e   :  { %v860_v6 = vpop.f32.mrf.mxu0 }
 0x26f   :  { %v966_v10 = vmax.f32 %v961_v2, 0.0  ;;  %v970_v11 = vmul.f32 %v7995_v41, %v965_v3 }
 0x271   :  { %v971_v12 = vmul.f32 %v8003_v8, %v966_v10 }
 0x273   :  { %v979_v15 = vcombine.low %v970_v11, %v971_v12 }
 0x275   :  { %990 = vrot.lane.b32.xlu1 %v979_v15, %s7702_s22 }
 0x280   :  { %v896_v24 = vpop.f32.mrf.mxu1 }
 0x281   :  { %v951_v26 = vmul.f32 %v7984_v50, %v896_v24 }
 0x282   :  { %v898_v29 = vpop.f32.mrf.mxu1 }
 0x283   :  { %v962_v31 = vadd.f32 %v7989_v56, %v951_v26  ;;  %v952_v28 = vmul.f32 %v7984_v50, %v898_v29 }
 0x284   :  { %v900_v32 = vpop.f32.mrf.mxu1 }
 0x285   :  { %v967_v33 = vmax.f32 %v962_v31, 0.0  ;;  %v963_v34 = vadd.f32 %v7989_v56, %v952_v28 }
 0x286   :  { %v901_v38 = vpop.f32.mrf.mxu1 }
 0x287   :  { %v968_v40 = vmax.f32 %v963_v34, 0.0  ;;  %v972_v43 = vmul.f32 %v8015_v36, %v967_v33 }
 0x288   :  { %v937_v42 = vpop.f32.mrf.mxu0 }
 0x289   :  { %v973_v44 = vmul.f32 %v8018_v37, %v968_v40  ;;  %v953_v45 = vmul.f32 %v7984_v50, %v937_v42 }
 0x28a   :  { %v7493_v46 = vpop.f32.mrf.mxu0 }
 0x28b   :  { %v980_v47 = vcombine.low %v972_v43, %v973_v44  ;;  %v964_v48 = vadd.f32 %v7989_v56, %v953_v45 }
 0x28c   :  { %v940_v51 = vpop.f32.mrf.mxu0 }
 0x28d   :  { %984 = vst [vmem:[#allocation5 + $0x8] sm:$0xff] %v980_v47  ;;  %v969_v52 = vmax.f32 %v964_v48, 0.0  ;;  %1257 = vrot.lane.b32.xlu1 %v980_v47, %s7704_s0 }
 0x28e   :  { %v7494_v53 = vpop.f32.mrf.mxu0 }
 0x28f   :  { %v974_v35 = vmul.f32 %v8025_v49, %v969_v52 }
 0x291   :  { %985 = vst.msk [vmem:[#allocation5 + $0x10] sm:$0xf] %vm147_vm10, %v974_v35 }
 0x294   :  { %v987_v55 = vld [vmem:[#allocation5 + $0x8] sm:$0xf] }
 0x295   :  { %992 = vrot.lane.b32.xlu0 %v987_v55, %s7702_s22 }
 0x298   :  { %v1254_v50 = vld [vmem:[#allocation5 + $0x10] sm:$0xf] }
 0x299   :  { %1259 = vrot.lane.b32.xlu0 %v1254_v50, %s7704_s0  ;;  %v6807_v50 = vld [vmem:[%s9294_s2 + $0x4] sm:$0xf] }
 0x2e7   :  { %v991_v56 = vpop.permute.xlu1 %990 }
 0x2e8   :  { %v994_v57 = vrot.slane %v991_v56, 4 }
 0x2ea   :  { %v995_v58 = vsel %vm158_vm8, %v994_v57, %v991_v56 }
 0x2eb   :  { %999 = vst.msk [vmem:[#allocation2] sm:$0xff] %vm7767_vm9, %v995_v58 }
 0x2f2   :  { %v1001_v59 = vld [vmem:[#allocation2] sm:$0xff] }
 0x2f3   :  { %v1004_v60 = vcombine.high %v1001_v59, %v1001_v59 }
 0x2f5   :  { %v7201_v62 = vpack.c.bf16 %v1004_v60, %v1001_v59 }
 0x2f7   :  { %1019 = vst [vmem:[#allocation3] sm:$0x33] %v7201_v62  ;;  %1241 = vrot.lane.b32.xlu1 %v7201_v62, %s7705_s25  ;;  %v1153_v63 = vrot.slane %v7201_v62, 6 }
 0x2fb   :  { %1125 = vrot.lane.b32.xlu1 %v7201_v62, %s7706_s26 }
 0x2ff   :  { %1183 = vrot.lane.b32.xlu1 %v7201_v62, %s7707_s27  ;;  %v1258_v2 = vpop.permute.xlu1 %1257 }
 0x300   :  { %v1261_v5 = vrot.slane %v1258_v2, 4 }
 0x303   :  { %1067 = vrot.lane.b32.xlu1 %v7201_v62, %s7708_s28 }
 0x307   :  { %v993_v0 = vpop.permute.xlu0 %992  ;;  %1155 = vrot.lane.b32.xlu1 %v1153_v63, %s7709_s29 }
 0x308   :  { %v996_v1 = vsel %vm158_vm8, %v994_v57, %v993_v0 }
 0x309   :  { %1000 = vst.msk [vmem:[#allocation2 + $0x8] sm:$0xf] %vm166_vm11, %v996_v1 }
 0x30b   :  { %v1260_v3 = vpop.permute.xlu0 %1259  ;;  %1213 = vrot.lane.b32.xlu1 %v1153_v63, %s7710_s30 }
 0x30c   :  { %v1262_v6 = vrot.slane %v1260_v3, 4 }
 0x30e   :  { %v1263_v9 = vsel %vm9332_vm12, %v1261_v5, %v1262_v6  ;;  %vm9342_vm12 = vmmov %vm9339_vm6 }
 0x30f   :  { %v1264_v10 = vsel %vm9333_vm1, %v1258_v2, %v1263_v9  ;;  %1039 = vrot.lane.b32.xlu1 %v1153_v63, %s7711_s5  ;;  %vm9343_vm1 = vcmask 752640  }
 0x310   :  { %v1002_v11 = vld [vmem:[#allocation2 + $0x8] sm:$0xf]  ;;  %1267 = vst.msk [vmem:[#allocation2] sm:$0xff] %vm7767_vm9, %v1264_v10 }
 0x311   :  { %v1226_v12 = vld [vmem:[#allocation2 + $0x8] sm:$0xf]  ;;  %v7202_v18 = vpack.c.bf16 %v1002_v11, %v1002_v11 }
 0x312   :  { %v1110_v13 = vld [vmem:[#allocation2 + $0x8] sm:$0xf]  ;;  %v7218_v14 = vpack.c.bf16 %v1226_v12, %v1226_v12 }
 0x313   :  { %v1168_v15 = vld [vmem:[#allocation2 + $0x8] sm:$0xf]  ;;  %1097 = vrot.lane.b32.xlu1 %v1153_v63, %s7712_s6  ;;  %1020 = vst.msk [vmem:[#allocation3 + $0x8] sm:$0x3] %vm9334_vm4, %v7202_v18  ;;  %v7210_v22 = vpack.c.bf16 %v1110_v13, %v1110_v13  ;;  %vm9344_vm4 = vmmov %vm9338_vm3 }
 0x314   :  { %v1052_v16 = vld [vmem:[#allocation2 + $0x8] sm:$0xf]  ;;  %1243 = vrot.lane.b32.xlu0 %v7218_v14, %s7705_s25  ;;  %v7214_v25 = vpack.c.bf16 %v1168_v15, %v1168_v15 }
 0x315   :  { %v1138_v17 = vld [vmem:[#allocation2 + $0x8] sm:$0xf]  ;;  %v7206_v29 = vpack.c.bf16 %v1052_v16, %v1052_v16 }
 0x316   :  { %v1196_v19 = vld [vmem:[#allocation2 + $0x8] sm:$0xf]  ;;  %v7212_v30 = vpack.c.bf16 %v1138_v17, %v1138_v17 }
 0x317   :  { %v1022_v20 = vld [vmem:[#allocation2 + $0x8] sm:$0xf]  ;;  %v1495_v23 = vld [vmem:[#allocation2] sm:$0xff]  ;;  %v7216_v28 = vpack.c.bf16 %v1196_v19, %v1196_v19 }
 0x318   :  { %v1080_v21 = vld [vmem:[#allocation2 + $0x8] sm:$0xf]  ;;  %1127 = vrot.lane.b32.xlu0 %v7210_v22, %s7706_s26  ;;  %v1498_v24 = vcombine.high %v1495_v23, %v1495_v23  ;;  %v1154_v31 = vrot.slane %v7212_v30, 6  ;;  %v7204_v33 = vpack.c.bf16 %v1022_v20, %v1022_v20 }
 0x319   :  { %1268 = vst.msk [vmem:[#allocation2 + $0x8] sm:$0xf] %vm166_vm11, %v1260_v3  ;;  %v1212_v32 = vrot.slane %v7216_v28, 6  ;;  %v7208_v38 = vpack.c.bf16 %v1080_v21, %v1080_v21  ;;  %v6808_v3 = vld [vmem:[%s9295_s3 + $0x4] sm:$0xf] }
 0x31a   :  { %v7235_v26 = vpack.c.bf16 %v1498_v24, %v1495_v23  ;;  %v1038_v34 = vrot.slane %v7204_v33, 6 }
 0x31b   :  { %v1096_v40 = vrot.slane %v7208_v38, 6 }
 0x31c   :  { %1185 = vrot.lane.b32.xlu0 %v7214_v25, %s7707_s27  ;;  %1511 = vrot.lane.b32.xlu1 %v7235_v26, %s7713_s7  ;;  %v1481_v39 = vrot.slane %v7235_v26, 6 }
 0x320   :  { %1069 = vrot.lane.b32.xlu0 %v7206_v29, %s7708_s28  ;;  %1453 = vrot.lane.b32.xlu1 %v7235_v26, %s7714_s8  ;;  %v1382_v42 = vld [vmem:[#allocation2 + $0x8] sm:$0xf] }
 0x321   :  { %v7228_v43 = vpack.c.bf16 %v1382_v42, %v1382_v42  ;;  %v1270_v44 = vld [vmem:[#allocation2 + $0x8] sm:$0xf] }
 0x322   :  { %v1496_v45 = vld [vmem:[#allocation2 + $0x8] sm:$0xf]  ;;  %v7220_v46 = vpack.c.bf16 %v1270_v44, %v1270_v44 }
 0x323   :  { %v1326_v47 = vld [vmem:[#allocation2 + $0x8] sm:$0xf]  ;;  %v7236_v48 = vpack.c.bf16 %v1496_v45, %v1496_v45 }
 0x324   :  { %1157 = vrot.lane.b32.xlu0 %v1154_v31, %s7709_s29  ;;  %1397 = vrot.lane.b32.xlu1 %v7235_v26, %s7715_s9  ;;  %v1438_v51 = vld [vmem:[#allocation2 + $0x8] sm:$0xf]  ;;  %v7224_v52 = vpack.c.bf16 %v1326_v47, %v1326_v47 }
 0x325   :  { %v1466_v53 = vld [vmem:[#allocation2 + $0x8] sm:$0xf]  ;;  %v7232_v35 = vpack.c.bf16 %v1438_v51, %v1438_v51 }
 0x326   :  { %v7234_v55 = vpack.c.bf16 %v1466_v53, %v1466_v53  ;;  %v1409_v57 = vld [vmem:[#allocation2 + $0x8] sm:$0xf] }
 0x327   :  { %v7230_v58 = vpack.c.bf16 %v1409_v57, %v1409_v57  ;;  %v1297_v59 = vld [vmem:[#allocation2 + $0x8] sm:$0xf] }
 0x328   :  { %1215 = vrot.lane.b32.xlu0 %v1212_v32, %s7710_s30  ;;  %1285 = vrot.lane.b32.xlu1 %v7235_v26, %s7701_s21  ;;  %v1482_v56 = vrot.slane %v7234_v55, 6  ;;  %v7222_v62 = vpack.c.bf16 %v1297_v59, %v1297_v59  ;;  %v1353_v63 = vld [vmem:[#allocation2 + $0x8] sm:$0xf] }
 0x329   :  { %v1425_v60 = vrot.slane %v7230_v58, 6  ;;  %v7226_v1 = vpack.c.bf16 %v1353_v63, %v1353_v63 }
 0x32a   :  { %v1313_v0 = vrot.slane %v7222_v62, 6 }
 0x32b   :  { %v1369_v2 = vrot.slane %v7226_v1, 6 }
 0x32c   :  { %1041 = vrot.lane.b32.xlu0 %v1038_v34, %s7711_s5  ;;  %1483 = vrot.lane.b32.xlu1 %v1481_v39, %s7716_s10 }
 0x330   :  { %1099 = vrot.lane.b32.xlu0 %v1096_v40, %s7712_s6  ;;  %1341 = vrot.lane.b32.xlu1 %v7235_v26, %s7717_s11 }
 0x334   :  { %1426 = vrot.lane.b32.xlu0 %v1481_v39, %s7718_s12  ;;  %1399 = vrot.lane.b32.xlu1 %v7228_v43, %s7715_s9 }
 0x338   :  { %1314 = vrot.lane.b32.xlu0 %v1481_v39, %s7720_s13  ;;  %1287 = vrot.lane.b32.xlu1 %v7220_v46, %s7701_s21 }
 0x33c   :  { %1513 = vrot.lane.b32.xlu0 %v7236_v48, %s7713_s7  ;;  %1343 = vrot.lane.b32.xlu1 %v7224_v52, %s7717_s11 }
 0x340   :  { %1455 = vrot.lane.b32.xlu0 %v7232_v35, %s7714_s8  ;;  %1749 = vperm.xlu1 %7599, %v6807_v50  }
 0x344   :  { %1485 = vrot.lane.b32.xlu0 %v1482_v56, %s7716_s10 }
 0x348   :  { %1370 = vrot.lane.b32.xlu0 %v1481_v39, %s7721_s14 }
 0x34c   :  { %1428 = vrot.lane.b32.xlu0 %v1425_v60, %s7718_s12 }
 0x350   :  { %1316 = vrot.lane.b32.xlu0 %v1313_v0, %s7720_s13 }
 0x354   :  { %1372 = vrot.lane.b32.xlu0 %v1369_v2, %s7721_s14 }
 0x358   :  { %1761 = vperm.xlu0 %7598, %v6808_v3  }
 0x369   :  { %v1242_v5 = vpop.permute.xlu1 %1241 }
 0x36a   :  { %v1245_v15 = vrot.slane %v1242_v5, 4 }
 0x36d   :  { %v1126_v6 = vpop.permute.xlu1 %1125 }
 0x36e   :  { %v1129_v20 = vrot.slane %v1126_v6, 4 }
 0x371   :  { %v1184_v9 = vpop.permute.xlu1 %1183 }
 0x372   :  { %v1187_v26 = vrot.slane %v1184_v9, 4 }
 0x375   :  { %v1068_v10 = vpop.permute.xlu1 %1067 }
 0x376   :  { %v1071_v34 = vrot.slane %v1068_v10, 4 }
 0x379   :  { %v1156_v11 = vpop.permute.xlu1 %1155 }
 0x37a   :  { %v1159_v47 = vrot.slane %v1156_v11, 4 }
 0x37d   :  { %v1214_v12 = vpop.permute.xlu1 %1213 }
 0x37e   :  { %v1217_v56 = vrot.slane %v1214_v12, 4 }
 0x381   :  { %v8083_v13 = vpop.permute.xlu1 %1039 }
 0x382   :  { %v1043_v1 = vrot.slane %v8083_v13, 4 }
 0x385   :  { %v8089_v22 = vpop.permute.xlu1 %1097 }
 0x386   :  { %v1244_v14 = vpop.permute.xlu0 %1243 }
 0x387   :  { %v1246_v16 = vrot.slane %v1244_v14, 4  ;;  %1252 = vst.msk [vmem:[#allocation3 + $0x58] sm:$0x3] %vm9335_vm5, %v1244_v14  ;;  %vm9345_vm5 = vmmov %vm9339_vm6 }
 0x389   :  { %v1247_v17 = vsel %vm9336_vm7, %v1245_v15, %v1246_v16  ;;  %vm9346_vm7 = vcmask 1041408  }
 0x38a   :  { %v1248_v18 = vsel %vm9337_vm14, %v1242_v5, %v1247_v17  ;;  %v1128_v19 = vpop.permute.xlu0 %1127  ;;  %vm9347_vm14 = vmmov %vm9346_vm7 }
 0x38b   :  { %1251 = vst [vmem:[#allocation3 + $0x50] sm:$0x33] %v1248_v18  ;;  %v1130_v21 = vrot.slane %v1128_v19, 4  ;;  %1136 = vst.msk [vmem:[#allocation3 + $0x30] sm:$0x3] %vm9338_vm3, %v1128_v19  ;;  %vm9348_vm3 = vcmask 1031168  }
 0x38d   :  { %v1131_v23 = vsel %vm9339_vm6, %v1129_v20, %v1130_v21  ;;  %vm9349_vm6 = vcmask 257026  }
 0x38e   :  { %v1132_v24 = vsel %vm9340_vm13, %v1126_v6, %v1131_v23  ;;  %v1186_v25 = vpop.permute.xlu0 %1185  ;;  %v8094_v30 = vpop.permute.xlu1 %1511  ;;  %vm9350_vm13 = vmmov %vm9345_vm5 }
 0x38f   :  { %1135 = vst [vmem:[#allocation3 + $0x28] sm:$0x33] %v1132_v24  ;;  %v1188_v29 = vrot.slane %v1186_v25, 4  ;;  %1194 = vst.msk [vmem:[#allocation3 + $0x44] sm:$0x3] %vm9341_vm15, %v1186_v25  ;;  %vm9351_vm15 = vcmask 883712  }
 0x391   :  { %v1189_v31 = vsel %vm9342_vm12, %v1187_v26, %v1188_v29  ;;  %vm9352_vm12 = vcmask 105472  }
 0x392   :  { %v1190_v28 = vsel %vm9343_vm1, %v1184_v9, %v1189_v31  ;;  %v1070_v32 = vpop.permute.xlu0 %1069  ;;  %v1537_v33 = vld [vmem:[#allocation3 + $0x50] sm:$0x33]  ;;  %v8099_v42 = vpop.permute.xlu1 %1453  ;;  %vm9353_vm1 = vmmov %vm9349_vm6 }
 0x393   :  { %1193 = vst [vmem:[#allocation3 + $0x3c] sm:$0x33] %v1190_v28  ;;  %v1072_v38 = vrot.slane %v1070_v32, 4  ;;  %1078 = vst.msk [vmem:[#allocation3 + $0x1c] sm:$0x3] %vm9344_vm4, %v1070_v32  ;;  %v6798_v39 = vcombine.high %v1537_v33, %v1537_v33  ;;  %v6797_v40 = vcombine.low %v1537_v33, %v1537_v33 }
 0x394   :  { %vm9354_vm4 = vmmov %vm9345_vm5 }
 0x395   :  { %v1073_v43 = vsel %vm9345_vm5, %v1071_v34, %v1072_v38  ;;  %6802 = vmatprep.subr.msk.bf16.mxu1 %vm9346_vm7, %v6798_v39  ;;  %v1609_v44 = vsel %vm9347_vm14, %v6797_v40, 0  ;;  %vm9355_vm5 = vcmask 744448   ;;  %vm9356_vm7 = vcmask 261120   ;;  %vm9357_vm14 = vmmov %vm9353_vm1 }
 0x396   :  { %v1074_v45 = vsel %vm9348_vm3, %v1068_v10, %v1073_v43  ;;  %v1158_v46 = vpop.permute.xlu0 %1157  ;;  %1634 = vmatpush1.bf16.msra.mxu1 %v1609_v44  ;;  %v1398_v51 = vpop.permute.xlu1 %1397  ;;  %vm9358_vm3 = vmmov %vm9354_vm4  ;;  %v1101_v10 = vrot.slane %v8089_v22, 4  ;;  %v1515_v39 = vrot.slane %v8094_v30, 4 }
 0x397   :  { %1077 = vst [vmem:[#allocation3 + $0x14] sm:$0x33] %v1074_v45  ;;  %v1160_v48 = vrot.slane %v1158_v46, 4  ;;  %1166 = vst.msk [vmem:[#allocation3 + $0x30] sm:$0xc] %vm9349_vm6, %v1158_v46  ;;  %v1401_v52 = vrot.slane %v1398_v51, 4 }
 0x398   :  { %vm9359_vm6 = vcmask 1039360  }
 0x399   :  { %v1161_v53 = vsel %vm9350_vm13, %v1159_v47, %v1160_v48  ;;  %v1402_v50 = vsel %vm9352_vm12, %v1401_v52, %v1398_v51  ;;  %vm9360_vm13 = vmmov %vm9353_vm1  ;;  %vm9362_vm12 = vcmask 900096  }
 0x39a   :  { %v1162_v35 = vsel %vm9351_vm15, %v1156_v11, %v1161_v53  ;;  %v1216_v55 = vpop.permute.xlu0 %1215  ;;  %1406 = vst.msk [vmem:[#allocation3 + $0x30] sm:$0x33] %vm7857_vm2, %v1402_v50  ;;  %v1286_v58 = vpop.permute.xlu1 %1285  ;;  %vm9361_vm15 = vmmov %vm9358_vm3  ;;  %v1457_v53 = vrot.slane %v8099_v42, 4 }
 0x39b   :  { %1165 = vst [vmem:[#allocation3 + $0x28] sm:$0xcc] %v1162_v35  ;;  %v1218_v57 = vrot.slane %v1216_v55, 4  ;;  %1224 = vst.msk [vmem:[#allocation3 + $0x44] sm:$0xc] %vm9353_vm1, %v1216_v55  ;;  %v1289_v59 = vrot.slane %v1286_v58, 4 }
 0x39c   :  { %vm9363_vm1 = vcmask 244736  }
 0x39d   :  { %v1219_v60 = vsel %vm9354_vm4, %v1217_v56, %v1218_v57  ;;  %v1290_v0 = vsel %vm9356_vm7, %v1289_v59, %v1286_v58  ;;  %vm9364_vm4 = vcmask 105472   ;;  %vm9366_vm7 = vcmask 517120  }
 0x39e   :  { %v1220_v62 = vsel %vm9355_vm5, %v1214_v12, %v1219_v60  ;;  %v1042_v63 = vpop.permute.xlu0 %1041  ;;  %1294 = vst.msk [vmem:[#allocation3 + $0x8] sm:$0x33] %vm7857_vm2, %v1290_v0  ;;  %v8119_v3 = vpop.permute.xlu1 %1483  ;;  %vm9365_vm5 = vcmask 97280  }
 0x39f   :  { %1223 = vst [vmem:[#allocation3 + $0x3c] sm:$0xcc] %v1220_v62  ;;  %v1044_v2 = vrot.slane %v1042_v63, 4  ;;  %1050 = vst.msk [vmem:[#allocation3 + $0x8] sm:$0xc] %vm9357_vm14, %v1042_v63  ;;  %vm9367_vm14 = vcmask 261120  }
 0x3a0   :  { %v1487_v57 = vrot.slane %v8119_v3, 4 }
 0x3a1   :  { %v1045_v5 = vsel %vm9358_vm3, %v1043_v1, %v1044_v2  ;;  %vm9368_vm3 = vcmask 252928  }
 0x3a2   :  { %v1046_v6 = vsel %vm9359_vm6, %v8083_v13, %v1045_v5  ;;  %v1100_v9 = vpop.permute.xlu0 %1099  ;;  %v1342_v12 = vpop.permute.xlu1 %1341  ;;  %v1531_v16 = vld [vmem:[#allocation3 + $0x28] sm:$0xff]  ;;  %vm9369_vm6 = vmmov %vm9366_vm7 }
 0x3a3   :  { %1049 = vst [vmem:[#allocation3] sm:$0xcc] %v1046_v6  ;;  %v1102_v11 = vrot.slane %v1100_v9, 4  ;;  %1108 = vst.msk [vmem:[#allocation3 + $0x1c] sm:$0xc] %vm9360_vm13, %v1100_v9  ;;  %v1345_v14 = vrot.slane %v1342_v12, 4 }
 0x3a4   :  { %vm9370_vm13 = vmmov %vm9369_vm6 }
 0x3a5   :  { %v1103_v15 = vsel %vm9361_vm15, %v1101_v10, %v1102_v11  ;;  %v1346_v13 = vsel %vm9363_vm1, %v1345_v14, %v1342_v12  ;;  %vm9371_vm15 = vmmov %vm9363_vm1 }
 0x3a6   :  { %v1534_v17 = vld [vmem:[#allocation3 + $0x3c] sm:$0xff]  ;;  %v1104_v18 = vsel %vm9362_vm12, %v8089_v22, %v1103_v15  ;;  %v8129_v19 = vpop.permute.xlu0 %1426  ;;  %1350 = vst.msk [vmem:[#allocation3 + $0x1c] sm:$0x33] %vm7857_vm2, %v1346_v13  ;;  %v1400_v24 = vpop.permute.xlu1 %1399  ;;  %vm9372_vm12 = vcmask 1043456   ;;  %vm9373_vm1 = vmmov %vm9369_vm6 }
 0x3a7   :  { %1107 = vst [vmem:[#allocation3 + $0x14] sm:$0xcc] %v1104_v18  ;;  %v1430_v20 = vrot.slane %v8129_v19, 4  ;;  %v6793_v21 = vcombine.high %v1531_v16, %v1534_v17  ;;  %v6792_v23 = vcombine.low %v1531_v16, %v1534_v17  ;;  %v1403_v25 = vsel %vm9364_vm4, %v1401_v52, %v1400_v24  ;;  %v8162_v52 = vld [vmem:[%s9296_s1 + $0x2] sm:$0x3] }
 0x3a8   :  { %1407 = vst.msk [vmem:[#allocation3 + $0x38] sm:$0x3] %vm9366_vm7, %v1403_v25  ;;  %vm9374_vm4 = vcmask 998400   ;;  %vm9376_vm7 = vmmov %vm9372_vm12 }
 0x3a9   :  { %v1431_v22 = vsel %vm9365_vm5, %v1430_v20, %v8129_v19  ;;  %1635 = vmatprep.subr.bf16.mxu1 %v6793_v21  ;;  %vm9375_vm5 = vmmov %vm9373_vm1 }
 0x3aa   :  { %1435 = vst.msk [vmem:[#allocation3 + $0x30] sm:$0xcc] %vm7893_vm0, %v1431_v22  ;;  %v8143_v26 = vpop.permute.xlu0 %1314  ;;  %1636 = vmatpush1.bf16.msra.mxu1 %v6792_v23  ;;  %v1288_v31 = vpop.permute.xlu1 %1287  ;;  %v1525_v33 = vld [vmem:[#allocation3] sm:$0xff] }
 0x3ab   :  { %v1318_v29 = vrot.slane %v8143_v26, 4  ;;  %v1291_v28 = vsel %vm9367_vm14, %v1289_v59, %v1288_v31  ;;  %vm9377_vm14 = vcmask 293888  }
 0x3ac   :  { %1295 = vst.msk [vmem:[#allocation3 + $0x10] sm:$0x3] %vm9369_vm6, %v1291_v28  ;;  %vm9379_vm6 = vmmov 0  }
 0x3ad   :  { %v1319_v32 = vsel %vm9368_vm3, %v1318_v29, %v8143_v26  ;;  %vm9378_vm3 = vcmask 1014784  }
 0x3ae   :  { %v1528_v34 = vld [vmem:[#allocation3 + $0x14] sm:$0xff]  ;;  %1323 = vst.msk [vmem:[#allocation3 + $0x8] sm:$0xcc] %vm7893_vm0, %v1319_v32  ;;  %v1514_v38 = vpop.permute.xlu0 %1513  ;;  %v1344_v45 = vpop.permute.xlu1 %1343  ;;  %v1769_v32 = vld [vmem:[#allocation4] sm:$0xff] }
 0x3af   :  { %v1516_v40 = vrot.slane %v1514_v38, 4  ;;  %1522 = vst.msk [vmem:[#allocation3 + $0x60] sm:$0x3] %vm9370_vm13, %v1514_v38  ;;  %v6788_v43 = vcombine.high %v1525_v33, %v1528_v34  ;;  %v6787_v44 = vcombine.low %v1525_v33, %v1528_v34  ;;  %v1347_v46 = vsel %vm9371_vm15, %v1345_v14, %v1344_v45 }
 0x3b0   :  { %1351 = vst.msk [vmem:[#allocation3 + $0x24] sm:$0x3] %vm9373_vm1, %v1347_v46  ;;  %vm9380_vm13 = vcmask 519170   ;;  %vm9381_vm15 = vcmask 1041408   ;;  %vm9383_vm1 = vcmask 1006592  }
 0x3b1   :  { %v1517_v47 = vsel %vm9372_vm12, %v1515_v39, %v1516_v40  ;;  %1637 = vmatprep.subr.bf16.mxu1 %v6788_v43  ;;  %vm9382_vm12 = vmmov %vm9376_vm7  ;;  %v1532_v10 = vld [vmem:[#allocation3 + $0x30] sm:$0xff]  ;;  %v1774_v43 = vcombine.high %v1769_v32, %v1769_v32 }
 0x3b2   :  { %v1518_v48 = vsel %vm9374_vm4, %v8094_v30, %v1517_v47  ;;  %v1456_v51 = vpop.permute.xlu0 %1455  ;;  %1638 = vmatpush1.bf16.msra.mxu1 %v6787_v44  ;;  %vm9384_vm4 = vcmask 113664  }
 0x3b3   :  { %1521 = vst.msk [vmem:[#allocation3 + $0x58] sm:$0x33] %vm7857_vm2, %v1518_v48  ;;  %v1458_v35 = vrot.slane %v1456_v51, 4  ;;  %7495 = vmatprep.subr.bf16.mxu1 %v7703_v4 }
 0x3b4   :  { %1464 = vst.msk [vmem:[#allocation3 + $0x4c] sm:$0x3] %vm9375_vm5, %v1456_v51  ;;  %vm9385_vm5 = vmmov %vm9381_vm15 }
 0x3b5   :  { %v1459_v55 = vsel %vm9376_vm7, %v1457_v53, %v1458_v35  ;;  %6803 = vmatmul.mubr.msk.bf16.vlgmr.msra.gmra.mxu1 %vm9377_vm14, %v8162_v52  ;;  %vm9386_vm7 = vmmov %vm9385_vm5  ;;  %vm9387_vm14 = vcmask 97280   ;;  %v1526_v17 = vld [vmem:[#allocation3 + $0x8] sm:$0xff] }
 0x3b6   :  { %v1460_v30 = vsel %vm9378_vm3, %v8099_v42, %v1459_v55  ;;  %v1486_v50 = vpop.permute.xlu0 %1485  ;;  %v7608_v56 = vld [vmem:[#allocation3 + $0x60] ss:$0 sps:$4 sm:$0x33]   ;;  %7501 = vmatprep.mubr.msk.bf16.mxu1 %vm9379_vm6, %v7703_v4  ;;  %vm9388_vm3 = vmmov %vm9380_vm13 }
 0x3b7   :  { %1463 = vst.msk [vmem:[#allocation3 + $0x44] sm:$0x33] %vm7857_vm2, %v1460_v30  ;;  %v1488_v58 = vrot.slane %v1486_v50, 4  ;;  %v1621_v59 = vsel %vm9381_vm15, %v7608_v56, 0  ;;  %vm9390_vm15 = vmmov %vm9388_vm3  ;;  %v1770_v56 = vld [vmem:[#allocation4 + $0x8] sm:$0xff] }
 0x3b8   :  { %1494 = vst.msk [vmem:[#allocation3 + $0x4c] sm:$0xc] %vm9380_vm13, %v1486_v50  ;;  %7496 = vmatpush3.bf16.msra.mxu1 %v1621_v59  ;;  %vm9389_vm13 = vcmask 252928  }
 0x3b9   :  { %v1489_v60 = vsel %vm9382_vm12, %v1487_v57, %v1488_v58  ;;  %7497 = vmatprep.subr.bf16.mxu1 %v7703_v4  ;;  %vm9391_vm12 = vmmov %vm9384_vm4 }
 0x3ba   :  { %v1538_v62 = vld [vmem:[#allocation3 + $0x58] sm:$0x33]  ;;  %v1490_v42 = vsel %vm9383_vm1, %v8119_v3, %v1489_v60  ;;  %v1371_v63 = vpop.permute.xlu0 %1370  ;;  %vm9392_vm1 = vmmov %vm9388_vm3 }
 0x3bb   :  { %1493 = vst.msk [vmem:[#allocation3 + $0x44] sm:$0xcc] %vm7893_vm0, %v1490_v42  ;;  %v1374_v0 = vrot.slane %v1371_v63, 4  ;;  %v6800_v1 = vcombine.high %v1538_v62, %v1538_v62  ;;  %v6799_v2 = vcombine.low %v1538_v62, %v1538_v62  ;;  %v1750_v31 = vpop.permute.xlu1 %1749 }
 0x3bd   :  { %v1375_v5 = vsel %vm9384_vm4, %v1374_v0, %v1371_v63  ;;  %6804 = vmatprep.subr.msk.bf16.mxu0 %vm9385_vm5, %v6800_v1  ;;  %v1615_v6 = vsel %vm9386_vm7, %v6799_v2, 0  ;;  %vm9393_vm4 = vcmask 293888   ;;  %v1775_v63 = vcombine.high %v1770_v56, %v1770_v56 }
 0x3be   :  { %1379 = vst.msk [vmem:[#allocation3 + $0x1c] sm:$0xcc] %vm7893_vm0, %v1375_v5  ;;  %v1429_v9 = vpop.permute.xlu0 %1428  ;;  %1675 = vmatpush1.bf16.msra.mxu0 %v1615_v6  ;;  %vm9394_vm5 = vmmov %vm9393_vm4  ;;  %vm9395_vm7 = vcmask 1043456  }
 0x3bf   :  { %v1432_v3 = vsel %vm9387_vm14, %v1430_v20, %v1429_v9  ;;  %v1536_v19 = vld [vmem:[#allocation3 + $0x4c] sm:$0xf]  ;;  %vm9396_vm14 = vcmask 941056  }
 0x3c0   :  { %1436 = vst.msk [vmem:[#allocation3 + $0x38] sm:$0xc] %vm9388_vm3, %v1432_v3  ;;  %vm9397_vm3 = vcmask 254976  }
 0x3c2   :  { %v1535_v11 = vld [vmem:[#allocation3 + $0x44] sm:$0xff]  ;;  %v1317_v12 = vpop.permute.xlu0 %1316 }
 0x3c3   :  { %v1320_v14 = vsel %vm9389_vm13, %v1318_v29, %v1317_v12  ;;  %v6795_v15 = vcombine.high %v1532_v10, %v1535_v11  ;;  %v6794_v16 = vcombine.low %v1532_v10, %v1535_v11  ;;  %vm9398_vm13 = vmmov %vm9397_vm3 }
 0x3c4   :  { %1324 = vst.msk [vmem:[#allocation3 + $0x10] sm:$0xc] %vm9390_vm15, %v1320_v14  ;;  %v1771_v14 = vld [vmem:[#allocation4 + $0x10] sm:$0xf]  ;;  %vm9399_vm15 = vmmov %vm9395_vm7 }
 0x3c5   :  { %v1529_v18 = vld [vmem:[#allocation3 + $0x1c] sm:$0xff]  ;;  %1676 = vmatprep.subr.bf16.mxu0 %v6795_v15 }
 0x3c6   :  { %v1373_v13 = vpop.permute.xlu0 %1372  ;;  %1677 = vmatpush1.bf16.msra.mxu0 %v6794_v16  ;;  %v6790_v21 = vcombine.high %v1526_v17, %v1529_v18  ;;  %v6789_v24 = vcombine.low %v1526_v17, %v1529_v18 }
 0x3c7   :  { %v1533_v23 = vld [vmem:[#allocation3 + $0x38] sm:$0xf]  ;;  %v1376_v20 = vsel %vm9391_vm12, %v1374_v0, %v1373_v13  ;;  %vm9400_vm12 = vcmask 736256  }
 0x3c8   :  { %1380 = vst.msk [vmem:[#allocation3 + $0x24] sm:$0xc] %vm9392_vm1, %v1376_v20  ;;  %1678 = vmatprep.subr.bf16.mxu0 %v6790_v21  ;;  %v6796_v25 = vcombine.low %v1533_v23, %v1536_v19  ;;  %vm9401_vm1 = vmmov %vm9397_vm3 }
 0x3ca   :  { %1679 = vmatpush1.bf16.msra.mxu0 %v6789_v24  ;;  %7498 = vmatpush3.bf16.msra.mxu1 %v6796_v25 }
 0x3cb   :  { %7499 = vmatprep.subr.bf16.mxu1 %v7703_v4  ;;  %v1527_v22 = vld [vmem:[#allocation3 + $0x10] sm:$0xf] }
 0x3cd   :  { %6805 = vmatmul.mubr.msk.bf16.vlgmr.msra.gmra.mxu0 %vm9393_vm4, %v8162_v52  ;;  %vm9402_vm4 = vmmov %vm9395_vm7 }
 0x3ce   :  { %2473 = vmatprep.mubr.bf16.mxu0 %v7719_v61 }
 0x3cf   :  { %v1530_v26 = vld [vmem:[#allocation3 + $0x24] sm:$0xf] }
 0x3d0   :  { %v6791_v29 = vcombine.low %v1527_v22, %v1530_v26 }
 0x3d2   :  { %7500 = vmatpush3.bf16.msra.mxu1 %v6791_v29 }
 0x3d3   :  { %v1762_v34 = vpop.permute.xlu0 %1761 }
 0x3d5   :  { %7502 = vmatmul.mubr.msk.bf16.vlgmr.msra.gmra.mxu1 %vm9394_vm5, %v8162_v52  ;;  %vm9403_vm5 = vcmask 891904  }
 0x3d6   :  { %2514 = vmatprep.mubr.bf16.mxu1 %v7719_v61 }
 0x475   :  { %v1657_v28 = vpop.f32.mrf.mxu1 }
 0x476   :  { %v1752_v33 = vmul.f32 %v1750_v31, %v1657_v28 }
 0x477   :  { %v1659_v38 = vpop.f32.mrf.mxu1 }
 0x478   :  { %v1764_v39 = vadd.f32 %v1762_v34, %v1752_v33  ;;  %v1753_v40 = vmul.f32 %v1750_v31, %v1659_v38 }
 0x479   :  { %v1661_v44 = vpop.f32.mrf.mxu1 }
 0x47a   :  { %v1778_v45 = vadd.f32 %v1769_v32, %v1764_v39  ;;  %v1765_v46 = vadd.f32 %v1762_v34, %v1753_v40 }
 0x47b   :  { %v1662_v47 = vpop.f32.mrf.mxu1 }
 0x47c   :  { %v1783_v48 = vmax.f32 %v1778_v45, 0.0  ;;  %v1779_v51 = vadd.f32 %v1774_v43, %v1765_v46 }
 0x47e   :  { %v1784_v53 = vmax.f32 %v1779_v51, 0.0  ;;  %v1788_v52 = vmul.f32 %v7995_v41, %v1783_v48 }
 0x480   :  { %v1789_v35 = vmul.f32 %v8003_v8, %v1784_v53 }
 0x482   :  { %v1797_v55 = vcombine.low %v1788_v52, %v1789_v35 }
 0x484   :  { %1801 = vst [vmem:[#allocation4] sm:$0xff] %v1797_v55  ;;  %1808 = vrot.lane.b32.xlu1 %v1797_v55, %s7702_s22 }
 0x48d   :  { %v1698_v30 = vpop.f32.mrf.mxu0 }
 0x48e   :  { %v1754_v50 = vmul.f32 %v1750_v31, %v1698_v30 }
 0x48f   :  { %v1700_v57 = vpop.f32.mrf.mxu0 }
 0x490   :  { %v1766_v58 = vadd.f32 %v1762_v34, %v1754_v50  ;;  %v1755_v59 = vmul.f32 %v1750_v31, %v1700_v57 }
 0x491   :  { %v1702_v60 = vpop.f32.mrf.mxu0 }
 0x492   :  { %v1780_v62 = vadd.f32 %v1770_v56, %v1766_v58  ;;  %v1767_v42 = vadd.f32 %v1762_v34, %v1755_v59 }
 0x493   :  { %v1703_v0 = vpop.f32.mrf.mxu0 }
 0x494   :  { %v1785_v1 = vmax.f32 %v1780_v62, 0.0  ;;  %v1781_v2 = vadd.f32 %v1775_v63, %v1767_v42 }
 0x495   :  { %v1739_v5 = vpop.f32.mrf.mxu1 }
 0x496   :  { %v1786_v6 = vmax.f32 %v1781_v2, 0.0  ;;  %v1756_v9 = vmul.f32 %v1750_v31, %v1739_v5  ;;  %v1790_v10 = vmul.f32 %v8015_v36, %v1785_v1 }
 0x497   :  { %v7503_v3 = vpop.f32.mrf.mxu1 }
 0x498   :  { %v1791_v11 = vmul.f32 %v8018_v37, %v1786_v6  ;;  %v1768_v12 = vadd.f32 %v1762_v34, %v1756_v9 }
 0x499   :  { %v1742_v15 = vpop.f32.mrf.mxu1 }
 0x49a   :  { %v1798_v16 = vcombine.low %v1790_v10, %v1791_v11  ;;  %v1782_v17 = vadd.f32 %v1771_v14, %v1768_v12 }
 0x49b   :  { %v7504_v18 = vpop.f32.mrf.mxu1 }
 0x49c   :  { %1802 = vst [vmem:[#allocation4 + $0x8] sm:$0xff] %v1798_v16  ;;  %v1787_v13 = vmax.f32 %v1782_v17, 0.0  ;;  %2075 = vrot.lane.b32.xlu1 %v1798_v16, %s7704_s0 }
 0x49e   :  { %v1792_v21 = vmul.f32 %v8025_v49, %v1787_v13 }
 0x4a0   :  { %1803 = vst.msk [vmem:[#allocation4 + $0x10] sm:$0xf] %vm147_vm10, %v1792_v21 }
 0x4a3   :  { %v1805_v19 = vld [vmem:[#allocation4 + $0x8] sm:$0xf] }
 0x4a4   :  { %1810 = vrot.lane.b32.xlu0 %v1805_v19, %s7702_s22 }
 0x4a7   :  { %v2072_v23 = vld [vmem:[#allocation4 + $0x10] sm:$0xf] }
 0x4a8   :  { %2077 = vrot.lane.b32.xlu0 %v2072_v23, %s7704_s0  ;;  %v6866_v23 = vld [vmem:[%s9294_s2 + $0x8] sm:$0xf] }
 0x4f6   :  { %v1809_v20 = vpop.permute.xlu1 %1808 }
 0x4f7   :  { %v1812_v24 = vrot.slane %v1809_v20, 4 }
 0x4f9   :  { %v1813_v25 = vsel %vm158_vm8, %v1812_v24, %v1809_v20 }
 0x4fa   :  { %1817 = vst.msk [vmem:[#allocation2] sm:$0xff] %vm7767_vm9, %v1813_v25 }
 0x501   :  { %v1819_v22 = vld [vmem:[#allocation2] sm:$0xff] }
 0x502   :  { %v1822_v26 = vcombine.high %v1819_v22, %v1819_v22 }
 0x504   :  { %v7237_v29 = vpack.c.bf16 %v1822_v26, %v1819_v22 }
 0x506   :  { %1837 = vst [vmem:[#allocation3] sm:$0x33] %v7237_v29  ;;  %2059 = vrot.lane.b32.xlu1 %v7237_v29, %s7705_s25  ;;  %v1971_v31 = vrot.slane %v7237_v29, 6 }
 0x50a   :  { %1943 = vrot.lane.b32.xlu1 %v7237_v29, %s7706_s26 }
 0x50e   :  { %2001 = vrot.lane.b32.xlu1 %v7237_v29, %s7707_s27  ;;  %v2076_v33 = vpop.permute.xlu1 %2075 }
 0x50f   :  { %v2079_v38 = vrot.slane %v2076_v33, 4 }
 0x512   :  { %1885 = vrot.lane.b32.xlu1 %v7237_v29, %s7708_s28 }
 0x516   :  { %v1811_v28 = vpop.permute.xlu0 %1810  ;;  %1973 = vrot.lane.b32.xlu1 %v1971_v31, %s7709_s29 }
 0x517   :  { %v1814_v32 = vsel %vm158_vm8, %v1812_v24, %v1811_v28 }
 0x518   :  { %1818 = vst.msk [vmem:[#allocation2 + $0x8] sm:$0xf] %vm166_vm11, %v1814_v32 }
 0x51a   :  { %v2078_v34 = vpop.permute.xlu0 %2077  ;;  %2031 = vrot.lane.b32.xlu1 %v1971_v31, %s7710_s30 }
 0x51b   :  { %v2080_v39 = vrot.slane %v2078_v34, 4 }
 0x51d   :  { %v2081_v40 = vsel %vm9395_vm7, %v2079_v38, %v2080_v39  ;;  %vm9404_vm7 = vmmov %vm9401_vm1 }
 0x51e   :  { %v2082_v43 = vsel %vm9396_vm14, %v2076_v33, %v2081_v40  ;;  %1857 = vrot.lane.b32.xlu1 %v1971_v31, %s7711_s5  ;;  %vm9405_vm14 = vmmov %vm9402_vm4 }
 0x51f   :  { %v1820_v44 = vld [vmem:[#allocation2 + $0x8] sm:$0xf]  ;;  %2085 = vst.msk [vmem:[#allocation2] sm:$0xff] %vm7767_vm9, %v2082_v43 }
 0x520   :  { %v2044_v45 = vld [vmem:[#allocation2 + $0x8] sm:$0xf]  ;;  %v7238_v52 = vpack.c.bf16 %v1820_v44, %v1820_v44 }
 0x521   :  { %v1928_v46 = vld [vmem:[#allocation2 + $0x8] sm:$0xf]  ;;  %v7254_v47 = vpack.c.bf16 %v2044_v45, %v2044_v45 }
 0x522   :  { %v1986_v48 = vld [vmem:[#allocation2 + $0x8] sm:$0xf]  ;;  %1915 = vrot.lane.b32.xlu1 %v1971_v31, %s7712_s6  ;;  %1838 = vst.msk [vmem:[#allocation3 + $0x8] sm:$0x3] %vm9397_vm3, %v7238_v52  ;;  %v7246_v50 = vpack.c.bf16 %v1928_v46, %v1928_v46  ;;  %vm9406_vm3 = vcmask 752640  }
 0x523   :  { %v1870_v51 = vld [vmem:[#allocation2 + $0x8] sm:$0xf]  ;;  %2061 = vrot.lane.b32.xlu0 %v7254_v47, %s7705_s25  ;;  %v7250_v58 = vpack.c.bf16 %v1986_v48, %v1986_v48 }
 0x524   :  { %v1956_v53 = vld [vmem:[#allocation2 + $0x8] sm:$0xf]  ;;  %v7242_v60 = vpack.c.bf16 %v1870_v51, %v1870_v51 }
 0x525   :  { %v2014_v35 = vld [vmem:[#allocation2 + $0x8] sm:$0xf]  ;;  %v7248_v62 = vpack.c.bf16 %v1956_v53, %v1956_v53 }
 0x526   :  { %v1840_v55 = vld [vmem:[#allocation2 + $0x8] sm:$0xf]  ;;  %v2313_v56 = vld [vmem:[#allocation2] sm:$0xff]  ;;  %v7252_v63 = vpack.c.bf16 %v2014_v35, %v2014_v35 }
 0x527   :  { %v1898_v30 = vld [vmem:[#allocation2 + $0x8] sm:$0xf]  ;;  %1945 = vrot.lane.b32.xlu0 %v7246_v50, %s7706_s26  ;;  %v2316_v57 = vcombine.high %v2313_v56, %v2313_v56  ;;  %v1972_v42 = vrot.slane %v7248_v62, 6  ;;  %v7240_v1 = vpack.c.bf16 %v1840_v55, %v1840_v55 }
 0x528   :  { %2086 = vst.msk [vmem:[#allocation2 + $0x8] sm:$0xf] %vm166_vm11, %v2078_v34  ;;  %v2030_v0 = vrot.slane %v7252_v63, 6  ;;  %v7244_v5 = vpack.c.bf16 %v1898_v30, %v1898_v30  ;;  %v6867_v34 = vld [vmem:[%s9295_s3 + $0x8] sm:$0xf] }
 0x529   :  { %v7271_v59 = vpack.c.bf16 %v2316_v57, %v2313_v56  ;;  %v1856_v2 = vrot.slane %v7240_v1, 6 }
 0x52a   :  { %v1914_v9 = vrot.slane %v7244_v5, 6 }
 0x52b   :  { %2003 = vrot.lane.b32.xlu0 %v7250_v58, %s7707_s27  ;;  %2329 = vrot.lane.b32.xlu1 %v7271_v59, %s7713_s7  ;;  %v2299_v6 = vrot.slane %v7271_v59, 6 }
 0x52f   :  { %1887 = vrot.lane.b32.xlu0 %v7242_v60, %s7708_s28  ;;  %2271 = vrot.lane.b32.xlu1 %v7271_v59, %s7714_s8  ;;  %v2200_v3 = vld [vmem:[#allocation2 + $0x8] sm:$0xf] }
 0x530   :  { %v7264_v10 = vpack.c.bf16 %v2200_v3, %v2200_v3  ;;  %v2088_v11 = vld [vmem:[#allocation2 + $0x8] sm:$0xf] }
 0x531   :  { %v2314_v12 = vld [vmem:[#allocation2 + $0x8] sm:$0xf]  ;;  %v7256_v14 = vpack.c.bf16 %v2088_v11, %v2088_v11 }
 0x532   :  { %v2144_v15 = vld [vmem:[#allocation2 + $0x8] sm:$0xf]  ;;  %v7272_v16 = vpack.c.bf16 %v2314_v12, %v2314_v12 }
 0x533   :  { %1975 = vrot.lane.b32.xlu0 %v1972_v42, %s7709_s29  ;;  %2215 = vrot.lane.b32.xlu1 %v7271_v59, %s7715_s9  ;;  %v2256_v17 = vld [vmem:[#allocation2 + $0x8] sm:$0xf]  ;;  %v7260_v18 = vpack.c.bf16 %v2144_v15, %v2144_v15 }
 0x534   :  { %v2284_v13 = vld [vmem:[#allocation2 + $0x8] sm:$0xf]  ;;  %v7268_v21 = vpack.c.bf16 %v2256_v17, %v2256_v17 }
 0x535   :  { %v7270_v19 = vpack.c.bf16 %v2284_v13, %v2284_v13  ;;  %v2227_v24 = vld [vmem:[#allocation2 + $0x8] sm:$0xf] }
 0x536   :  { %v7266_v25 = vpack.c.bf16 %v2227_v24, %v2227_v24  ;;  %v2115_v22 = vld [vmem:[#allocation2 + $0x8] sm:$0xf] }
 0x537   :  { %2033 = vrot.lane.b32.xlu0 %v2030_v0, %s7710_s30  ;;  %2103 = vrot.lane.b32.xlu1 %v7271_v59, %s7701_s21  ;;  %v2300_v20 = vrot.slane %v7270_v19, 6  ;;  %v7258_v29 = vpack.c.bf16 %v2115_v22, %v2115_v22  ;;  %v2171_v31 = vld [vmem:[#allocation2 + $0x8] sm:$0xf] }
 0x538   :  { %v2243_v26 = vrot.slane %v7266_v25, 6  ;;  %v7262_v32 = vpack.c.bf16 %v2171_v31, %v2171_v31 }
 0x539   :  { %v2131_v28 = vrot.slane %v7258_v29, 6 }
 0x53a   :  { %v2187_v33 = vrot.slane %v7262_v32, 6 }
 0x53b   :  { %1859 = vrot.lane.b32.xlu0 %v1856_v2, %s7711_s5  ;;  %2301 = vrot.lane.b32.xlu1 %v2299_v6, %s7716_s10 }
 0x53f   :  { %1917 = vrot.lane.b32.xlu0 %v1914_v9, %s7712_s6  ;;  %2159 = vrot.lane.b32.xlu1 %v7271_v59, %s7717_s11 }
 0x543   :  { %2244 = vrot.lane.b32.xlu0 %v2299_v6, %s7718_s12  ;;  %2217 = vrot.lane.b32.xlu1 %v7264_v10, %s7715_s9 }
 0x547   :  { %2132 = vrot.lane.b32.xlu0 %v2299_v6, %s7720_s13  ;;  %2105 = vrot.lane.b32.xlu1 %v7256_v14, %s7701_s21 }
 0x54b   :  { %2331 = vrot.lane.b32.xlu0 %v7272_v16, %s7713_s7  ;;  %2161 = vrot.lane.b32.xlu1 %v7260_v18, %s7717_s11 }
 0x54f   :  { %2273 = vrot.lane.b32.xlu0 %v7268_v21, %s7714_s8  ;;  %2567 = vperm.xlu1 %7599, %v6866_v23  }
 0x553   :  { %2303 = vrot.lane.b32.xlu0 %v2300_v20, %s7716_s10 }
 0x557   :  { %2188 = vrot.lane.b32.xlu0 %v2299_v6, %s7721_s14 }
 0x55b   :  { %2246 = vrot.lane.b32.xlu0 %v2243_v26, %s7718_s12 }
 0x55f   :  { %2134 = vrot.lane.b32.xlu0 %v2131_v28, %s7720_s13 }
 0x563   :  { %2190 = vrot.lane.b32.xlu0 %v2187_v33, %s7721_s14 }
 0x567   :  { %2579 = vperm.xlu0 %7598, %v6867_v34  }
 0x578   :  { %v2060_v38 = vpop.permute.xlu1 %2059 }
 0x579   :  { %v2063_v48 = vrot.slane %v2060_v38, 4 }
 0x57c   :  { %v1944_v39 = vpop.permute.xlu1 %1943 }
 0x57d   :  { %v1947_v55 = vrot.slane %v1944_v39, 4 }
 0x580   :  { %v2002_v40 = vpop.permute.xlu1 %2001 }
 0x581   :  { %v2005_v59 = vrot.slane %v2002_v40, 4 }
 0x584   :  { %v1886_v43 = vpop.permute.xlu1 %1885 }
 0x585   :  { %v1889_v2 = vrot.slane %v1886_v43, 4 }
 0x588   :  { %v1974_v44 = vpop.permute.xlu1 %1973 }
 0x589   :  { %v1977_v15 = vrot.slane %v1974_v44, 4 }
 0x58c   :  { %v2032_v45 = vpop.permute.xlu1 %2031 }
 0x58d   :  { %v2035_v20 = vrot.slane %v2032_v45, 4 }
 0x590   :  { %v8268_v46 = vpop.permute.xlu1 %1857 }
 0x591   :  { %v1861_v32 = vrot.slane %v8268_v46, 4 }
 0x594   :  { %v8274_v50 = vpop.permute.xlu1 %1915 }
 0x595   :  { %v2062_v47 = vpop.permute.xlu0 %2061 }
 0x596   :  { %v2064_v51 = vrot.slane %v2062_v47, 4  ;;  %2070 = vst.msk [vmem:[#allocation3 + $0x58] sm:$0x3] %vm9398_vm13, %v2062_v47  ;;  %vm9407_vm13 = vmmov %vm9401_vm1 }
 0x598   :  { %v2065_v53 = vsel %vm9399_vm15, %v2063_v48, %v2064_v51  ;;  %vm9408_vm15 = vmmov %vm9402_vm4 }
 0x599   :  { %v2066_v52 = vsel %vm9400_vm12, %v2060_v38, %v2065_v53  ;;  %v1946_v35 = vpop.permute.xlu0 %1945  ;;  %vm9409_vm12 = vcmask 1041408  }
 0x59a   :  { %2069 = vst [vmem:[#allocation3 + $0x50] sm:$0x33] %v2066_v52  ;;  %v1948_v30 = vrot.slane %v1946_v35, 4  ;;  %1954 = vst.msk [vmem:[#allocation3 + $0x30] sm:$0x3] %vm9401_vm1, %v1946_v35 }
 0x59b   :  { %vm9410_vm1 = vmmov %vm9409_vm12 }
 0x59c   :  { %v1949_v56 = vsel %vm9402_vm4, %v1947_v55, %v1948_v30  ;;  %vm9411_vm4 = vcmask 1031168  }
 0x59d   :  { %v1950_v57 = vsel %vm9403_vm5, %v1944_v39, %v1949_v56  ;;  %v2004_v58 = vpop.permute.xlu0 %2003  ;;  %v8279_v62 = vpop.permute.xlu1 %2329  ;;  %vm9412_vm5 = vcmask 257026  }
 0x59e   :  { %1953 = vst [vmem:[#allocation3 + $0x28] sm:$0x33] %v1950_v57  ;;  %v2006_v60 = vrot.slane %v2004_v58, 4  ;;  %2012 = vst.msk [vmem:[#allocation3 + $0x44] sm:$0x3] %vm9404_vm7, %v2004_v58 }
 0x59f   :  { %vm9413_vm7 = vmmov %vm9405_vm14 }
 0x5a0   :  { %v2007_v42 = vsel %vm9405_vm14, %v2005_v59, %v2006_v60  ;;  %vm9414_vm14 = vcmask 883712  }
 0x5a1   :  { %v2008_v63 = vsel %vm9406_vm3, %v2002_v40, %v2007_v42  ;;  %v1888_v0 = vpop.permute.xlu0 %1887  ;;  %v2355_v1 = vld [vmem:[#allocation3 + $0x50] sm:$0x33]  ;;  %v8284_v3 = vpop.permute.xlu1 %2271  ;;  %vm9415_vm3 = vcmask 105472  }
 0x5a2   :  { %2011 = vst [vmem:[#allocation3 + $0x3c] sm:$0x33] %v2008_v63  ;;  %v1890_v5 = vrot.slane %v1888_v0, 4  ;;  %1896 = vst.msk [vmem:[#allocation3 + $0x1c] sm:$0x3] %vm9407_vm13, %v1888_v0  ;;  %v6857_v6 = vcombine.high %v2355_v1, %v2355_v1  ;;  %v6856_v9 = vcombine.low %v2355_v1, %v2355_v1 }
 0x5a3   :  { %vm9416_vm13 = vmmov %vm9412_vm5 }
 0x5a4   :  { %v1891_v10 = vsel %vm9408_vm15, %v1889_v2, %v1890_v5  ;;  %6861 = vmatprep.subr.msk.bf16.mxu0 %vm9409_vm12, %v6857_v6  ;;  %v2427_v11 = vsel %vm9410_vm1, %v6856_v9, 0  ;;  %vm9417_vm15 = vmmov %vm9413_vm7  ;;  %vm9418_vm12 = vcmask 744448   ;;  %vm9419_vm1 = vcmask 261120  }
 0x5a5   :  { %v1892_v12 = vsel %vm9411_vm4, %v1886_v43, %v1891_v10  ;;  %v1976_v14 = vpop.permute.xlu0 %1975  ;;  %2452 = vmatpush1.bf16.msra.mxu0 %v2427_v11  ;;  %v2216_v17 = vpop.permute.xlu1 %2215  ;;  %vm9420_vm4 = vmmov %vm9412_vm5  ;;  %v1919_v43 = vrot.slane %v8274_v50, 4  ;;  %v2333_v9 = vrot.slane %v8279_v62, 4 }
 0x5a6   :  { %1895 = vst [vmem:[#allocation3 + $0x14] sm:$0x33] %v1892_v12  ;;  %v1978_v16 = vrot.slane %v1976_v14, 4  ;;  %1984 = vst.msk [vmem:[#allocation3 + $0x30] sm:$0xc] %vm9412_vm5, %v1976_v14  ;;  %v2219_v18 = vrot.slane %v2216_v17, 4 }
 0x5a7   :  { %vm9421_vm5 = vmmov %vm9413_vm7 }
 0x5a8   :  { %v1979_v13 = vsel %vm9413_vm7, %v1977_v15, %v1978_v16  ;;  %v2220_v23 = vsel %vm9415_vm3, %v2219_v18, %v2216_v17  ;;  %vm9422_vm7 = vcmask 1039360   ;;  %vm9424_vm3 = vmmov %vm9421_vm5  ;;  %v6845_v16 = vld [vmem:[%s9296_s1 + $0x4] sm:$0x3] }
 0x5a9   :  { %v1980_v21 = vsel %vm9414_vm14, %v1974_v44, %v1979_v13  ;;  %v2034_v19 = vpop.permute.xlu0 %2033  ;;  %2224 = vst.msk [vmem:[#allocation3 + $0x30] sm:$0x33] %vm7857_vm2, %v2220_v23  ;;  %v2104_v25 = vpop.permute.xlu1 %2103  ;;  %vm9423_vm14 = vmmov %vm9420_vm4  ;;  %v2275_v13 = vrot.slane %v8284_v3, 4 }
 0x5aa   :  { %1983 = vst [vmem:[#allocation3 + $0x28] sm:$0xcc] %v1980_v21  ;;  %v2036_v24 = vrot.slane %v2034_v19, 4  ;;  %2042 = vst.msk [vmem:[#allocation3 + $0x44] sm:$0xc] %vm9416_vm13, %v2034_v19  ;;  %v2107_v22 = vrot.slane %v2104_v25, 4 }
 0x5ab   :  { %vm9425_vm13 = vcmask 900096  }
 0x5ac   :  { %v2037_v26 = vsel %vm9417_vm15, %v2035_v20, %v2036_v24  ;;  %v2108_v28 = vsel %vm9419_vm1, %v2107_v22, %v2104_v25  ;;  %vm9426_vm15 = vcmask 244736   ;;  %vm9428_vm1 = vcmask 97280  }
 0x5ad   :  { %v2038_v29 = vsel %vm9418_vm12, %v2032_v45, %v2037_v26  ;;  %v1860_v31 = vpop.permute.xlu0 %1859  ;;  %2112 = vst.msk [vmem:[#allocation3 + $0x8] sm:$0x33] %vm7857_vm2, %v2108_v28  ;;  %v8304_v34 = vpop.permute.xlu1 %2301  ;;  %vm9427_vm12 = vcmask 105472  }
 0x5ae   :  { %2041 = vst [vmem:[#allocation3 + $0x3c] sm:$0xcc] %v2038_v29  ;;  %v1862_v33 = vrot.slane %v1860_v31, 4  ;;  %1868 = vst.msk [vmem:[#allocation3 + $0x8] sm:$0xc] %vm9420_vm4, %v1860_v31  ;;  %vm9429_vm4 = vcmask 517120  }
 0x5af   :  { %v2305_v24 = vrot.slane %v8304_v34, 4 }
 0x5b0   :  { %v1863_v38 = vsel %vm9421_vm5, %v1861_v32, %v1862_v33  ;;  %vm9430_vm5 = vcmask 261120  }
 0x5b1   :  { %v1864_v39 = vsel %vm9422_vm7, %v8268_v46, %v1863_v38  ;;  %v1918_v40 = vpop.permute.xlu0 %1917  ;;  %v2160_v45 = vpop.permute.xlu1 %2159  ;;  %v2349_v35 = vld [vmem:[#allocation3 + $0x28] sm:$0xff]  ;;  %vm9431_vm7 = vcmask 252928  }
 0x5b2   :  { %1867 = vst [vmem:[#allocation3] sm:$0xcc] %v1864_v39  ;;  %v1920_v44 = vrot.slane %v1918_v40, 4  ;;  %1926 = vst.msk [vmem:[#allocation3 + $0x1c] sm:$0xc] %vm9423_vm14, %v1918_v40  ;;  %v2163_v47 = vrot.slane %v2160_v45, 4 }
 0x5b3   :  { %vm9432_vm14 = vmmov %vm9429_vm4 }
 0x5b4   :  { %v1921_v48 = vsel %vm9424_vm3, %v1919_v43, %v1920_v44  ;;  %v2164_v52 = vsel %vm9426_vm15, %v2163_v47, %v2160_v45  ;;  %vm9433_vm3 = vmmov %vm9429_vm4 }
 0x5b5   :  { %v1922_v51 = vsel %vm9425_vm13, %v8274_v50, %v1921_v48  ;;  %v8314_v53 = vpop.permute.xlu0 %2244  ;;  %v2352_v46 = vld [vmem:[#allocation3 + $0x3c] sm:$0xff]  ;;  %2168 = vst.msk [vmem:[#allocation3 + $0x1c] sm:$0x33] %vm7857_vm2, %v2164_v52  ;;  %v2218_v57 = vpop.permute.xlu1 %2217  ;;  %vm9434_vm13 = vmmov %vm9426_vm15  ;;  %vm9435_vm15 = vcmask 1043456  }
 0x5b6   :  { %v7614_v55 = vld [vmem:[#allocation3 + $0x2c] ss:$20 sps:$4 sm:$0xff]   ;;  %1925 = vst [vmem:[#allocation3 + $0x14] sm:$0xcc] %v1922_v51  ;;  %v2248_v30 = vrot.slane %v8314_v53, 4  ;;  %v6851_v56 = vcombine.low %v2349_v35, %v2352_v46  ;;  %v2221_v58 = vsel %vm9427_vm12, %v2219_v18, %v2218_v57  ;;  %vm9436_vm12 = vmmov %vm9433_vm3 }
 0x5b7   :  { %2453 = vmatprep.subr.bf16.mxu0 %v7614_v55  ;;  %2225 = vst.msk [vmem:[#allocation3 + $0x38] sm:$0x3] %vm9429_vm4, %v2221_v58  ;;  %vm9438_vm4 = vmmov %vm9433_vm3 }
 0x5b8   :  { %v2249_v50 = vsel %vm9428_vm1, %v2248_v30, %v8314_v53  ;;  %2454 = vmatpush1.bf16.msra.mxu0 %v6851_v56  ;;  %vm9437_vm1 = vcmask 998400  }
 0x5b9   :  { %2253 = vst.msk [vmem:[#allocation3 + $0x30] sm:$0xcc] %vm7893_vm0, %v2249_v50  ;;  %v8328_v59 = vpop.permute.xlu0 %2132  ;;  %v2106_v42 = vpop.permute.xlu1 %2105  ;;  %v2343_v2 = vld [vmem:[#allocation3] sm:$0xff] }
 0x5ba   :  { %v2136_v60 = vrot.slane %v8328_v59, 4  ;;  %v2109_v63 = vsel %vm9430_vm5, %v2107_v22, %v2106_v42  ;;  %vm9439_vm5 = vcmask 293888  }
 0x5bb   :  { %2113 = vst.msk [vmem:[#allocation3 + $0x10] sm:$0x3] %vm9432_vm14, %v2109_v63  ;;  %vm9441_vm14 = vcmask 1014784  }
 0x5bc   :  { %v2137_v0 = vsel %vm9431_vm7, %v2136_v60, %v8328_v59  ;;  %vm9440_vm7 = vmmov %vm9435_vm15 }
 0x5bd   :  { %2141 = vst.msk [vmem:[#allocation3 + $0x8] sm:$0xcc] %vm7893_vm0, %v2137_v0  ;;  %v2332_v1 = vpop.permute.xlu0 %2331  ;;  %v2346_v5 = vld [vmem:[#allocation3 + $0x14] sm:$0xff]  ;;  %v2162_v12 = vpop.permute.xlu1 %2161 }
 0x5be   :  { %v7616_v6 = vld [vmem:[#allocation3 + $0x4] ss:$20 sps:$4 sm:$0xff]   ;;  %v2334_v10 = vrot.slane %v2332_v1, 4  ;;  %2340 = vst.msk [vmem:[#allocation3 + $0x60] sm:$0x3] %vm9433_vm3, %v2332_v1  ;;  %v6846_v11 = vcombine.low %v2343_v2, %v2346_v5  ;;  %v2165_v14 = vsel %vm9434_vm13, %v2163_v47, %v2162_v12  ;;  %vm9442_vm3 = vcmask 519170  }
 0x5bf   :  { %2455 = vmatprep.subr.bf16.mxu0 %v7616_v6  ;;  %2169 = vst.msk [vmem:[#allocation3 + $0x24] sm:$0x3] %vm9436_vm12, %v2165_v14  ;;  %vm9443_vm13 = vcmask 1041408   ;;  %vm9445_vm12 = vcmask 1006592  }
 0x5c0   :  { %v2335_v15 = vsel %vm9435_vm15, %v2333_v9, %v2334_v10  ;;  %2456 = vmatpush1.bf16.msra.mxu0 %v6846_v11  ;;  %vm9444_vm15 = vmmov %vm9440_vm7  ;;  %v2350_v43 = vld [vmem:[#allocation3 + $0x30] sm:$0xff] }
 0x5c1   :  { %v2336_v17 = vsel %vm9437_vm1, %v8279_v62, %v2335_v15  ;;  %v2274_v18 = vpop.permute.xlu0 %2273  ;;  %7505 = vmatprep.subr.bf16.mxu0 %v7703_v4  ;;  %vm9446_vm1 = vcmask 113664  }
 0x5c2   :  { %2339 = vst.msk [vmem:[#allocation3 + $0x58] sm:$0x33] %vm7857_vm2, %v2336_v17  ;;  %v2276_v21 = vrot.slane %v2274_v18, 4 }
 0x5c3   :  { %2282 = vst.msk [vmem:[#allocation3 + $0x4c] sm:$0x3] %vm9438_vm4, %v2274_v18  ;;  %6862 = vmatmul.mubr.msk.bf16.vlgmr.msra.gmra.mxu0 %vm9439_vm5, %v6845_v16  ;;  %vm9447_vm4 = vmmov %vm9443_vm13 }
 0x5c4   :  { %v2277_v19 = vsel %vm9440_vm7, %v2275_v13, %v2276_v21  ;;  %7511 = vmatprep.mubr.msk.bf16.mxu0 %vm9379_vm6, %v7703_v4  ;;  %vm9448_vm5 = vmmov %vm9447_vm4  ;;  %vm9449_vm7 = vcmask 97280   ;;  %v2344_v52 = vld [vmem:[#allocation3 + $0x8] sm:$0xff] }
 0x5c5   :  { %v2278_v62 = vsel %vm9441_vm14, %v8284_v3, %v2277_v19  ;;  %v2304_v23 = vpop.permute.xlu0 %2303  ;;  %v7618_v20 = vld [vmem:[#allocation3 + $0x60] ss:$0 sps:$4 sm:$0x33]   ;;  %vm9450_vm14 = vmmov %vm9442_vm3 }
 0x5c6   :  { %2281 = vst.msk [vmem:[#allocation3 + $0x44] sm:$0x33] %vm7857_vm2, %v2278_v62  ;;  %v2306_v25 = vrot.slane %v2304_v23, 4  ;;  %v2439_v22 = vsel %vm9443_vm13, %v7618_v20, 0  ;;  %vm9452_vm13 = vmmov %vm9450_vm14 }
 0x5c7   :  { %2312 = vst.msk [vmem:[#allocation3 + $0x4c] sm:$0xc] %vm9442_vm3, %v2304_v23  ;;  %7506 = vmatpush3.bf16.msra.mxu0 %v2439_v22  ;;  %vm9451_vm3 = vcmask 252928  }
 0x5c8   :  { %v2307_v26 = vsel %vm9444_vm15, %v2305_v24, %v2306_v25  ;;  %7507 = vmatprep.subr.bf16.mxu0 %v7703_v4  ;;  %vm9453_vm15 = vmmov %vm9446_vm1 }
 0x5c9   :  { %v2308_v29 = vsel %vm9445_vm12, %v8304_v34, %v2307_v26  ;;  %v2189_v31 = vpop.permute.xlu0 %2188  ;;  %v2356_v3 = vld [vmem:[#allocation3 + $0x58] sm:$0x33]  ;;  %vm9454_vm12 = vmmov %vm9452_vm13 }
 0x5ca   :  { %2311 = vst.msk [vmem:[#allocation3 + $0x44] sm:$0xcc] %vm7893_vm0, %v2308_v29  ;;  %v2192_v28 = vrot.slane %v2189_v31, 4  ;;  %v6859_v32 = vcombine.high %v2356_v3, %v2356_v3  ;;  %v6858_v33 = vcombine.low %v2356_v3, %v2356_v3  ;;  %v2568_v58 = vpop.permute.xlu1 %2567 }
 0x5cc   :  { %v2193_v38 = vsel %vm9446_vm1, %v2192_v28, %v2189_v31  ;;  %6863 = vmatprep.subr.msk.bf16.mxu1 %vm9447_vm4, %v6859_v32  ;;  %v2433_v39 = vsel %vm9448_vm5, %v6858_v33, 0  ;;  %vm9455_vm1 = vcmask 293888   ;;  %vm9457_vm5 = vcmask 1043456  }
 0x5cd   :  { %2197 = vst.msk [vmem:[#allocation3 + $0x1c] sm:$0xcc] %vm7893_vm0, %v2193_v38  ;;  %v2247_v34 = vpop.permute.xlu0 %2246  ;;  %2493 = vmatpush1.bf16.msra.mxu1 %v2433_v39  ;;  %vm9456_vm4 = vmmov %vm9455_vm1 }
 0x5ce   :  { %v2250_v40 = vsel %vm9449_vm7, %v2248_v30, %v2247_v34  ;;  %vm9458_vm7 = vcmask 941056  }
 0x5cf   :  { %2254 = vst.msk [vmem:[#allocation3 + $0x38] sm:$0xc] %vm9450_vm14, %v2250_v40  ;;  %vm9459_vm14 = vcmask 254976  }
 0x5d1   :  { %v2353_v44 = vld [vmem:[#allocation3 + $0x44] sm:$0xff]  ;;  %v2135_v45 = vpop.permute.xlu0 %2134 }
 0x5d2   :  { %v2138_v47 = vsel %vm9451_vm3, %v2136_v60, %v2135_v45  ;;  %v6854_v48 = vcombine.high %v2350_v43, %v2353_v44  ;;  %v6853_v51 = vcombine.low %v2350_v43, %v2353_v44  ;;  %vm9460_vm3 = vmmov %vm9459_vm14 }
 0x5d3   :  { %2142 = vst.msk [vmem:[#allocation3 + $0x10] sm:$0xc] %vm9452_vm13, %v2138_v47  ;;  %vm9461_vm13 = vmmov %vm9457_vm5 }
 0x5d4   :  { %v2347_v35 = vld [vmem:[#allocation3 + $0x1c] sm:$0xff]  ;;  %2494 = vmatprep.subr.bf16.mxu1 %v6854_v48 }
 0x5d5   :  { %v2191_v46 = vpop.permute.xlu0 %2190  ;;  %2495 = vmatpush1.bf16.msra.mxu1 %v6853_v51  ;;  %v6849_v55 = vcombine.high %v2344_v52, %v2347_v35  ;;  %v6848_v56 = vcombine.low %v2344_v52, %v2347_v35 }
 0x5d6   :  { %v2194_v53 = vsel %vm9453_vm15, %v2192_v28, %v2191_v46  ;;  %v7620_v30 = vld [vmem:[#allocation3 + $0x38] ss:$20 sps:$4 sm:$0xff]   ;;  %vm9462_vm15 = vcmask 736256  }
 0x5d7   :  { %2198 = vst.msk [vmem:[#allocation3 + $0x24] sm:$0xc] %vm9454_vm12, %v2194_v53  ;;  %2496 = vmatprep.subr.bf16.mxu1 %v6849_v55  ;;  %7508 = vmatpush3.bf16.msra.mxu0 %v7620_v30  ;;  %vm9463_vm12 = vmmov %vm9460_vm3 }
 0x5d8   :  { %7509 = vmatprep.subr.bf16.mxu0 %v7703_v4 }
 0x5d9   :  { %2497 = vmatpush1.bf16.msra.mxu1 %v6848_v56 }
 0x5dc   :  { %6864 = vmatmul.mubr.msk.bf16.vlgmr.msra.gmra.mxu1 %vm9455_vm1, %v6845_v16  ;;  %vm9464_vm1 = vmmov %vm9457_vm5 }
 0x5dd   :  { %3277 = vmatprep.mubr.bf16.mxu1 %v7719_v61 }
 0x5de   :  { %v7621_v57 = vld [vmem:[#allocation3 + $0x10] ss:$20 sps:$4 sm:$0xff]  }
 0x5df   :  { %7510 = vmatpush3.bf16.msra.mxu0 %v7621_v57 }
 0x5e2   :  { %7512 = vmatmul.mubr.msk.bf16.vlgmr.msra.gmra.mxu0 %vm9456_vm4, %v6845_v16  ;;  %v2580_v60 = vpop.permute.xlu0 %2579  ;;  %vm9465_vm4 = vcmask 891904  }
 0x5e3   :  { %3318 = vmatprep.mubr.bf16.mxu0 %v7719_v61 }
 0x683   :  { %v2475_v50 = vpop.f32.mrf.mxu0 }
 0x684   :  { %v2570_v59 = vmul.f32 %v2568_v58, %v2475_v50 }
 0x685   :  { %v2477_v42 = vpop.f32.mrf.mxu0 }
 0x686   :  { %v2582_v63 = vadd.f32 %v2580_v60, %v2570_v59  ;;  %v2571_v0 = vmul.f32 %v2568_v58, %v2477_v42 }
 0x687   :  { %v2479_v1 = vpop.f32.mrf.mxu0 }
 0x688   :  { %v2587_v2 = vmax.f32 %v2582_v63, 0.0  ;;  %v2583_v5 = vadd.f32 %v2580_v60, %v2571_v0 }
 0x689   :  { %v2480_v6 = vpop.f32.mrf.mxu0 }
 0x68a   :  { %v2588_v9 = vmax.f32 %v2583_v5, 0.0  ;;  %v2592_v10 = vmul.f32 %v7995_v41, %v2587_v2 }
 0x68c   :  { %v2593_v11 = vmul.f32 %v8003_v8, %v2588_v9 }
 0x68e   :  { %v2601_v12 = vcombine.low %v2592_v10, %v2593_v11 }
 0x690   :  { %2612 = vrot.lane.b32.xlu1 %v2601_v12, %s7702_s22 }
 0x69c   :  { %v2516_v14 = vpop.f32.mrf.mxu1 }
 0x69d   :  { %v2572_v15 = vmul.f32 %v2568_v58, %v2516_v14 }
 0x69e   :  { %v2518_v16 = vpop.f32.mrf.mxu1 }
 0x69f   :  { %v2584_v17 = vadd.f32 %v2580_v60, %v2572_v15  ;;  %v2573_v18 = vmul.f32 %v2568_v58, %v2518_v16 }
 0x6a0   :  { %v2520_v13 = vpop.f32.mrf.mxu1 }
 0x6a1   :  { %v2589_v21 = vmax.f32 %v2584_v17, 0.0  ;;  %v2585_v19 = vadd.f32 %v2580_v60, %v2573_v18 }
 0x6a2   :  { %v2521_v62 = vpop.f32.mrf.mxu1  ;;  %v2557_v20 = vpop.f32.mrf.mxu0 }
 0x6a3   :  { %v2590_v23 = vmax.f32 %v2585_v19, 0.0  ;;  %v2574_v24 = vmul.f32 %v2568_v58, %v2557_v20  ;;  %v2594_v25 = vmul.f32 %v8015_v36, %v2589_v21 }
 0x6a4   :  { %v7513_v26 = vpop.f32.mrf.mxu0 }
 0x6a5   :  { %v2595_v22 = vmul.f32 %v8018_v37, %v2590_v23  ;;  %v2586_v29 = vadd.f32 %v2580_v60, %v2574_v24 }
 0x6a6   :  { %v2560_v3 = vpop.f32.mrf.mxu0 }
 0x6a7   :  { %v2602_v31 = vcombine.low %v2594_v25, %v2595_v22  ;;  %v2591_v28 = vmax.f32 %v2586_v29, 0.0 }
 0x6a8   :  { %v7514_v32 = vpop.f32.mrf.mxu0 }
 0x6a9   :  { %2606 = vst [vmem:[#allocation5 + $0x8] sm:$0xff] %v2602_v31  ;;  %2879 = vrot.lane.b32.xlu1 %v2602_v31, %s7704_s0  ;;  %v2596_v33 = vmul.f32 %v8025_v49, %v2591_v28 }
 0x6ab   :  { %2607 = vst.msk [vmem:[#allocation5 + $0x10] sm:$0xf] %vm147_vm10, %v2596_v33 }
 0x6b0   :  { %v2609_v38 = vld [vmem:[#allocation5 + $0x8] sm:$0xf] }
 0x6b1   :  { %2614 = vrot.lane.b32.xlu0 %v2609_v38, %s7702_s22 }
 0x6b2   :  { %v2876_v39 = vld [vmem:[#allocation5 + $0x10] sm:$0xf] }
 0x6b5   :  { %2881 = vrot.lane.b32.xlu0 %v2876_v39, %s7704_s0  ;;  %v6925_v39 = vld [vmem:[%s9294_s2 + $0xc] sm:$0xf] }
 0x702   :  { %v2613_v34 = vpop.permute.xlu1 %2612 }
 0x703   :  { %v2616_v40 = vrot.slane %v2613_v34, 4 }
 0x705   :  { %v2617_v43 = vsel %vm158_vm8, %v2616_v40, %v2613_v34 }
 0x706   :  { %2621 = vst.msk [vmem:[#allocation2] sm:$0xff] %vm7767_vm9, %v2617_v43 }
 0x70d   :  { %v2623_v44 = vld [vmem:[#allocation2] sm:$0xff] }
 0x70e   :  { %v2626_v45 = vcombine.high %v2623_v44, %v2623_v44 }
 0x710   :  { %v7289_v47 = vpack.c.bf16 %v2626_v45, %v2623_v44 }
 0x712   :  { %2863 = vrot.lane.b32.xlu1 %v7289_v47, %s7705_s25  ;;  %2641 = vst [vmem:[#allocation3] sm:$0x33] %v7289_v47  ;;  %v2775_v48 = vrot.slane %v7289_v47, 6 }
 0x716   :  { %2747 = vrot.lane.b32.xlu1 %v7289_v47, %s7706_s26 }
 0x71a   :  { %2805 = vrot.lane.b32.xlu1 %v7289_v47, %s7707_s27 }
 0x71b   :  { %v2880_v35 = vpop.permute.xlu1 %2879 }
 0x71c   :  { %v2883_v55 = vrot.slane %v2880_v35, 4 }
 0x71e   :  { %2689 = vrot.lane.b32.xlu1 %v7289_v47, %s7708_s28 }
 0x722   :  { %2777 = vrot.lane.b32.xlu1 %v2775_v48, %s7709_s29 }
 0x723   :  { %v2615_v51 = vpop.permute.xlu0 %2614 }
 0x724   :  { %v2618_v52 = vsel %vm158_vm8, %v2616_v40, %v2615_v51 }
 0x725   :  { %2622 = vst.msk [vmem:[#allocation2 + $0x8] sm:$0xf] %vm166_vm11, %v2618_v52 }
 0x726   :  { %2835 = vrot.lane.b32.xlu1 %v2775_v48, %s7710_s30 }
 0x727   :  { %v2882_v46 = vpop.permute.xlu0 %2881 }
 0x728   :  { %v2884_v53 = vrot.slane %v2882_v46, 4 }
 0x72a   :  { %v2885_v30 = vsel %vm9457_vm5, %v2883_v55, %v2884_v53  ;;  %2661 = vrot.lane.b32.xlu1 %v2775_v48, %s7711_s5  ;;  %vm9466_vm5 = vmmov %vm9460_vm3 }
 0x72b   :  { %v2886_v56 = vsel %vm9458_vm7, %v2880_v35, %v2885_v30  ;;  %vm9467_vm7 = vmmov %vm9464_vm1 }
 0x72c   :  { %v2624_v57 = vld [vmem:[#allocation2 + $0x8] sm:$0xf]  ;;  %2889 = vst.msk [vmem:[#allocation2] sm:$0xff] %vm7767_vm9, %v2886_v56 }
 0x72d   :  { %v2848_v58 = vld [vmem:[#allocation2 + $0x8] sm:$0xf]  ;;  %v7274_v0 = vpack.c.bf16 %v2624_v57, %v2624_v57 }
 0x72e   :  { %v2732_v50 = vld [vmem:[#allocation2 + $0x8] sm:$0xf]  ;;  %v7290_v59 = vpack.c.bf16 %v2848_v58, %v2848_v58  ;;  %2719 = vrot.lane.b32.xlu1 %v2775_v48, %s7712_s6 }
 0x72f   :  { %v2790_v60 = vld [vmem:[#allocation2 + $0x8] sm:$0xf]  ;;  %2642 = vst.msk [vmem:[#allocation3 + $0x8] sm:$0x3] %vm9459_vm14, %v7274_v0  ;;  %v7282_v6 = vpack.c.bf16 %v2732_v50, %v2732_v50  ;;  %vm9468_vm14 = vcmask 752640  }
 0x730   :  { %v2674_v42 = vld [vmem:[#allocation2 + $0x8] sm:$0xf]  ;;  %2865 = vrot.lane.b32.xlu0 %v7290_v59, %s7705_s25  ;;  %v7286_v11 = vpack.c.bf16 %v2790_v60, %v2790_v60 }
 0x731   :  { %v2760_v63 = vld [vmem:[#allocation2 + $0x8] sm:$0xf]  ;;  %v7278_v14 = vpack.c.bf16 %v2674_v42, %v2674_v42 }
 0x732   :  { %v2818_v1 = vld [vmem:[#allocation2 + $0x8] sm:$0xf]  ;;  %v7284_v15 = vpack.c.bf16 %v2760_v63, %v2760_v63 }
 0x733   :  { %v2644_v2 = vld [vmem:[#allocation2 + $0x8] sm:$0xf]  ;;  %v3117_v9 = vld [vmem:[#allocation2] sm:$0xff]  ;;  %v7288_v17 = vpack.c.bf16 %v2818_v1, %v2818_v1 }
 0x734   :  { %v2702_v5 = vld [vmem:[#allocation2 + $0x8] sm:$0xf]  ;;  %2749 = vrot.lane.b32.xlu0 %v7282_v6, %s7706_s26  ;;  %v3120_v10 = vcombine.high %v3117_v9, %v3117_v9  ;;  %v2776_v16 = vrot.slane %v7284_v15, 6  ;;  %v7276_v13 = vpack.c.bf16 %v2644_v2, %v2644_v2 }
 0x735   :  { %2890 = vst.msk [vmem:[#allocation2 + $0x8] sm:$0xf] %vm166_vm11, %v2882_v46  ;;  %v2834_v18 = vrot.slane %v7288_v17, 6  ;;  %v7280_v19 = vpack.c.bf16 %v2702_v5, %v2702_v5  ;;  %v6926_v46 = vld [vmem:[%s9295_s3 + $0xc] sm:$0xf] }
 0x736   :  { %v7307_v12 = vpack.c.bf16 %v3120_v10, %v3117_v9  ;;  %v2660_v21 = vrot.slane %v7276_v13, 6 }
 0x737   :  { %v2718_v23 = vrot.slane %v7280_v19, 6 }
 0x738   :  { %2807 = vrot.lane.b32.xlu0 %v7286_v11, %s7707_s27  ;;  %3133 = vrot.lane.b32.xlu1 %v7307_v12, %s7713_s7  ;;  %v3103_v62 = vrot.slane %v7307_v12, 6 }
 0x73c   :  { %2691 = vrot.lane.b32.xlu0 %v7278_v14, %s7708_s28  ;;  %3075 = vrot.lane.b32.xlu1 %v7307_v12, %s7714_s8  ;;  %v3004_v20 = vld [vmem:[#allocation2 + $0x8] sm:$0xf] }
 0x73d   :  { %v7300_v24 = vpack.c.bf16 %v3004_v20, %v3004_v20  ;;  %v2892_v25 = vld [vmem:[#allocation2 + $0x8] sm:$0xf] }
 0x73e   :  { %v3118_v22 = vld [vmem:[#allocation2 + $0x8] sm:$0xf]  ;;  %v7292_v26 = vpack.c.bf16 %v2892_v25, %v2892_v25 }
 0x73f   :  { %v2948_v29 = vld [vmem:[#allocation2 + $0x8] sm:$0xf]  ;;  %v7308_v31 = vpack.c.bf16 %v3118_v22, %v3118_v22 }
 0x740   :  { %2779 = vrot.lane.b32.xlu0 %v2776_v16, %s7709_s29  ;;  %3019 = vrot.lane.b32.xlu1 %v7307_v12, %s7715_s9  ;;  %v3060_v3 = vld [vmem:[#allocation2 + $0x8] sm:$0xf]  ;;  %v7296_v28 = vpack.c.bf16 %v2948_v29, %v2948_v29 }
 0x741   :  { %v3088_v32 = vld [vmem:[#allocation2 + $0x8] sm:$0xf]  ;;  %v7304_v33 = vpack.c.bf16 %v3060_v3, %v3060_v3 }
 0x742   :  { %v7306_v38 = vpack.c.bf16 %v3088_v32, %v3088_v32  ;;  %v3031_v40 = vld [vmem:[#allocation2 + $0x8] sm:$0xf] }
 0x743   :  { %v7302_v43 = vpack.c.bf16 %v3031_v40, %v3031_v40  ;;  %v2919_v44 = vld [vmem:[#allocation2 + $0x8] sm:$0xf] }
 0x744   :  { %2837 = vrot.lane.b32.xlu0 %v2834_v18, %s7710_s30  ;;  %2907 = vrot.lane.b32.xlu1 %v7307_v12, %s7701_s21  ;;  %v3104_v34 = vrot.slane %v7306_v38, 6  ;;  %v7294_v47 = vpack.c.bf16 %v2919_v44, %v2919_v44  ;;  %v2975_v48 = vld [vmem:[#allocation2 + $0x8] sm:$0xf] }
 0x745   :  { %v3047_v45 = vrot.slane %v7302_v43, 6  ;;  %v7298_v52 = vpack.c.bf16 %v2975_v48, %v2975_v48 }
 0x746   :  { %v2935_v51 = vrot.slane %v7294_v47, 6 }
 0x747   :  { %v2991_v35 = vrot.slane %v7298_v52, 6 }
 0x748   :  { %2663 = vrot.lane.b32.xlu0 %v2660_v21, %s7711_s5  ;;  %3105 = vrot.lane.b32.xlu1 %v3103_v62, %s7716_s10 }
 0x74c   :  { %2721 = vrot.lane.b32.xlu0 %v2718_v23, %s7712_s6  ;;  %2963 = vrot.lane.b32.xlu1 %v7307_v12, %s7717_s11 }
 0x750   :  { %3048 = vrot.lane.b32.xlu0 %v3103_v62, %s7718_s12  ;;  %3021 = vrot.lane.b32.xlu1 %v7300_v24, %s7715_s9 }
 0x754   :  { %2936 = vrot.lane.b32.xlu0 %v3103_v62, %s7720_s13  ;;  %2909 = vrot.lane.b32.xlu1 %v7292_v26, %s7701_s21 }
 0x758   :  { %3135 = vrot.lane.b32.xlu0 %v7308_v31, %s7713_s7  ;;  %2965 = vrot.lane.b32.xlu1 %v7296_v28, %s7717_s11 }
 0x75c   :  { %3077 = vrot.lane.b32.xlu0 %v7304_v33, %s7714_s8  ;;  %3371 = vperm.xlu1 %7599, %v6925_v39  }
 0x760   :  { %3107 = vrot.lane.b32.xlu0 %v3104_v34, %s7716_s10 }
 0x764   :  { %2992 = vrot.lane.b32.xlu0 %v3103_v62, %s7721_s14 }
 0x768   :  { %3050 = vrot.lane.b32.xlu0 %v3047_v45, %s7718_s12 }
 0x76c   :  { %2938 = vrot.lane.b32.xlu0 %v2935_v51, %s7720_s13 }
 0x770   :  { %2994 = vrot.lane.b32.xlu0 %v2991_v35, %s7721_s14 }
 0x774   :  { %3383 = vperm.xlu0 %7598, %v6926_v46  }
 0x784   :  { %v2864_v55 = vpop.permute.xlu1 %2863 }
 0x785   :  { %v2867_v60 = vrot.slane %v2864_v55, 4 }
 0x788   :  { %v2748_v53 = vpop.permute.xlu1 %2747 }
 0x789   :  { %v2751_v2 = vrot.slane %v2748_v53, 4 }
 0x78c   :  { %v2806_v30 = vpop.permute.xlu1 %2805 }
 0x78d   :  { %v2809_v12 = vrot.slane %v2806_v30, 4 }
 0x790   :  { %v2690_v56 = vpop.permute.xlu1 %2689 }
 0x791   :  { %v2693_v21 = vrot.slane %v2690_v56, 4 }
 0x794   :  { %v2778_v57 = vpop.permute.xlu1 %2777 }
 0x795   :  { %v2781_v29 = vrot.slane %v2778_v57, 4 }
 0x798   :  { %v2836_v58 = vpop.permute.xlu1 %2835 }
 0x799   :  { %v2839_v34 = vrot.slane %v2836_v58, 4 }
 0x79c   :  { %v8448_v50 = vpop.permute.xlu1 %2661 }
 0x79d   :  { %v2665_v52 = vrot.slane %v8448_v50, 4 }
 0x7a0   :  { %v8454_v6 = vpop.permute.xlu1 %2719 }
 0x7a2   :  { %v2866_v59 = vpop.permute.xlu0 %2865 }
 0x7a3   :  { %v2868_v42 = vrot.slane %v2866_v59, 4  ;;  %2874 = vst.msk [vmem:[#allocation3 + $0x58] sm:$0x3] %vm9460_vm3, %v2866_v59 }
 0x7a5   :  { %v2869_v63 = vsel %vm9461_vm13, %v2867_v60, %v2868_v42  ;;  %vm9469_vm13 = vmmov %vm9464_vm1 }
 0x7a6   :  { %v2870_v0 = vsel %vm9462_vm15, %v2864_v55, %v2869_v63  ;;  %v2750_v1 = vpop.permute.xlu0 %2749  ;;  %vm9470_vm15 = vcmask 1041408  }
 0x7a7   :  { %2873 = vst [vmem:[#allocation3 + $0x50] sm:$0x33] %v2870_v0  ;;  %v2752_v5 = vrot.slane %v2750_v1, 4  ;;  %2758 = vst.msk [vmem:[#allocation3 + $0x30] sm:$0x3] %vm9463_vm12, %v2750_v1 }
 0x7a8   :  { %vm9471_vm12 = vmmov %vm9470_vm15 }
 0x7a9   :  { %v2753_v9 = vsel %vm9464_vm1, %v2751_v2, %v2752_v5  ;;  %vm9472_vm1 = vcmask 1031168  }
 0x7aa   :  { %v2754_v10 = vsel %vm9465_vm4, %v2748_v53, %v2753_v9  ;;  %v2808_v11 = vpop.permute.xlu0 %2807  ;;  %v8459_v15 = vpop.permute.xlu1 %3133  ;;  %vm9473_vm4 = vcmask 257026  }
 0x7ab   :  { %2757 = vst [vmem:[#allocation3 + $0x28] sm:$0x33] %v2754_v10  ;;  %v2810_v14 = vrot.slane %v2808_v11, 4  ;;  %2816 = vst.msk [vmem:[#allocation3 + $0x44] sm:$0x3] %vm9466_vm5, %v2808_v11 }
 0x7ac   :  { %vm9474_vm5 = vmmov %vm9467_vm7 }
 0x7ad   :  { %v2811_v16 = vsel %vm9467_vm7, %v2809_v12, %v2810_v14  ;;  %vm9475_vm7 = vcmask 883712  }
 0x7ae   :  { %v2812_v17 = vsel %vm9468_vm14, %v2806_v30, %v2811_v16  ;;  %v2692_v18 = vpop.permute.xlu0 %2691  ;;  %v3159_v13 = vld [vmem:[#allocation3 + $0x50] sm:$0x33]  ;;  %v8464_v20 = vpop.permute.xlu1 %3075  ;;  %vm9476_vm14 = vcmask 105472  }
 0x7af   :  { %2815 = vst [vmem:[#allocation3 + $0x3c] sm:$0x33] %v2812_v17  ;;  %v2694_v19 = vrot.slane %v2692_v18, 4  ;;  %2700 = vst.msk [vmem:[#allocation3 + $0x1c] sm:$0x3] %vm9460_vm3, %v2692_v18  ;;  %v6916_v62 = vcombine.high %v3159_v13, %v3159_v13  ;;  %v6915_v23 = vcombine.low %v3159_v13, %v3159_v13 }
 0x7b0   :  { %vm9477_vm3 = vmmov %vm9473_vm4 }
 0x7b1   :  { %v2695_v24 = vsel %vm9469_vm13, %v2693_v21, %v2694_v19  ;;  %6920 = vmatprep.subr.msk.bf16.mxu1 %vm9470_vm15, %v6916_v62  ;;  %v3231_v25 = vsel %vm9471_vm12, %v6915_v23, 0  ;;  %vm9478_vm13 = vmmov %vm9474_vm5  ;;  %vm9479_vm15 = vcmask 744448   ;;  %vm9480_vm12 = vcmask 261120  }
 0x7b2   :  { %v2696_v22 = vsel %vm9472_vm1, %v2690_v56, %v2695_v24  ;;  %v2780_v26 = vpop.permute.xlu0 %2779  ;;  %3256 = vmatpush1.bf16.msra.mxu1 %v3231_v25  ;;  %v3020_v3 = vpop.permute.xlu1 %3019  ;;  %vm9481_vm1 = vmmov %vm9477_vm3  ;;  %v2723_v56 = vrot.slane %v8454_v6, 4  ;;  %v3137_v23 = vrot.slane %v8459_v15, 4 }
 0x7b3   :  { %2699 = vst [vmem:[#allocation3 + $0x14] sm:$0x33] %v2696_v22  ;;  %v2782_v31 = vrot.slane %v2780_v26, 4  ;;  %2788 = vst.msk [vmem:[#allocation3 + $0x30] sm:$0xc] %vm9473_vm4, %v2780_v26  ;;  %v3023_v28 = vrot.slane %v3020_v3, 4 }
 0x7b4   :  { %vm9482_vm4 = vmmov %vm9474_vm5 }
 0x7b5   :  { %v2783_v32 = vsel %vm9474_vm5, %v2781_v29, %v2782_v31  ;;  %v3024_v39 = vsel %vm9476_vm14, %v3023_v28, %v3020_v3  ;;  %vm9483_vm5 = vcmask 1039360   ;;  %vm9485_vm14 = vmmov %vm9482_vm4  ;;  %v6904_v31 = vld [vmem:[%s9296_s1 + $0x6] sm:$0x3] }
 0x7b6   :  { %v2784_v33 = vsel %vm9475_vm7, %v2778_v57, %v2783_v32  ;;  %v2838_v38 = vpop.permute.xlu0 %2837  ;;  %3028 = vst.msk [vmem:[#allocation3 + $0x30] sm:$0x33] %vm7857_vm2, %v3024_v39  ;;  %v2908_v43 = vpop.permute.xlu1 %2907  ;;  %vm9484_vm7 = vmmov %vm9481_vm1  ;;  %v3079_v32 = vrot.slane %v8464_v20, 4 }
 0x7b7   :  { %2787 = vst [vmem:[#allocation3 + $0x28] sm:$0xcc] %v2784_v33  ;;  %v2840_v40 = vrot.slane %v2838_v38, 4  ;;  %2846 = vst.msk [vmem:[#allocation3 + $0x44] sm:$0xc] %vm9477_vm3, %v2838_v38  ;;  %v2911_v44 = vrot.slane %v2908_v43, 4 }
 0x7b8   :  { %vm9486_vm3 = vcmask 900096  }
 0x7b9   :  { %v2841_v45 = vsel %vm9478_vm13, %v2839_v34, %v2840_v40  ;;  %v2912_v51 = vsel %vm9480_vm12, %v2911_v44, %v2908_v43  ;;  %vm9487_vm13 = vcmask 244736   ;;  %vm9489_vm12 = vcmask 97280  }
 0x7ba   :  { %v2842_v47 = vsel %vm9479_vm15, %v2836_v58, %v2841_v45  ;;  %v2664_v48 = vpop.permute.xlu0 %2663  ;;  %2916 = vst.msk [vmem:[#allocation3 + $0x8] sm:$0x33] %vm7857_vm2, %v2912_v51  ;;  %v8484_v46 = vpop.permute.xlu1 %3105  ;;  %vm9488_vm15 = vcmask 105472  }
 0x7bb   :  { %2845 = vst [vmem:[#allocation3 + $0x3c] sm:$0xcc] %v2842_v47  ;;  %v2666_v35 = vrot.slane %v2664_v48, 4  ;;  %2672 = vst.msk [vmem:[#allocation3 + $0x8] sm:$0xc] %vm9481_vm1, %v2664_v48  ;;  %vm9490_vm1 = vcmask 517120  }
 0x7bc   :  { %v3109_v40 = vrot.slane %v8484_v46, 4 }
 0x7bd   :  { %v2667_v55 = vsel %vm9482_vm4, %v2665_v52, %v2666_v35  ;;  %vm9491_vm4 = vcmask 261120  }
 0x7be   :  { %v2668_v53 = vsel %vm9483_vm5, %v8448_v50, %v2667_v55  ;;  %v2722_v30 = vpop.permute.xlu0 %2721  ;;  %v2964_v58 = vpop.permute.xlu1 %2963  ;;  %v3153_v1 = vld [vmem:[#allocation3 + $0x28] sm:$0xff]  ;;  %vm9492_vm5 = vcmask 252928  }
 0x7bf   :  { %2671 = vst [vmem:[#allocation3] sm:$0xcc] %v2668_v53  ;;  %v2724_v57 = vrot.slane %v2722_v30, 4  ;;  %2730 = vst.msk [vmem:[#allocation3 + $0x1c] sm:$0xc] %vm9484_vm7, %v2722_v30  ;;  %v2967_v59 = vrot.slane %v2964_v58, 4 }
 0x7c0   :  { %vm9493_vm7 = vmmov %vm9490_vm1 }
 0x7c1   :  { %v2725_v60 = vsel %vm9485_vm14, %v2723_v56, %v2724_v57  ;;  %v2968_v0 = vsel %vm9487_vm13, %v2967_v59, %v2964_v58  ;;  %vm9494_vm14 = vmmov %vm9490_vm1 }
 0x7c2   :  { %v2726_v42 = vsel %vm9486_vm3, %v8454_v6, %v2725_v60  ;;  %v8494_v63 = vpop.permute.xlu0 %3048  ;;  %v3156_v50 = vld [vmem:[#allocation3 + $0x3c] sm:$0xff]  ;;  %2972 = vst.msk [vmem:[#allocation3 + $0x1c] sm:$0x33] %vm7857_vm2, %v2968_v0  ;;  %v3022_v10 = vpop.permute.xlu1 %3021  ;;  %vm9495_vm3 = vmmov %vm9487_vm13  ;;  %vm9496_vm13 = vcmask 1043456  }
 0x7c3   :  { %v7625_v2 = vld [vmem:[#allocation3 + $0x2c] ss:$20 sps:$4 sm:$0xff]   ;;  %2729 = vst [vmem:[#allocation3 + $0x14] sm:$0xcc] %v2726_v42  ;;  %v3052_v5 = vrot.slane %v8494_v63, 4  ;;  %v6910_v9 = vcombine.low %v3153_v1, %v3156_v50  ;;  %v3025_v11 = vsel %vm9488_vm15, %v3023_v28, %v3022_v10  ;;  %vm9497_vm15 = vmmov %vm9490_vm1 }
 0x7c4   :  { %3257 = vmatprep.subr.bf16.mxu1 %v7625_v2  ;;  %3029 = vst.msk [vmem:[#allocation3 + $0x38] sm:$0x3] %vm9490_vm1, %v3025_v11 }
 0x7c5   :  { %v3053_v6 = vsel %vm9489_vm12, %v3052_v5, %v8494_v63  ;;  %3258 = vmatpush1.bf16.msra.mxu1 %v6910_v9  ;;  %vm9498_vm12 = vcmask 998400  }
 0x7c6   :  { %3057 = vst.msk [vmem:[#allocation3 + $0x30] sm:$0xcc] %vm7893_vm0, %v3053_v6  ;;  %v8508_v12 = vpop.permute.xlu0 %2936  ;;  %v2910_v16 = vpop.permute.xlu1 %2909  ;;  %v3147_v21 = vld [vmem:[#allocation3] sm:$0xff] }
 0x7c7   :  { %v2940_v14 = vrot.slane %v8508_v12, 4  ;;  %v2913_v17 = vsel %vm9491_vm4, %v2911_v44, %v2910_v16  ;;  %vm9499_vm4 = vcmask 293888   ;;  %v3391_v16 = vld [vmem:[#allocation4] sm:$0xff] }
 0x7c8   :  { %2917 = vst.msk [vmem:[#allocation3 + $0x10] sm:$0x3] %vm9493_vm7, %v2913_v17  ;;  %vm9501_vm7 = vcmask 1014784  }
 0x7c9   :  { %v2941_v18 = vsel %vm9492_vm5, %v2940_v14, %v8508_v12  ;;  %vm9500_vm5 = vmmov %vm9496_vm13 }
 0x7ca   :  { %2945 = vst.msk [vmem:[#allocation3 + $0x8] sm:$0xcc] %vm7893_vm0, %v2941_v18  ;;  %v3136_v13 = vpop.permute.xlu0 %3135  ;;  %v3150_v19 = vld [vmem:[#allocation3 + $0x14] sm:$0xff]  ;;  %v2966_v22 = vpop.permute.xlu1 %2965 }
 0x7cb   :  { %v7627_v62 = vld [vmem:[#allocation3 + $0x4] ss:$20 sps:$4 sm:$0xff]   ;;  %v3138_v24 = vrot.slane %v3136_v13, 4  ;;  %3144 = vst.msk [vmem:[#allocation3 + $0x60] sm:$0x3] %vm9494_vm14, %v3136_v13  ;;  %v6905_v25 = vcombine.low %v3147_v21, %v3150_v19  ;;  %v2969_v26 = vsel %vm9495_vm3, %v2967_v59, %v2966_v22  ;;  %vm9502_vm14 = vcmask 519170  }
 0x7cc   :  { %3259 = vmatprep.subr.bf16.mxu1 %v7627_v62  ;;  %2973 = vst.msk [vmem:[#allocation3 + $0x24] sm:$0x3] %vm9497_vm15, %v2969_v26  ;;  %vm9503_vm3 = vcmask 1041408   ;;  %vm9505_vm15 = vcmask 1006592  }
 0x7cd   :  { %v3139_v29 = vsel %vm9496_vm13, %v3137_v23, %v3138_v24  ;;  %3260 = vmatpush1.bf16.msra.mxu1 %v6905_v25  ;;  %vm9504_vm13 = vmmov %vm9500_vm5  ;;  %v3154_v56 = vld [vmem:[#allocation3 + $0x30] sm:$0xff]  ;;  %v3396_v23 = vcombine.high %v3391_v16, %v3391_v16 }
 0x7ce   :  { %v3140_v3 = vsel %vm9498_vm12, %v8459_v15, %v3139_v29  ;;  %v3078_v28 = vpop.permute.xlu0 %3077  ;;  %7515 = vmatprep.subr.bf16.mxu1 %v7703_v4  ;;  %vm9506_vm12 = vcmask 113664  }
 0x7cf   :  { %3143 = vst.msk [vmem:[#allocation3 + $0x58] sm:$0x33] %vm7857_vm2, %v3140_v3  ;;  %v3080_v33 = vrot.slane %v3078_v28, 4 }
 0x7d0   :  { %3086 = vst.msk [vmem:[#allocation3 + $0x4c] sm:$0x3] %vm9490_vm1, %v3078_v28  ;;  %6921 = vmatmul.mubr.msk.bf16.vlgmr.msra.gmra.mxu1 %vm9499_vm4, %v6904_v31  ;;  %vm9507_vm1 = vmmov %vm9503_vm3 }
 0x7d1   :  { %v3081_v38 = vsel %vm9500_vm5, %v3079_v32, %v3080_v33  ;;  %7521 = vmatprep.mubr.msk.bf16.mxu1 %vm9379_vm6, %v7703_v4  ;;  %vm9508_vm4 = vmmov %vm9507_vm1  ;;  %vm9509_vm5 = vcmask 97280   ;;  %v3148_v0 = vld [vmem:[#allocation3 + $0x8] sm:$0xff] }
 0x7d2   :  { %v3082_v15 = vsel %vm9501_vm7, %v8464_v20, %v3081_v38  ;;  %v3108_v39 = vpop.permute.xlu0 %3107  ;;  %v7629_v34 = vld [vmem:[#allocation3 + $0x60] ss:$0 sps:$4 sm:$0x33]   ;;  %vm9510_vm7 = vmmov %vm9502_vm14  ;;  %v3392_v33 = vld [vmem:[#allocation4 + $0x8] sm:$0xff] }
 0x7d3   :  { %3085 = vst.msk [vmem:[#allocation3 + $0x44] sm:$0x33] %vm7857_vm2, %v3082_v15  ;;  %v3110_v43 = vrot.slane %v3108_v39, 4  ;;  %v3243_v44 = vsel %vm9503_vm3, %v7629_v34, 0  ;;  %vm9512_vm3 = vmmov %vm9510_vm7 }
 0x7d4   :  { %3116 = vst.msk [vmem:[#allocation3 + $0x4c] sm:$0xc] %vm9502_vm14, %v3108_v39  ;;  %7516 = vmatpush3.bf16.msra.mxu1 %v3243_v44  ;;  %vm9511_vm14 = vcmask 252928   ;;  %v3397_v44 = vcombine.high %v3392_v33, %v3392_v33 }
 0x7d5   :  { %v3111_v45 = vsel %vm9504_vm13, %v3109_v40, %v3110_v43  ;;  %7517 = vmatprep.subr.bf16.mxu1 %v7703_v4  ;;  %vm9513_vm13 = vmmov %vm9506_vm12 }
 0x7d6   :  { %v3112_v47 = vsel %vm9505_vm15, %v8484_v46, %v3111_v45  ;;  %v2993_v48 = vpop.permute.xlu0 %2992  ;;  %v3160_v20 = vld [vmem:[#allocation3 + $0x58] sm:$0x33]  ;;  %vm9514_vm15 = vmmov %vm9512_vm3 }
 0x7d7   :  { %3115 = vst.msk [vmem:[#allocation3 + $0x44] sm:$0xcc] %vm7893_vm0, %v3112_v47  ;;  %v2996_v51 = vrot.slane %v2993_v48, 4  ;;  %v6918_v52 = vcombine.high %v3160_v20, %v3160_v20  ;;  %v6917_v35 = vcombine.low %v3160_v20, %v3160_v20  ;;  %v3372_v11 = vpop.permute.xlu1 %3371 }
 0x7d9   :  { %v2997_v55 = vsel %vm9506_vm12, %v2996_v51, %v2993_v48  ;;  %6922 = vmatprep.subr.msk.bf16.mxu0 %vm9507_vm1, %v6918_v52  ;;  %v3237_v53 = vsel %vm9508_vm4, %v6917_v35, 0  ;;  %vm9515_vm12 = vcmask 293888   ;;  %vm9517_vm4 = vcmask 1043456  }
 0x7da   :  { %3001 = vst.msk [vmem:[#allocation3 + $0x1c] sm:$0xcc] %vm7893_vm0, %v2997_v55  ;;  %v3051_v46 = vpop.permute.xlu0 %3050  ;;  %3297 = vmatpush1.bf16.msra.mxu0 %v3237_v53  ;;  %vm9516_vm1 = vmmov %vm9515_vm12 }
 0x7db   :  { %v3054_v30 = vsel %vm9509_vm5, %v3052_v5, %v3051_v46  ;;  %vm9518_vm5 = vcmask 941056  }
 0x7dc   :  { %3058 = vst.msk [vmem:[#allocation3 + $0x38] sm:$0xc] %vm9510_vm7, %v3054_v30  ;;  %v3393_v30 = vld [vmem:[#allocation4 + $0x10] sm:$0xf]  ;;  %vm9519_vm7 = vcmask 254976  }
 0x7de   :  { %v3157_v57 = vld [vmem:[#allocation3 + $0x44] sm:$0xff]  ;;  %v2939_v58 = vpop.permute.xlu0 %2938 }
 0x7df   :  { %v2942_v59 = vsel %vm9511_vm14, %v2940_v14, %v2939_v58  ;;  %v6913_v60 = vcombine.high %v3154_v56, %v3157_v57  ;;  %v6912_v42 = vcombine.low %v3154_v56, %v3157_v57  ;;  %vm9520_vm14 = vmmov %vm9519_vm7 }
 0x7e0   :  { %2946 = vst.msk [vmem:[#allocation3 + $0x10] sm:$0xc] %vm9512_vm3, %v2942_v59  ;;  %vm9521_vm3 = vmmov %vm9517_vm4 }
 0x7e1   :  { %v3151_v1 = vld [vmem:[#allocation3 + $0x1c] sm:$0xff]  ;;  %3298 = vmatprep.subr.bf16.mxu0 %v6913_v60 }
 0x7e2   :  { %v2995_v50 = vpop.permute.xlu0 %2994  ;;  %3299 = vmatpush1.bf16.msra.mxu0 %v6912_v42  ;;  %v6908_v2 = vcombine.high %v3148_v0, %v3151_v1  ;;  %v6907_v9 = vcombine.low %v3148_v0, %v3151_v1 }
 0x7e3   :  { %v2998_v63 = vsel %vm9513_vm13, %v2996_v51, %v2995_v50  ;;  %v7631_v5 = vld [vmem:[#allocation3 + $0x38] ss:$20 sps:$4 sm:$0xff]   ;;  %vm9522_vm13 = vcmask 736256  }
 0x7e4   :  { %3002 = vst.msk [vmem:[#allocation3 + $0x24] sm:$0xc] %vm9514_vm15, %v2998_v63  ;;  %3300 = vmatprep.subr.bf16.mxu0 %v6908_v2  ;;  %7518 = vmatpush3.bf16.msra.mxu1 %v7631_v5  ;;  %vm9523_vm15 = vmmov %vm9519_vm7 }
 0x7e5   :  { %7519 = vmatprep.subr.bf16.mxu1 %v7703_v4 }
 0x7e6   :  { %3301 = vmatpush1.bf16.msra.mxu0 %v6907_v9 }
 0x7e9   :  { %6923 = vmatmul.mubr.msk.bf16.vlgmr.msra.gmra.mxu0 %vm9515_vm12, %v6904_v31  ;;  %vm9524_vm12 = vmmov %vm9521_vm3 }
 0x7ea   :  { %4095 = vmatprep.mubr.bf16.mxu0 %v7719_v61 }
 0x7eb   :  { %v7632_v10 = vld [vmem:[#allocation3 + $0x10] ss:$20 sps:$4 sm:$0xff]  }
 0x7ec   :  { %7520 = vmatpush3.bf16.msra.mxu1 %v7632_v10 }
 0x7ef   :  { %7522 = vmatmul.mubr.msk.bf16.vlgmr.msra.gmra.mxu1 %vm9516_vm1, %v6904_v31  ;;  %v3384_v14 = vpop.permute.xlu0 %3383  ;;  %vm9525_vm1 = vcmask 891904  }
 0x7f0   :  { %4136 = vmatprep.mubr.bf16.mxu1 %v7719_v61 }
 0x890   :  { %v3279_v6 = vpop.f32.mrf.mxu1 }
 0x891   :  { %v3374_v12 = vmul.f32 %v3372_v11, %v3279_v6 }
 0x892   :  { %v3281_v17 = vpop.f32.mrf.mxu1 }
 0x893   :  { %v3386_v18 = vadd.f32 %v3384_v14, %v3374_v12  ;;  %v3375_v13 = vmul.f32 %v3372_v11, %v3281_v17 }
 0x894   :  { %v3283_v21 = vpop.f32.mrf.mxu1 }
 0x895   :  { %v3400_v19 = vadd.f32 %v3391_v16, %v3386_v18  ;;  %v3387_v62 = vadd.f32 %v3384_v14, %v3375_v13 }
 0x896   :  { %v3284_v24 = vpop.f32.mrf.mxu1 }
 0x897   :  { %v3405_v25 = vmax.f32 %v3400_v19, 0.0  ;;  %v3401_v22 = vadd.f32 %v3396_v23, %v3387_v62 }
 0x899   :  { %v3406_v26 = vmax.f32 %v3401_v22, 0.0  ;;  %v3410_v29 = vmul.f32 %v7995_v41, %v3405_v25 }
 0x89b   :  { %v3411_v31 = vmul.f32 %v8003_v8, %v3406_v26 }
 0x89d   :  { %v3419_v3 = vcombine.low %v3410_v29, %v3411_v31 }
 0x89f   :  { %3423 = vst [vmem:[#allocation4] sm:$0xff] %v3419_v3  ;;  %3430 = vrot.lane.b32.xlu1 %v3419_v3, %s7702_s22 }
 0x8a9   :  { %v3320_v28 = vpop.f32.mrf.mxu0 }
 0x8aa   :  { %v3376_v32 = vmul.f32 %v3372_v11, %v3320_v28 }
 0x8ab   :  { %v3322_v38 = vpop.f32.mrf.mxu0 }
 0x8ac   :  { %v3388_v15 = vadd.f32 %v3384_v14, %v3376_v32  ;;  %v3377_v39 = vmul.f32 %v3372_v11, %v3322_v38 }
 0x8ad   :  { %v3324_v34 = vpop.f32.mrf.mxu0 }
 0x8ae   :  { %v3402_v40 = vadd.f32 %v3392_v33, %v3388_v15  ;;  %v3389_v43 = vadd.f32 %v3384_v14, %v3377_v39 }
 0x8af   :  { %v3325_v45 = vpop.f32.mrf.mxu0  ;;  %v3361_v20 = vpop.f32.mrf.mxu1 }
 0x8b0   :  { %v3407_v47 = vmax.f32 %v3402_v40, 0.0  ;;  %v3403_v48 = vadd.f32 %v3397_v44, %v3389_v43  ;;  %v3378_v51 = vmul.f32 %v3372_v11, %v3361_v20 }
 0x8b1   :  { %v7523_v35 = vpop.f32.mrf.mxu1 }
 0x8b2   :  { %v3408_v52 = vmax.f32 %v3403_v48, 0.0  ;;  %v3390_v55 = vadd.f32 %v3384_v14, %v3378_v51  ;;  %v3412_v53 = vmul.f32 %v8015_v36, %v3407_v47 }
 0x8b3   :  { %v3364_v56 = vpop.f32.mrf.mxu1 }
 0x8b4   :  { %v3413_v46 = vmul.f32 %v8018_v37, %v3408_v52  ;;  %v3404_v57 = vadd.f32 %v3393_v30, %v3390_v55 }
 0x8b5   :  { %v7524_v59 = vpop.f32.mrf.mxu1 }
 0x8b6   :  { %v3420_v58 = vcombine.low %v3412_v53, %v3413_v46  ;;  %v3409_v60 = vmax.f32 %v3404_v57, 0.0 }
 0x8b8   :  { %3424 = vst [vmem:[#allocation4 + $0x8] sm:$0xff] %v3420_v58  ;;  %3697 = vrot.lane.b32.xlu1 %v3420_v58, %s7704_s0  ;;  %v3414_v42 = vmul.f32 %v8025_v49, %v3409_v60 }
 0x8ba   :  { %3425 = vst.msk [vmem:[#allocation4 + $0x10] sm:$0xf] %vm147_vm10, %v3414_v42 }
 0x8bf   :  { %v3427_v0 = vld [vmem:[#allocation4 + $0x8] sm:$0xf] }
 0x8c0   :  { %3432 = vrot.lane.b32.xlu0 %v3427_v0, %s7702_s22 }
 0x8c1   :  { %v3694_v1 = vld [vmem:[#allocation4 + $0x10] sm:$0xf] }
 0x8c4   :  { %3699 = vrot.lane.b32.xlu0 %v3694_v1, %s7704_s0  ;;  %v6984_v1 = vld [vmem:[%s9294_s2 + $0x10] sm:$0xf] }
 0x911   :  { %v3431_v50 = vpop.permute.xlu1 %3430 }
 0x912   :  { %v3434_v2 = vrot.slane %v3431_v50, 4 }
 0x914   :  { %v3435_v63 = vsel %vm158_vm8, %v3434_v2, %v3431_v50 }
 0x915   :  { %3439 = vst.msk [vmem:[#allocation2] sm:$0xff] %vm7767_vm9, %v3435_v63 }
 0x91c   :  { %v3441_v5 = vld [vmem:[#allocation2] sm:$0xff] }
 0x91d   :  { %v3668_v9 = vcombine.high %v3441_v5, %v3441_v5 }
 0x91f   :  { %v7325_v10 = vpack.c.bf16 %v3668_v9, %v3441_v5 }
 0x921   :  { %3681 = vrot.lane.b32.xlu1 %v7325_v10, %s7705_s25  ;;  %3459 = vst [vmem:[#allocation3] sm:$0x33] %v7325_v10  ;;  %v3593_v11 = vrot.slane %v7325_v10, 6 }
 0x925   :  { %3565 = vrot.lane.b32.xlu1 %v7325_v10, %s7706_s26 }
 0x929   :  { %3623 = vrot.lane.b32.xlu1 %v7325_v10, %s7707_s27 }
 0x92a   :  { %v3698_v14 = vpop.permute.xlu1 %3697 }
 0x92b   :  { %v3701_v17 = vrot.slane %v3698_v14, 4 }
 0x92d   :  { %3507 = vrot.lane.b32.xlu1 %v7325_v10, %s7708_s28 }
 0x931   :  { %3595 = vrot.lane.b32.xlu1 %v3593_v11, %s7709_s29 }
 0x932   :  { %v3433_v6 = vpop.permute.xlu0 %3432 }
 0x933   :  { %v3436_v12 = vsel %vm158_vm8, %v3434_v2, %v3433_v6 }
 0x934   :  { %3440 = vst.msk [vmem:[#allocation2 + $0x8] sm:$0xf] %vm166_vm11, %v3436_v12 }
 0x935   :  { %3653 = vrot.lane.b32.xlu1 %v3593_v11, %s7710_s30 }
 0x936   :  { %v3700_v16 = vpop.permute.xlu0 %3699 }
 0x937   :  { %v3702_v18 = vrot.slane %v3700_v16, 4 }
 0x939   :  { %v3703_v13 = vsel %vm9517_vm4, %v3701_v17, %v3702_v18  ;;  %3479 = vrot.lane.b32.xlu1 %v3593_v11, %s7711_s5  ;;  %vm9526_vm4 = vmmov %vm9519_vm7 }
 0x93a   :  { %v3704_v21 = vsel %vm9518_vm5, %v3698_v14, %v3703_v13  ;;  %vm9527_vm5 = vmmov %vm9521_vm3 }
 0x93b   :  { %v3442_v19 = vld [vmem:[#allocation2 + $0x8] sm:$0xf]  ;;  %3707 = vst.msk [vmem:[#allocation2] sm:$0xff] %vm7767_vm9, %v3704_v21 }
 0x93c   :  { %v3666_v62 = vld [vmem:[#allocation2 + $0x8] sm:$0xf]  ;;  %v7310_v29 = vpack.c.bf16 %v3442_v19, %v3442_v19 }
 0x93d   :  { %v3550_v23 = vld [vmem:[#allocation2 + $0x8] sm:$0xf]  ;;  %v7326_v24 = vpack.c.bf16 %v3666_v62, %v3666_v62  ;;  %3537 = vrot.lane.b32.xlu1 %v3593_v11, %s7712_s6 }
 0x93e   :  { %v3608_v25 = vld [vmem:[#allocation2 + $0x8] sm:$0xf]  ;;  %3460 = vst.msk [vmem:[#allocation3 + $0x8] sm:$0x3] %vm9519_vm7, %v7310_v29  ;;  %v7318_v32 = vpack.c.bf16 %v3550_v23, %v3550_v23  ;;  %vm9528_vm7 = vcmask 752640  }
 0x93f   :  { %v3492_v22 = vld [vmem:[#allocation2 + $0x8] sm:$0xf]  ;;  %3683 = vrot.lane.b32.xlu0 %v7326_v24, %s7705_s25  ;;  %v7322_v15 = vpack.c.bf16 %v3608_v25, %v3608_v25 }
 0x940   :  { %v3578_v26 = vld [vmem:[#allocation2 + $0x8] sm:$0xf]  ;;  %v7314_v34 = vpack.c.bf16 %v3492_v22, %v3492_v22 }
 0x941   :  { %v3636_v31 = vld [vmem:[#allocation2 + $0x8] sm:$0xf]  ;;  %v7320_v40 = vpack.c.bf16 %v3578_v26, %v3578_v26 }
 0x942   :  { %v3462_v3 = vld [vmem:[#allocation2 + $0x8] sm:$0xf]  ;;  %v3935_v33 = vld [vmem:[#allocation2] sm:$0xff]  ;;  %v7324_v44 = vpack.c.bf16 %v3636_v31, %v3636_v31 }
 0x943   :  { %v3520_v28 = vld [vmem:[#allocation2 + $0x8] sm:$0xf]  ;;  %3567 = vrot.lane.b32.xlu0 %v7318_v32, %s7706_s26  ;;  %v3938_v38 = vcombine.high %v3935_v33, %v3935_v33  ;;  %v3594_v43 = vrot.slane %v7320_v40, 6  ;;  %v7312_v47 = vpack.c.bf16 %v3462_v3, %v3462_v3 }
 0x944   :  { %3708 = vst.msk [vmem:[#allocation2 + $0x8] sm:$0xf] %vm166_vm11, %v3700_v16  ;;  %v3652_v45 = vrot.slane %v7324_v44, 6  ;;  %v7316_v20 = vpack.c.bf16 %v3520_v28, %v3520_v28  ;;  %v6985_v16 = vld [vmem:[%s9295_s3 + $0x10] sm:$0xf] }
 0x945   :  { %v7343_v39 = vpack.c.bf16 %v3938_v38, %v3935_v33  ;;  %v3478_v48 = vrot.slane %v7312_v47, 6 }
 0x946   :  { %v3536_v52 = vrot.slane %v7316_v20, 6 }
 0x947   :  { %3625 = vrot.lane.b32.xlu0 %v7322_v15, %s7707_s27  ;;  %3951 = vrot.lane.b32.xlu1 %v7343_v39, %s7713_s7  ;;  %v3921_v51 = vrot.slane %v7343_v39, 6 }
 0x94b   :  { %3509 = vrot.lane.b32.xlu0 %v7314_v34, %s7708_s28  ;;  %3893 = vrot.lane.b32.xlu1 %v7343_v39, %s7714_s8  ;;  %v3822_v35 = vld [vmem:[#allocation2 + $0x8] sm:$0xf] }
 0x94c   :  { %v7336_v55 = vpack.c.bf16 %v3822_v35, %v3822_v35  ;;  %v3710_v53 = vld [vmem:[#allocation2 + $0x8] sm:$0xf] }
 0x94d   :  { %v3936_v46 = vld [vmem:[#allocation2 + $0x8] sm:$0xf]  ;;  %v7328_v30 = vpack.c.bf16 %v3710_v53, %v3710_v53 }
 0x94e   :  { %v3766_v56 = vld [vmem:[#allocation2 + $0x8] sm:$0xf]  ;;  %v7344_v57 = vpack.c.bf16 %v3936_v46, %v3936_v46 }
 0x94f   :  { %3597 = vrot.lane.b32.xlu0 %v3594_v43, %s7709_s29  ;;  %3837 = vrot.lane.b32.xlu1 %v7343_v39, %s7715_s9  ;;  %v3878_v58 = vld [vmem:[#allocation2 + $0x8] sm:$0xf]  ;;  %v7332_v59 = vpack.c.bf16 %v3766_v56, %v3766_v56 }
 0x950   :  { %v3906_v60 = vld [vmem:[#allocation2 + $0x8] sm:$0xf]  ;;  %v7340_v42 = vpack.c.bf16 %v3878_v58, %v3878_v58 }
 0x951   :  { %v7342_v0 = vpack.c.bf16 %v3906_v60, %v3906_v60  ;;  %v3849_v2 = vld [vmem:[#allocation2 + $0x8] sm:$0xf] }
 0x952   :  { %v7338_v63 = vpack.c.bf16 %v3849_v2, %v3849_v2  ;;  %v3737_v5 = vld [vmem:[#allocation2 + $0x8] sm:$0xf] }
 0x953   :  { %3655 = vrot.lane.b32.xlu0 %v3652_v45, %s7710_s30  ;;  %3725 = vrot.lane.b32.xlu1 %v7343_v39, %s7701_s21  ;;  %v3922_v50 = vrot.slane %v7342_v0, 6  ;;  %v7330_v10 = vpack.c.bf16 %v3737_v5, %v3737_v5  ;;  %v3793_v11 = vld [vmem:[#allocation2 + $0x8] sm:$0xf] }
 0x954   :  { %v3865_v9 = vrot.slane %v7338_v63, 6  ;;  %v7334_v12 = vpack.c.bf16 %v3793_v11, %v3793_v11 }
 0x955   :  { %v3753_v6 = vrot.slane %v7330_v10, 6 }
 0x956   :  { %v3809_v14 = vrot.slane %v7334_v12, 6 }
 0x957   :  { %3481 = vrot.lane.b32.xlu0 %v3478_v48, %s7711_s5  ;;  %3923 = vrot.lane.b32.xlu1 %v3921_v51, %s7716_s10 }
 0x95b   :  { %3539 = vrot.lane.b32.xlu0 %v3536_v52, %s7712_s6  ;;  %3781 = vrot.lane.b32.xlu1 %v7343_v39, %s7717_s11 }
 0x95f   :  { %3866 = vrot.lane.b32.xlu0 %v3921_v51, %s7718_s12  ;;  %3839 = vrot.lane.b32.xlu1 %v7336_v55, %s7715_s9 }
 0x963   :  { %3754 = vrot.lane.b32.xlu0 %v3921_v51, %s7720_s13  ;;  %3727 = vrot.lane.b32.xlu1 %v7328_v30, %s7701_s21 }
 0x967   :  { %3953 = vrot.lane.b32.xlu0 %v7344_v57, %s7713_s7  ;;  %3783 = vrot.lane.b32.xlu1 %v7332_v59, %s7717_s11 }
 0x96b   :  { %3895 = vrot.lane.b32.xlu0 %v7340_v42, %s7714_s8  ;;  %4189 = vperm.xlu1 %7599, %v6984_v1  }
 0x96f   :  { %3925 = vrot.lane.b32.xlu0 %v3922_v50, %s7716_s10 }
 0x973   :  { %3810 = vrot.lane.b32.xlu0 %v3921_v51, %s7721_s14 }
 0x977   :  { %3868 = vrot.lane.b32.xlu0 %v3865_v9, %s7718_s12 }
 0x97b   :  { %3756 = vrot.lane.b32.xlu0 %v3753_v6, %s7720_s13 }
 0x97f   :  { %3812 = vrot.lane.b32.xlu0 %v3809_v14, %s7721_s14 }
 0x983   :  { %4201 = vperm.xlu0 %7598, %v6985_v16  }
 0x993   :  { %v3682_v17 = vpop.permute.xlu1 %3681 }
 0x994   :  { %v3685_v25 = vrot.slane %v3682_v17, 4 }
 0x997   :  { %v3566_v18 = vpop.permute.xlu1 %3565 }
 0x998   :  { %v3569_v3 = vrot.slane %v3566_v18, 4 }
 0x99b   :  { %v3624_v13 = vpop.permute.xlu1 %3623 }
 0x99c   :  { %v3627_v39 = vrot.slane %v3624_v13, 4 }
 0x99f   :  { %v3508_v21 = vpop.permute.xlu1 %3507 }
 0x9a0   :  { %v3511_v48 = vrot.slane %v3508_v21, 4 }
 0x9a3   :  { %v3596_v19 = vpop.permute.xlu1 %3595 }
 0x9a4   :  { %v3599_v56 = vrot.slane %v3596_v19, 4 }
 0x9a7   :  { %v3654_v62 = vpop.permute.xlu1 %3653 }
 0x9a8   :  { %v3657_v50 = vrot.slane %v3654_v62, 4 }
 0x9ab   :  { %v8628_v23 = vpop.permute.xlu1 %3479 }
 0x9ac   :  { %v3483_v12 = vrot.slane %v8628_v23, 4 }
 0x9af   :  { %v8634_v32 = vpop.permute.xlu1 %3537 }
 0x9b1   :  { %v3684_v24 = vpop.permute.xlu0 %3683 }
 0x9b2   :  { %v3686_v22 = vrot.slane %v3684_v24, 4  ;;  %3692 = vst.msk [vmem:[#allocation3 + $0x58] sm:$0x3] %vm9520_vm14, %v3684_v24  ;;  %vm9529_vm14 = vmmov %vm9526_vm4 }
 0x9b4   :  { %v3687_v26 = vsel %vm9521_vm3, %v3685_v25, %v3686_v22 }
 0x9b5   :  { %v3688_v29 = vsel %vm9522_vm13, %v3682_v17, %v3687_v26  ;;  %v3568_v31 = vpop.permute.xlu0 %3567  ;;  %vm9530_vm13 = vcmask 1041408  }
 0x9b6   :  { %3691 = vst [vmem:[#allocation3 + $0x50] sm:$0x33] %v3688_v29  ;;  %v3570_v28 = vrot.slane %v3568_v31, 4  ;;  %3576 = vst.msk [vmem:[#allocation3 + $0x30] sm:$0x3] %vm9523_vm15, %v3568_v31 }
 0x9b7   :  { %vm9531_vm15 = vmmov %vm9530_vm13 }
 0x9b8   :  { %v3571_v33 = vsel %vm9524_vm12, %v3569_v3, %v3570_v28  ;;  %vm9532_vm12 = vcmask 1031168  }
 0x9b9   :  { %v3572_v38 = vsel %vm9525_vm1, %v3566_v18, %v3571_v33  ;;  %v3626_v15 = vpop.permute.xlu0 %3625  ;;  %v8639_v40 = vpop.permute.xlu1 %3951  ;;  %vm9533_vm1 = vcmask 257026  }
 0x9ba   :  { %3575 = vst [vmem:[#allocation3 + $0x28] sm:$0x33] %v3572_v38  ;;  %v3628_v34 = vrot.slane %v3626_v15, 4  ;;  %3634 = vst.msk [vmem:[#allocation3 + $0x44] sm:$0x3] %vm9526_vm4, %v3626_v15 }
 0x9bb   :  { %vm9534_vm4 = vmmov %vm9521_vm3 }
 0x9bc   :  { %v3629_v43 = vsel %vm9527_vm5, %v3627_v39, %v3628_v34  ;;  %vm9535_vm5 = vcmask 883712  }
 0x9bd   :  { %v3630_v44 = vsel %vm9528_vm7, %v3624_v13, %v3629_v43  ;;  %v3510_v45 = vpop.permute.xlu0 %3509  ;;  %v3977_v47 = vld [vmem:[#allocation3 + $0x50] sm:$0x33]  ;;  %v8644_v35 = vpop.permute.xlu1 %3893  ;;  %vm9536_vm7 = vcmask 105472  }
 0x9be   :  { %3633 = vst [vmem:[#allocation3 + $0x3c] sm:$0x33] %v3630_v44  ;;  %v3512_v20 = vrot.slane %v3510_v45, 4  ;;  %3518 = vst.msk [vmem:[#allocation3 + $0x1c] sm:$0x3] %vm9529_vm14, %v3510_v45  ;;  %v6975_v51 = vcombine.high %v3977_v47, %v3977_v47  ;;  %v6974_v52 = vcombine.low %v3977_v47, %v3977_v47 }
 0x9bf   :  { %vm9537_vm14 = vmmov %vm9533_vm1 }
 0x9c0   :  { %v3513_v55 = vsel %vm9521_vm3, %v3511_v48, %v3512_v20  ;;  %6979 = vmatprep.subr.msk.bf16.mxu0 %vm9530_vm13, %v6975_v51  ;;  %v4049_v53 = vsel %vm9531_vm15, %v6974_v52, 0  ;;  %vm9538_vm13 = vcmask 744448   ;;  %vm9539_vm15 = vcmask 261120  }
 0x9c1   :  { %v3514_v46 = vsel %vm9532_vm12, %v3508_v21, %v3513_v55  ;;  %v3598_v30 = vpop.permute.xlu0 %3597  ;;  %4074 = vmatpush1.bf16.msra.mxu0 %v4049_v53  ;;  %v3838_v58 = vpop.permute.xlu1 %3837  ;;  %vm9540_vm12 = vmmov %vm9533_vm1  ;;  %v3541_v21 = vrot.slane %v8634_v32, 4  ;;  %v3955_v52 = vrot.slane %v8639_v40, 4 }
 0x9c2   :  { %3517 = vst [vmem:[#allocation3 + $0x14] sm:$0x33] %v3514_v46  ;;  %v3600_v57 = vrot.slane %v3598_v30, 4  ;;  %3606 = vst.msk [vmem:[#allocation3 + $0x30] sm:$0xc] %vm9533_vm1, %v3598_v30  ;;  %v3841_v59 = vrot.slane %v3838_v58, 4 }
 0x9c3   :  { %vm9541_vm1 = vmmov %vm9521_vm3 }
 0x9c4   :  { %v3601_v60 = vsel %vm9534_vm4, %v3599_v56, %v3600_v57  ;;  %v3842_v1 = vsel %vm9536_vm7, %v3841_v59, %v3838_v58  ;;  %vm9542_vm4 = vcmask 1039360   ;;  %vm9544_vm7 = vmmov %vm9541_vm1  ;;  %v6963_v57 = vld [vmem:[%s9296_s1 + $0x8] sm:$0x3] }
 0x9c5   :  { %v3602_v42 = vsel %vm9535_vm5, %v3596_v19, %v3601_v60  ;;  %v3656_v0 = vpop.permute.xlu0 %3655  ;;  %3846 = vst.msk [vmem:[#allocation3 + $0x30] sm:$0x33] %vm7857_vm2, %v3842_v1  ;;  %v3726_v63 = vpop.permute.xlu1 %3725  ;;  %vm9543_vm5 = vmmov %vm9540_vm12  ;;  %v3897_v60 = vrot.slane %v8644_v35, 4 }
 0x9c6   :  { %3605 = vst [vmem:[#allocation3 + $0x28] sm:$0xcc] %v3602_v42  ;;  %v3658_v2 = vrot.slane %v3656_v0, 4  ;;  %3664 = vst.msk [vmem:[#allocation3 + $0x44] sm:$0xc] %vm9537_vm14, %v3656_v0  ;;  %v3729_v5 = vrot.slane %v3726_v63, 4 }
 0x9c7   :  { %vm9545_vm14 = vcmask 900096  }
 0x9c8   :  { %v3659_v9 = vsel %vm9521_vm3, %v3657_v50, %v3658_v2  ;;  %v3730_v6 = vsel %vm9539_vm15, %v3729_v5, %v3726_v63  ;;  %vm9546_vm3 = vcmask 244736   ;;  %vm9548_vm15 = vcmask 97280  }
 0x9c9   :  { %v3660_v10 = vsel %vm9538_vm13, %v3654_v62, %v3659_v9  ;;  %v3482_v11 = vpop.permute.xlu0 %3481  ;;  %3734 = vst.msk [vmem:[#allocation3 + $0x8] sm:$0x33] %vm7857_vm2, %v3730_v6  ;;  %v8664_v16 = vpop.permute.xlu1 %3923  ;;  %vm9547_vm13 = vcmask 105472  }
 0x9ca   :  { %3663 = vst [vmem:[#allocation3 + $0x3c] sm:$0xcc] %v3660_v10  ;;  %v3484_v14 = vrot.slane %v3482_v11, 4  ;;  %3490 = vst.msk [vmem:[#allocation3 + $0x8] sm:$0xc] %vm9540_vm12, %v3482_v11  ;;  %vm9549_vm12 = vcmask 517120  }
 0x9cb   :  { %v3927_v2 = vrot.slane %v8664_v16, 4 }
 0x9cc   :  { %v3485_v17 = vsel %vm9541_vm1, %v3483_v12, %v3484_v14  ;;  %vm9550_vm1 = vcmask 261120  }
 0x9cd   :  { %v3486_v18 = vsel %vm9542_vm4, %v8628_v23, %v3485_v17  ;;  %v3540_v13 = vpop.permute.xlu0 %3539  ;;  %v3782_v62 = vpop.permute.xlu1 %3781  ;;  %v3971_v31 = vld [vmem:[#allocation3 + $0x28] sm:$0xff]  ;;  %vm9551_vm4 = vcmask 252928  }
 0x9ce   :  { %3489 = vst [vmem:[#allocation3] sm:$0xcc] %v3486_v18  ;;  %v3542_v19 = vrot.slane %v3540_v13, 4  ;;  %3548 = vst.msk [vmem:[#allocation3 + $0x1c] sm:$0xc] %vm9543_vm5, %v3540_v13  ;;  %v3785_v24 = vrot.slane %v3782_v62, 4 }
 0x9cf   :  { %vm9552_vm5 = vmmov %vm9549_vm12 }
 0x9d0   :  { %v3543_v25 = vsel %vm9544_vm7, %v3541_v21, %v3542_v19  ;;  %v3786_v29 = vsel %vm9546_vm3, %v3785_v24, %v3782_v62  ;;  %vm9553_vm7 = vmmov %vm9552_vm5 }
 0x9d1   :  { %v3544_v22 = vsel %vm9545_vm14, %v8634_v32, %v3543_v25  ;;  %v8674_v26 = vpop.permute.xlu0 %3866  ;;  %v3974_v23 = vld [vmem:[#allocation3 + $0x3c] sm:$0xff]  ;;  %3790 = vst.msk [vmem:[#allocation3 + $0x1c] sm:$0x33] %vm7857_vm2, %v3786_v29  ;;  %v3840_v38 = vpop.permute.xlu1 %3839  ;;  %vm9554_vm14 = vmmov %vm9546_vm3  ;;  %vm9555_vm3 = vcmask 1043456  }
 0x9d2   :  { %v7638_v3 = vld [vmem:[#allocation3 + $0x2c] ss:$20 sps:$4 sm:$0xff]   ;;  %3547 = vst [vmem:[#allocation3 + $0x14] sm:$0xcc] %v3544_v22  ;;  %v3870_v28 = vrot.slane %v8674_v26, 4  ;;  %v6969_v33 = vcombine.low %v3971_v31, %v3974_v23  ;;  %v3843_v15 = vsel %vm9547_vm13, %v3841_v59, %v3840_v38  ;;  %vm9556_vm13 = vmmov %vm9552_vm5 }
 0x9d3   :  { %4075 = vmatprep.subr.bf16.mxu0 %v7638_v3  ;;  %3847 = vst.msk [vmem:[#allocation3 + $0x38] sm:$0x3] %vm9549_vm12, %v3843_v15  ;;  %vm9558_vm12 = vmmov %vm9552_vm5 }
 0x9d4   :  { %v3871_v32 = vsel %vm9548_vm15, %v3870_v28, %v8674_v26  ;;  %4076 = vmatpush1.bf16.msra.mxu0 %v6969_v33  ;;  %vm9557_vm15 = vcmask 998400  }
 0x9d5   :  { %3875 = vst.msk [vmem:[#allocation3 + $0x30] sm:$0xcc] %vm7893_vm0, %v3871_v32  ;;  %v8688_v39 = vpop.permute.xlu0 %3754  ;;  %v3728_v43 = vpop.permute.xlu1 %3727  ;;  %v3965_v48 = vld [vmem:[#allocation3] sm:$0xff] }
 0x9d6   :  { %v3758_v34 = vrot.slane %v8688_v39, 4  ;;  %v3731_v44 = vsel %vm9550_vm1, %v3729_v5, %v3728_v43  ;;  %vm9559_vm1 = vcmask 293888  }
 0x9d7   :  { %3735 = vst.msk [vmem:[#allocation3 + $0x10] sm:$0x3] %vm9552_vm5, %v3731_v44  ;;  %vm9561_vm5 = vcmask 1014784  }
 0x9d8   :  { %v3759_v45 = vsel %vm9551_vm4, %v3758_v34, %v8688_v39  ;;  %vm9560_vm4 = vmmov %vm9555_vm3 }
 0x9d9   :  { %3763 = vst.msk [vmem:[#allocation3 + $0x8] sm:$0xcc] %vm7893_vm0, %v3759_v45  ;;  %v3954_v47 = vpop.permute.xlu0 %3953  ;;  %v3968_v20 = vld [vmem:[#allocation3 + $0x14] sm:$0xff]  ;;  %v3784_v46 = vpop.permute.xlu1 %3783 }
 0x9da   :  { %v7640_v51 = vld [vmem:[#allocation3 + $0x4] ss:$20 sps:$4 sm:$0xff]   ;;  %v3956_v55 = vrot.slane %v3954_v47, 4  ;;  %3962 = vst.msk [vmem:[#allocation3 + $0x60] sm:$0x3] %vm9553_vm7, %v3954_v47  ;;  %v6964_v53 = vcombine.low %v3965_v48, %v3968_v20  ;;  %v3787_v30 = vsel %vm9554_vm14, %v3785_v24, %v3784_v46  ;;  %vm9562_vm7 = vcmask 519170  }
 0x9db   :  { %4077 = vmatprep.subr.bf16.mxu0 %v7640_v51  ;;  %3791 = vst.msk [vmem:[#allocation3 + $0x24] sm:$0x3] %vm9556_vm13, %v3787_v30  ;;  %vm9563_vm14 = vcmask 1041408   ;;  %vm9564_vm13 = vcmask 1006592  }
 0x9dc   :  { %v3957_v56 = vsel %vm9555_vm3, %v3955_v52, %v3956_v55  ;;  %4078 = vmatpush1.bf16.msra.mxu0 %v6964_v53  ;;  %v3972_v21 = vld [vmem:[#allocation3 + $0x30] sm:$0xff] }
 0x9dd   :  { %v3958_v58 = vsel %vm9557_vm15, %v8639_v40, %v3957_v56  ;;  %v3896_v59 = vpop.permute.xlu0 %3895  ;;  %7525 = vmatprep.subr.bf16.mxu0 %v7703_v4  ;;  %vm9565_vm15 = vcmask 113664  }
 0x9de   :  { %3961 = vst.msk [vmem:[#allocation3 + $0x58] sm:$0x33] %vm7857_vm2, %v3958_v58  ;;  %v3898_v42 = vrot.slane %v3896_v59, 4 }
 0x9df   :  { %3904 = vst.msk [vmem:[#allocation3 + $0x4c] sm:$0x3] %vm9558_vm12, %v3896_v59  ;;  %6980 = vmatmul.mubr.msk.bf16.vlgmr.msra.gmra.mxu0 %vm9559_vm1, %v6963_v57  ;;  %vm9566_vm12 = vmmov %vm9563_vm14 }
 0x9e0   :  { %v3899_v0 = vsel %vm9560_vm4, %v3897_v60, %v3898_v42  ;;  %7531 = vmatprep.mubr.msk.bf16.mxu0 %vm9379_vm6, %v7703_v4  ;;  %vm9567_vm1 = vmmov %vm9566_vm12  ;;  %vm9568_vm4 = vcmask 97280   ;;  %v3966_v29 = vld [vmem:[#allocation3 + $0x8] sm:$0xff] }
 0x9e1   :  { %v3900_v40 = vsel %vm9561_vm5, %v8644_v35, %v3899_v0  ;;  %v3926_v1 = vpop.permute.xlu0 %3925  ;;  %v7642_v50 = vld [vmem:[#allocation3 + $0x60] ss:$0 sps:$4 sm:$0x33]   ;;  %vm9569_vm5 = vmmov %vm9562_vm7 }
 0x9e2   :  { %3903 = vst.msk [vmem:[#allocation3 + $0x44] sm:$0x33] %vm7857_vm2, %v3900_v40  ;;  %v3928_v63 = vrot.slane %v3926_v1, 4  ;;  %v4061_v5 = vsel %vm9563_vm14, %v7642_v50, 0  ;;  %vm9571_vm14 = vmmov %vm9569_vm5 }
 0x9e3   :  { %3934 = vst.msk [vmem:[#allocation3 + $0x4c] sm:$0xc] %vm9562_vm7, %v3926_v1  ;;  %7526 = vmatpush3.bf16.msra.mxu0 %v4061_v5  ;;  %vm9570_vm7 = vcmask 252928  }
 0x9e4   :  { %v3929_v9 = vsel %vm9555_vm3, %v3927_v2, %v3928_v63  ;;  %7527 = vmatprep.subr.bf16.mxu0 %v7703_v4  ;;  %vm9572_vm3 = vmmov %vm9565_vm15 }
 0x9e5   :  { %v3930_v10 = vsel %vm9564_vm13, %v8664_v16, %v3929_v9  ;;  %v3811_v11 = vpop.permute.xlu0 %3810  ;;  %v3978_v35 = vld [vmem:[#allocation3 + $0x58] sm:$0x33]  ;;  %vm9573_vm13 = vmmov %vm9569_vm5 }
 0x9e6   :  { %3933 = vst.msk [vmem:[#allocation3 + $0x44] sm:$0xcc] %vm7893_vm0, %v3930_v10  ;;  %v3814_v6 = vrot.slane %v3811_v11, 4  ;;  %v6977_v12 = vcombine.high %v3978_v35, %v3978_v35  ;;  %v6976_v14 = vcombine.low %v3978_v35, %v3978_v35  ;;  %v4190_v15 = vpop.permute.xlu1 %4189 }
 0x9e8   :  { %v3815_v17 = vsel %vm9565_vm15, %v3814_v6, %v3811_v11  ;;  %6981 = vmatprep.subr.msk.bf16.mxu1 %vm9566_vm12, %v6977_v12  ;;  %v4055_v18 = vsel %vm9567_vm1, %v6976_v14, 0  ;;  %vm9574_vm15 = vcmask 293888   ;;  %vm9576_vm1 = vcmask 1043456  }
 0x9e9   :  { %3819 = vst.msk [vmem:[#allocation3 + $0x1c] sm:$0xcc] %vm7893_vm0, %v3815_v17  ;;  %v3869_v16 = vpop.permute.xlu0 %3868  ;;  %4115 = vmatpush1.bf16.msra.mxu1 %v4055_v18  ;;  %vm9575_vm12 = vmmov %vm9574_vm15 }
 0x9ea   :  { %v3872_v13 = vsel %vm9568_vm4, %v3870_v28, %v3869_v16  ;;  %vm9577_vm4 = vcmask 941056  }
 0x9eb   :  { %3876 = vst.msk [vmem:[#allocation3 + $0x38] sm:$0xc] %vm9569_vm5, %v3872_v13  ;;  %vm9578_vm5 = vcmask 254976  }
 0x9ed   :  { %v3757_v19 = vpop.permute.xlu0 %3756  ;;  %v3975_v62 = vld [vmem:[#allocation3 + $0x44] sm:$0xff] }
 0x9ee   :  { %v3760_v24 = vsel %vm9570_vm7, %v3758_v34, %v3757_v19  ;;  %v6972_v25 = vcombine.high %v3972_v21, %v3975_v62  ;;  %v6971_v22 = vcombine.low %v3972_v21, %v3975_v62  ;;  %vm9579_vm7 = vmmov %vm9578_vm5 }
 0x9ef   :  { %3764 = vst.msk [vmem:[#allocation3 + $0x10] sm:$0xc] %vm9571_vm14, %v3760_v24  ;;  %vm9580_vm14 = vmmov %vm9576_vm1 }
 0x9f0   :  { %v3969_v31 = vld [vmem:[#allocation3 + $0x1c] sm:$0xff]  ;;  %4116 = vmatprep.subr.bf16.mxu1 %v6972_v25 }
 0x9f1   :  { %v3813_v23 = vpop.permute.xlu0 %3812  ;;  %4117 = vmatpush1.bf16.msra.mxu1 %v6971_v22  ;;  %v6967_v3 = vcombine.high %v3966_v29, %v3969_v31  ;;  %v6966_v33 = vcombine.low %v3966_v29, %v3969_v31 }
 0x9f2   :  { %v3816_v26 = vsel %vm9572_vm3, %v3814_v6, %v3813_v23  ;;  %v7644_v28 = vld [vmem:[#allocation3 + $0x38] ss:$20 sps:$4 sm:$0xff]   ;;  %vm9581_vm3 = vcmask 736256  }
 0x9f3   :  { %3820 = vst.msk [vmem:[#allocation3 + $0x24] sm:$0xc] %vm9573_vm13, %v3816_v26  ;;  %4118 = vmatprep.subr.bf16.mxu1 %v6967_v3  ;;  %7528 = vmatpush3.bf16.msra.mxu0 %v7644_v28  ;;  %vm9582_vm13 = vmmov %vm9578_vm5 }
 0x9f4   :  { %7529 = vmatprep.subr.bf16.mxu0 %v7703_v4 }
 0x9f5   :  { %4119 = vmatpush1.bf16.msra.mxu1 %v6966_v33 }
 0x9f8   :  { %6982 = vmatmul.mubr.msk.bf16.vlgmr.msra.gmra.mxu1 %vm9574_vm15, %v6963_v57  ;;  %vm9583_vm15 = vmmov %vm9576_vm1 }
 0x9f9   :  { %4899 = vmatprep.mubr.bf16.mxu1 %v7719_v61 }
 0x9fa   :  { %v7645_v38 = vld [vmem:[#allocation3 + $0x10] ss:$20 sps:$4 sm:$0xff]  }
 0x9fb   :  { %7530 = vmatpush3.bf16.msra.mxu0 %v7645_v38 }
 0x9fe   :  { %7532 = vmatmul.mubr.msk.bf16.vlgmr.msra.gmra.mxu0 %vm9575_vm12, %v6963_v57  ;;  %v4202_v34 = vpop.permute.xlu0 %4201  ;;  %vm9584_vm12 = vcmask 891904  }
 0x9ff   :  { %4940 = vmatprep.mubr.bf16.mxu0 %v7719_v61 }
 0xa9f   :  { %v4097_v32 = vpop.f32.mrf.mxu0 }
 0xaa0   :  { %v4192_v39 = vmul.f32 %v4190_v15, %v4097_v32 }
 0xaa1   :  { %v4099_v43 = vpop.f32.mrf.mxu0 }
 0xaa2   :  { %v4204_v44 = vadd.f32 %v4202_v34, %v4192_v39  ;;  %v4193_v45 = vmul.f32 %v4190_v15, %v4099_v43 }
 0xaa3   :  { %v4101_v47 = vpop.f32.mrf.mxu0 }
 0xaa4   :  { %v4209_v48 = vmax.f32 %v4204_v44, 0.0  ;;  %v4205_v20 = vadd.f32 %v4202_v34, %v4193_v45 }
 0xaa5   :  { %v4102_v51 = vpop.f32.mrf.mxu0 }
 0xaa6   :  { %v4210_v52 = vmax.f32 %v4205_v20, 0.0  ;;  %v4214_v55 = vmul.f32 %v7995_v41, %v4209_v48 }
 0xaa8   :  { %v4215_v53 = vmul.f32 %v8003_v8, %v4210_v52 }
 0xaaa   :  { %v4223_v46 = vcombine.low %v4214_v55, %v4215_v53 }
 0xaac   :  { %4234 = vrot.lane.b32.xlu1 %v4223_v46, %s7702_s22 }
 0xab8   :  { %v4138_v30 = vpop.f32.mrf.mxu1 }
 0xab9   :  { %v4194_v56 = vmul.f32 %v4190_v15, %v4138_v30 }
 0xaba   :  { %v4140_v57 = vpop.f32.mrf.mxu1 }
 0xabb   :  { %v4206_v58 = vadd.f32 %v4202_v34, %v4194_v56  ;;  %v4195_v59 = vmul.f32 %v4190_v15, %v4140_v57 }
 0xabc   :  { %v4142_v60 = vpop.f32.mrf.mxu1 }
 0xabd   :  { %v4211_v42 = vmax.f32 %v4206_v58, 0.0  ;;  %v4207_v0 = vadd.f32 %v4202_v34, %v4195_v59 }
 0xabe   :  { %v4143_v40 = vpop.f32.mrf.mxu1  ;;  %v4179_v50 = vpop.f32.mrf.mxu0 }
 0xabf   :  { %v4212_v1 = vmax.f32 %v4207_v0, 0.0  ;;  %v4196_v2 = vmul.f32 %v4190_v15, %v4179_v50  ;;  %v4216_v63 = vmul.f32 %v8015_v36, %v4211_v42 }
 0xac0   :  { %v7533_v9 = vpop.f32.mrf.mxu0 }
 0xac1   :  { %v4217_v5 = vmul.f32 %v8018_v37, %v4212_v1  ;;  %v4208_v10 = vadd.f32 %v4202_v34, %v4196_v2 }
 0xac2   :  { %v4182_v35 = vpop.f32.mrf.mxu0 }
 0xac3   :  { %v4224_v11 = vcombine.low %v4216_v63, %v4217_v5  ;;  %v4213_v6 = vmax.f32 %v4208_v10, 0.0 }
 0xac4   :  { %v7534_v12 = vpop.f32.mrf.mxu0 }
 0xac5   :  { %4228 = vst [vmem:[#allocation5 + $0x8] sm:$0xff] %v4224_v11  ;;  %4501 = vrot.lane.b32.xlu1 %v4224_v11, %s7704_s0  ;;  %v4218_v14 = vmul.f32 %v8025_v49, %v4213_v6 }
 0xac7   :  { %4229 = vst.msk [vmem:[#allocation5 + $0x10] sm:$0xf] %vm147_vm10, %v4218_v14 }
 0xacc   :  { %v4231_v17 = vld [vmem:[#allocation5 + $0x8] sm:$0xf] }
 0xacd   :  { %4236 = vrot.lane.b32.xlu0 %v4231_v17, %s7702_s22 }
 0xace   :  { %v4498_v18 = vld [vmem:[#allocation5 + $0x10] sm:$0xf] }
 0xad1   :  { %4503 = vrot.lane.b32.xlu0 %v4498_v18, %s7704_s0  ;;  %v7043_v18 = vld [vmem:[%s9294_s2 + $0x14] sm:$0xf] }
 0xb1e   :  { %v4235_v16 = vpop.permute.xlu1 %4234 }
 0xb1f   :  { %v4238_v13 = vrot.slane %v4235_v16, 4 }
 0xb21   :  { %v4239_v21 = vsel %vm158_vm8, %v4238_v13, %v4235_v16 }
 0xb22   :  { %4243 = vst.msk [vmem:[#allocation2] sm:$0xff] %vm7767_vm9, %v4239_v21 }
 0xb29   :  { %v4245_v19 = vld [vmem:[#allocation2] sm:$0xff] }
 0xb2a   :  { %v4472_v62 = vcombine.high %v4245_v19, %v4245_v19 }
 0xb2c   :  { %v7361_v24 = vpack.c.bf16 %v4472_v62, %v4245_v19 }
 0xb2e   :  { %4485 = vrot.lane.b32.xlu1 %v7361_v24, %s7705_s25  ;;  %4263 = vst [vmem:[#allocation3] sm:$0x33] %v7361_v24  ;;  %v4397_v25 = vrot.slane %v7361_v24, 6 }
 0xb32   :  { %4369 = vrot.lane.b32.xlu1 %v7361_v24, %s7706_s26 }
 0xb36   :  { %4427 = vrot.lane.b32.xlu1 %v7361_v24, %s7707_s27 }
 0xb37   :  { %v4502_v31 = vpop.permute.xlu1 %4501 }
 0xb38   :  { %v4505_v3 = vrot.slane %v4502_v31, 4 }
 0xb3a   :  { %4311 = vrot.lane.b32.xlu1 %v7361_v24, %s7708_s28 }
 0xb3e   :  { %4399 = vrot.lane.b32.xlu1 %v4397_v25, %s7709_s29 }
 0xb3f   :  { %v4237_v22 = vpop.permute.xlu0 %4236 }
 0xb40   :  { %v4240_v29 = vsel %vm158_vm8, %v4238_v13, %v4237_v22 }
 0xb41   :  { %4244 = vst.msk [vmem:[#allocation2 + $0x8] sm:$0xf] %vm166_vm11, %v4240_v29 }
 0xb42   :  { %4457 = vrot.lane.b32.xlu1 %v4397_v25, %s7710_s30 }
 0xb43   :  { %v4504_v23 = vpop.permute.xlu0 %4503 }
 0xb44   :  { %v4506_v26 = vrot.slane %v4504_v23, 4 }
 0xb46   :  { %v4507_v28 = vsel %vm9576_vm1, %v4505_v3, %v4506_v26  ;;  %4283 = vrot.lane.b32.xlu1 %v4397_v25, %s7711_s5  ;;  %vm9585_vm1 = vmmov %vm9578_vm5 }
 0xb47   :  { %v4508_v33 = vsel %vm9577_vm4, %v4502_v31, %v4507_v28  ;;  %vm9586_vm4 = vmmov %vm9580_vm14 }
 0xb48   :  { %v4246_v38 = vld [vmem:[#allocation2 + $0x8] sm:$0xf]  ;;  %4511 = vst.msk [vmem:[#allocation2] sm:$0xff] %vm7767_vm9, %v4508_v33 }
 0xb49   :  { %v4470_v15 = vld [vmem:[#allocation2 + $0x8] sm:$0xf]  ;;  %v7346_v45 = vpack.c.bf16 %v4246_v38, %v4246_v38 }
 0xb4a   :  { %v4354_v32 = vld [vmem:[#allocation2 + $0x8] sm:$0xf]  ;;  %v7362_v39 = vpack.c.bf16 %v4470_v15, %v4470_v15  ;;  %4341 = vrot.lane.b32.xlu1 %v4397_v25, %s7712_s6 }
 0xb4b   :  { %v4412_v34 = vld [vmem:[#allocation2 + $0x8] sm:$0xf]  ;;  %4264 = vst.msk [vmem:[#allocation3 + $0x8] sm:$0x3] %vm9578_vm5, %v7346_v45  ;;  %v7354_v51 = vpack.c.bf16 %v4354_v32, %v4354_v32  ;;  %vm9587_vm5 = vcmask 752640  }
 0xb4c   :  { %v4296_v43 = vld [vmem:[#allocation2 + $0x8] sm:$0xf]  ;;  %4487 = vrot.lane.b32.xlu0 %v7362_v39, %s7705_s25  ;;  %v7358_v53 = vpack.c.bf16 %v4412_v34, %v4412_v34 }
 0xb4d   :  { %v4382_v44 = vld [vmem:[#allocation2 + $0x8] sm:$0xf]  ;;  %v7350_v30 = vpack.c.bf16 %v4296_v43, %v4296_v43 }
 0xb4e   :  { %v4440_v47 = vld [vmem:[#allocation2 + $0x8] sm:$0xf]  ;;  %v7356_v56 = vpack.c.bf16 %v4382_v44, %v4382_v44 }
 0xb4f   :  { %v4266_v48 = vld [vmem:[#allocation2 + $0x8] sm:$0xf]  ;;  %v4739_v52 = vld [vmem:[#allocation2] sm:$0xff]  ;;  %v7360_v58 = vpack.c.bf16 %v4440_v47, %v4440_v47 }
 0xb50   :  { %v4324_v20 = vld [vmem:[#allocation2 + $0x8] sm:$0xf]  ;;  %4371 = vrot.lane.b32.xlu0 %v7354_v51, %s7706_s26  ;;  %v4742_v55 = vcombine.high %v4739_v52, %v4739_v52  ;;  %v4398_v57 = vrot.slane %v7356_v56, 6  ;;  %v7348_v60 = vpack.c.bf16 %v4266_v48, %v4266_v48 }
 0xb51   :  { %4512 = vst.msk [vmem:[#allocation2 + $0x8] sm:$0xf] %vm166_vm11, %v4504_v23  ;;  %v4456_v59 = vrot.slane %v7360_v58, 6  ;;  %v7352_v0 = vpack.c.bf16 %v4324_v20, %v4324_v20  ;;  %v7044_v23 = vld [vmem:[%s9295_s3 + $0x14] sm:$0xf] }
 0xb52   :  { %v7379_v46 = vpack.c.bf16 %v4742_v55, %v4739_v52  ;;  %v4282_v42 = vrot.slane %v7348_v60, 6 }
 0xb53   :  { %v4340_v1 = vrot.slane %v7352_v0, 6 }
 0xb54   :  { %4429 = vrot.lane.b32.xlu0 %v7358_v53, %s7707_s27  ;;  %4755 = vrot.lane.b32.xlu1 %v7379_v46, %s7713_s7  ;;  %v4725_v40 = vrot.slane %v7379_v46, 6 }
 0xb58   :  { %4313 = vrot.lane.b32.xlu0 %v7350_v30, %s7708_s28  ;;  %4697 = vrot.lane.b32.xlu1 %v7379_v46, %s7714_s8  ;;  %v4626_v50 = vld [vmem:[#allocation2 + $0x8] sm:$0xf] }
 0xb59   :  { %v7372_v2 = vpack.c.bf16 %v4626_v50, %v4626_v50  ;;  %v4514_v63 = vld [vmem:[#allocation2 + $0x8] sm:$0xf] }
 0xb5a   :  { %v4740_v5 = vld [vmem:[#allocation2 + $0x8] sm:$0xf]  ;;  %v7364_v9 = vpack.c.bf16 %v4514_v63, %v4514_v63 }
 0xb5b   :  { %v4570_v10 = vld [vmem:[#allocation2 + $0x8] sm:$0xf]  ;;  %v7380_v11 = vpack.c.bf16 %v4740_v5, %v4740_v5 }
 0xb5c   :  { %4401 = vrot.lane.b32.xlu0 %v4398_v57, %s7709_s29  ;;  %4641 = vrot.lane.b32.xlu1 %v7379_v46, %s7715_s9  ;;  %v4682_v35 = vld [vmem:[#allocation2 + $0x8] sm:$0xf]  ;;  %v7368_v6 = vpack.c.bf16 %v4570_v10, %v4570_v10 }
 0xb5d   :  { %v4710_v12 = vld [vmem:[#allocation2 + $0x8] sm:$0xf]  ;;  %v7376_v14 = vpack.c.bf16 %v4682_v35, %v4682_v35 }
 0xb5e   :  { %v7378_v17 = vpack.c.bf16 %v4710_v12, %v4710_v12  ;;  %v4653_v13 = vld [vmem:[#allocation2 + $0x8] sm:$0xf] }
 0xb5f   :  { %v7374_v21 = vpack.c.bf16 %v4653_v13, %v4653_v13  ;;  %v4541_v19 = vld [vmem:[#allocation2 + $0x8] sm:$0xf] }
 0xb60   :  { %4459 = vrot.lane.b32.xlu0 %v4456_v59, %s7710_s30  ;;  %4529 = vrot.lane.b32.xlu1 %v7379_v46, %s7701_s21  ;;  %v4726_v16 = vrot.slane %v7378_v17, 6  ;;  %v7366_v24 = vpack.c.bf16 %v4541_v19, %v4541_v19  ;;  %v4597_v25 = vld [vmem:[#allocation2 + $0x8] sm:$0xf] }
 0xb61   :  { %v4669_v62 = vrot.slane %v7374_v21, 6  ;;  %v7370_v29 = vpack.c.bf16 %v4597_v25, %v4597_v25 }
 0xb62   :  { %v4557_v22 = vrot.slane %v7366_v24, 6 }
 0xb63   :  { %v4613_v31 = vrot.slane %v7370_v29, 6 }
 0xb64   :  { %4285 = vrot.lane.b32.xlu0 %v4282_v42, %s7711_s5  ;;  %4727 = vrot.lane.b32.xlu1 %v4725_v40, %s7716_s10 }
 0xb68   :  { %4343 = vrot.lane.b32.xlu0 %v4340_v1, %s7712_s6  ;;  %4585 = vrot.lane.b32.xlu1 %v7379_v46, %s7717_s11 }
 0xb6c   :  { %4670 = vrot.lane.b32.xlu0 %v4725_v40, %s7718_s12  ;;  %4643 = vrot.lane.b32.xlu1 %v7372_v2, %s7715_s9 }
 0xb70   :  { %4558 = vrot.lane.b32.xlu0 %v4725_v40, %s7720_s13  ;;  %4531 = vrot.lane.b32.xlu1 %v7364_v9, %s7701_s21 }
 0xb74   :  { %4757 = vrot.lane.b32.xlu0 %v7380_v11, %s7713_s7  ;;  %4587 = vrot.lane.b32.xlu1 %v7368_v6, %s7717_s11 }
 0xb78   :  { %4699 = vrot.lane.b32.xlu0 %v7376_v14, %s7714_s8  ;;  %4993 = vperm.xlu1 %7599, %v7043_v18  }
 0xb7c   :  { %4729 = vrot.lane.b32.xlu0 %v4726_v16, %s7716_s10 }
 0xb80   :  { %4614 = vrot.lane.b32.xlu0 %v4725_v40, %s7721_s14 }
 0xb84   :  { %4672 = vrot.lane.b32.xlu0 %v4669_v62, %s7718_s12 }
 0xb88   :  { %4560 = vrot.lane.b32.xlu0 %v4557_v22, %s7720_s13 }
 0xb8c   :  { %4616 = vrot.lane.b32.xlu0 %v4613_v31, %s7721_s14 }
 0xb90   :  { %5005 = vperm.xlu0 %7598, %v7044_v23  }
 0xba0   :  { %v4486_v3 = vpop.permute.xlu1 %4485 }
 0xba1   :  { %v4489_v34 = vrot.slane %v4486_v3, 4 }
 0xba4   :  { %v4370_v26 = vpop.permute.xlu1 %4369 }
 0xba5   :  { %v4373_v48 = vrot.slane %v4370_v26, 4 }
 0xba8   :  { %v4428_v28 = vpop.permute.xlu1 %4427 }
 0xba9   :  { %v4431_v46 = vrot.slane %v4428_v28, 4 }
 0xbac   :  { %v4312_v33 = vpop.permute.xlu1 %4311 }
 0xbad   :  { %v4315_v42 = vrot.slane %v4312_v33, 4 }
 0xbb0   :  { %v4400_v38 = vpop.permute.xlu1 %4399 }
 0xbb1   :  { %v4403_v10 = vrot.slane %v4400_v38, 4 }
 0xbb4   :  { %v4458_v15 = vpop.permute.xlu1 %4457 }
 0xbb5   :  { %v4461_v16 = vrot.slane %v4458_v15, 4 }
 0xbb8   :  { %v8808_v32 = vpop.permute.xlu1 %4283 }
 0xbb9   :  { %v4287_v29 = vrot.slane %v8808_v32, 4 }
 0xbbc   :  { %v8814_v51 = vpop.permute.xlu1 %4341 }
 0xbbe   :  { %v4488_v39 = vpop.permute.xlu0 %4487 }
 0xbbf   :  { %v4490_v43 = vrot.slane %v4488_v39, 4  ;;  %4496 = vst.msk [vmem:[#allocation3 + $0x58] sm:$0x3] %vm9579_vm7, %v4488_v39  ;;  %vm9588_vm7 = vmmov %vm9585_vm1 }
 0xbc1   :  { %v4491_v44 = vsel %vm9580_vm14, %v4489_v34, %v4490_v43  ;;  %vm9589_vm14 = vmmov %vm9586_vm4 }
 0xbc2   :  { %v4492_v45 = vsel %vm9581_vm3, %v4486_v3, %v4491_v44  ;;  %v4372_v47 = vpop.permute.xlu0 %4371  ;;  %vm9590_vm3 = vcmask 1041408  }
 0xbc3   :  { %4495 = vst [vmem:[#allocation3 + $0x50] sm:$0x33] %v4492_v45  ;;  %v4374_v20 = vrot.slane %v4372_v47, 4  ;;  %4380 = vst.msk [vmem:[#allocation3 + $0x30] sm:$0x3] %vm9582_vm13, %v4372_v47 }
 0xbc4   :  { %vm9591_vm13 = vmmov %vm9590_vm3 }
 0xbc5   :  { %v4375_v52 = vsel %vm9583_vm15, %v4373_v48, %v4374_v20  ;;  %vm9592_vm15 = vcmask 1031168  }
 0xbc6   :  { %v4376_v55 = vsel %vm9584_vm12, %v4370_v26, %v4375_v52  ;;  %v4430_v53 = vpop.permute.xlu0 %4429  ;;  %v8819_v56 = vpop.permute.xlu1 %4755  ;;  %vm9593_vm12 = vcmask 257026  }
 0xbc7   :  { %4379 = vst [vmem:[#allocation3 + $0x28] sm:$0x33] %v4376_v55  ;;  %v4432_v30 = vrot.slane %v4430_v53, 4  ;;  %4438 = vst.msk [vmem:[#allocation3 + $0x44] sm:$0x3] %vm9585_vm1, %v4430_v53 }
 0xbc8   :  { %vm9594_vm1 = vmmov %vm9586_vm4 }
 0xbc9   :  { %v4433_v57 = vsel %vm9586_vm4, %v4431_v46, %v4432_v30  ;;  %vm9595_vm4 = vcmask 883712  }
 0xbca   :  { %v4434_v58 = vsel %vm9587_vm5, %v4428_v28, %v4433_v57  ;;  %v4314_v59 = vpop.permute.xlu0 %4313  ;;  %v4781_v60 = vld [vmem:[#allocation3 + $0x50] sm:$0x33]  ;;  %v8824_v50 = vpop.permute.xlu1 %4697  ;;  %vm9596_vm5 = vcmask 105472  }
 0xbcb   :  { %4437 = vst [vmem:[#allocation3 + $0x3c] sm:$0x33] %v4434_v58  ;;  %v4316_v0 = vrot.slane %v4314_v59, 4  ;;  %4322 = vst.msk [vmem:[#allocation3 + $0x1c] sm:$0x3] %vm9588_vm7, %v4314_v59  ;;  %v7034_v40 = vcombine.high %v4781_v60, %v4781_v60  ;;  %v7033_v1 = vcombine.low %v4781_v60, %v4781_v60 }
 0xbcc   :  { %vm9597_vm7 = vmmov %vm9593_vm12 }
 0xbcd   :  { %v4317_v2 = vsel %vm9589_vm14, %v4315_v42, %v4316_v0  ;;  %7038 = vmatprep.subr.msk.bf16.mxu1 %vm9590_vm3, %v7034_v40  ;;  %v4853_v63 = vsel %vm9591_vm13, %v7033_v1, 0  ;;  %vm9598_vm14 = vmmov %vm9594_vm1  ;;  %vm9599_vm3 = vcmask 744448   ;;  %vm9600_vm13 = vcmask 261120  }
 0xbce   :  { %v4318_v5 = vsel %vm9592_vm15, %v4312_v33, %v4317_v2  ;;  %v4402_v9 = vpop.permute.xlu0 %4401  ;;  %4878 = vmatpush1.bf16.msra.mxu1 %v4853_v63  ;;  %v4642_v35 = vpop.permute.xlu1 %4641  ;;  %vm9601_vm15 = vmmov %vm9597_vm7  ;;  %v4345_v33 = vrot.slane %v8814_v51, 4  ;;  %v4759_v1 = vrot.slane %v8819_v56, 4 }
 0xbcf   :  { %4321 = vst [vmem:[#allocation3 + $0x14] sm:$0x33] %v4318_v5  ;;  %v4404_v11 = vrot.slane %v4402_v9, 4  ;;  %4410 = vst.msk [vmem:[#allocation3 + $0x30] sm:$0xc] %vm9593_vm12, %v4402_v9  ;;  %v4645_v6 = vrot.slane %v4642_v35, 4 }
 0xbd0   :  { %vm9602_vm12 = vmmov %vm9594_vm1 }
 0xbd1   :  { %v4405_v12 = vsel %vm9594_vm1, %v4403_v10, %v4404_v11  ;;  %v4646_v18 = vsel %vm9596_vm5, %v4645_v6, %v4642_v35  ;;  %vm9603_vm1 = vcmask 1039360   ;;  %vm9605_vm5 = vmmov %vm9602_vm12  ;;  %v7022_v11 = vld [vmem:[%s9296_s1 + $0xa] sm:$0x3] }
 0xbd2   :  { %v4406_v14 = vsel %vm9595_vm4, %v4400_v38, %v4405_v12  ;;  %v4460_v17 = vpop.permute.xlu0 %4459  ;;  %4650 = vst.msk [vmem:[#allocation3 + $0x30] sm:$0x33] %vm7857_vm2, %v4646_v18  ;;  %v4530_v21 = vpop.permute.xlu1 %4529  ;;  %vm9604_vm4 = vmmov %vm9597_vm7  ;;  %v4701_v12 = vrot.slane %v8824_v50, 4 }
 0xbd3   :  { %4409 = vst [vmem:[#allocation3 + $0x28] sm:$0xcc] %v4406_v14  ;;  %v4462_v13 = vrot.slane %v4460_v17, 4  ;;  %4468 = vst.msk [vmem:[#allocation3 + $0x44] sm:$0xc] %vm9597_vm7, %v4460_v17  ;;  %v4533_v19 = vrot.slane %v4530_v21, 4 }
 0xbd4   :  { %vm9606_vm7 = vcmask 900096  }
 0xbd5   :  { %v4463_v62 = vsel %vm9598_vm14, %v4461_v16, %v4462_v13  ;;  %v4534_v22 = vsel %vm9600_vm13, %v4533_v19, %v4530_v21  ;;  %vm9607_vm14 = vcmask 244736   ;;  %vm9609_vm13 = vcmask 97280  }
 0xbd6   :  { %v4464_v24 = vsel %vm9599_vm3, %v4458_v15, %v4463_v62  ;;  %v4286_v25 = vpop.permute.xlu0 %4285  ;;  %4538 = vst.msk [vmem:[#allocation3 + $0x8] sm:$0x33] %vm7857_vm2, %v4534_v22  ;;  %v8844_v23 = vpop.permute.xlu1 %4727  ;;  %vm9608_vm3 = vcmask 105472  }
 0xbd7   :  { %4467 = vst [vmem:[#allocation3 + $0x3c] sm:$0xcc] %v4464_v24  ;;  %v4288_v31 = vrot.slane %v4286_v25, 4  ;;  %4294 = vst.msk [vmem:[#allocation3 + $0x8] sm:$0xc] %vm9601_vm15, %v4286_v25  ;;  %vm9610_vm15 = vcmask 517120  }
 0xbd8   :  { %v4731_v13 = vrot.slane %v8844_v23, 4 }
 0xbd9   :  { %v4289_v3 = vsel %vm9602_vm12, %v4287_v29, %v4288_v31  ;;  %vm9611_vm12 = vcmask 261120  }
 0xbda   :  { %v4290_v26 = vsel %vm9603_vm1, %v8808_v32, %v4289_v3  ;;  %v4344_v28 = vpop.permute.xlu0 %4343  ;;  %v4586_v15 = vpop.permute.xlu1 %4585  ;;  %v4775_v47 = vld [vmem:[#allocation3 + $0x28] sm:$0xff]  ;;  %vm9612_vm1 = vcmask 252928  }
 0xbdb   :  { %4293 = vst [vmem:[#allocation3] sm:$0xcc] %v4290_v26  ;;  %v4346_v38 = vrot.slane %v4344_v28, 4  ;;  %4352 = vst.msk [vmem:[#allocation3 + $0x1c] sm:$0xc] %vm9604_vm4, %v4344_v28  ;;  %v4589_v39 = vrot.slane %v4586_v15, 4 }
 0xbdc   :  { %vm9613_vm4 = vmmov %vm9610_vm15 }
 0xbdd   :  { %v4347_v34 = vsel %vm9605_vm5, %v4345_v33, %v4346_v38  ;;  %v4590_v45 = vsel %vm9607_vm14, %v4589_v39, %v4586_v15  ;;  %vm9614_vm5 = vmmov %vm9613_vm4 }
 0xbde   :  { %v4348_v43 = vsel %vm9606_vm7, %v8814_v51, %v4347_v34  ;;  %v8854_v44 = vpop.permute.xlu0 %4670  ;;  %v4778_v32 = vld [vmem:[#allocation3 + $0x3c] sm:$0xff]  ;;  %4594 = vst.msk [vmem:[#allocation3 + $0x1c] sm:$0x33] %vm7857_vm2, %v4590_v45  ;;  %v4644_v55 = vpop.permute.xlu1 %4643  ;;  %vm9615_vm7 = vmmov %vm9607_vm14  ;;  %vm9616_vm14 = vcmask 1043456  }
 0xbdf   :  { %v7649_v48 = vld [vmem:[#allocation3 + $0x2c] ss:$20 sps:$4 sm:$0xff]   ;;  %4351 = vst [vmem:[#allocation3 + $0x14] sm:$0xcc] %v4348_v43  ;;  %v4674_v20 = vrot.slane %v8854_v44, 4  ;;  %v7028_v52 = vcombine.low %v4775_v47, %v4778_v32  ;;  %v4647_v53 = vsel %vm9608_vm3, %v4645_v6, %v4644_v55  ;;  %vm9617_vm3 = vmmov %vm9613_vm4 }
 0xbe0   :  { %4879 = vmatprep.subr.bf16.mxu1 %v7649_v48  ;;  %4651 = vst.msk [vmem:[#allocation3 + $0x38] sm:$0x3] %vm9610_vm15, %v4647_v53  ;;  %vm9619_vm15 = vmmov %vm9617_vm3 }
 0xbe1   :  { %v4675_v51 = vsel %vm9609_vm13, %v4674_v20, %v8854_v44  ;;  %4880 = vmatpush1.bf16.msra.mxu1 %v7028_v52  ;;  %vm9618_vm13 = vcmask 998400  }
 0xbe2   :  { %4679 = vst.msk [vmem:[#allocation3 + $0x30] sm:$0xcc] %vm7893_vm0, %v4675_v51  ;;  %v8868_v46 = vpop.permute.xlu0 %4558  ;;  %v4532_v57 = vpop.permute.xlu1 %4531  ;;  %v4769_v42 = vld [vmem:[#allocation3] sm:$0xff] }
 0xbe3   :  { %v4562_v30 = vrot.slane %v8868_v46, 4  ;;  %v4535_v58 = vsel %vm9611_vm12, %v4533_v19, %v4532_v57  ;;  %vm9620_vm12 = vcmask 293888  }
 0xbe4   :  { %4539 = vst.msk [vmem:[#allocation3 + $0x10] sm:$0x3] %vm9613_vm4, %v4535_v58  ;;  %vm9622_vm4 = vcmask 1014784  }
 0xbe5   :  { %v4563_v59 = vsel %vm9612_vm1, %v4562_v30, %v8868_v46  ;;  %vm9621_vm1 = vmmov %vm9616_vm14  ;;  %v5013_v46 = vld [vmem:[#allocation4] sm:$0xff] }
 0xbe6   :  { %4567 = vst.msk [vmem:[#allocation3 + $0x8] sm:$0xcc] %vm7893_vm0, %v4563_v59  ;;  %v4758_v60 = vpop.permute.xlu0 %4757  ;;  %v4772_v0 = vld [vmem:[#allocation3 + $0x14] sm:$0xff]  ;;  %v4588_v5 = vpop.permute.xlu1 %4587 }
 0xbe7   :  { %v7651_v40 = vld [vmem:[#allocation3 + $0x4] ss:$20 sps:$4 sm:$0xff]   ;;  %v4760_v2 = vrot.slane %v4758_v60, 4  ;;  %4766 = vst.msk [vmem:[#allocation3 + $0x60] sm:$0x3] %vm9614_vm5, %v4758_v60  ;;  %v7023_v63 = vcombine.low %v4769_v42, %v4772_v0  ;;  %v4591_v9 = vsel %vm9615_vm7, %v4589_v39, %v4588_v5  ;;  %vm9623_vm5 = vcmask 519170  }
 0xbe8   :  { %4881 = vmatprep.subr.bf16.mxu1 %v7651_v40  ;;  %4595 = vst.msk [vmem:[#allocation3 + $0x24] sm:$0x3] %vm9617_vm3, %v4591_v9  ;;  %vm9624_vm7 = vcmask 1041408   ;;  %vm9626_vm3 = vcmask 1006592   ;;  %v5018_v0 = vcombine.high %v5013_v46, %v5013_v46 }
 0xbe9   :  { %v4761_v10 = vsel %vm9616_vm14, %v4759_v1, %v4760_v2  ;;  %4882 = vmatpush1.bf16.msra.mxu1 %v7023_v63  ;;  %vm9625_vm14 = vmmov %vm9621_vm1  ;;  %v4776_v38 = vld [vmem:[#allocation3 + $0x30] sm:$0xff] }
 0xbea   :  { %v4762_v35 = vsel %vm9618_vm13, %v8819_v56, %v4761_v10  ;;  %v4700_v6 = vpop.permute.xlu0 %4699  ;;  %7535 = vmatprep.subr.bf16.mxu1 %v7703_v4  ;;  %vm9627_vm13 = vcmask 113664  }
 0xbeb   :  { %4765 = vst.msk [vmem:[#allocation3 + $0x58] sm:$0x33] %vm7857_vm2, %v4762_v35  ;;  %v4702_v14 = vrot.slane %v4700_v6, 4 }
 0xbec   :  { %4708 = vst.msk [vmem:[#allocation3 + $0x4c] sm:$0x3] %vm9619_vm15, %v4700_v6  ;;  %7039 = vmatmul.mubr.msk.bf16.vlgmr.msra.gmra.mxu1 %vm9620_vm12, %v7022_v11  ;;  %vm9628_vm15 = vmmov %vm9624_vm7  ;;  %v5014_v6 = vld [vmem:[#allocation4 + $0x8] sm:$0xff] }
 0xbed   :  { %v4703_v17 = vsel %vm9621_vm1, %v4701_v12, %v4702_v14  ;;  %7541 = vmatprep.mubr.msk.bf16.mxu1 %vm9379_vm6, %v7703_v4  ;;  %vm9629_vm12 = vmmov %vm9624_vm7  ;;  %vm9630_vm1 = vcmask 97280  }
 0xbee   :  { %v4704_v56 = vsel %vm9622_vm4, %v8824_v50, %v4703_v17  ;;  %v4730_v18 = vpop.permute.xlu0 %4729  ;;  %v7653_v16 = vld [vmem:[#allocation3 + $0x60] ss:$0 sps:$4 sm:$0x33]   ;;  %vm9631_vm4 = vmmov %vm9623_vm5 }
 0xbef   :  { %4707 = vst.msk [vmem:[#allocation3 + $0x44] sm:$0x33] %vm7857_vm2, %v4704_v56  ;;  %v4732_v21 = vrot.slane %v4730_v18, 4  ;;  %v4865_v19 = vsel %vm9624_vm7, %v7653_v16, 0  ;;  %vm9633_vm7 = vmmov %vm9631_vm4 }
 0xbf0   :  { %4738 = vst.msk [vmem:[#allocation3 + $0x4c] sm:$0xc] %vm9623_vm5, %v4730_v18  ;;  %7536 = vmatpush3.bf16.msra.mxu1 %v4865_v19  ;;  %vm9632_vm5 = vcmask 252928  }
 0xbf1   :  { %v4733_v62 = vsel %vm9625_vm14, %v4731_v13, %v4732_v21  ;;  %7537 = vmatprep.subr.bf16.mxu1 %v7703_v4  ;;  %vm9634_vm14 = vmmov %vm9627_vm13  ;;  %v5019_v13 = vcombine.high %v5014_v6, %v5014_v6 }
 0xbf2   :  { %v4734_v24 = vsel %vm9626_vm3, %v8844_v23, %v4733_v62  ;;  %v4615_v25 = vpop.permute.xlu0 %4614  ;;  %v4782_v50 = vld [vmem:[#allocation3 + $0x58] sm:$0x33]  ;;  %vm9635_vm3 = vmmov %vm9631_vm4 }
 0xbf3   :  { %4737 = vst.msk [vmem:[#allocation3 + $0x44] sm:$0xcc] %vm7893_vm0, %v4734_v24  ;;  %v4618_v22 = vrot.slane %v4615_v25, 4  ;;  %v7036_v29 = vcombine.high %v4782_v50, %v4782_v50  ;;  %v7035_v31 = vcombine.low %v4782_v50, %v4782_v50  ;;  %v4994_v52 = vpop.permute.xlu1 %4993 }
 0xbf5   :  { %v4619_v3 = vsel %vm9627_vm13, %v4618_v22, %v4615_v25  ;;  %7040 = vmatprep.subr.msk.bf16.mxu0 %vm9628_vm15, %v7036_v29  ;;  %v4859_v26 = vsel %vm9629_vm12, %v7035_v31, 0  ;;  %vm9636_vm13 = vcmask 293888   ;;  %vm9638_vm12 = vcmask 1043456  }
 0xbf6   :  { %4623 = vst.msk [vmem:[#allocation3 + $0x1c] sm:$0xcc] %vm7893_vm0, %v4619_v3  ;;  %v4673_v23 = vpop.permute.xlu0 %4672  ;;  %4919 = vmatpush1.bf16.msra.mxu0 %v4859_v26  ;;  %vm9637_vm15 = vmmov %vm9636_vm13  ;;  %v5015_v26 = vld [vmem:[#allocation4 + $0x10] sm:$0xf] }
 0xbf7   :  { %v4676_v28 = vsel %vm9630_vm1, %v4674_v20, %v4673_v23  ;;  %vm9639_vm1 = vcmask 941056  }
 0xbf8   :  { %4680 = vst.msk [vmem:[#allocation3 + $0x38] sm:$0xc] %vm9631_vm4, %v4676_v28  ;;  %vm9640_vm4 = vcmask 254976  }
 0xbfa   :  { %v4561_v33 = vpop.permute.xlu0 %4560  ;;  %v4779_v15 = vld [vmem:[#allocation3 + $0x44] sm:$0xff] }
 0xbfb   :  { %v7655_v39 = vld [vmem:[#allocation3 + $0x34] ss:$20 sps:$4 sm:$0xff]   ;;  %v4564_v34 = vsel %vm9632_vm5, %v4562_v30, %v4561_v33  ;;  %v7030_v43 = vcombine.low %v4776_v38, %v4779_v15  ;;  %vm9641_vm5 = vmmov %vm9640_vm4 }
 0xbfc   :  { %4568 = vst.msk [vmem:[#allocation3 + $0x10] sm:$0xc] %vm9633_vm7, %v4564_v34  ;;  %4920 = vmatprep.subr.bf16.mxu0 %v7655_v39  ;;  %vm9642_vm7 = vmmov %vm9638_vm12 }
 0xbfd   :  { %4921 = vmatpush1.bf16.msra.mxu0 %v7030_v43  ;;  %v7657_v45 = vld [vmem:[#allocation3 + $0xc] ss:$20 sps:$4 sm:$0xff]   ;;  %v7659_v44 = vld [vmem:[#allocation3 + $0x8] ss:$20 sps:$4 sm:$0xff]  }
 0xbfe   :  { %v4617_v47 = vpop.permute.xlu0 %4616  ;;  %4922 = vmatprep.subr.bf16.mxu0 %v7657_v45 }
 0xbff   :  { %v4620_v32 = vsel %vm9634_vm14, %v4618_v22, %v4617_v47  ;;  %v7660_v48 = vld [vmem:[#allocation3 + $0x38] ss:$20 sps:$4 sm:$0xff]   ;;  %vm9643_vm14 = vcmask 736256  }
 0xc00   :  { %4624 = vst.msk [vmem:[#allocation3 + $0x24] sm:$0xc] %vm9635_vm3, %v4620_v32  ;;  %7538 = vmatpush3.bf16.msra.mxu1 %v7660_v48  ;;  %vm9644_vm3 = vmmov %vm9640_vm4 }
 0xc01   :  { %4923 = vmatpush1.bf16.msra.mxu0 %v7659_v44  ;;  %7539 = vmatprep.subr.bf16.mxu1 %v7703_v4 }
 0xc04   :  { %7041 = vmatmul.mubr.msk.bf16.vlgmr.msra.gmra.mxu0 %vm9636_vm13, %v7022_v11  ;;  %vm9645_vm13 = vmmov %vm9642_vm7 }
 0xc05   :  { %5717 = vmatprep.mubr.bf16.mxu0 %v7719_v61 }
 0xc07   :  { %v7661_v20 = vld [vmem:[#allocation3 + $0x10] ss:$20 sps:$4 sm:$0xff]  }
 0xc08   :  { %7540 = vmatpush3.bf16.msra.mxu1 %v7661_v20 }
 0xc0b   :  { %7542 = vmatmul.mubr.msk.bf16.vlgmr.msra.gmra.mxu1 %vm9637_vm15, %v7022_v11  ;;  %v5006_v51 = vpop.permute.xlu0 %5005  ;;  %vm9646_vm15 = vcmask 891904  }
 0xc0c   :  { %5758 = vmatprep.mubr.bf16.mxu1 %v7719_v61 }
 0xcac   :  { %v4901_v55 = vpop.f32.mrf.mxu1 }
 0xcad   :  { %v4996_v53 = vmul.f32 %v4994_v52, %v4901_v55 }
 0xcae   :  { %v4903_v30 = vpop.f32.mrf.mxu1 }
 0xcaf   :  { %v5008_v57 = vadd.f32 %v5006_v51, %v4996_v53  ;;  %v4997_v58 = vmul.f32 %v4994_v52, %v4903_v30 }
 0xcb0   :  { %v4905_v59 = vpop.f32.mrf.mxu1 }
 0xcb1   :  { %v5022_v60 = vadd.f32 %v5013_v46, %v5008_v57  ;;  %v5009_v42 = vadd.f32 %v5006_v51, %v4997_v58 }
 0xcb2   :  { %v4906_v40 = vpop.f32.mrf.mxu1 }
 0xcb3   :  { %v5027_v1 = vmax.f32 %v5022_v60, 0.0  ;;  %v5023_v2 = vadd.f32 %v5018_v0, %v5009_v42 }
 0xcb5   :  { %v5028_v63 = vmax.f32 %v5023_v2, 0.0  ;;  %v5032_v5 = vmul.f32 %v7995_v41, %v5027_v1 }
 0xcb7   :  { %v5033_v9 = vmul.f32 %v8003_v8, %v5028_v63 }
 0xcb9   :  { %v5041_v10 = vcombine.low %v5032_v5, %v5033_v9 }
 0xcbb   :  { %5045 = vst [vmem:[#allocation4] sm:$0xff] %v5041_v10  ;;  %5052 = vrot.lane.b32.xlu1 %v5041_v10, %s7702_s22 }
 0xcc4   :  { %v4942_v11 = vpop.f32.mrf.mxu0 }
 0xcc5   :  { %v4998_v35 = vmul.f32 %v4994_v52, %v4942_v11 }
 0xcc6   :  { %v4944_v12 = vpop.f32.mrf.mxu0 }
 0xcc7   :  { %v5010_v14 = vadd.f32 %v5006_v51, %v4998_v35  ;;  %v4999_v17 = vmul.f32 %v4994_v52, %v4944_v12 }
 0xcc8   :  { %v4946_v56 = vpop.f32.mrf.mxu0 }
 0xcc9   :  { %v5024_v18 = vadd.f32 %v5014_v6, %v5010_v14  ;;  %v5011_v16 = vadd.f32 %v5006_v51, %v4999_v17 }
 0xcca   :  { %v4947_v21 = vpop.f32.mrf.mxu0 }
 0xccb   :  { %v5029_v19 = vmax.f32 %v5024_v18, 0.0  ;;  %v5025_v62 = vadd.f32 %v5019_v13, %v5011_v16  ;;  %v4983_v24 = vpop.f32.mrf.mxu1 }
 0xccc   :  { %v5000_v50 = vmul.f32 %v4994_v52, %v4983_v24 }
 0xccd   :  { %v5030_v25 = vmax.f32 %v5025_v62, 0.0  ;;  %v7543_v22 = vpop.f32.mrf.mxu1  ;;  %v5034_v29 = vmul.f32 %v8015_v36, %v5029_v19 }
 0xcce   :  { %v5012_v3 = vadd.f32 %v5006_v51, %v5000_v50 }
 0xccf   :  { %v5035_v31 = vmul.f32 %v8018_v37, %v5030_v25  ;;  %v4986_v23 = vpop.f32.mrf.mxu1 }
 0xcd0   :  { %v5026_v33 = vadd.f32 %v5015_v26, %v5012_v3 }
 0xcd1   :  { %v5042_v28 = vcombine.low %v5034_v29, %v5035_v31  ;;  %v7544_v38 = vpop.f32.mrf.mxu1 }
 0xcd2   :  { %v5031_v15 = vmax.f32 %v5026_v33, 0.0 }
 0xcd3   :  { %5046 = vst [vmem:[#allocation4 + $0x8] sm:$0xff] %v5042_v28  ;;  %5319 = vrot.lane.b32.xlu1 %v5042_v28, %s7704_s0 }
 0xcd4   :  { %v5036_v39 = vmul.f32 %v8025_v49, %v5031_v15 }
 0xcd6   :  { %5047 = vst.msk [vmem:[#allocation4 + $0x10] sm:$0xf] %vm147_vm10, %v5036_v39 }
 0xcda   :  { %v5049_v34 = vld [vmem:[#allocation4 + $0x8] sm:$0xf] }
 0xcdb   :  { %5054 = vrot.lane.b32.xlu0 %v5049_v34, %s7702_s22 }
 0xcdd   :  { %v5316_v43 = vld [vmem:[#allocation4 + $0x10] sm:$0xf] }
 0xcdf   :  { %5321 = vrot.lane.b32.xlu0 %v5316_v43, %s7704_s0  ;;  %v7102_v43 = vld [vmem:[%s9294_s2 + $0x18] sm:$0xf] }
 0xd2d   :  { %v5053_v45 = vpop.permute.xlu1 %5052 }
 0xd2e   :  { %v5056_v47 = vrot.slane %v5053_v45, 4 }
 0xd30   :  { %v5057_v32 = vsel %vm158_vm8, %v5056_v47, %v5053_v45 }
 0xd31   :  { %5061 = vst.msk [vmem:[#allocation2] sm:$0xff] %vm7767_vm9, %v5057_v32 }
 0xd38   :  { %v5063_v44 = vld [vmem:[#allocation2] sm:$0xff] }
 0xd39   :  { %v5066_v48 = vcombine.high %v5063_v44, %v5063_v44 }
 0xd3b   :  { %v7397_v20 = vpack.c.bf16 %v5066_v48, %v5063_v44 }
 0xd3d   :  { %5303 = vrot.lane.b32.xlu1 %v7397_v20, %s7705_s25  ;;  %5081 = vst [vmem:[#allocation3] sm:$0x33] %v7397_v20  ;;  %v5215_v52 = vrot.slane %v7397_v20, 6 }
 0xd41   :  { %5187 = vrot.lane.b32.xlu1 %v7397_v20, %s7706_s26 }
 0xd45   :  { %5245 = vrot.lane.b32.xlu1 %v7397_v20, %s7707_s27  ;;  %v5320_v51 = vpop.permute.xlu1 %5319 }
 0xd46   :  { %v5323_v30 = vrot.slane %v5320_v51, 4 }
 0xd49   :  { %5129 = vrot.lane.b32.xlu1 %v7397_v20, %s7708_s28 }
 0xd4d   :  { %v5055_v55 = vpop.permute.xlu0 %5054  ;;  %5217 = vrot.lane.b32.xlu1 %v5215_v52, %s7709_s29 }
 0xd4e   :  { %v5058_v53 = vsel %vm158_vm8, %v5056_v47, %v5055_v55 }
 0xd4f   :  { %5062 = vst.msk [vmem:[#allocation2 + $0x8] sm:$0xf] %vm166_vm11, %v5058_v53 }
 0xd51   :  { %v5322_v46 = vpop.permute.xlu0 %5321  ;;  %5275 = vrot.lane.b32.xlu1 %v5215_v52, %s7710_s30 }
 0xd52   :  { %v5324_v57 = vrot.slane %v5322_v46, 4 }
 0xd54   :  { %v5325_v58 = vsel %vm9638_vm12, %v5323_v30, %v5324_v57  ;;  %vm9647_vm12 = vmmov %vm9644_vm3 }
 0xd55   :  { %v5326_v59 = vsel %vm9639_vm1, %v5320_v51, %v5325_v58  ;;  %5101 = vrot.lane.b32.xlu1 %v5215_v52, %s7711_s5  ;;  %vm9648_vm1 = vmmov %vm9642_vm7 }
 0xd56   :  { %v5064_v60 = vld [vmem:[#allocation2 + $0x8] sm:$0xf]  ;;  %5329 = vst.msk [vmem:[#allocation2] sm:$0xff] %vm7767_vm9, %v5326_v59 }
 0xd57   :  { %v5288_v42 = vld [vmem:[#allocation2 + $0x8] sm:$0xf]  ;;  %v7382_v5 = vpack.c.bf16 %v5064_v60, %v5064_v60 }
 0xd58   :  { %v5172_v0 = vld [vmem:[#allocation2 + $0x8] sm:$0xf]  ;;  %v7398_v40 = vpack.c.bf16 %v5288_v42, %v5288_v42 }
 0xd59   :  { %v5230_v1 = vld [vmem:[#allocation2 + $0x8] sm:$0xf]  ;;  %5159 = vrot.lane.b32.xlu1 %v5215_v52, %s7712_s6  ;;  %5082 = vst.msk [vmem:[#allocation3 + $0x8] sm:$0x3] %vm9640_vm4, %v7382_v5  ;;  %v7390_v35 = vpack.c.bf16 %v5172_v0, %v5172_v0  ;;  %vm9649_vm4 = vcmask 752640  }
 0xd5a   :  { %v5114_v2 = vld [vmem:[#allocation2 + $0x8] sm:$0xf]  ;;  %5305 = vrot.lane.b32.xlu0 %v7398_v40, %s7705_s25  ;;  %v7394_v14 = vpack.c.bf16 %v5230_v1, %v5230_v1 }
 0xd5b   :  { %v5200_v63 = vld [vmem:[#allocation2 + $0x8] sm:$0xf]  ;;  %v7386_v56 = vpack.c.bf16 %v5114_v2, %v5114_v2 }
 0xd5c   :  { %v5258_v9 = vld [vmem:[#allocation2 + $0x8] sm:$0xf]  ;;  %v7392_v18 = vpack.c.bf16 %v5200_v63, %v5200_v63 }
 0xd5d   :  { %v5084_v10 = vld [vmem:[#allocation2 + $0x8] sm:$0xf]  ;;  %v5557_v6 = vld [vmem:[#allocation2] sm:$0xff]  ;;  %v7396_v13 = vpack.c.bf16 %v5258_v9, %v5258_v9 }
 0xd5e   :  { %v5142_v11 = vld [vmem:[#allocation2 + $0x8] sm:$0xf]  ;;  %5189 = vrot.lane.b32.xlu0 %v7390_v35, %s7706_s26  ;;  %v5560_v12 = vcombine.high %v5557_v6, %v5557_v6  ;;  %v5216_v16 = vrot.slane %v7392_v18, 6  ;;  %v7384_v19 = vpack.c.bf16 %v5084_v10, %v5084_v10 }
 0xd5f   :  { %5330 = vst.msk [vmem:[#allocation2 + $0x8] sm:$0xf] %vm166_vm11, %v5322_v46  ;;  %v5274_v21 = vrot.slane %v7396_v13, 6  ;;  %v7388_v24 = vpack.c.bf16 %v5142_v11, %v5142_v11  ;;  %v7103_v46 = vld [vmem:[%s9295_s3 + $0x18] sm:$0xf] }
 0xd60   :  { %v7415_v17 = vpack.c.bf16 %v5560_v12, %v5557_v6  ;;  %v5100_v62 = vrot.slane %v7384_v19, 6 }
 0xd61   :  { %v5158_v50 = vrot.slane %v7388_v24, 6 }
 0xd62   :  { %5247 = vrot.lane.b32.xlu0 %v7394_v14, %s7707_s27  ;;  %5573 = vrot.lane.b32.xlu1 %v7415_v17, %s7713_s7  ;;  %v5543_v25 = vrot.slane %v7415_v17, 6 }
 0xd66   :  { %5131 = vrot.lane.b32.xlu0 %v7386_v56, %s7708_s28  ;;  %5515 = vrot.lane.b32.xlu1 %v7415_v17, %s7714_s8  ;;  %v5444_v22 = vld [vmem:[#allocation2 + $0x8] sm:$0xf] }
 0xd67   :  { %v7408_v29 = vpack.c.bf16 %v5444_v22, %v5444_v22  ;;  %v5332_v31 = vld [vmem:[#allocation2 + $0x8] sm:$0xf] }
 0xd68   :  { %v5558_v3 = vld [vmem:[#allocation2 + $0x8] sm:$0xf]  ;;  %v7400_v26 = vpack.c.bf16 %v5332_v31, %v5332_v31 }
 0xd69   :  { %v5388_v23 = vld [vmem:[#allocation2 + $0x8] sm:$0xf]  ;;  %v7416_v28 = vpack.c.bf16 %v5558_v3, %v5558_v3 }
 0xd6a   :  { %5219 = vrot.lane.b32.xlu0 %v5216_v16, %s7709_s29  ;;  %5459 = vrot.lane.b32.xlu1 %v7415_v17, %s7715_s9  ;;  %v5500_v33 = vld [vmem:[#allocation2 + $0x8] sm:$0xf]  ;;  %v7404_v38 = vpack.c.bf16 %v5388_v23, %v5388_v23 }
 0xd6b   :  { %v5528_v15 = vld [vmem:[#allocation2 + $0x8] sm:$0xf]  ;;  %v7412_v39 = vpack.c.bf16 %v5500_v33, %v5500_v33 }
 0xd6c   :  { %v7414_v34 = vpack.c.bf16 %v5528_v15, %v5528_v15  ;;  %v5471_v47 = vld [vmem:[#allocation2 + $0x8] sm:$0xf] }
 0xd6d   :  { %v7410_v32 = vpack.c.bf16 %v5471_v47, %v5471_v47  ;;  %v5359_v44 = vld [vmem:[#allocation2 + $0x8] sm:$0xf] }
 0xd6e   :  { %5277 = vrot.lane.b32.xlu0 %v5274_v21, %s7710_s30  ;;  %5347 = vrot.lane.b32.xlu1 %v7415_v17, %s7701_s21  ;;  %v5544_v45 = vrot.slane %v7414_v34, 6  ;;  %v7402_v20 = vpack.c.bf16 %v5359_v44, %v5359_v44  ;;  %v5415_v52 = vld [vmem:[#allocation2 + $0x8] sm:$0xf] }
 0xd6f   :  { %v5487_v48 = vrot.slane %v7410_v32, 6  ;;  %v7406_v53 = vpack.c.bf16 %v5415_v52, %v5415_v52 }
 0xd70   :  { %v5375_v55 = vrot.slane %v7402_v20, 6 }
 0xd71   :  { %v5431_v51 = vrot.slane %v7406_v53, 6 }
 0xd72   :  { %5103 = vrot.lane.b32.xlu0 %v5100_v62, %s7711_s5  ;;  %5545 = vrot.lane.b32.xlu1 %v5543_v25, %s7716_s10 }
 0xd76   :  { %5161 = vrot.lane.b32.xlu0 %v5158_v50, %s7712_s6  ;;  %5403 = vrot.lane.b32.xlu1 %v7415_v17, %s7717_s11 }
 0xd7a   :  { %5488 = vrot.lane.b32.xlu0 %v5543_v25, %s7718_s12  ;;  %5461 = vrot.lane.b32.xlu1 %v7408_v29, %s7715_s9 }
 0xd7e   :  { %5376 = vrot.lane.b32.xlu0 %v5543_v25, %s7720_s13  ;;  %5349 = vrot.lane.b32.xlu1 %v7400_v26, %s7701_s21 }
 0xd82   :  { %5575 = vrot.lane.b32.xlu0 %v7416_v28, %s7713_s7  ;;  %5405 = vrot.lane.b32.xlu1 %v7404_v38, %s7717_s11 }
 0xd86   :  { %5517 = vrot.lane.b32.xlu0 %v7412_v39, %s7714_s8  ;;  %5811 = vperm.xlu1 %7599, %v7102_v43  }
 0xd8a   :  { %5547 = vrot.lane.b32.xlu0 %v5544_v45, %s7716_s10 }
 0xd8e   :  { %5432 = vrot.lane.b32.xlu0 %v5543_v25, %s7721_s14 }
 0xd92   :  { %5490 = vrot.lane.b32.xlu0 %v5487_v48, %s7718_s12 }
 0xd96   :  { %5378 = vrot.lane.b32.xlu0 %v5375_v55, %s7720_s13 }
 0xd9a   :  { %5434 = vrot.lane.b32.xlu0 %v5431_v51, %s7721_s14 }
 0xd9e   :  { %5823 = vperm.xlu0 %7598, %v7103_v46  }
 0xdaf   :  { %v5304_v30 = vpop.permute.xlu1 %5303 }
 0xdb0   :  { %v5307_v1 = vrot.slane %v5304_v30, 4 }
 0xdb3   :  { %v5188_v57 = vpop.permute.xlu1 %5187 }
 0xdb4   :  { %v5191_v10 = vrot.slane %v5188_v57, 4 }
 0xdb7   :  { %v5246_v58 = vpop.permute.xlu1 %5245 }
 0xdb8   :  { %v5249_v17 = vrot.slane %v5246_v58, 4 }
 0xdbb   :  { %v5130_v59 = vpop.permute.xlu1 %5129 }
 0xdbc   :  { %v5133_v62 = vrot.slane %v5130_v59, 4 }
 0xdbf   :  { %v5218_v60 = vpop.permute.xlu1 %5217 }
 0xdc0   :  { %v5221_v23 = vrot.slane %v5218_v60, 4 }
 0xdc3   :  { %v5276_v42 = vpop.permute.xlu1 %5275 }
 0xdc4   :  { %v5279_v45 = vrot.slane %v5276_v42, 4 }
 0xdc7   :  { %v8988_v0 = vpop.permute.xlu1 %5101 }
 0xdc8   :  { %v5105_v53 = vrot.slane %v8988_v0, 4 }
 0xdcb   :  { %v8994_v35 = vpop.permute.xlu1 %5159 }
 0xdcc   :  { %v5306_v40 = vpop.permute.xlu0 %5305 }
 0xdcd   :  { %v5308_v2 = vrot.slane %v5306_v40, 4  ;;  %5314 = vst.msk [vmem:[#allocation3 + $0x58] sm:$0x3] %vm9641_vm5, %v5306_v40  ;;  %vm9650_vm5 = vmmov %vm9644_vm3 }
 0xdcf   :  { %v5309_v63 = vsel %vm9642_vm7, %v5307_v1, %v5308_v2  ;;  %vm9651_vm7 = vmmov %vm9648_vm1 }
 0xdd0   :  { %v5310_v5 = vsel %vm9643_vm14, %v5304_v30, %v5309_v63  ;;  %v5190_v9 = vpop.permute.xlu0 %5189  ;;  %vm9652_vm14 = vcmask 1041408  }
 0xdd1   :  { %5313 = vst [vmem:[#allocation3 + $0x50] sm:$0x33] %v5310_v5  ;;  %v5192_v11 = vrot.slane %v5190_v9, 4  ;;  %5198 = vst.msk [vmem:[#allocation3 + $0x30] sm:$0x3] %vm9644_vm3, %v5190_v9 }
 0xdd2   :  { %vm9653_vm3 = vmmov %vm9652_vm14 }
 0xdd3   :  { %v5193_v6 = vsel %vm9645_vm13, %v5191_v10, %v5192_v11  ;;  %vm9654_vm13 = vcmask 1031168  }
 0xdd4   :  { %v5194_v12 = vsel %vm9646_vm15, %v5188_v57, %v5193_v6  ;;  %v5248_v14 = vpop.permute.xlu0 %5247  ;;  %v8999_v18 = vpop.permute.xlu1 %5573  ;;  %vm9655_vm15 = vcmask 257026  }
 0xdd5   :  { %5197 = vst [vmem:[#allocation3 + $0x28] sm:$0x33] %v5194_v12  ;;  %v5250_v56 = vrot.slane %v5248_v14, 4  ;;  %5256 = vst.msk [vmem:[#allocation3 + $0x44] sm:$0x3] %vm9647_vm12, %v5248_v14 }
 0xdd6   :  { %vm9656_vm12 = vmmov %vm9648_vm1 }
 0xdd7   :  { %v5251_v16 = vsel %vm9648_vm1, %v5249_v17, %v5250_v56  ;;  %vm9657_vm1 = vcmask 883712  }
 0xdd8   :  { %v5252_v13 = vsel %vm9649_vm4, %v5246_v58, %v5251_v16  ;;  %v5132_v21 = vpop.permute.xlu0 %5131  ;;  %v5599_v19 = vld [vmem:[#allocation3 + $0x50] sm:$0x33]  ;;  %v9004_v22 = vpop.permute.xlu1 %5515  ;;  %vm9658_vm4 = vcmask 105472  }
 0xdd9   :  { %5255 = vst [vmem:[#allocation3 + $0x3c] sm:$0x33] %v5252_v13  ;;  %v5134_v24 = vrot.slane %v5132_v21, 4  ;;  %5140 = vst.msk [vmem:[#allocation3 + $0x1c] sm:$0x3] %vm9650_vm5, %v5132_v21  ;;  %v7093_v25 = vcombine.high %v5599_v19, %v5599_v19  ;;  %v7092_v50 = vcombine.low %v5599_v19, %v5599_v19 }
 0xdda   :  { %vm9659_vm5 = vmmov %vm9655_vm15 }
 0xddb   :  { %v5135_v29 = vsel %vm9651_vm7, %v5133_v62, %v5134_v24  ;;  %7097 = vmatprep.subr.msk.bf16.mxu0 %vm9652_vm14, %v7093_v25  ;;  %v5671_v31 = vsel %vm9653_vm3, %v7092_v50, 0  ;;  %vm9660_vm14 = vcmask 744448   ;;  %vm9661_vm3 = vcmask 261120  }
 0xddc   :  { %v5136_v3 = vsel %vm9654_vm13, %v5130_v59, %v5135_v29  ;;  %v5220_v26 = vpop.permute.xlu0 %5219  ;;  %5696 = vmatpush1.bf16.msra.mxu0 %v5671_v31  ;;  %v5460_v33 = vpop.permute.xlu1 %5459  ;;  %vm9662_vm13 = vmmov %vm9659_vm5  ;;  %v5163_v59 = vrot.slane %v8994_v35, 4  ;;  %v5577_v50 = vrot.slane %v8999_v18, 4 }
 0xddd   :  { %5139 = vst [vmem:[#allocation3 + $0x14] sm:$0x33] %v5136_v3  ;;  %v5222_v28 = vrot.slane %v5220_v26, 4  ;;  %5228 = vst.msk [vmem:[#allocation3 + $0x30] sm:$0xc] %vm9655_vm15, %v5220_v26  ;;  %v5463_v38 = vrot.slane %v5460_v33, 4 }
 0xdde   :  { %vm9663_vm15 = vmmov %vm9651_vm7 }
 0xddf   :  { %v5223_v15 = vsel %vm9656_vm12, %v5221_v23, %v5222_v28  ;;  %v5464_v43 = vsel %vm9658_vm4, %v5463_v38, %v5460_v33  ;;  %vm9664_vm12 = vcmask 1039360   ;;  %vm9666_vm4 = vmmov %vm9651_vm7  ;;  %v7081_v28 = vld [vmem:[%s9296_s1 + $0xc] sm:$0x3] }
 0xde0   :  { %v5224_v39 = vsel %vm9657_vm1, %v5218_v60, %v5223_v15  ;;  %v5278_v34 = vpop.permute.xlu0 %5277  ;;  %5468 = vst.msk [vmem:[#allocation3 + $0x30] sm:$0x33] %vm7857_vm2, %v5464_v43  ;;  %v5348_v32 = vpop.permute.xlu1 %5347  ;;  %vm9665_vm1 = vmmov %vm9659_vm5  ;;  %v5519_v15 = vrot.slane %v9004_v22, 4 }
 0xde1   :  { %5227 = vst [vmem:[#allocation3 + $0x28] sm:$0xcc] %v5224_v39  ;;  %v5280_v47 = vrot.slane %v5278_v34, 4  ;;  %5286 = vst.msk [vmem:[#allocation3 + $0x44] sm:$0xc] %vm9659_vm5, %v5278_v34  ;;  %v5351_v44 = vrot.slane %v5348_v32, 4 }
 0xde2   :  { %vm9667_vm5 = vcmask 900096  }
 0xde3   :  { %v5281_v48 = vsel %vm9651_vm7, %v5279_v45, %v5280_v47  ;;  %v5352_v55 = vsel %vm9661_vm3, %v5351_v44, %v5348_v32  ;;  %vm9668_vm7 = vcmask 244736   ;;  %vm9670_vm3 = vcmask 97280  }
 0xde4   :  { %v5282_v20 = vsel %vm9660_vm14, %v5276_v42, %v5281_v48  ;;  %v5104_v52 = vpop.permute.xlu0 %5103  ;;  %5356 = vst.msk [vmem:[#allocation3 + $0x8] sm:$0x33] %vm7857_vm2, %v5352_v55  ;;  %v9024_v46 = vpop.permute.xlu1 %5545  ;;  %vm9669_vm14 = vcmask 105472  }
 0xde5   :  { %5285 = vst [vmem:[#allocation3 + $0x3c] sm:$0xcc] %v5282_v20  ;;  %v5106_v51 = vrot.slane %v5104_v52, 4  ;;  %5112 = vst.msk [vmem:[#allocation3 + $0x8] sm:$0xc] %vm9662_vm13, %v5104_v52  ;;  %vm9671_vm13 = vcmask 517120  }
 0xde6   :  { %v5549_v47 = vrot.slane %v9024_v46, 4 }
 0xde7   :  { %v5107_v30 = vsel %vm9663_vm15, %v5105_v53, %v5106_v51  ;;  %vm9672_vm15 = vcmask 261120  }
 0xde8   :  { %v5108_v57 = vsel %vm9664_vm12, %v8988_v0, %v5107_v30  ;;  %v5162_v58 = vpop.permute.xlu0 %5161  ;;  %v5404_v42 = vpop.permute.xlu1 %5403  ;;  %v5593_v9 = vld [vmem:[#allocation3 + $0x28] sm:$0xff]  ;;  %vm9673_vm12 = vcmask 252928  }
 0xde9   :  { %5111 = vst [vmem:[#allocation3] sm:$0xcc] %v5108_v57  ;;  %v5164_v60 = vrot.slane %v5162_v58, 4  ;;  %5170 = vst.msk [vmem:[#allocation3 + $0x1c] sm:$0xc] %vm9665_vm1, %v5162_v58  ;;  %v5407_v40 = vrot.slane %v5404_v42, 4 }
 0xdea   :  { %vm9674_vm1 = vmmov %vm9671_vm13 }
 0xdeb   :  { %v5165_v1 = vsel %vm9666_vm4, %v5163_v59, %v5164_v60  ;;  %v5408_v5 = vsel %vm9668_vm7, %v5407_v40, %v5404_v42  ;;  %vm9675_vm4 = vmmov %vm9674_vm1 }
 0xdec   :  { %v5166_v2 = vsel %vm9667_vm5, %v8994_v35, %v5165_v1  ;;  %v9034_v63 = vpop.permute.xlu0 %5488  ;;  %v5596_v0 = vld [vmem:[#allocation3 + $0x3c] sm:$0xff]  ;;  %5412 = vst.msk [vmem:[#allocation3 + $0x1c] sm:$0x33] %vm7857_vm2, %v5408_v5  ;;  %v5462_v12 = vpop.permute.xlu1 %5461  ;;  %vm9676_vm5 = vmmov %vm9668_vm7  ;;  %vm9677_vm7 = vcmask 1043456  }
 0xded   :  { %v7667_v10 = vld [vmem:[#allocation3 + $0x2c] ss:$20 sps:$4 sm:$0xff]   ;;  %5169 = vst [vmem:[#allocation3 + $0x14] sm:$0xcc] %v5166_v2  ;;  %v5492_v11 = vrot.slane %v9034_v63, 4  ;;  %v7087_v6 = vcombine.low %v5593_v9, %v5596_v0  ;;  %v5465_v14 = vsel %vm9669_vm14, %v5463_v38, %v5462_v12  ;;  %vm9678_vm14 = vmmov %vm9674_vm1 }
 0xdee   :  { %5697 = vmatprep.subr.bf16.mxu0 %v7667_v10  ;;  %5469 = vst.msk [vmem:[#allocation3 + $0x38] sm:$0x3] %vm9671_vm13, %v5465_v14  ;;  %vm9680_vm13 = vmmov %vm9674_vm1 }
 0xdef   :  { %v5493_v35 = vsel %vm9670_vm3, %v5492_v11, %v9034_v63  ;;  %5698 = vmatpush1.bf16.msra.mxu0 %v7087_v6  ;;  %vm9679_vm3 = vcmask 998400  }
 0xdf0   :  { %5497 = vst.msk [vmem:[#allocation3 + $0x30] sm:$0xcc] %vm7893_vm0, %v5493_v35  ;;  %v9048_v17 = vpop.permute.xlu0 %5376  ;;  %v5350_v16 = vpop.permute.xlu1 %5349  ;;  %v5587_v62 = vld [vmem:[#allocation3] sm:$0xff] }
 0xdf1   :  { %v5380_v56 = vrot.slane %v9048_v17, 4  ;;  %v5353_v13 = vsel %vm9672_vm15, %v5351_v44, %v5350_v16  ;;  %vm9681_vm15 = vcmask 293888  }
 0xdf2   :  { %5357 = vst.msk [vmem:[#allocation3 + $0x10] sm:$0x3] %vm9674_vm1, %v5353_v13  ;;  %vm9683_vm1 = vcmask 1014784  }
 0xdf3   :  { %v5381_v21 = vsel %vm9673_vm12, %v5380_v56, %v9048_v17  ;;  %vm9682_vm12 = vmmov %vm9677_vm7 }
 0xdf4   :  { %5385 = vst.msk [vmem:[#allocation3 + $0x8] sm:$0xcc] %vm7893_vm0, %v5381_v21  ;;  %v5576_v19 = vpop.permute.xlu0 %5575  ;;  %v5590_v24 = vld [vmem:[#allocation3 + $0x14] sm:$0xff]  ;;  %v5406_v3 = vpop.permute.xlu1 %5405 }
 0xdf5   :  { %v7669_v25 = vld [vmem:[#allocation3 + $0x4] ss:$20 sps:$4 sm:$0xff]   ;;  %v5578_v29 = vrot.slane %v5576_v19, 4  ;;  %5584 = vst.msk [vmem:[#allocation3 + $0x60] sm:$0x3] %vm9675_vm4, %v5576_v19  ;;  %v7082_v31 = vcombine.low %v5587_v62, %v5590_v24  ;;  %v5409_v26 = vsel %vm9676_vm5, %v5407_v40, %v5406_v3  ;;  %vm9684_vm4 = vcmask 519170  }
 0xdf6   :  { %5699 = vmatprep.subr.bf16.mxu0 %v7669_v25  ;;  %5413 = vst.msk [vmem:[#allocation3 + $0x24] sm:$0x3] %vm9678_vm14, %v5409_v26  ;;  %vm9685_vm5 = vcmask 1041408   ;;  %vm9686_vm14 = vcmask 1006592  }
 0xdf7   :  { %v5579_v23 = vsel %vm9677_vm7, %v5577_v50, %v5578_v29  ;;  %5700 = vmatpush1.bf16.msra.mxu0 %v7082_v31  ;;  %v5594_v60 = vld [vmem:[#allocation3 + $0x30] sm:$0xff] }
 0xdf8   :  { %v5580_v33 = vsel %vm9679_vm3, %v8999_v18, %v5579_v23  ;;  %v5518_v38 = vpop.permute.xlu0 %5517  ;;  %7545 = vmatprep.subr.bf16.mxu0 %v7703_v4  ;;  %vm9687_vm3 = vcmask 113664  }
 0xdf9   :  { %5583 = vst.msk [vmem:[#allocation3 + $0x58] sm:$0x33] %vm7857_vm2, %v5580_v33  ;;  %v5520_v39 = vrot.slane %v5518_v38, 4 }
 0xdfa   :  { %5526 = vst.msk [vmem:[#allocation3 + $0x4c] sm:$0x3] %vm9680_vm13, %v5518_v38  ;;  %7098 = vmatmul.mubr.msk.bf16.vlgmr.msra.gmra.mxu0 %vm9681_vm15, %v7081_v28  ;;  %vm9688_vm13 = vmmov %vm9685_vm5 }
 0xdfb   :  { %v5521_v34 = vsel %vm9682_vm12, %v5519_v15, %v5520_v39  ;;  %7551 = vmatprep.mubr.msk.bf16.mxu0 %vm9379_vm6, %v7703_v4  ;;  %vm9689_vm15 = vmmov %vm9685_vm5  ;;  %vm9690_vm12 = vcmask 97280  }
 0xdfc   :  { %v5522_v18 = vsel %vm9683_vm1, %v9004_v22, %v5521_v34  ;;  %v5548_v43 = vpop.permute.xlu0 %5547  ;;  %v7671_v45 = vld [vmem:[#allocation3 + $0x60] ss:$0 sps:$4 sm:$0x33]   ;;  %vm9691_vm1 = vmmov %vm9684_vm4 }
 0xdfd   :  { %5525 = vst.msk [vmem:[#allocation3 + $0x44] sm:$0x33] %vm7857_vm2, %v5522_v18  ;;  %v5550_v32 = vrot.slane %v5548_v43, 4  ;;  %v5683_v44 = vsel %vm9685_vm5, %v7671_v45, 0  ;;  %vm9693_vm5 = vmmov %vm9691_vm1 }
 0xdfe   :  { %5556 = vst.msk [vmem:[#allocation3 + $0x4c] sm:$0xc] %vm9684_vm4, %v5548_v43  ;;  %7546 = vmatpush3.bf16.msra.mxu0 %v5683_v44  ;;  %vm9692_vm4 = vcmask 252928  }
 0xdff   :  { %v5551_v48 = vsel %vm9677_vm7, %v5549_v47, %v5550_v32  ;;  %7547 = vmatprep.subr.bf16.mxu0 %v7703_v4  ;;  %vm9694_vm7 = vmmov %vm9687_vm3 }
 0xe00   :  { %v5552_v20 = vsel %vm9686_vm14, %v9024_v46, %v5551_v48  ;;  %v5433_v52 = vpop.permute.xlu0 %5432  ;;  %v5600_v22 = vld [vmem:[#allocation3 + $0x58] sm:$0x33]  ;;  %vm9695_vm14 = vmmov %vm9691_vm1 }
 0xe01   :  { %5555 = vst.msk [vmem:[#allocation3 + $0x44] sm:$0xcc] %vm7893_vm0, %v5552_v20  ;;  %v5436_v55 = vrot.slane %v5433_v52, 4  ;;  %v7095_v53 = vcombine.high %v5600_v22, %v5600_v22  ;;  %v7094_v51 = vcombine.low %v5600_v22, %v5600_v22  ;;  %v5812_v6 = vpop.permute.xlu1 %5811 }
 0xe03   :  { %v5437_v30 = vsel %vm9687_vm3, %v5436_v55, %v5433_v52  ;;  %7099 = vmatprep.subr.msk.bf16.mxu1 %vm9688_vm13, %v7095_v53  ;;  %v5677_v57 = vsel %vm9689_vm15, %v7094_v51, 0  ;;  %vm9696_vm3 = vcmask 293888   ;;  %vm9699_vm15 = vcmask 941056  }
 0xe04   :  { %5441 = vst.msk [vmem:[#allocation3 + $0x1c] sm:$0xcc] %vm7893_vm0, %v5437_v30  ;;  %v5491_v46 = vpop.permute.xlu0 %5490  ;;  %5737 = vmatpush1.bf16.msra.mxu1 %v5677_v57  ;;  %vm9697_vm13 = vmmov %vm9696_vm3 }
 0xe05   :  { %v5494_v58 = vsel %vm9690_vm12, %v5492_v11, %v5491_v46  ;;  %vm9703_vm12 = vcmask 736256  }
 0xe06   :  { %5498 = vst.msk [vmem:[#allocation3 + $0x38] sm:$0xc] %vm9691_vm1, %v5494_v58 }
 0xe08   :  { %v5379_v59 = vpop.permute.xlu0 %5378  ;;  %v5597_v42 = vld [vmem:[#allocation3 + $0x44] sm:$0xff] }
 0xe09   :  { %v7673_v40 = vld [vmem:[#allocation3 + $0x34] ss:$20 sps:$4 sm:$0xff]   ;;  %v5382_v1 = vsel %vm9692_vm4, %v5380_v56, %v5379_v59  ;;  %v7089_v2 = vcombine.low %v5594_v60, %v5597_v42 }
 0xe0a   :  { %5386 = vst.msk [vmem:[#allocation3 + $0x10] sm:$0xc] %vm9693_vm5, %v5382_v1  ;;  %5738 = vmatprep.subr.bf16.mxu1 %v7673_v40  ;;  %vm9706_vm5 = vcmask 891904  }
 0xe0b   :  { %5739 = vmatpush1.bf16.msra.mxu1 %v7089_v2  ;;  %v7675_v5 = vld [vmem:[#allocation3 + $0xc] ss:$20 sps:$4 sm:$0xff]   ;;  %v7677_v63 = vld [vmem:[#allocation3 + $0x8] ss:$20 sps:$4 sm:$0xff]  }
 0xe0c   :  { %v5435_v9 = vpop.permute.xlu0 %5434  ;;  %5740 = vmatprep.subr.bf16.mxu1 %v7675_v5 }
 0xe0d   :  { %v5438_v0 = vsel %vm9694_vm7, %v5436_v55, %v5435_v9  ;;  %v7678_v10 = vld [vmem:[#allocation3 + $0x38] ss:$20 sps:$4 sm:$0xff]  }
 0xe0e   :  { %5442 = vst.msk [vmem:[#allocation3 + $0x24] sm:$0xc] %vm9695_vm14, %v5438_v0  ;;  %7548 = vmatpush3.bf16.msra.mxu0 %v7678_v10 }
 0xe0f   :  { %5741 = vmatpush1.bf16.msra.mxu1 %v7677_v63  ;;  %7549 = vmatprep.subr.bf16.mxu0 %v7703_v4 }
 0xe12   :  { %7100 = vmatmul.mubr.msk.bf16.vlgmr.msra.gmra.mxu1 %vm9696_vm3, %v7081_v28  ;;  %vm9709_vm3 = vcmask 752640  }
 0xe13   :  { %6521 = vmatprep.mubr.bf16.mxu1 %v7719_v61 }
 0xe15   :  { %v7679_v11 = vld [vmem:[#allocation3 + $0x10] ss:$20 sps:$4 sm:$0xff]  }
 0xe16   :  { %7550 = vmatpush3.bf16.msra.mxu0 %v7679_v11 }
 0xe19   :  { %7552 = vmatmul.mubr.msk.bf16.vlgmr.msra.gmra.mxu0 %vm9697_vm13, %v7081_v28  ;;  %v5824_v35 = vpop.permute.xlu0 %5823 }
 0xe1a   :  { %6562 = vmatprep.mubr.bf16.mxu0 %v7719_v61 }
 0xeba   :  { %v5719_v12 = vpop.f32.mrf.mxu0 }
 0xebb   :  { %v5814_v14 = vmul.f32 %v5812_v6, %v5719_v12 }
 0xebc   :  { %v5721_v17 = vpop.f32.mrf.mxu0 }
 0xebd   :  { %v5826_v56 = vadd.f32 %v5824_v35, %v5814_v14  ;;  %v5815_v16 = vmul.f32 %v5812_v6, %v5721_v17 }
 0xebe   :  { %v5723_v13 = vpop.f32.mrf.mxu0 }
 0xebf   :  { %v5831_v21 = vmax.f32 %v5826_v56, 0.0  ;;  %v5827_v19 = vadd.f32 %v5824_v35, %v5815_v16 }
 0xec0   :  { %v5724_v62 = vpop.f32.mrf.mxu0 }
 0xec1   :  { %v5832_v24 = vmax.f32 %v5827_v19, 0.0  ;;  %v5836_v25 = vmul.f32 %v7995_v41, %v5831_v21 }
 0xec3   :  { %v5837_v50 = vmul.f32 %v8003_v8, %v5832_v24 }
 0xec5   :  { %v5845_v29 = vcombine.low %v5836_v25, %v5837_v50 }
 0xec7   :  { %5856 = vrot.lane.b32.xlu1 %v5845_v29, %s7702_s22 }
 0xed2   :  { %v5760_v61 = vpop.f32.mrf.mxu1 }
 0xed3   :  { %v5816_v31 = vmul.f32 %v5812_v6, %v5760_v61 }
 0xed4   :  { %v5762_v3 = vpop.f32.mrf.mxu1 }
 0xed5   :  { %v5828_v26 = vadd.f32 %v5824_v35, %v5816_v31  ;;  %v5817_v23 = vmul.f32 %v5812_v6, %v5762_v3 }
 0xed6   :  { %v5764_v28 = vpop.f32.mrf.mxu1 }
 0xed7   :  { %v5833_v33 = vmax.f32 %v5828_v26, 0.0  ;;  %v5829_v38 = vadd.f32 %v5824_v35, %v5817_v23 }
 0xed8   :  { %v5765_v15 = vpop.f32.mrf.mxu1 }
 0xed9   :  { %v5834_v39 = vmax.f32 %v5829_v38, 0.0  ;;  %v5801_v34 = vpop.f32.mrf.mxu0  ;;  %v5838_v18 = vmul.f32 %v8015_v36, %v5833_v33 }
 0xeda   :  { %v5818_v45 = vmul.f32 %v5812_v6, %v5801_v34 }
 0xedb   :  { %v5839_v43 = vmul.f32 %v8018_v37, %v5834_v39  ;;  %v7553_v47 = vpop.f32.mrf.mxu0 }
 0xedc   :  { %v5830_v44 = vadd.f32 %v5824_v35, %v5818_v45 }
 0xedd   :  { %v5846_v32 = vcombine.low %v5838_v18, %v5839_v43  ;;  %v5804_v48 = vpop.f32.mrf.mxu0 }
 0xede   :  { %v5835_v20 = vmax.f32 %v5830_v44, 0.0  ;;  %v7161_v44 = vld [vmem:[%s9294_s2 + $0x1c] sm:$0xf] }
 0xedf   :  { %5850 = vst [vmem:[#allocation5 + $0x8] sm:$0xff] %v5846_v32  ;;  %6123 = vrot.lane.b32.xlu1 %v5846_v32, %s7704_s0  ;;  %v7554_v52 = vpop.f32.mrf.mxu0 }
 0xee0   :  { %v5840_v22 = vmul.f32 %v8025_v49, %v5835_v20 }
 0xee2   :  { %5851 = vst.msk [vmem:[#allocation5 + $0x10] sm:$0xf] %vm147_vm10, %v5840_v22  ;;  %vm9698_vm10 = vcmask 1043456  }
 0xee3   :  { %vm9705_vm4 = vmmov %vm9698_vm10 }
 0xee4   :  { %vm9708_vm14 = vmmov %vm9705_vm4 }
 0xee6   :  { %v5853_v55 = vld [vmem:[#allocation5 + $0x8] sm:$0xf] }
 0xee7   :  { %5858 = vrot.lane.b32.xlu0 %v5853_v55, %s7702_s22 }
 0xee9   :  { %v6120_v53 = vld [vmem:[#allocation5 + $0x10] sm:$0xf] }
 0xeeb   :  { %6125 = vrot.lane.b32.xlu0 %v6120_v53, %s7704_s0 }
 0xf39   :  { %v5857_v51 = vpop.permute.xlu1 %5856 }
 0xf3a   :  { %v5860_v30 = vrot.slane %v5857_v51, 4 }
 0xf3c   :  { %v5861_v57 = vsel %vm158_vm8, %v5860_v30, %v5857_v51 }
 0xf3d   :  { %5865 = vst.msk [vmem:[#allocation2] sm:$0xff] %vm7767_vm9, %v5861_v57 }
 0xf44   :  { %v5867_v46 = vld [vmem:[#allocation2] sm:$0xff] }
 0xf45   :  { %v5870_v58 = vcombine.high %v5867_v46, %v5867_v46 }
 0xf47   :  { %v7417_v59 = vpack.c.bf16 %v5870_v58, %v5867_v46 }
 0xf49   :  { %5885 = vst [vmem:[#allocation3] sm:$0x33] %v7417_v59  ;;  %6107 = vrot.lane.b32.xlu1 %v7417_v59, %s7705_s25  ;;  %v6019_v60 = vrot.slane %v7417_v59, 6 }
 0xf4d   :  { %5991 = vrot.lane.b32.xlu1 %v7417_v59, %s7706_s26 }
 0xf51   :  { %6049 = vrot.lane.b32.xlu1 %v7417_v59, %s7707_s27  ;;  %v6124_v1 = vpop.permute.xlu1 %6123 }
 0xf52   :  { %v6127_v5 = vrot.slane %v6124_v1, 4 }
 0xf55   :  { %5933 = vrot.lane.b32.xlu1 %v7417_v59, %s7708_s28 }
 0xf59   :  { %v5859_v42 = vpop.permute.xlu0 %5858  ;;  %6021 = vrot.lane.b32.xlu1 %v6019_v60, %s7709_s29 }
 0xf5a   :  { %v5862_v40 = vsel %vm158_vm8, %v5860_v30, %v5859_v42  ;;  %vm9700_vm8 = vcmask 254976  }
 0xf5b   :  { %5866 = vst.msk [vmem:[#allocation2 + $0x8] sm:$0xf] %vm166_vm11, %v5862_v40  ;;  %v7162_v40 = vld [vmem:[%s9295_s3 + $0x1c] sm:$0xf]  ;;  %vm9704_vm1 = vmmov %vm9700_vm8 }
 0xf5c   :  { %vm9707_vm7 = vmmov %vm9704_vm1 }
 0xf5d   :  { %v6126_v2 = vpop.permute.xlu0 %6125  ;;  %6079 = vrot.lane.b32.xlu1 %v6019_v60, %s7710_s30  ;;  %vm9710_vm13 = vmmov %vm9704_vm1 }
 0xf5e   :  { %v6128_v9 = vrot.slane %v6126_v2, 4 }
 0xf60   :  { %v6129_v0 = vsel %vm9698_vm10, %v6127_v5, %v6128_v9 }
 0xf61   :  { %v6130_v63 = vsel %vm9699_vm15, %v6124_v1, %v6129_v0  ;;  %5905 = vrot.lane.b32.xlu1 %v6019_v60, %s7711_s5  ;;  %vm9712_vm15 = vcmask 1041408  }
 0xf62   :  { %v5868_v10 = vld [vmem:[#allocation2 + $0x8] sm:$0xf]  ;;  %6133 = vst.msk [vmem:[#allocation2] sm:$0xff] %vm7767_vm9, %v6130_v63  ;;  %vm9701_vm9 = vmmov %vm9700_vm8 }
 0xf63   :  { %v6092_v11 = vld [vmem:[#allocation2 + $0x8] sm:$0xf]  ;;  %v7418_v56 = vpack.c.bf16 %v5868_v10, %v5868_v10 }
 0xf64   :  { %v5976_v6 = vld [vmem:[#allocation2 + $0x8] sm:$0xf]  ;;  %v7434_v12 = vpack.c.bf16 %v6092_v11, %v6092_v11 }
 0xf65   :  { %v6034_v14 = vld [vmem:[#allocation2 + $0x8] sm:$0xf]  ;;  %5963 = vrot.lane.b32.xlu1 %v6019_v60, %s7712_s6  ;;  %5886 = vst.msk [vmem:[#allocation3 + $0x8] sm:$0x3] %vm9700_vm8, %v7418_v56  ;;  %v7426_v19 = vpack.c.bf16 %v5976_v6, %v5976_v6  ;;  %vm9713_vm8 = vmmov %vm9712_vm15 }
 0xf66   :  { %v5918_v35 = vld [vmem:[#allocation2 + $0x8] sm:$0xf]  ;;  %6109 = vrot.lane.b32.xlu0 %v7434_v12, %s7705_s25  ;;  %v7430_v24 = vpack.c.bf16 %v6034_v14, %v6034_v14 }
 0xf67   :  { %v6004_v17 = vld [vmem:[#allocation2 + $0x8] sm:$0xf]  ;;  %v7422_v50 = vpack.c.bf16 %v5918_v35, %v5918_v35 }
 0xf68   :  { %v6062_v16 = vld [vmem:[#allocation2 + $0x8] sm:$0xf]  ;;  %v7428_v29 = vpack.c.bf16 %v6004_v17, %v6004_v17 }
 0xf69   :  { %v5888_v13 = vld [vmem:[#allocation2 + $0x8] sm:$0xf]  ;;  %v6361_v7 = vld [vmem:[#allocation2] sm:$0xff]  ;;  %v7432_v31 = vpack.c.bf16 %v6062_v16, %v6062_v16 }
 0xf6a   :  { %v5946_v21 = vld [vmem:[#allocation2 + $0x8] sm:$0xf]  ;;  %5993 = vrot.lane.b32.xlu0 %v7426_v19, %s7706_s26  ;;  %v6364_v62 = vcombine.high %v6361_v7, %v6361_v7  ;;  %v6020_v61 = vrot.slane %v7428_v29, 6  ;;  %v7420_v26 = vpack.c.bf16 %v5888_v13, %v5888_v13 }
 0xf6b   :  { %6134 = vst.msk [vmem:[#allocation2 + $0x8] sm:$0xf] %vm166_vm11, %v6126_v2  ;;  %v6078_v3 = vrot.slane %v7432_v31, 6  ;;  %v7424_v28 = vpack.c.bf16 %v5946_v21, %v5946_v21  ;;  %vm9702_vm11 = vmmov %vm9698_vm10 }
 0xf6c   :  { %v7451_v25 = vpack.c.bf16 %v6364_v62, %v6361_v7  ;;  %v5904_v23 = vrot.slane %v7420_v26, 6  ;;  %vm9711_vm10 = vmmov %vm9705_vm4 }
 0xf6d   :  { %v5962_v33 = vrot.slane %v7424_v28, 6 }
 0xf6e   :  { %6051 = vrot.lane.b32.xlu0 %v7430_v24, %s7707_s27  ;;  %6377 = vrot.lane.b32.xlu1 %v7451_v25, %s7713_s7  ;;  %v6347_v38 = vrot.slane %v7451_v25, 6 }
 0xf72   :  { %5935 = vrot.lane.b32.xlu0 %v7422_v50, %s7708_s28  ;;  %6319 = vrot.lane.b32.xlu1 %v7451_v25, %s7714_s8  ;;  %v6248_v15 = vld [vmem:[#allocation2 + $0x8] sm:$0xf] }
 0xf73   :  { %v7444_v39 = vpack.c.bf16 %v6248_v15, %v6248_v15  ;;  %v6136_v34 = vld [vmem:[#allocation2 + $0x8] sm:$0xf] }
 0xf74   :  { %v7436_v18 = vpack.c.bf16 %v6136_v34, %v6136_v34  ;;  %v6192_v43 = vld [vmem:[#allocation2 + $0x8] sm:$0xf] }
 0xf75   :  { %v6362_v45 = vld [vmem:[#allocation2 + $0x8] sm:$0xf]  ;;  %v7440_v47 = vpack.c.bf16 %v6192_v43, %v6192_v43 }
 0xf76   :  { %6023 = vrot.lane.b32.xlu0 %v6020_v61, %s7709_s29  ;;  %6263 = vrot.lane.b32.xlu1 %v7451_v25, %s7715_s9  ;;  %v7452_v32 = vpack.c.bf16 %v6362_v45, %v6362_v45  ;;  %v6304_v48 = vld [vmem:[#allocation2 + $0x8] sm:$0xf]  ;;  %s7723_s29 = smov 96  }
 0xf77   :  { %v6332_v20 = vld [vmem:[#allocation2 + $0x8] sm:$0xf]  ;;  %v7448_v52 = vpack.c.bf16 %v6304_v48, %v6304_v48 }
 0xf78   :  { %v7450_v22 = vpack.c.bf16 %v6332_v20, %v6332_v20  ;;  %v6275_v55 = vld [vmem:[#allocation2 + $0x8] sm:$0xf] }
 0xf79   :  { %v7446_v51 = vpack.c.bf16 %v6275_v55, %v6275_v55  ;;  %v6163_v30 = vld [vmem:[#allocation2 + $0x8] sm:$0xf] }
 0xf7a   :  { %6081 = vrot.lane.b32.xlu0 %v6078_v3, %s7710_s30  ;;  %6151 = vrot.lane.b32.xlu1 %v7451_v25, %s7701_s21  ;;  %v6348_v53 = vrot.slane %v7450_v22, 6  ;;  %v7438_v46 = vpack.c.bf16 %v6163_v30, %v6163_v30  ;;  %v6219_v58 = vld [vmem:[#allocation2 + $0x8] sm:$0xf] }
 0xf7b   :  { %v6291_v57 = vrot.slane %v7446_v51, 6  ;;  %v7442_v60 = vpack.c.bf16 %v6219_v58, %v6219_v58 }
 0xf7c   :  { %v6179_v59 = vrot.slane %v7438_v46, 6 }
 0xf7d   :  { %v6235_v42 = vrot.slane %v7442_v60, 6 }
 0xf7e   :  { %5907 = vrot.lane.b32.xlu0 %v5904_v23, %s7711_s5  ;;  %6207 = vrot.lane.b32.xlu1 %v7451_v25, %s7717_s11 }
 0xf82   :  { %5965 = vrot.lane.b32.xlu0 %v5962_v33, %s7712_s6  ;;  %6349 = vrot.lane.b32.xlu1 %v6347_v38, %s7716_s10 }
 0xf86   :  { %6292 = vrot.lane.b32.xlu0 %v6347_v38, %s7718_s12  ;;  %6265 = vrot.lane.b32.xlu1 %v7444_v39, %s7715_s9 }
 0xf8a   :  { %6180 = vrot.lane.b32.xlu0 %v6347_v38, %s7720_s13  ;;  %6153 = vrot.lane.b32.xlu1 %v7436_v18, %s7701_s21 }
 0xf8e   :  { %6236 = vrot.lane.b32.xlu0 %v6347_v38, %s7721_s14  ;;  %6209 = vrot.lane.b32.xlu1 %v7440_v47, %s7717_s11 }
 0xf92   :  { %6379 = vrot.lane.b32.xlu0 %v7452_v32, %s7713_s7  ;;  %6615 = vperm.xlu1 %7599, %v7161_v44  }
 0xf96   :  { %6321 = vrot.lane.b32.xlu0 %v7448_v52, %s7714_s8 }
 0xf9a   :  { %6351 = vrot.lane.b32.xlu0 %v6348_v53, %s7716_s10 }
 0xf9e   :  { %6294 = vrot.lane.b32.xlu0 %v6291_v57, %s7718_s12 }
 0xfa2   :  { %6182 = vrot.lane.b32.xlu0 %v6179_v59, %s7720_s13 }
 0xfa6   :  { %6238 = vrot.lane.b32.xlu0 %v6235_v42, %s7721_s14 }
 0xfaa   :  { %6627 = vperm.xlu0 %7598, %v7162_v40  }
 0xfbb   :  { %v6108_v1 = vpop.permute.xlu1 %6107 }
 0xfbc   :  { %v6111_v6 = vrot.slane %v6108_v1, 4 }
 0xfbf   :  { %v5992_v2 = vpop.permute.xlu1 %5991 }
 0xfc0   :  { %v5995_v56 = vrot.slane %v5992_v2, 4 }
 0xfc3   :  { %v6050_v5 = vpop.permute.xlu1 %6049 }
 0xfc4   :  { %v6053_v62 = vrot.slane %v6050_v5, 4 }
 0xfc7   :  { %v5934_v9 = vpop.permute.xlu1 %5933 }
 0xfc8   :  { %v5937_v3 = vrot.slane %v5934_v9, 4 }
 0xfcb   :  { %v6022_v0 = vpop.permute.xlu1 %6021 }
 0xfcc   :  { %v6025_v18 = vrot.slane %v6022_v0, 4 }
 0xfcf   :  { %v6080_v63 = vpop.permute.xlu1 %6079 }
 0xfd0   :  { %v6083_v52 = vrot.slane %v6080_v63, 4 }
 0xfd3   :  { %v9168_v10 = vpop.permute.xlu1 %5905 }
 0xfd4   :  { %v5909_v58 = vrot.slane %v9168_v10, 4 }
 0xfd7   :  { %v9174_v13 = vpop.permute.xlu1 %5963 }
 0xfd8   :  { %v6110_v11 = vpop.permute.xlu0 %6109 }
 0xfd9   :  { %v6112_v12 = vrot.slane %v6110_v11, 4  ;;  %6118 = vst.msk [vmem:[#allocation3 + $0x58] sm:$0x3] %vm9701_vm9, %v6110_v11  ;;  %vm9714_vm9 = vcmask 1031168  }
 0xfdb   :  { %v6113_v14 = vsel %vm9702_vm11, %v6111_v6, %v6112_v12  ;;  %vm9715_vm11 = vcmask 257026  }
 0xfdc   :  { %v6114_v35 = vsel %vm9703_vm12, %v6108_v1, %v6113_v14  ;;  %v5994_v17 = vpop.permute.xlu0 %5993  ;;  %vm9716_vm12 = vmmov %vm9705_vm4 }
 0xfdd   :  { %6117 = vst [vmem:[#allocation3 + $0x50] sm:$0x33] %v6114_v35  ;;  %v5996_v16 = vrot.slane %v5994_v17, 4  ;;  %6002 = vst.msk [vmem:[#allocation3 + $0x30] sm:$0x3] %vm9704_vm1, %v5994_v17  ;;  %vm9717_vm1 = vcmask 883712  }
 0xfdf   :  { %v5997_v21 = vsel %vm9705_vm4, %v5995_v56, %v5996_v16  ;;  %vm9718_vm4 = vcmask 105472  }
 0xfe0   :  { %v5998_v19 = vsel %vm9706_vm5, %v5992_v2, %v5997_v21  ;;  %v6052_v7 = vpop.permute.xlu0 %6051  ;;  %v9179_v25 = vpop.permute.xlu1 %6377  ;;  %vm9719_vm5 = vmmov %vm9715_vm11 }
 0xfe1   :  { %6001 = vst [vmem:[#allocation3 + $0x28] sm:$0x33] %v5998_v19  ;;  %v6054_v24 = vrot.slane %v6052_v7, 4  ;;  %6060 = vst.msk [vmem:[#allocation3 + $0x44] sm:$0x3] %vm9707_vm7, %v6052_v7 }
 0xfe2   :  { %vm9720_vm7 = vmmov %vm9711_vm10 }
 0xfe3   :  { %v6055_v50 = vsel %vm9708_vm14, %v6053_v62, %v6054_v24  ;;  %vm9721_vm14 = vcmask 744448  }
 0xfe4   :  { %v6056_v29 = vsel %vm9709_vm3, %v6050_v5, %v6055_v50  ;;  %v5936_v61 = vpop.permute.xlu0 %5935  ;;  %v6403_v31 = vld [vmem:[#allocation3 + $0x50] sm:$0x33]  ;;  %v9184_v33 = vpop.permute.xlu1 %6319  ;;  %vm9722_vm3 = vcmask 261120  }
 0xfe5   :  { %6059 = vst [vmem:[#allocation3 + $0x3c] sm:$0x33] %v6056_v29  ;;  %v5938_v26 = vrot.slane %v5936_v61, 4  ;;  %5944 = vst.msk [vmem:[#allocation3 + $0x1c] sm:$0x3] %vm9710_vm13, %v5936_v61  ;;  %v7152_v23 = vcombine.high %v6403_v31, %v6403_v31  ;;  %v7151_v28 = vcombine.low %v6403_v31, %v6403_v31 }
 0xfe6   :  { %vm9723_vm13 = vmmov %vm9719_vm5 }
 0xfe7   :  { %v5939_v38 = vsel %vm9711_vm10, %v5937_v3, %v5938_v26  ;;  %7156 = vmatprep.subr.msk.bf16.mxu1 %vm9712_vm15, %v7152_v23  ;;  %v6475_v15 = vsel %vm9713_vm8, %v7151_v28, 0  ;;  %vm9724_vm10 = vmmov %vm9720_vm7  ;;  %vm9725_vm15 = vcmask 1039360   ;;  %vm9726_vm8 = vcmask 244736   ;;  %v7140_v23 = vld [vmem:[%s9296_s1 + $0xe] sm:$0x3] }
 0xfe8   :  { %v5940_v39 = vsel %vm9714_vm9, %v5934_v9, %v5939_v38  ;;  %v6024_v34 = vpop.permute.xlu0 %6023  ;;  %6500 = vmatpush1.bf16.msra.mxu1 %v6475_v15  ;;  %v6264_v45 = vpop.permute.xlu1 %6263  ;;  %v5967_v9 = vrot.slane %v9174_v13, 4  ;;  %vm9727_vm9 = vmmov %vm9719_vm5  ;;  %v6381_v38 = vrot.slane %v9179_v25, 4 }
 0xfe9   :  { %5943 = vst [vmem:[#allocation3 + $0x14] sm:$0x33] %v5940_v39  ;;  %v6026_v43 = vrot.slane %v6024_v34, 4  ;;  %6032 = vst.msk [vmem:[#allocation3 + $0x30] sm:$0xc] %vm9715_vm11, %v6024_v34  ;;  %v6267_v47 = vrot.slane %v6264_v45, 4 }
 0xfea   :  { %vm9728_vm11 = vmmov %vm9720_vm7 }
 0xfeb   :  { %v6027_v32 = vsel %vm9716_vm12, %v6025_v18, %v6026_v43  ;;  %v6268_v20 = vsel %vm9718_vm4, %v6267_v47, %v6264_v45  ;;  %vm9729_vm12 = vcmask 900096   ;;  %v6323_v43 = vrot.slane %v9184_v33, 4 }
 0xfec   :  { %v6028_v44 = vsel %vm9717_vm1, %v6022_v0, %v6027_v32  ;;  %v6082_v48 = vpop.permute.xlu0 %6081  ;;  %6272 = vst.msk [vmem:[#allocation3 + $0x30] sm:$0x33] %vm7857_vm2, %v6268_v20  ;;  %v6152_v55 = vpop.permute.xlu1 %6151  ;;  %vm9730_vm1 = vmmov %vm9718_vm4  ;;  %vm9731_vm4 = vcmask 97280  }
 0xfed   :  { %6031 = vst [vmem:[#allocation3 + $0x28] sm:$0xcc] %v6028_v44  ;;  %v6084_v22 = vrot.slane %v6082_v48, 4  ;;  %6090 = vst.msk [vmem:[#allocation3 + $0x44] sm:$0xc] %vm9719_vm5, %v6082_v48  ;;  %v6155_v53 = vrot.slane %v6152_v55, 4 }
 0xfee   :  { %vm9732_vm5 = vcmask 517120  }
 0xfef   :  { %v6085_v51 = vsel %vm9720_vm7, %v6083_v52, %v6084_v22  ;;  %v6156_v46 = vsel %vm9722_vm3, %v6155_v53, %v6152_v55  ;;  %vm9733_vm7 = vmmov %vm9722_vm3 }
 0xff0   :  { %v6086_v30 = vsel %vm9721_vm14, %v6080_v63, %v6085_v51  ;;  %v5908_v57 = vpop.permute.xlu0 %5907  ;;  %6160 = vst.msk [vmem:[#allocation3 + $0x8] sm:$0x33] %vm7857_vm2, %v6156_v46  ;;  %v6208_v60 = vpop.permute.xlu1 %6207  ;;  %vm9734_vm14 = vcmask 252928   ;;  %vm9735_vm3 = vmmov %vm9732_vm5 }
 0xff1   :  { %6089 = vst [vmem:[#allocation3 + $0x3c] sm:$0xcc] %v6086_v30  ;;  %v5910_v59 = vrot.slane %v5908_v57, 4  ;;  %5916 = vst.msk [vmem:[#allocation3 + $0x8] sm:$0xc] %vm9723_vm13, %v5908_v57  ;;  %v6211_v42 = vrot.slane %v6208_v60, 4 }
 0xff2   :  { %vm9736_vm13 = vmmov %vm9726_vm8 }
 0xff3   :  { %v5911_v40 = vsel %vm9724_vm10, %v5909_v58, %v5910_v59  ;;  %v6212_v5 = vsel %vm9726_vm8, %v6211_v42, %v6208_v60  ;;  %vm9737_vm10 = vcmask 113664   ;;  %vm9739_vm8 = vmmov %vm9735_vm3 }
 0xff4   :  { %v5912_v1 = vsel %vm9725_vm15, %v9168_v10, %v5911_v40  ;;  %v5966_v2 = vpop.permute.xlu0 %5965  ;;  %6216 = vst.msk [vmem:[#allocation3 + $0x1c] sm:$0x33] %vm7857_vm2, %v6212_v5  ;;  %v6350_v63 = vpop.permute.xlu1 %6349  ;;  %vm9738_vm15 = vmmov %vm9735_vm3 }
 0xff5   :  { %5915 = vst [vmem:[#allocation3] sm:$0xcc] %v5912_v1  ;;  %v5968_v0 = vrot.slane %v5966_v2, 4  ;;  %5974 = vst.msk [vmem:[#allocation3 + $0x1c] sm:$0xc] %vm9727_vm9, %v5966_v2  ;;  %vm9740_vm9 = vcmask 293888  }
 0xff6   :  { %v6353_v20 = vrot.slane %v6350_v63, 4 }
 0xff7   :  { %v5969_v11 = vsel %vm9728_vm11, %v5967_v9, %v5968_v0 }
 0xff8   :  { %v5970_v6 = vsel %vm9729_vm12, %v9174_v13, %v5969_v11  ;;  %v9215_v12 = vpop.permute.xlu0 %6292  ;;  %v7683_v10 = vld [vmem:[#allocation3 + $0x28] ss:$20 sps:$4 sm:$0xff]   ;;  %v7685_v14 = vld [vmem:[#allocation3 + $0x2c] ss:$20 sps:$4 sm:$0xff]   ;;  %v6266_v17 = vpop.permute.xlu1 %6265  ;;  %vm9741_vm12 = vcmask 998400  }
 0xff9   :  { %5973 = vst [vmem:[#allocation3 + $0x14] sm:$0xcc] %v5970_v6  ;;  %v6296_v35 = vrot.slane %v9215_v12, 4  ;;  %6501 = vmatprep.subr.bf16.mxu1 %v7685_v14  ;;  %v6269_v56 = vsel %vm9730_vm1, %v6267_v47, %v6266_v17  ;;  %vm9742_vm1 = vmmov %vm9735_vm3  ;;  %v6635_v6 = vld [vmem:[#allocation4] sm:$0xff] }
 0xffa   :  { %6502 = vmatpush1.bf16.msra.mxu1 %v7683_v10  ;;  %6273 = vst.msk [vmem:[#allocation3 + $0x38] sm:$0x3] %vm9732_vm5, %v6269_v56  ;;  %vm9744_vm5 = vcmask 1014784  }
 0xffb   :  { %v6297_v16 = vsel %vm9731_vm4, %v6296_v35, %v9215_v12  ;;  %vm9743_vm4 = vmmov %vm9728_vm11 }
 0xffc   :  { %6301 = vst.msk [vmem:[#allocation3 + $0x30] sm:$0xcc] %vm7893_vm0, %v6297_v16  ;;  %v6181_v13 = vpop.permute.xlu0 %6180  ;;  %v6154_v19 = vpop.permute.xlu1 %6153 }
 0xffd   :  { %v6184_v21 = vrot.slane %v6181_v13, 4  ;;  %v6157_v7 = vsel %vm9733_vm7, %v6155_v53, %v6154_v19  ;;  %vm9746_vm7 = vcmask 1041408  }
 0xffe   :  { %6161 = vst.msk [vmem:[#allocation3 + $0x10] sm:$0x3] %vm9735_vm3, %v6157_v7  ;;  %vm9748_vm3 = vcmask 1006592  }
 0xfff   :  { %v6185_v62 = vsel %vm9734_vm14, %v6184_v21, %v6181_v13  ;;  %vm9747_vm14 = vmmov %vm9743_vm4 }
0x1000   :  { %6189 = vst.msk [vmem:[#allocation3 + $0x8] sm:$0xcc] %vm7893_vm0, %v6185_v62  ;;  %v6237_v24 = vpop.permute.xlu0 %6236  ;;  %v7686_v50 = vld [vmem:[#allocation3] ss:$20 sps:$4 sm:$0xff]   ;;  %v7688_v29 = vld [vmem:[#allocation3 + $0x4] ss:$20 sps:$4 sm:$0xff]   ;;  %v6210_v31 = vpop.permute.xlu1 %6209 }
0x1001   :  { %v6240_v61 = vrot.slane %v6237_v24, 4  ;;  %6503 = vmatprep.subr.bf16.mxu1 %v7688_v29  ;;  %v6213_v3 = vsel %vm9736_vm13, %v6211_v42, %v6210_v31  ;;  %vm9749_vm13 = vcmask 97280  }
0x1002   :  { %6504 = vmatpush1.bf16.msra.mxu1 %v7686_v50  ;;  %6217 = vst.msk [vmem:[#allocation3 + $0x24] sm:$0x3] %vm9738_vm15, %v6213_v3  ;;  %vm9752_vm15 = vmmov %vm9746_vm7 }
0x1003   :  { %v6241_v26 = vsel %vm9737_vm10, %v6240_v61, %v6237_v24  ;;  %7555 = vmatprep.subr.bf16.mxu1 %v7703_v4  ;;  %vm9751_vm10 = vmmov %vm9746_vm7 }
0x1004   :  { %6245 = vst.msk [vmem:[#allocation3 + $0x1c] sm:$0xcc] %vm7893_vm0, %v6241_v26  ;;  %v6380_v28 = vpop.permute.xlu0 %6379 }
0x1005   :  { %v6382_v15 = vrot.slane %v6380_v28, 4  ;;  %6388 = vst.msk [vmem:[#allocation3 + $0x60] sm:$0x3] %vm9739_vm8, %v6380_v28  ;;  %7157 = vmatmul.mubr.msk.bf16.vlgmr.msra.gmra.mxu1 %vm9740_vm9, %v7140_v23  ;;  %vm9753_vm8 = vcmask 252928  }
0x1006   :  { %7561 = vmatprep.mubr.msk.bf16.mxu1 %vm9379_vm6, %v7703_v4  ;;  %vm9745_vm6 = vcmask 519170  }
0x1007   :  { %v6383_v39 = vsel %vm9728_vm11, %v6381_v38, %v6382_v15 }
0x1008   :  { %v6384_v34 = vsel %vm9741_vm12, %v9179_v25, %v6383_v39  ;;  %v6322_v18 = vpop.permute.xlu0 %6321  ;;  %vm9757_vm12 = vcmask 293888  }
0x1009   :  { %6387 = vst.msk [vmem:[#allocation3 + $0x58] sm:$0x33] %vm7857_vm2, %v6384_v34  ;;  %v6324_v45 = vrot.slane %v6322_v18, 4 }
0x100a   :  { %6330 = vst.msk [vmem:[#allocation3 + $0x4c] sm:$0x3] %vm9742_vm1, %v6322_v18  ;;  %vm9758_vm1 = vmmov %vm9757_vm12 }
0x100b   :  { %v6325_v47 = vsel %vm9743_vm4, %v6323_v43, %v6324_v45  ;;  %v7697_v1 = vld [vmem:[#allocation3 + $0xc] ss:$20 sps:$4 sm:$0xff]   ;;  %v7695_v2 = vld [vmem:[#allocation3 + $0x8] ss:$20 sps:$4 sm:$0xff]   ;;  %vm9759_vm4 = vcmask 257024  }
0x100c   :  { %v6326_v32 = vsel %vm9744_vm5, %v9184_v33, %v6325_v47  ;;  %v6352_v44 = vpop.permute.xlu0 %6351  ;;  %v7689_v48 = vld [vmem:[#allocation3 + $0x60] ss:$0 sps:$4 sm:$0x33]   ;;  %v6637_v47 = vld [vmem:[#allocation4 + $0x10] sm:$0xf]  ;;  %vm9760_vm5 = vmmov %vm9759_vm4 }
0x100d   :  { %6329 = vst.msk [vmem:[#allocation3 + $0x44] sm:$0x33] %vm7857_vm2, %v6326_v32  ;;  %v6354_v25 = vrot.slane %v6352_v44, 4  ;;  %v6487_v52 = vsel %vm9746_vm7, %v7689_v48, 0  ;;  %vm9750_vm2 = vmmov %vm9745_vm6  ;;  %v6616_v9 = vpop.permute.xlu1 %6615 }
0x100e   :  { %6360 = vst.msk [vmem:[#allocation3 + $0x4c] sm:$0xc] %vm9745_vm6, %v6352_v44  ;;  %7556 = vmatpush3.bf16.msra.mxu1 %v6487_v52  ;;  %vm9754_vm9 = vmmov %vm9750_vm2  ;;  %vm6676_vm6 = vcmask 785408  }
0x100f   :  { %v6355_v22 = vsel %vm9747_vm14, %v6353_v20, %v6354_v25  ;;  %7557 = vmatprep.subr.bf16.mxu1 %v7703_v4  ;;  %vm9756_vm11 = vmmov %vm9750_vm2 }
0x1010   :  { %v6356_v55 = vsel %vm9748_vm3, %v6350_v63, %v6355_v22  ;;  %v6295_v53 = vpop.permute.xlu0 %6294  ;;  %v6404_v51 = vld [vmem:[#allocation3 + $0x58] sm:$0x33]  ;;  %vm9761_vm7 = vmmov %vm9747_vm14 }
0x1011   :  { %6359 = vst.msk [vmem:[#allocation3 + $0x44] sm:$0xcc] %vm7893_vm0, %v6356_v55  ;;  %v6298_v54 = vsel %vm9749_vm13, %v6296_v35, %v6295_v53  ;;  %v7154_v33 = vcombine.high %v6404_v51, %v6404_v51  ;;  %v7153_v30 = vcombine.low %v6404_v51, %v6404_v51  ;;  %vm9755_vm0 = vcmask 113664  }
0x1012   :  { %6302 = vst.msk [vmem:[#allocation3 + $0x38] sm:$0xc] %vm9750_vm2, %v6298_v54 }
0x1013   :  { %7158 = vmatprep.subr.msk.bf16.mxu0 %vm9751_vm10, %v7154_v33  ;;  %v6481_v57 = vsel %vm9752_vm15, %v7153_v30, 0 }
0x1014   :  { %v6183_v46 = vpop.permute.xlu0 %6182  ;;  %6541 = vmatpush1.bf16.msra.mxu0 %v6481_v57 }
0x1015   :  { %v6186_v58 = vsel %vm9753_vm8, %v6184_v21, %v6183_v46 }
0x1016   :  { %6190 = vst.msk [vmem:[#allocation3 + $0x10] sm:$0xc] %vm9754_vm9, %v6186_v58 }
0x1018   :  { %v6239_v59 = vpop.permute.xlu0 %6238  ;;  %v7691_v60 = vld [vmem:[#allocation3 + $0x30] ss:$20 sps:$4 sm:$0xff]   ;;  %v7693_v27 = vld [vmem:[#allocation3 + $0x34] ss:$20 sps:$4 sm:$0xff]  }
0x1019   :  { %v6242_v42 = vsel %vm9755_vm0, %v6240_v61, %v6239_v59  ;;  %v7694_v40 = vld [vmem:[#allocation3 + $0x38] ss:$20 sps:$4 sm:$0xff]   ;;  %6542 = vmatprep.subr.bf16.mxu0 %v7693_v27 }
0x101a   :  { %6246 = vst.msk [vmem:[#allocation3 + $0x24] sm:$0xc] %vm9756_vm11, %v6242_v42  ;;  %6543 = vmatpush1.bf16.msra.mxu0 %v7691_v60  ;;  %7558 = vmatpush3.bf16.msra.mxu1 %v7694_v40  ;;  %v6636_v61 = vld [vmem:[#allocation4 + $0x8] sm:$0xff] }
0x101b   :  { %6544 = vmatprep.subr.bf16.mxu0 %v7697_v1  ;;  %7559 = vmatprep.subr.bf16.mxu1 %v7703_v4  ;;  %v6640_v4 = vcombine.high %v6635_v6, %v6635_v6  ;;  %v6641_v39 = vcombine.high %v6636_v61, %v6636_v61 }
0x101e   :  { %6545 = vmatpush1.bf16.msra.mxu0 %v7695_v2 }
0x1021   :  { %v7698_v5 = vld [vmem:[#allocation3 + $0x10] ss:$20 sps:$4 sm:$0xff]   ;;  %7159 = vmatmul.mubr.msk.bf16.vlgmr.msra.gmra.mxu0 %vm9757_vm12, %v7140_v23 }
0x1022   :  { %7560 = vmatpush3.bf16.msra.mxu1 %v7698_v5 }
0x1025   :  { %7562 = vmatmul.mubr.msk.bf16.vlgmr.msra.gmra.mxu1 %vm9758_vm1, %v7140_v23  ;;  %v6628_v11 = vpop.permute.xlu0 %6627 }
0x10c5   :  { %v6523_v0 = vpop.f32.mrf.mxu1 }
0x10c6   :  { %v6618_v63 = vmul.f32 %v6616_v9, %v6523_v0 }
0x10c7   :  { %v6525_v12 = vpop.f32.mrf.mxu1 }
0x10c8   :  { %v6630_v10 = vadd.f32 %v6628_v11, %v6618_v63  ;;  %v6619_v14 = vmul.f32 %v6616_v9, %v6525_v12 }
0x10c9   :  { %v6527_v35 = vpop.f32.mrf.mxu1 }
0x10ca   :  { %v6644_v17 = vadd.f32 %v6635_v6, %v6630_v10  ;;  %v6631_v56 = vadd.f32 %v6628_v11, %v6619_v14 }
0x10cb   :  { %v6528_v16 = vpop.f32.mrf.mxu1 }
0x10cc   :  { %v6649_v13 = vmax.f32 %v6644_v17, 0.0  ;;  %v6645_v21 = vadd.f32 %v6640_v4, %v6631_v56 }
0x10ce   :  { %v6650_v19 = vmax.f32 %v6645_v21, 0.0  ;;  %v6654_v7 = vmul.f32 %v7995_v41, %v6649_v13 }
0x10d0   :  { %v6655_v62 = vmul.f32 %v8003_v8, %v6650_v19 }
0x10d2   :  { %v6662_v24 = vcombine.low %v6654_v7, %v6655_v62 }
0x10d4   :  { %6664 = vst [vmem:[%s9297_s4] sm:$0xff] %v6662_v24 }
0x10e1   :  { %v6564_v50 = vpop.f32.mrf.mxu0 }
0x10e2   :  { %v6620_v29 = vmul.f32 %v6616_v9, %v6564_v50 }
0x10e3   :  { %v6566_v31 = vpop.f32.mrf.mxu0 }
0x10e4   :  { %v6632_v3 = vadd.f32 %v6628_v11, %v6620_v29  ;;  %v6621_v26 = vmul.f32 %v6616_v9, %v6566_v31 }
0x10e5   :  { %v6568_v23 = vpop.f32.mrf.mxu0  ;;  %v6605_v28 = vpop.f32.mrf.mxu1 }
0x10e6   :  { %v6646_v38 = vadd.f32 %v6636_v61, %v6632_v3  ;;  %v6633_v15 = vadd.f32 %v6628_v11, %v6621_v26  ;;  %v6622_v34 = vmul.f32 %v6616_v9, %v6605_v28 }
0x10e7   :  { %v6569_v41 = vpop.f32.mrf.mxu0  ;;  %v7563_v18 = vpop.f32.mrf.mxu1 }
0x10e8   :  { %v6651_v8 = vmax.f32 %v6646_v38, 0.0  ;;  %v6647_v43 = vadd.f32 %v6641_v39, %v6633_v15  ;;  %v6634_v45 = vadd.f32 %v6628_v11, %v6622_v34 }
0x10e9   :  { %v6608_v32 = vpop.f32.mrf.mxu1 }
0x10ea   :  { %v6656_v44 = vmul.f32 %v8015_v36, %v6651_v8  ;;  %v6652_v48 = vmax.f32 %v6647_v43, 0.0  ;;  %v6648_v20 = vadd.f32 %v6637_v47, %v6634_v45 }
0x10eb   :  { %v7564_v25 = vpop.f32.mrf.mxu1 }
0x10ec   :  { %v6657_v52 = vmul.f32 %v8018_v37, %v6652_v48  ;;  %v6653_v22 = vmax.f32 %v6648_v20, 0.0  ;;  %6665 = vst.msk [vmem:[%s9297_s4 + $0x8] sm:$0xf] %vm9759_vm4, %v6656_v44 }
0x10ee   :  { %v6658_v55 = vmul.f32 %v8025_v49, %v6653_v22  ;;  %v6668_v53 = vcombine.low %v6656_v44, %v6657_v52 }
0x10f0   :  { %6671 = vrot.lane.b32.xlu0 %v6658_v55, %s7723_s29  ;;  %6669 = vrot.lane.b32.xlu1 %v6668_v53, %s7723_s29 }
0x1162   :  { %v6672_v51 = vpop.permute.xlu0 %6671  ;;  %v6670_v54 = vpop.permute.xlu1 %6669 }
0x1163   :  { %v6674_v36 = vrot.slane %v6672_v51, 4  ;;  %7164 = vst.msk [vmem:[%s9297_s4 + $0x14] sm:$0xf] %vm9760_vm5, %v6672_v51  ;;  %v6673_v37 = vrot.slane %v6670_v54, 4 }
0x1165   :  { %v6675_v33 = vsel %vm9761_vm7, %v6673_v37, %v6674_v36 }
0x1166   :  { %v6677_v30 = vsel %vm6676_vm6, %v6670_v54, %v6675_v33 }
0x1167   :  { %7163 = vst [vmem:[%s9297_s4 + $0xc] sm:$0xff] %v6677_v30 }

</bundles_post_ra>
